<compile_context>
chip_gen: v6e
topology: v6e:2x2x1
jax: 0.10.0
libtpu: 0.0.40
codegen_flags: <defaults>
</compile_context>

<pallas_src>
import functools

import jax
import jax.numpy as jnp
from jax.experimental import pallas as pl
from jax.experimental.pallas import tpu as pltpu

NUM_CLASSES = 27


def round_up(x, m):
    return ((x + m - 1) // m) * m


# ----------------------------- Pallas kernels --------------------------------

def _matmul_bias_act_single_kernel(a_ref, b_ref, bias_ref, o_ref, *, apply_relu):
    """Single-K-step fused matmul + bias (+ ReLU). No accumulator scratch."""
    out = jnp.dot(a_ref[...], b_ref[...], preferred_element_type=jnp.float32)
    out = out + bias_ref[...]                       # (tm,tn) + (1,tn)
    if apply_relu:
        out = jnp.maximum(out, 0.0)
    o_ref[...] = out.astype(o_ref.dtype)


def _matmul_bias_act_multi_kernel(a_ref, b_ref, bias_ref, o_ref, acc_ref, *,
                                  apply_relu):
    """K-tiled matmul with f32 accumulator; bias (+ ReLU) fused on last K step.
    Grid = (M/tm, N/tn, K/tk); K is the reduction axis."""
    @pl.when(pl.program_id(2) == 0)
    def _():
        acc_ref[...] = jnp.zeros_like(acc_ref)

    acc_ref[...] += jnp.dot(a_ref[...], b_ref[...],
                            preferred_element_type=jnp.float32)

    @pl.when(pl.program_id(2) == pl.num_programs(2) - 1)
    def _():
        out = acc_ref[...] + bias_ref[...]
        if apply_relu:
            out = jnp.maximum(out, 0.0)
        o_ref[...] = out.astype(o_ref.dtype)


def matmul_bias_act(a, b_p, bias_p, *, apply_relu, out_dtype, tm, tn, tk):
    """out = act(a @ b_p + bias_p).

    a:      (M, K)  float; cast to bf16 and padded (M->tm mult, K->Kp) here.
    b_p:    (Kp, Np) bf16, already padded/laid out:  Kp % tk == 0, Np % tn == 0.
    bias_p: (1, Np)  f32, already padded.
    Returns the full padded (Mp, Np) result; caller slices the valid region.
    """
    M, K = a.shape
    Kp, Np = b_p.shape
    assert K <= Kp and Kp % tk == 0 and Np % tn == 0
    Mp = round_up(M, tm)
    a_p = jnp.pad(a.astype(jnp.bfloat16), ((0, Mp - M), (0, Kp - K)))

    if Kp == tk:
        # Single K step: drop the reduction grid axis and the accumulator.
        kernel = functools.partial(_matmul_bias_act_single_kernel,
                                   apply_relu=apply_relu)
        return pl.pallas_call(
            kernel,
            out_shape=jax.ShapeDtypeStruct((Mp, Np), out_dtype),
            grid_spec=pltpu.PrefetchScalarGridSpec(
                num_scalar_prefetch=0,
                grid=(Mp // tm, Np // tn),
                in_specs=[
                    pl.BlockSpec((tm, tk), lambda i, j: (i, 0)),
                    pl.BlockSpec((tk, tn), lambda i, j: (0, j)),
                    pl.BlockSpec((1, tn), lambda i, j: (0, j)),
                ],
                out_specs=pl.BlockSpec((tm, tn), lambda i, j: (i, j)),
            ),
            compiler_params=pltpu.CompilerParams(
                dimension_semantics=("parallel", "parallel")),
        )(a_p, b_p, bias_p)

    kernel = functools.partial(_matmul_bias_act_multi_kernel,
                               apply_relu=apply_relu)
    return pl.pallas_call(
        kernel,
        out_shape=jax.ShapeDtypeStruct((Mp, Np), out_dtype),
        grid_spec=pltpu.PrefetchScalarGridSpec(
            num_scalar_prefetch=0,
            grid=(Mp // tm, Np // tn, Kp // tk),
            in_specs=[
                pl.BlockSpec((tm, tk), lambda i, j, k: (i, k)),
                pl.BlockSpec((tk, tn), lambda i, j, k: (k, j)),
                pl.BlockSpec((1, tn), lambda i, j, k: (0, j)),
            ],
            out_specs=pl.BlockSpec((tm, tn), lambda i, j, k: (i, j)),
            scratch_shapes=[pltpu.VMEM((tm, tn), jnp.float32)],
        ),
        compiler_params=pltpu.CompilerParams(
            dimension_semantics=("parallel", "parallel", "arbitrary")),
    )(a_p, b_p, bias_p)


def _max4_kernel(a_ref, b_ref, c_ref, d_ref, o_ref):
    o_ref[...] = jnp.maximum(jnp.maximum(a_ref[...], b_ref[...]),
                             jnp.maximum(c_ref[...], d_ref[...]))


def maxpool2x2(x):
    """nn.MaxPool2d(kernel_size=2) on NHWC (stride 2, floor). The 4-way max
    runs in a lane-dense Pallas kernel; the strided tap selection + pad fuse
    into one XLA loop fusion under jit."""
    # TODO(synk): fold the stride-2 window gather into the Pallas kernel
    # (strided DMA taps) to drop the remaining XLA materialization.
    N, H, W, C = x.shape
    Ho, Wo = H // 2, W // 2
    x = x[:, :Ho * 2, :Wo * 2, :]
    cands = (x[:, 0::2, 0::2, :], x[:, 0::2, 1::2, :],
             x[:, 1::2, 0::2, :], x[:, 1::2, 1::2, :])
    n = N * Ho * Wo * C
    rows_tile = 512
    tile_elems = rows_tile * 128
    npad = round_up(n, tile_elems)
    flat = [jnp.pad(c.reshape(-1), (0, npad - n)).reshape(-1, 128) for c in cands]
    rows = npad // 128

    out = pl.pallas_call(
        _max4_kernel,
        out_shape=jax.ShapeDtypeStruct((rows, 128), x.dtype),
        grid=(rows // rows_tile,),
        in_specs=[pl.BlockSpec((rows_tile, 128), lambda i: (i, 0))] * 4,
        out_specs=pl.BlockSpec((rows_tile, 128), lambda i: (i, 0)),
        compiler_params=pltpu.CompilerParams(dimension_semantics=("parallel",)),
    )(*flat)
    return out.reshape(-1)[:n].reshape(N, Ho, Wo, C)


# ------------------------------- glue ---------------------------------------

def im2col_3x3(x):
    """x NHWC -> (N*Ho*Wo, 9*C) with feature order (ky, kx, c).
    No transpose of the expanded tensor: the 9 shifted views are concatenated
    on the channel axis; the matching permutation is applied to the (tiny)
    weight once at param-prep time instead."""
    N, H, W, C = x.shape
    Ho, Wo = H - 2, W - 2
    cols = jnp.concatenate(
        [x[:, dy:dy + Ho, dx:dx + Wo, :] for dy in range(3) for dx in range(3)],
        axis=-1)                                        # (N, Ho, Wo, 9*C)
    return cols.reshape(N * Ho * Wo, 9 * C), Ho, Wo


def conv3x3_relu(x, w_p, bias_p, cout, *, tm=512):
    """x NHWC bf16; w_p (Kp, Np) bf16 prepared im2col weight; bias_p (1, Np) f32.
    Conv = im2col (glue) + fused single-K-step Pallas matmul+bias+ReLU."""
    N = x.shape[0]
    cols, Ho, Wo = im2col_3x3(x)
    Kp, Np = w_p.shape
    y = matmul_bias_act(cols, w_p, bias_p, apply_relu=True,
                        out_dtype=jnp.bfloat16, tm=tm, tn=Np, tk=Kp)
    return y[:N * Ho * Wo, :cout].reshape(N, Ho, Wo, cout)


def my_model_forward(x_nchw, p):
    n = x_nchw.shape[0]
    x = jnp.transpose(x_nchw, (0, 2, 3, 1)).astype(jnp.bfloat16)  # NCHW -> NHWC
    x = conv3x3_relu(x, p["w1"], p["b1"], 32);  x = maxpool2x2(x)
    x = conv3x3_relu(x, p["w2"], p["b2"], 64);  x = maxpool2x2(x)
    x = conv3x3_relu(x, p["w3"], p["b3"], 128); x = maxpool2x2(x)
    # torch's x.view(N, -1) flattens in NCHW (c, h, w) order.
    flat = jnp.transpose(x, (0, 3, 1, 2)).reshape(n, -1)          # (n, 86528)
    # FC1: K = 86528 = 26 * 3328; tm=16 (M=2), tn=256 (2 parallel N tiles).
    h = matmul_bias_act(flat, p["fc1_w"], p["fc1_b"], apply_relu=True,
                        out_dtype=jnp.bfloat16, tm=16, tn=256, tk=3328)
    # FC2: single K step (K=512), N padded 27 -> 128.
    logits = matmul_bias_act(h, p["fc2_w"], p["fc2_b"], apply_relu=False,
                             out_dtype=jnp.float32, tm=16, tn=128, tk=512)
    return logits[:n, :NUM_CLASSES]


# --------------------------- parameters --------------------------------------

def init_params(key):
    """Parameters in the PyTorch layout (Conv: (Cout,Cin,3,3); Linear: (out,in))."""
    ks = jax.random.split(key, 10)

    def normal(k, shape, scale):
        return scale * jax.random.normal(k, shape, jnp.float32)

    return dict(
        w1=normal(ks[0], (32, 3, 3, 3), 0.10),   b1=normal(ks[1], (32,), 0.01),
        w2=normal(ks[2], (64, 32, 3, 3), 0.05),  b2=normal(ks[3], (64,), 0.01),
        w3=normal(ks[4], (128, 64, 3, 3), 0.05), b3=normal(ks[5], (128,), 0.01),
        fc1_w=normal(ks[6], (512, 128 * 26 * 26), 0.005),
        fc1_b=normal(ks[7], (512,), 0.01),
        fc2_w=normal(ks[8], (NUM_CLASSES, 512), 0.05),
        fc2_b=normal(ks[9], (NUM_CLASSES,), 0.01),
    )


def prepare_params(params):
    """One-time layout prep (runs once, OUTSIDE the jitted forward):
      * conv weights -> (ky,kx,cin,cout) im2col layout, K padded to mult of 32,
        Cout padded to 128 lanes, cast to bf16.
      * fc weights   -> pre-transposed to (K, N), N padded to 128, cast to bf16
        (no per-forward 177 MB fc1_w.T materialization).
      * biases       -> (1, Np) f32, padded to match.
    bf16 operands + f32 MXU accumulation is the documented numerics tradeoff.
    """
    def prep_conv(w, b):
        cout, cin = w.shape[0], w.shape[1]
        k = 9 * cin
        kp, np_ = round_up(k, 32), round_up(cout, 128)
        w2 = jnp.transpose(w, (2, 3, 1, 0)).reshape(k, cout)   # (ky,kx,cin) x cout
        w2 = jnp.pad(w2, ((0, kp - k), (0, np_ - cout))).astype(jnp.bfloat16)
        b2 = jnp.pad(b, (0, np_ - cout)).reshape(1, np_).astype(jnp.float32)
        return w2, b2

    def prep_fc(w, b):
        nout = w.shape[0]
        np_ = round_up(nout, 128)
        w2 = jnp.pad(w.T, ((0, 0), (0, np_ - nout))).astype(jnp.bfloat16)
        b2 = jnp.pad(b, (0, np_ - nout)).reshape(1, np_).astype(jnp.float32)
        return w2, b2

    w1, b1 = prep_conv(params["w1"], params["b1"])
    w2, b2 = prep_conv(params["w2"], params["b2"])
    w3, b3 = prep_conv(params["w3"], params["b3"])
    fc1_w, fc1_b = prep_fc(params["fc1_w"], params["fc1_b"])
    fc2_w, fc2_b = prep_fc(params["fc2_w"], params["fc2_b"])
    return dict(w1=w1, b1=b1, w2=w2, b2=b2, w3=w3, b3=b3,
                fc1_w=fc1_w, fc1_b=fc1_b, fc2_w=fc2_w, fc2_b=fc2_b)


if __name__ == "__main__":
    key = jax.random.PRNGKey(0)
    pkey, xkey = jax.random.split(key)
    params = prepare_params(init_params(pkey))
    # 224x224 input is implied by nn.Linear(128*26*26, 512):
    # 224 -conv-> 222 -pool-> 111 -conv-> 109 -pool-> 54 -conv-> 52 -pool-> 26
    x = jax.random.normal(xkey, (2, 3, 224, 224), jnp.float32)
    forward = jax.jit(my_model_forward)
    out = jax.block_until_ready(forward(x, params))
    assert out.shape == (2, NUM_CLASSES), out.shape
    assert bool(jnp.all(jnp.isfinite(out)))
    print("KERNEL_OK")
</pallas_src>

<mosaic_0001>
module attributes {stable_mosaic.version = 11 : i64} {
  func.func @_matmul_bias_act_single_kernel(%arg0: i32, %arg1: i32, %arg2: memref<512x32xbf16, #tpu.memory_space<vmem>>, %arg3: memref<32x128xbf16, #tpu.memory_space<vmem>>, %arg4: memref<1x128xf32, #tpu.memory_space<vmem>>, %arg5: memref<512x128xbf16, #tpu.memory_space<vmem>>) attributes {dimension_semantics = [#tpu.dimension_semantics<parallel>, #tpu.dimension_semantics<parallel>], iteration_bounds = array<i64: 193, 1>, scalar_prefetch = 0 : i64, scratch_operands = 0 : i64, tpu.core_type = #tpu.core_type<tc>, window_params = [{transform_indices = @transform_0, window_bounds = array<i64: 512, 32>}, {transform_indices = @transform_1, window_bounds = array<i64: 32, 128>}, {transform_indices = @transform_2, window_bounds = array<i64: 1, 128>}, {transform_indices = @transform_3, window_bounds = array<i64: 512, 128>}]} {
    %c0 = arith.constant 0 : index
    %c0_0 = arith.constant 0 : index
    %0 = vector.load %arg2[%c0, %c0_0] : memref<512x32xbf16, #tpu.memory_space<vmem>>, vector<512x32xbf16>
    %c0_1 = arith.constant 0 : index
    %c0_2 = arith.constant 0 : index
    %1 = vector.load %arg3[%c0_1, %c0_2] : memref<32x128xbf16, #tpu.memory_space<vmem>>, vector<32x128xbf16>
    %cst = arith.constant dense<0.000000e+00> : vector<512x128xf32>
    %2 = tpu.matmul %0, %1, %cst {dimension_numbers = #tpu.dot_dimension_numbers<[1], [0], [0], [1], [0, 0, 1, 1], [], []>} : vector<512x32xbf16>, vector<32x128xbf16>, vector<512x128xf32> -> vector<512x128xf32>
    %c0_3 = arith.constant 0 : index
    %c0_4 = arith.constant 0 : index
    %3 = vector.load %arg4[%c0_3, %c0_4] : memref<1x128xf32, #tpu.memory_space<vmem>>, vector<1x128xf32>
    %4 = vector.broadcast %3 : vector<1x128xf32> to vector<512x128xf32>
    %5 = arith.addf %2, %4 : vector<512x128xf32>
    %cst_5 = arith.constant 0.000000e+00 : f32
    %6 = vector.broadcast %cst_5 : f32 to vector<512x128xf32>
    %7 = arith.maximumf %5, %6 : vector<512x128xf32>
    %8 = arith.truncf %7 : vector<512x128xf32> to vector<512x128xbf16>
    %c0_6 = arith.constant 0 : index
    %c0_7 = arith.constant 0 : index
    %9 = vector.load %arg5[%c0_6, %c0_7] : memref<512x128xbf16, #tpu.memory_space<vmem>>, vector<512x128xbf16>
    tpu.vector_store %arg5[%c0_6, %c0_7], %8 {strides = array<i32>} : memref<512x128xbf16, #tpu.memory_space<vmem>>, vector<512x128xbf16>,
    return
  }
  func.func @transform_0(%arg0: i32, %arg1: i32) -> (i32, i32) {
    %c0_i32 = arith.constant 0 : i32
    %c0_i32_0 = arith.constant 0 : i32
    return %arg0, %c0_i32 : i32, i32
  }
  func.func @transform_1(%arg0: i32, %arg1: i32) -> (i32, i32) {
    %c0_i32 = arith.constant 0 : i32
    %c0_i32_0 = arith.constant 0 : i32
    return %c0_i32, %arg1 : i32, i32
  }
  func.func @transform_2(%arg0: i32, %arg1: i32) -> (i32, i32) {
    %c0_i32 = arith.constant 0 : i32
    %c0_i32_0 = arith.constant 0 : i32
    return %c0_i32, %arg1 : i32, i32
  }
  func.func @transform_3(%arg0: i32, %arg1: i32) -> (i32, i32) {
    %c0_i32 = arith.constant 0 : i32
    return %arg0, %arg1 : i32, i32
  }
}

module attributes {stable_mosaic.version = 11 : i64} {
  func.func @_max4_kernel(%arg0: i32, %arg1: memref<512x128xbf16, #tpu.memory_space<vmem>>, %arg2: memref<512x128xbf16, #tpu.memory_space<vmem>>, %arg3: memref<512x128xbf16, #tpu.memory_space<vmem>>, %arg4: memref<512x128xbf16, #tpu.memory_space<vmem>>, %arg5: memref<512x128xbf16, #tpu.memory_space<vmem>>) attributes {dimension_semantics = [#tpu.dimension_semantics<parallel>], iteration_bounds = array<i64: 13>, scalar_prefetch = 0 : i64, scratch_operands = 0 : i64, tpu.core_type = #tpu.core_type<tc>, window_params = [{transform_indices = @transform_0, window_bounds = array<i64: 512, 128>}, {transform_indices = @transform_1, window_bounds = array<i64: 512, 128>}, {transform_indices = @transform_2, window_bounds = array<i64: 512, 128>}, {transform_indices = @transform_3, window_bounds = array<i64: 512, 128>}, {transform_indices = @transform_4, window_bounds = array<i64: 512, 128>}]} {
    %c0 = arith.constant 0 : index
    %c0_0 = arith.constant 0 : index
    %0 = vector.load %arg1[%c0, %c0_0] : memref<512x128xbf16, #tpu.memory_space<vmem>>, vector<512x128xbf16>
    %c0_1 = arith.constant 0 : index
    %c0_2 = arith.constant 0 : index
    %1 = vector.load %arg2[%c0_1, %c0_2] : memref<512x128xbf16, #tpu.memory_space<vmem>>, vector<512x128xbf16>
    %2 = arith.maximumf %0, %1 : vector<512x128xbf16>
    %c0_3 = arith.constant 0 : index
    %c0_4 = arith.constant 0 : index
    %3 = vector.load %arg3[%c0_3, %c0_4] : memref<512x128xbf16, #tpu.memory_space<vmem>>, vector<512x128xbf16>
    %c0_5 = arith.constant 0 : index
    %c0_6 = arith.constant 0 : index
    %4 = vector.load %arg4[%c0_5, %c0_6] : memref<512x128xbf16, #tpu.memory_space<vmem>>, vector<512x128xbf16>
    %5 = arith.maximumf %3, %4 : vector<512x128xbf16>
    %6 = arith.maximumf %2, %5 : vector<512x128xbf16>
    %c0_7 = arith.constant 0 : index
    %c0_8 = arith.constant 0 : index
    %7 = vector.load %arg5[%c0_7, %c0_8] : memref<512x128xbf16, #tpu.memory_space<vmem>>, vector<512x128xbf16>
    tpu.vector_store %arg5[%c0_7, %c0_8], %6 {strides = array<i32>} : memref<512x128xbf16, #tpu.memory_space<vmem>>, vector<512x128xbf16>,
    return
  }
  func.func @transform_0(%arg0: i32) -> (i32, i32) {
    %c0_i32 = arith.constant 0 : i32
    %c0_i32_0 = arith.constant 0 : i32
    return %arg0, %c0_i32 : i32, i32
  }
  func.func @transform_1(%arg0: i32) -> (i32, i32) {
    %c0_i32 = arith.constant 0 : i32
    %c0_i32_0 = arith.constant 0 : i32
    return %arg0, %c0_i32 : i32, i32
  }
  func.func @transform_2(%arg0: i32) -> (i32, i32) {
    %c0_i32 = arith.constant 0 : i32
    %c0_i32_0 = arith.constant 0 : i32
    return %arg0, %c0_i32 : i32, i32
  }
  func.func @transform_3(%arg0: i32) -> (i32, i32) {
    %c0_i32 = arith.constant 0 : i32
    %c0_i32_0 = arith.constant 0 : i32
    return %arg0, %c0_i32 : i32, i32
  }
  func.func @transform_4(%arg0: i32) -> (i32, i32) {
    %c0_i32 = arith.constant 0 : i32
    %c0_i32_0 = arith.constant 0 : i32
    return %arg0, %c0_i32 : i32, i32
  }
}

module attributes {stable_mosaic.version = 11 : i64} {
  func.func @_matmul_bias_act_single_kernel(%arg0: i32, %arg1: i32, %arg2: memref<512x288xbf16, #tpu.memory_space<vmem>>, %arg3: memref<288x128xbf16, #tpu.memory_space<vmem>>, %arg4: memref<1x128xf32, #tpu.memory_space<vmem>>, %arg5: memref<512x128xbf16, #tpu.memory_space<vmem>>) attributes {dimension_semantics = [#tpu.dimension_semantics<parallel>, #tpu.dimension_semantics<parallel>], iteration_bounds = array<i64: 47, 1>, scalar_prefetch = 0 : i64, scratch_operands = 0 : i64, tpu.core_type = #tpu.core_type<tc>, window_params = [{transform_indices = @transform_0, window_bounds = array<i64: 512, 288>}, {transform_indices = @transform_1, window_bounds = array<i64: 288, 128>}, {transform_indices = @transform_2, window_bounds = array<i64: 1, 128>}, {transform_indices = @transform_3, window_bounds = array<i64: 512, 128>}]} {
    %c0 = arith.constant 0 : index
    %c0_0 = arith.constant 0 : index
    %0 = vector.load %arg2[%c0, %c0_0] : memref<512x288xbf16, #tpu.memory_space<vmem>>, vector<512x288xbf16>
    %c0_1 = arith.constant 0 : index
    %c0_2 = arith.constant 0 : index
    %1 = vector.load %arg3[%c0_1, %c0_2] : memref<288x128xbf16, #tpu.memory_space<vmem>>, vector<288x128xbf16>
    %cst = arith.constant dense<0.000000e+00> : vector<512x128xf32>
    %2 = tpu.matmul %0, %1, %cst {dimension_numbers = #tpu.dot_dimension_numbers<[1], [0], [0], [1], [0, 0, 1, 1], [], []>} : vector<512x288xbf16>, vector<288x128xbf16>, vector<512x128xf32> -> vector<512x128xf32>
    %c0_3 = arith.constant 0 : index
    %c0_4 = arith.constant 0 : index
    %3 = vector.load %arg4[%c0_3, %c0_4] : memref<1x128xf32, #tpu.memory_space<vmem>>, vector<1x128xf32>
    %4 = vector.broadcast %3 : vector<1x128xf32> to vector<512x128xf32>
    %5 = arith.addf %2, %4 : vector<512x128xf32>
    %cst_5 = arith.constant 0.000000e+00 : f32
    %6 = vector.broadcast %cst_5 : f32 to vector<512x128xf32>
    %7 = arith.maximumf %5, %6 : vector<512x128xf32>
    %8 = arith.truncf %7 : vector<512x128xf32> to vector<512x128xbf16>
    %c0_6 = arith.constant 0 : index
    %c0_7 = arith.constant 0 : index
    %9 = vector.load %arg5[%c0_6, %c0_7] : memref<512x128xbf16, #tpu.memory_space<vmem>>, vector<512x128xbf16>
    tpu.vector_store %arg5[%c0_6, %c0_7], %8 {strides = array<i32>} : memref<512x128xbf16, #tpu.memory_space<vmem>>, vector<512x128xbf16>,
    return
  }
  func.func @transform_0(%arg0: i32, %arg1: i32) -> (i32, i32) {
    %c0_i32 = arith.constant 0 : i32
    %c0_i32_0 = arith.constant 0 : i32
    return %arg0, %c0_i32 : i32, i32
  }
  func.func @transform_1(%arg0: i32, %arg1: i32) -> (i32, i32) {
    %c0_i32 = arith.constant 0 : i32
    %c0_i32_0 = arith.constant 0 : i32
    return %c0_i32, %arg1 : i32, i32
  }
  func.func @transform_2(%arg0: i32, %arg1: i32) -> (i32, i32) {
    %c0_i32 = arith.constant 0 : i32
    %c0_i32_0 = arith.constant 0 : i32
    return %c0_i32, %arg1 : i32, i32
  }
  func.func @transform_3(%arg0: i32, %arg1: i32) -> (i32, i32) {
    %c0_i32 = arith.constant 0 : i32
    return %arg0, %arg1 : i32, i32
  }
}

module attributes {stable_mosaic.version = 11 : i64} {
  func.func @_max4_kernel(%arg0: i32, %arg1: memref<512x128xbf16, #tpu.memory_space<vmem>>, %arg2: memref<512x128xbf16, #tpu.memory_space<vmem>>, %arg3: memref<512x128xbf16, #tpu.memory_space<vmem>>, %arg4: memref<512x128xbf16, #tpu.memory_space<vmem>>, %arg5: memref<512x128xbf16, #tpu.memory_space<vmem>>) attributes {dimension_semantics = [#tpu.dimension_semantics<parallel>], iteration_bounds = array<i64: 6>, scalar_prefetch = 0 : i64, scratch_operands = 0 : i64, tpu.core_type = #tpu.core_type<tc>, window_params = [{transform_indices = @transform_0, window_bounds = array<i64: 512, 128>}, {transform_indices = @transform_1, window_bounds = array<i64: 512, 128>}, {transform_indices = @transform_2, window_bounds = array<i64: 512, 128>}, {transform_indices = @transform_3, window_bounds = array<i64: 512, 128>}, {transform_indices = @transform_4, window_bounds = array<i64: 512, 128>}]} {
    %c0 = arith.constant 0 : index
    %c0_0 = arith.constant 0 : index
    %0 = vector.load %arg1[%c0, %c0_0] : memref<512x128xbf16, #tpu.memory_space<vmem>>, vector<512x128xbf16>
    %c0_1 = arith.constant 0 : index
    %c0_2 = arith.constant 0 : index
    %1 = vector.load %arg2[%c0_1, %c0_2] : memref<512x128xbf16, #tpu.memory_space<vmem>>, vector<512x128xbf16>
    %2 = arith.maximumf %0, %1 : vector<512x128xbf16>
    %c0_3 = arith.constant 0 : index
    %c0_4 = arith.constant 0 : index
    %3 = vector.load %arg3[%c0_3, %c0_4] : memref<512x128xbf16, #tpu.memory_space<vmem>>, vector<512x128xbf16>
    %c0_5 = arith.constant 0 : index
    %c0_6 = arith.constant 0 : index
    %4 = vector.load %arg4[%c0_5, %c0_6] : memref<512x128xbf16, #tpu.memory_space<vmem>>, vector<512x128xbf16>
    %5 = arith.maximumf %3, %4 : vector<512x128xbf16>
    %6 = arith.maximumf %2, %5 : vector<512x128xbf16>
    %c0_7 = arith.constant 0 : index
    %c0_8 = arith.constant 0 : index
    %7 = vector.load %arg5[%c0_7, %c0_8] : memref<512x128xbf16, #tpu.memory_space<vmem>>, vector<512x128xbf16>
    tpu.vector_store %arg5[%c0_7, %c0_8], %6 {strides = array<i32>} : memref<512x128xbf16, #tpu.memory_space<vmem>>, vector<512x128xbf16>,
    return
  }
  func.func @transform_0(%arg0: i32) -> (i32, i32) {
    %c0_i32 = arith.constant 0 : i32
    %c0_i32_0 = arith.constant 0 : i32
    return %arg0, %c0_i32 : i32, i32
  }
  func.func @transform_1(%arg0: i32) -> (i32, i32) {
    %c0_i32 = arith.constant 0 : i32
    %c0_i32_0 = arith.constant 0 : i32
    return %arg0, %c0_i32 : i32, i32
  }
  func.func @transform_2(%arg0: i32) -> (i32, i32) {
    %c0_i32 = arith.constant 0 : i32
    %c0_i32_0 = arith.constant 0 : i32
    return %arg0, %c0_i32 : i32, i32
  }
  func.func @transform_3(%arg0: i32) -> (i32, i32) {
    %c0_i32 = arith.constant 0 : i32
    %c0_i32_0 = arith.constant 0 : i32
    return %arg0, %c0_i32 : i32, i32
  }
  func.func @transform_4(%arg0: i32) -> (i32, i32) {
    %c0_i32 = arith.constant 0 : i32
    %c0_i32_0 = arith.constant 0 : i32
    return %arg0, %c0_i32 : i32, i32
  }
}

module attributes {stable_mosaic.version = 11 : i64} {
  func.func @_matmul_bias_act_single_kernel(%arg0: i32, %arg1: i32, %arg2: memref<512x576xbf16, #tpu.memory_space<vmem>>, %arg3: memref<576x128xbf16, #tpu.memory_space<vmem>>, %arg4: memref<1x128xf32, #tpu.memory_space<vmem>>, %arg5: memref<512x128xbf16, #tpu.memory_space<vmem>>) attributes {dimension_semantics = [#tpu.dimension_semantics<parallel>, #tpu.dimension_semantics<parallel>], iteration_bounds = array<i64: 11, 1>, scalar_prefetch = 0 : i64, scratch_operands = 0 : i64, tpu.core_type = #tpu.core_type<tc>, window_params = [{transform_indices = @transform_0, window_bounds = array<i64: 512, 576>}, {transform_indices = @transform_1, window_bounds = array<i64: 576, 128>}, {transform_indices = @transform_2, window_bounds = array<i64: 1, 128>}, {transform_indices = @transform_3, window_bounds = array<i64: 512, 128>}]} {
    %c0 = arith.constant 0 : index
    %c0_0 = arith.constant 0 : index
    %0 = vector.load %arg2[%c0, %c0_0] : memref<512x576xbf16, #tpu.memory_space<vmem>>, vector<512x576xbf16>
    %c0_1 = arith.constant 0 : index
    %c0_2 = arith.constant 0 : index
    %1 = vector.load %arg3[%c0_1, %c0_2] : memref<576x128xbf16, #tpu.memory_space<vmem>>, vector<576x128xbf16>
    %cst = arith.constant dense<0.000000e+00> : vector<512x128xf32>
    %2 = tpu.matmul %0, %1, %cst {dimension_numbers = #tpu.dot_dimension_numbers<[1], [0], [0], [1], [0, 0, 1, 1], [], []>} : vector<512x576xbf16>, vector<576x128xbf16>, vector<512x128xf32> -> vector<512x128xf32>
    %c0_3 = arith.constant 0 : index
    %c0_4 = arith.constant 0 : index
    %3 = vector.load %arg4[%c0_3, %c0_4] : memref<1x128xf32, #tpu.memory_space<vmem>>, vector<1x128xf32>
    %4 = vector.broadcast %3 : vector<1x128xf32> to vector<512x128xf32>
    %5 = arith.addf %2, %4 : vector<512x128xf32>
    %cst_5 = arith.constant 0.000000e+00 : f32
    %6 = vector.broadcast %cst_5 : f32 to vector<512x128xf32>
    %7 = arith.maximumf %5, %6 : vector<512x128xf32>
    %8 = arith.truncf %7 : vector<512x128xf32> to vector<512x128xbf16>
    %c0_6 = arith.constant 0 : index
    %c0_7 = arith.constant 0 : index
    %9 = vector.load %arg5[%c0_6, %c0_7] : memref<512x128xbf16, #tpu.memory_space<vmem>>, vector<512x128xbf16>
    tpu.vector_store %arg5[%c0_6, %c0_7], %8 {strides = array<i32>} : memref<512x128xbf16, #tpu.memory_space<vmem>>, vector<512x128xbf16>,
    return
  }
  func.func @transform_0(%arg0: i32, %arg1: i32) -> (i32, i32) {
    %c0_i32 = arith.constant 0 : i32
    %c0_i32_0 = arith.constant 0 : i32
    return %arg0, %c0_i32 : i32, i32
  }
  func.func @transform_1(%arg0: i32, %arg1: i32) -> (i32, i32) {
    %c0_i32 = arith.constant 0 : i32
    %c0_i32_0 = arith.constant 0 : i32
    return %c0_i32, %arg1 : i32, i32
  }
  func.func @transform_2(%arg0: i32, %arg1: i32) -> (i32, i32) {
    %c0_i32 = arith.constant 0 : i32
    %c0_i32_0 = arith.constant 0 : i32
    return %c0_i32, %arg1 : i32, i32
  }
  func.func @transform_3(%arg0: i32, %arg1: i32) -> (i32, i32) {
    %c0_i32 = arith.constant 0 : i32
    return %arg0, %arg1 : i32, i32
  }
}

module attributes {stable_mosaic.version = 11 : i64} {
  func.func @_max4_kernel(%arg0: i32, %arg1: memref<512x128xbf16, #tpu.memory_space<vmem>>, %arg2: memref<512x128xbf16, #tpu.memory_space<vmem>>, %arg3: memref<512x128xbf16, #tpu.memory_space<vmem>>, %arg4: memref<512x128xbf16, #tpu.memory_space<vmem>>, %arg5: memref<512x128xbf16, #tpu.memory_space<vmem>>) attributes {dimension_semantics = [#tpu.dimension_semantics<parallel>], iteration_bounds = array<i64: 3>, scalar_prefetch = 0 : i64, scratch_operands = 0 : i64, tpu.core_type = #tpu.core_type<tc>, window_params = [{transform_indices = @transform_0, window_bounds = array<i64: 512, 128>}, {transform_indices = @transform_1, window_bounds = array<i64: 512, 128>}, {transform_indices = @transform_2, window_bounds = array<i64: 512, 128>}, {transform_indices = @transform_3, window_bounds = array<i64: 512, 128>}, {transform_indices = @transform_4, window_bounds = array<i64: 512, 128>}]} {
    %c0 = arith.constant 0 : index
    %c0_0 = arith.constant 0 : index
    %0 = vector.load %arg1[%c0, %c0_0] : memref<512x128xbf16, #tpu.memory_space<vmem>>, vector<512x128xbf16>
    %c0_1 = arith.constant 0 : index
    %c0_2 = arith.constant 0 : index
    %1 = vector.load %arg2[%c0_1, %c0_2] : memref<512x128xbf16, #tpu.memory_space<vmem>>, vector<512x128xbf16>
    %2 = arith.maximumf %0, %1 : vector<512x128xbf16>
    %c0_3 = arith.constant 0 : index
    %c0_4 = arith.constant 0 : index
    %3 = vector.load %arg3[%c0_3, %c0_4] : memref<512x128xbf16, #tpu.memory_space<vmem>>, vector<512x128xbf16>
    %c0_5 = arith.constant 0 : index
    %c0_6 = arith.constant 0 : index
    %4 = vector.load %arg4[%c0_5, %c0_6] : memref<512x128xbf16, #tpu.memory_space<vmem>>, vector<512x128xbf16>
    %5 = arith.maximumf %3, %4 : vector<512x128xbf16>
    %6 = arith.maximumf %2, %5 : vector<512x128xbf16>
    %c0_7 = arith.constant 0 : index
    %c0_8 = arith.constant 0 : index
    %7 = vector.load %arg5[%c0_7, %c0_8] : memref<512x128xbf16, #tpu.memory_space<vmem>>, vector<512x128xbf16>
    tpu.vector_store %arg5[%c0_7, %c0_8], %6 {strides = array<i32>} : memref<512x128xbf16, #tpu.memory_space<vmem>>, vector<512x128xbf16>,
    return
  }
  func.func @transform_0(%arg0: i32) -> (i32, i32) {
    %c0_i32 = arith.constant 0 : i32
    %c0_i32_0 = arith.constant 0 : i32
    return %arg0, %c0_i32 : i32, i32
  }
  func.func @transform_1(%arg0: i32) -> (i32, i32) {
    %c0_i32 = arith.constant 0 : i32
    %c0_i32_0 = arith.constant 0 : i32
    return %arg0, %c0_i32 : i32, i32
  }
  func.func @transform_2(%arg0: i32) -> (i32, i32) {
    %c0_i32 = arith.constant 0 : i32
    %c0_i32_0 = arith.constant 0 : i32
    return %arg0, %c0_i32 : i32, i32
  }
  func.func @transform_3(%arg0: i32) -> (i32, i32) {
    %c0_i32 = arith.constant 0 : i32
    %c0_i32_0 = arith.constant 0 : i32
    return %arg0, %c0_i32 : i32, i32
  }
  func.func @transform_4(%arg0: i32) -> (i32, i32) {
    %c0_i32 = arith.constant 0 : i32
    %c0_i32_0 = arith.constant 0 : i32
    return %arg0, %c0_i32 : i32, i32
  }
}

module attributes {stable_mosaic.version = 11 : i64} {
  func.func @_matmul_bias_act_multi_kernel(%arg0: i32, %arg1: i32, %arg2: i32, %arg3: memref<16x3328xbf16, #tpu.memory_space<vmem>>, %arg4: memref<3328x256xbf16, #tpu.memory_space<vmem>>, %arg5: memref<1x256xf32, #tpu.memory_space<vmem>>, %arg6: memref<16x256xbf16, #tpu.memory_space<vmem>>, %arg7: memref<16x256xf32, #tpu.memory_space<vmem>>) attributes {dimension_semantics = [#tpu.dimension_semantics<parallel>, #tpu.dimension_semantics<parallel>, #tpu.dimension_semantics<arbitrary>], iteration_bounds = array<i64: 1, 2, 26>, scalar_prefetch = 0 : i64, scratch_operands = 1 : i64, tpu.core_type = #tpu.core_type<tc>, window_params = [{transform_indices = @transform_0, window_bounds = array<i64: 16, 3328>}, {transform_indices = @transform_1, window_bounds = array<i64: 3328, 256>}, {transform_indices = @transform_2, window_bounds = array<i64: 1, 256>}, {transform_indices = @transform_3, window_bounds = array<i64: 16, 256>}]} {
    %c0_i32 = arith.constant 0 : i32
    %0 = arith.cmpi eq, %arg2, %c0_i32 : i32
    %1 = arith.extui %0 : i1 to i32
    %c0_i32_0 = arith.constant 0 : i32
    %2 = arith.cmpi ne, %1, %c0_i32_0 : i32
    scf.if %2 {
      %cst_9 = arith.constant 0.000000e+00 : f32
      %12 = vector.broadcast %cst_9 : f32 to vector<16x256xf32>
      %c0_10 = arith.constant 0 : index
      %c0_11 = arith.constant 0 : index
      %13 = vector.load %arg7[%c0_10, %c0_11] : memref<16x256xf32, #tpu.memory_space<vmem>>, vector<16x256xf32>
      tpu.vector_store %arg7[%c0_10, %c0_11], %12 {strides = array<i32>} : memref<16x256xf32, #tpu.memory_space<vmem>>, vector<16x256xf32>,
    } else {
    }
    %c0 = arith.constant 0 : index
    %c0_1 = arith.constant 0 : index
    %3 = vector.load %arg7[%c0, %c0_1] : memref<16x256xf32, #tpu.memory_space<vmem>>, vector<16x256xf32>
    %c0_2 = arith.constant 0 : index
    %c0_3 = arith.constant 0 : index
    %4 = vector.load %arg3[%c0_2, %c0_3] : memref<16x3328xbf16, #tpu.memory_space<vmem>>, vector<16x3328xbf16>
    %c0_4 = arith.constant 0 : index
    %c0_5 = arith.constant 0 : index
    %5 = vector.load %arg4[%c0_4, %c0_5] : memref<3328x256xbf16, #tpu.memory_space<vmem>>, vector<3328x256xbf16>
    %cst = arith.constant dense<0.000000e+00> : vector<16x256xf32>
    %6 = tpu.matmul %4, %5, %cst {dimension_numbers = #tpu.dot_dimension_numbers<[1], [0], [0], [1], [0, 0, 1, 1], [], []>} : vector<16x3328xbf16>, vector<3328x256xbf16>, vector<16x256xf32> -> vector<16x256xf32>
    %7 = arith.addf %3, %6 : vector<16x256xf32>
    %c0_6 = arith.constant 0 : index
    %c0_7 = arith.constant 0 : index
    %8 = vector.load %arg7[%c0_6, %c0_7] : memref<16x256xf32, #tpu.memory_space<vmem>>, vector<16x256xf32>
    tpu.vector_store %arg7[%c0_6, %c0_7], %7 {strides = array<i32>} : memref<16x256xf32, #tpu.memory_space<vmem>>, vector<16x256xf32>,
    %c25_i32 = arith.constant 25 : i32
    %9 = arith.cmpi eq, %arg2, %c25_i32 : i32
    %10 = arith.extui %9 : i1 to i32
    %c0_i32_8 = arith.constant 0 : i32
    %11 = arith.cmpi ne, %10, %c0_i32_8 : i32
    scf.if %11 {
      %c0_9 = arith.constant 0 : index
      %c0_10 = arith.constant 0 : index
      %12 = vector.load %arg7[%c0_9, %c0_10] : memref<16x256xf32, #tpu.memory_space<vmem>>, vector<16x256xf32>
      %c0_11 = arith.constant 0 : index
      %c0_12 = arith.constant 0 : index
      %13 = vector.load %arg5[%c0_11, %c0_12] : memref<1x256xf32, #tpu.memory_space<vmem>>, vector<1x256xf32>
      %14 = vector.broadcast %13 : vector<1x256xf32> to vector<16x256xf32>
      %15 = arith.addf %12, %14 : vector<16x256xf32>
      %cst_13 = arith.constant 0.000000e+00 : f32
      %16 = vector.broadcast %cst_13 : f32 to vector<16x256xf32>
      %17 = arith.maximumf %15, %16 : vector<16x256xf32>
      %18 = arith.truncf %17 : vector<16x256xf32> to vector<16x256xbf16>
      %c0_14 = arith.constant 0 : index
      %c0_15 = arith.constant 0 : index
      %19 = vector.load %arg6[%c0_14, %c0_15] : memref<16x256xbf16, #tpu.memory_space<vmem>>, vector<16x256xbf16>
      tpu.vector_store %arg6[%c0_14, %c0_15], %18 {strides = array<i32>} : memref<16x256xbf16, #tpu.memory_space<vmem>>, vector<16x256xbf16>,
    } else {
    }
    return
  }
  func.func @transform_0(%arg0: i32, %arg1: i32, %arg2: i32) -> (i32, i32) {
    %c0_i32 = arith.constant 0 : i32
    return %arg0, %arg2 : i32, i32
  }
  func.func @transform_1(%arg0: i32, %arg1: i32, %arg2: i32) -> (i32, i32) {
    %c0_i32 = arith.constant 0 : i32
    return %arg2, %arg1 : i32, i32
  }
  func.func @transform_2(%arg0: i32, %arg1: i32, %arg2: i32) -> (i32, i32) {
    %c0_i32 = arith.constant 0 : i32
    %c0_i32_0 = arith.constant 0 : i32
    return %c0_i32, %arg1 : i32, i32
  }
  func.func @transform_3(%arg0: i32, %arg1: i32, %arg2: i32) -> (i32, i32) {
    %c0_i32 = arith.constant 0 : i32
    return %arg0, %arg1 : i32, i32
  }
}

module attributes {stable_mosaic.version = 11 : i64} {
  func.func @_matmul_bias_act_single_kernel(%arg0: i32, %arg1: i32, %arg2: memref<16x512xbf16, #tpu.memory_space<vmem>>, %arg3: memref<512x128xbf16, #tpu.memory_space<vmem>>, %arg4: memref<1x128xf32, #tpu.memory_space<vmem>>, %arg5: memref<16x128xf32, #tpu.memory_space<vmem>>) attributes {dimension_semantics = [#tpu.dimension_semantics<parallel>, #tpu.dimension_semantics<parallel>], iteration_bounds = array<i64: 1, 1>, scalar_prefetch = 0 : i64, scratch_operands = 0 : i64, tpu.core_type = #tpu.core_type<tc>, window_params = [{transform_indices = @transform_0, window_bounds = array<i64: 16, 512>}, {transform_indices = @transform_1, window_bounds = array<i64: 512, 128>}, {transform_indices = @transform_2, window_bounds = array<i64: 1, 128>}, {transform_indices = @transform_3, window_bounds = array<i64: 16, 128>}]} {
    %c0 = arith.constant 0 : index
    %c0_0 = arith.constant 0 : index
    %0 = vector.load %arg2[%c0, %c0_0] : memref<16x512xbf16, #tpu.memory_space<vmem>>, vector<16x512xbf16>
    %c0_1 = arith.constant 0 : index
    %c0_2 = arith.constant 0 : index
    %1 = vector.load %arg3[%c0_1, %c0_2] : memref<512x128xbf16, #tpu.memory_space<vmem>>, vector<512x128xbf16>
    %cst = arith.constant dense<0.000000e+00> : vector<16x128xf32>
    %2 = tpu.matmul %0, %1, %cst {dimension_numbers = #tpu.dot_dimension_numbers<[1], [0], [0], [1], [0, 0, 1, 1], [], []>} : vector<16x512xbf16>, vector<512x128xbf16>, vector<16x128xf32> -> vector<16x128xf32>
    %c0_3 = arith.constant 0 : index
    %c0_4 = arith.constant 0 : index
    %3 = vector.load %arg4[%c0_3, %c0_4] : memref<1x128xf32, #tpu.memory_space<vmem>>, vector<1x128xf32>
    %4 = vector.broadcast %3 : vector<1x128xf32> to vector<16x128xf32>
    %5 = arith.addf %2, %4 : vector<16x128xf32>
    %c0_5 = arith.constant 0 : index
    %c0_6 = arith.constant 0 : index
    %6 = vector.load %arg5[%c0_5, %c0_6] : memref<16x128xf32, #tpu.memory_space<vmem>>, vector<16x128xf32>
    tpu.vector_store %arg5[%c0_5, %c0_6], %5 {strides = array<i32>} : memref<16x128xf32, #tpu.memory_space<vmem>>, vector<16x128xf32>,
    return
  }
  func.func @transform_0(%arg0: i32, %arg1: i32) -> (i32, i32) {
    %c0_i32 = arith.constant 0 : i32
    %c0_i32_0 = arith.constant 0 : i32
    return %arg0, %c0_i32 : i32, i32
  }
  func.func @transform_1(%arg0: i32, %arg1: i32) -> (i32, i32) {
    %c0_i32 = arith.constant 0 : i32
    %c0_i32_0 = arith.constant 0 : i32
    return %c0_i32, %arg1 : i32, i32
  }
  func.func @transform_2(%arg0: i32, %arg1: i32) -> (i32, i32) {
    %c0_i32 = arith.constant 0 : i32
    %c0_i32_0 = arith.constant 0 : i32
    return %c0_i32, %arg1 : i32, i32
  }
  func.func @transform_3(%arg0: i32, %arg1: i32) -> (i32, i32) {
    %c0_i32 = arith.constant 0 : i32
    return %arg0, %arg1 : i32, i32
  }
}

</mosaic_0001>

<bundles_post_ra>
// kernel: my_model_forward.8
= control target key start
LH: loop header
LB: loop body
LE: loop exit
PB: predicated region body
PF: predicated region fallthrough
CT: control target
= control target key end

     0   :  { %s1952_s12 = smov 0   ;;  %s1954_s13 = smov 0   ;;  %s2167_s0 = inlined_call_operand.vmem [shape: bf16[98816,32], index: 0, kind: input, shape index: {}]   ;;  %s2168_s1 = inlined_call_operand.vmem [shape: bf16[32,128], index: 1, kind: input, shape index: {}]   ;;  %s2169_s2 = inlined_call_operand.vmem [shape: f32[1,128], index: 2, kind: input, shape index: {}]   ;;  %s2170_s3 = inlined_call_operand.vmem [shape: bf16[98816,128], index: 3, kind: output, shape index: {}]  }
   0x1   :  { %s1956_s14 = smov 0  }
   0x2 LB: > { %s25_s15 = sadd.s32 1, %s1926_s13  ;;  %p1351_p0 = scmp.ge.s32.totalorder %s1930_s14, 1  ;;  %s1930_s14 = sphi %s1956_s14, %s13_s14   ;;  %s1926_s13 = sphi %s1954_s13, %s2172_s13   ;;  %s1922_s12 = sphi %s1952_s12, %s2171_s12  }
   0x3   : > { %p27_p1 = scmp.ge.s32.totalorder %s25_s15, 193  ;;  %p169_p2 = scmp.lt.s32.totalorder %s1930_s14, 194 }
   0x5   : > { %s2174_s15 = smov (%p27_p1, %s25_s15), 0  ;;  %p170_p3 = pnand %p1351_p0, %p169_p2 }
   0x6   : > { %s1352_s18 = sshll.u32 (!%p170_p3), %s1922_s12, 6 }
   0x7   : > { %173 = sbr.rel (%p170_p3) target bundleno = 283 (0x11b), region = 32  ;;  %p204_p4 = scmp.lt.s32.totalorder (!%p170_p3), %s1352_s18, 12351 }
   0xc   : > { %v1874_v0 = vld [vmem:[%s2168_s1 + $0x8] sm:$0xff]   ;;  %v1875_v1 = vld [vmem:[%s2168_s1] sm:$0xff]   ;;  %s2176_s18 = smov (!%p204_p4, %s1352_s18), 12351  ;;  %vm473_vm0 = vcmask 261120  }
   0xd   : > { %1778 = vmatprep.subr.bf16.mxu0 %v1874_v0  ;;  %1846 = vmatprep.subr.bf16.mxu1 %v1874_v0  ;;  %s1353_s21 = sshll.u32 %s2176_s18, 2  ;;  %v2053_v35 = vld [vmem:[%s2169_s2] ss:$0 sm:$0xff] }
   0xe   : > { %1779 = vmatpush3.bf16.msra.mxu0 %v1874_v0  ;;  %1848 = vmatpush3.bf16.msra.mxu1 %v1874_v0  ;;  %s1984_s24 = scalar_lea.vmem %s2167_s0, %s1353_s21  ;;  %s2067_s29 = scalar_lea.vmem %s2170_s3, %s1353_s21 }
   0xf   : > { %1780 = vmatprep.subr.bf16.mxu0 %v1875_v1  ;;  %1847 = vmatprep.subr.bf16.mxu1 %v1875_v1  ;;  %v1876_v2 = vld [vmem:[%s1984_s24] sm:$0xff]   ;;  %v1878_v4 = vld [vmem:[%s1984_s24 + $0x8] sm:$0xff]   ;;  %v1880_v6 = vld [vmem:[%s1984_s24 + $0x10] sm:$0xff]  }
  0x10   : > { %v1877_v3 = vld [vmem:[%s1984_s24 + $0x80] sm:$0xff]   ;;  %1782 = vmatprep.mubr.msk.bf16.mxu0 %vm473_vm0, %v1876_v2  ;;  %v1879_v5 = vld [vmem:[%s1984_s24 + $0x88] sm:$0xff]   ;;  %v1881_v7 = vld [vmem:[%s1984_s24 + $0x90] sm:$0xff]  }
  0x11   : > { %1814 = vmatprep.mubr.msk.bf16.mxu1 %vm473_vm0, %v1877_v3  ;;  %v1882_v8 = vld [vmem:[%s1984_s24 + $0x18] sm:$0xff]   ;;  %v1884_v10 = vld [vmem:[%s1984_s24 + $0x20] sm:$0xff]   ;;  %v1886_v12 = vld [vmem:[%s1984_s24 + $0x28] sm:$0xff]  }
  0x12   : > { %1781 = vmatpush3.bf16.msra.mxu0 %v1875_v1  ;;  %1849 = vmatpush3.bf16.msra.mxu1 %v1875_v1  ;;  %v1883_v9 = vld [vmem:[%s1984_s24 + $0x98] sm:$0xff]   ;;  %v1885_v11 = vld [vmem:[%s1984_s24 + $0xa0] sm:$0xff]   ;;  %v1887_v13 = vld [vmem:[%s1984_s24 + $0xa8] sm:$0xff]  }
  0x13   : > { %v1888_v14 = vld [vmem:[%s1984_s24 + $0x30] sm:$0xff]   ;;  %v1890_v16 = vld [vmem:[%s1984_s24 + $0x38] sm:$0xff]   ;;  %v1892_v18 = vld [vmem:[%s1984_s24 + $0x40] sm:$0xff]  }
  0x14   : > { %v1889_v15 = vld [vmem:[%s1984_s24 + $0xb0] sm:$0xff]   ;;  %v1891_v17 = vld [vmem:[%s1984_s24 + $0xb8] sm:$0xff]   ;;  %v1893_v19 = vld [vmem:[%s1984_s24 + $0xc0] sm:$0xff]  }
  0x15   : > { %1783 = vmatmul.mubr.msk.bf16.vlgmr.msra.gmra.mxu0 %vm473_vm0, %v1878_v4  ;;  %1815 = vmatmul.mubr.msk.bf16.vlgmr.msra.gmra.mxu1 %vm473_vm0, %v1879_v5  ;;  %v1894_v20 = vld [vmem:[%s1984_s24 + $0x48] sm:$0xff]   ;;  %v1896_v22 = vld [vmem:[%s1984_s24 + $0x50] sm:$0xff]   ;;  %v1898_v24 = vld [vmem:[%s1984_s24 + $0x58] sm:$0xff]  }
  0x16   : > { %1786 = vmatprep.mubr.msk.bf16.mxu0 %vm473_vm0, %v1880_v6  ;;  %1818 = vmatprep.mubr.msk.bf16.mxu1 %vm473_vm0, %v1881_v7  ;;  %v1895_v21 = vld [vmem:[%s1984_s24 + $0xc8] sm:$0xff]   ;;  %v1897_v23 = vld [vmem:[%s1984_s24 + $0xd0] sm:$0xff]   ;;  %v1899_v25 = vld [vmem:[%s1984_s24 + $0xd8] sm:$0xff]  }
  0x17   : > { %v1900_v26 = vld [vmem:[%s1984_s24 + $0x60] sm:$0xff]   ;;  %v1902_v28 = vld [vmem:[%s1984_s24 + $0x68] sm:$0xff]   ;;  %v1904_v30 = vld [vmem:[%s1984_s24 + $0x70] sm:$0xff]  }
  0x18   : > { %v1901_v27 = vld [vmem:[%s1984_s24 + $0xe0] sm:$0xff]   ;;  %v1903_v29 = vld [vmem:[%s1984_s24 + $0xe8] sm:$0xff]   ;;  %v1905_v31 = vld [vmem:[%s1984_s24 + $0xf0] sm:$0xff]  }
  0x19   : > { %v1906_v32 = vld [vmem:[%s1984_s24 + $0x78] sm:$0xff]  }
  0x1a   : > { %v1907_v33 = vld [vmem:[%s1984_s24 + $0xf8] sm:$0xff]  }
  0x1d   : > { %1787 = vmatmul.mubr.msk.bf16.gmra.mxu0 %vm473_vm0, %v1882_v8  ;;  %1819 = vmatmul.mubr.msk.bf16.gmra.mxu1 %vm473_vm0, %v1883_v9 }
  0x1e   : > { %1790 = vmatprep.mubr.msk.bf16.mxu0 %vm473_vm0, %v1884_v10  ;;  %1822 = vmatprep.mubr.msk.bf16.mxu1 %vm473_vm0, %v1885_v11 }
  0x25   : > { %1791 = vmatmul.mubr.msk.bf16.gmra.mxu0 %vm473_vm0, %v1886_v12  ;;  %1823 = vmatmul.mubr.msk.bf16.gmra.mxu1 %vm473_vm0, %v1887_v13 }
  0x26   : > { %1794 = vmatprep.mubr.msk.bf16.mxu0 %vm473_vm0, %v1888_v14  ;;  %1826 = vmatprep.mubr.msk.bf16.mxu1 %vm473_vm0, %v1889_v15 }
  0x2d   : > { %1795 = vmatmul.mubr.msk.bf16.gmra.mxu0 %vm473_vm0, %v1890_v16  ;;  %1827 = vmatmul.mubr.msk.bf16.gmra.mxu1 %vm473_vm0, %v1891_v17 }
  0x2e   : > { %1798 = vmatprep.mubr.msk.bf16.mxu0 %vm473_vm0, %v1892_v18  ;;  %1830 = vmatprep.mubr.msk.bf16.mxu1 %vm473_vm0, %v1893_v19 }
  0x35   : > { %1799 = vmatmul.mubr.msk.bf16.gmra.mxu0 %vm473_vm0, %v1894_v20  ;;  %1831 = vmatmul.mubr.msk.bf16.gmra.mxu1 %vm473_vm0, %v1895_v21 }
  0x36   : > { %1802 = vmatprep.mubr.msk.bf16.mxu0 %vm473_vm0, %v1896_v22  ;;  %1834 = vmatprep.mubr.msk.bf16.mxu1 %vm473_vm0, %v1897_v23 }
  0x3d   : > { %1803 = vmatmul.mubr.msk.bf16.gmra.mxu0 %vm473_vm0, %v1898_v24  ;;  %1835 = vmatmul.mubr.msk.bf16.gmra.mxu1 %vm473_vm0, %v1899_v25 }
  0x3e   : > { %1806 = vmatprep.mubr.msk.bf16.mxu0 %vm473_vm0, %v1900_v26  ;;  %1838 = vmatprep.mubr.msk.bf16.mxu1 %vm473_vm0, %v1901_v27 }
  0x45   : > { %1807 = vmatmul.mubr.msk.bf16.gmra.mxu0 %vm473_vm0, %v1902_v28  ;;  %1839 = vmatmul.mubr.msk.bf16.gmra.mxu1 %vm473_vm0, %v1903_v29 }
  0x46   : > { %1810 = vmatprep.mubr.msk.bf16.mxu0 %vm473_vm0, %v1904_v30  ;;  %1842 = vmatprep.mubr.msk.bf16.mxu1 %vm473_vm0, %v1905_v31 }
  0x4d   : > { %1811 = vmatmul.mubr.msk.bf16.gmra.mxu0 %vm473_vm0, %v1906_v32  ;;  %1843 = vmatmul.mubr.msk.bf16.gmra.mxu1 %vm473_vm0, %v1907_v33 }
  0xd5   : > { %v1784_v34 = vpop.f32.mrf.mxu0  ;;  %v1816_v36 = vpop.f32.mrf.mxu1 }
  0xd6   : > { %v613_v38 = vadd.f32 %v1784_v34, %v2053_v35  ;;  %v741_v40 = vadd.f32 %v1816_v36, %v2053_v35 }
  0xd7   : > { %v604_v37 = vpop.f32.mrf.mxu0  ;;  %v732_v39 = vpop.f32.mrf.mxu1 }
  0xd8   : > { %v605_v42 = vadd.f32 %v2053_v35, %v604_v37  ;;  %v733_v45 = vadd.f32 %v2053_v35, %v732_v39  ;;  %v861_v48 = vmax.f32 %v613_v38, 0.0  ;;  %v893_v52 = vmax.f32 %v741_v40, 0.0 }
  0xd9   : > { %v1785_v41 = vpop.f32.mrf.mxu0  ;;  %v1817_v44 = vpop.f32.mrf.mxu1 }
  0xda   : > { %v616_v43 = vadd.f32 %v1785_v41, %v2053_v35  ;;  %v744_v46 = vadd.f32 %v1817_v44, %v2053_v35  ;;  %v859_v56 = vmax.f32 %v605_v42, 0.0  ;;  %v891_v60 = vmax.f32 %v733_v45, 0.0 }
  0xdb   : > { %v607_v47 = vpop.f32.mrf.mxu0  ;;  %v735_v51 = vpop.f32.mrf.mxu1 }
  0xdc   : > { %v862_v49 = vmax.f32 %v616_v43, 0.0  ;;  %v608_v50 = vadd.f32 %v2053_v35, %v607_v47  ;;  %v894_v53 = vmax.f32 %v744_v46, 0.0  ;;  %v736_v54 = vadd.f32 %v2053_v35, %v735_v51 }
  0xdd   : > { %v1788_v55 = vpop.f32.mrf.mxu0  ;;  %v1820_v59 = vpop.f32.mrf.mxu1 }
  0xde   : > { %v1561_v57 = vpack.c.bf16 %v862_v49, %v861_v48  ;;  %v860_v58 = vmax.f32 %v608_v50, 0.0  ;;  %v1641_v61 = vpack.c.bf16 %v894_v53, %v893_v52  ;;  %v892_v62 = vmax.f32 %v736_v54, 0.0 }
  0xdf   : > { %v620_v63 = vpop.f32.mrf.mxu0  ;;  %v629_v1 = vadd.f32 %v1788_v55, %v2053_v35  ;;  %v748_v2 = vpop.f32.mrf.mxu1  ;;  %v757_v4 = vadd.f32 %v1820_v59, %v2053_v35 }
  0xe0   : > { %1713 = vst [vmem:[%s2067_s29 + $0x8] sm:$0xff] %v1561_v57   ;;  %v1556_v0 = vpack.c.bf16 %v860_v58, %v859_v56  ;;  %1729 = vst [vmem:[%s2067_s29 + $0x88] sm:$0xff] %v1641_v61   ;;  %v1636_v3 = vpack.c.bf16 %v892_v62, %v891_v60  ;;  %v621_v6 = vadd.f32 %v2053_v35, %v620_v63 }
  0xe1   : > { %v1789_v5 = vpop.f32.mrf.mxu0  ;;  %v1821_v8 = vpop.f32.mrf.mxu1  ;;  %v749_v9 = vadd.f32 %v2053_v35, %v748_v2  ;;  %v865_v12 = vmax.f32 %v629_v1, 0.0  ;;  %v897_v16 = vmax.f32 %v757_v4, 0.0 }
  0xe2   : > { %1557 = vst [vmem:[%s2067_s29] sm:$0xff] %v1556_v0   ;;  %v632_v7 = vadd.f32 %v1789_v5, %v2053_v35  ;;  %1728 = vst [vmem:[%s2067_s29 + $0x80] sm:$0xff] %v1636_v3   ;;  %v760_v10 = vadd.f32 %v1821_v8, %v2053_v35  ;;  %v863_v20 = vmax.f32 %v621_v6, 0.0 }
  0xe3   : > { %v623_v11 = vpop.f32.mrf.mxu0  ;;  %v751_v15 = vpop.f32.mrf.mxu1  ;;  %v895_v24 = vmax.f32 %v749_v9, 0.0 }
  0xe4   : > { %v866_v13 = vmax.f32 %v632_v7, 0.0  ;;  %v624_v14 = vadd.f32 %v2053_v35, %v623_v11  ;;  %v898_v17 = vmax.f32 %v760_v10, 0.0  ;;  %v752_v18 = vadd.f32 %v2053_v35, %v751_v15 }
  0xe5   : > { %v1792_v19 = vpop.f32.mrf.mxu0  ;;  %v1824_v23 = vpop.f32.mrf.mxu1 }
  0xe6   : > { %v1571_v21 = vpack.c.bf16 %v866_v13, %v865_v12  ;;  %v864_v22 = vmax.f32 %v624_v14, 0.0  ;;  %v1651_v25 = vpack.c.bf16 %v898_v17, %v897_v16  ;;  %v896_v26 = vmax.f32 %v752_v18, 0.0 }
  0xe7   : > { %v636_v27 = vpop.f32.mrf.mxu0  ;;  %v645_v29 = vadd.f32 %v1792_v19, %v2053_v35  ;;  %v764_v30 = vpop.f32.mrf.mxu1  ;;  %v773_v32 = vadd.f32 %v1824_v23, %v2053_v35 }
  0xe8   : > { %1715 = vst [vmem:[%s2067_s29 + $0x18] sm:$0xff] %v1571_v21   ;;  %v1566_v28 = vpack.c.bf16 %v864_v22, %v863_v20  ;;  %1731 = vst [vmem:[%s2067_s29 + $0x98] sm:$0xff] %v1651_v25   ;;  %v1646_v31 = vpack.c.bf16 %v896_v26, %v895_v24  ;;  %v637_v34 = vadd.f32 %v2053_v35, %v636_v27 }
  0xe9   : > { %v1793_v33 = vpop.f32.mrf.mxu0  ;;  %v1825_v37 = vpop.f32.mrf.mxu1  ;;  %v765_v38 = vadd.f32 %v2053_v35, %v764_v30  ;;  %v869_v41 = vmax.f32 %v645_v29, 0.0  ;;  %v901_v45 = vmax.f32 %v773_v32, 0.0 }
  0xea   : > { %1714 = vst [vmem:[%s2067_s29 + $0x10] sm:$0xff] %v1566_v28   ;;  %v648_v36 = vadd.f32 %v1793_v33, %v2053_v35  ;;  %1730 = vst [vmem:[%s2067_s29 + $0x90] sm:$0xff] %v1646_v31   ;;  %v776_v39 = vadd.f32 %v1825_v37, %v2053_v35  ;;  %v867_v49 = vmax.f32 %v637_v34, 0.0 }
  0xeb   : > { %v639_v40 = vpop.f32.mrf.mxu0  ;;  %v767_v44 = vpop.f32.mrf.mxu1  ;;  %v899_v53 = vmax.f32 %v765_v38, 0.0 }
  0xec   : > { %v870_v42 = vmax.f32 %v648_v36, 0.0  ;;  %v640_v43 = vadd.f32 %v2053_v35, %v639_v40  ;;  %v902_v46 = vmax.f32 %v776_v39, 0.0  ;;  %v768_v47 = vadd.f32 %v2053_v35, %v767_v44 }
  0xed   : > { %v1796_v48 = vpop.f32.mrf.mxu0  ;;  %v1828_v52 = vpop.f32.mrf.mxu1 }
  0xee   : > { %v1581_v50 = vpack.c.bf16 %v870_v42, %v869_v41  ;;  %v868_v51 = vmax.f32 %v640_v43, 0.0  ;;  %v1661_v54 = vpack.c.bf16 %v902_v46, %v901_v45  ;;  %v900_v55 = vmax.f32 %v768_v47, 0.0 }
  0xef   : > { %v652_v56 = vpop.f32.mrf.mxu0  ;;  %v661_v58 = vadd.f32 %v1796_v48, %v2053_v35  ;;  %v780_v59 = vpop.f32.mrf.mxu1  ;;  %v789_v61 = vadd.f32 %v1828_v52, %v2053_v35 }
  0xf0   : > { %1717 = vst [vmem:[%s2067_s29 + $0x28] sm:$0xff] %v1581_v50   ;;  %v1576_v57 = vpack.c.bf16 %v868_v51, %v867_v49  ;;  %1733 = vst [vmem:[%s2067_s29 + $0xa8] sm:$0xff] %v1661_v54   ;;  %v1656_v60 = vpack.c.bf16 %v900_v55, %v899_v53  ;;  %v653_v63 = vadd.f32 %v2053_v35, %v652_v56 }
  0xf1   : > { %v1797_v62 = vpop.f32.mrf.mxu0  ;;  %v1829_v1 = vpop.f32.mrf.mxu1  ;;  %v781_v2 = vadd.f32 %v2053_v35, %v780_v59  ;;  %v873_v5 = vmax.f32 %v661_v58, 0.0  ;;  %v905_v9 = vmax.f32 %v789_v61, 0.0 }
  0xf2   : > { %1716 = vst [vmem:[%s2067_s29 + $0x20] sm:$0xff] %v1576_v57   ;;  %v664_v0 = vadd.f32 %v1797_v62, %v2053_v35  ;;  %1732 = vst [vmem:[%s2067_s29 + $0xa0] sm:$0xff] %v1656_v60   ;;  %v792_v3 = vadd.f32 %v1829_v1, %v2053_v35  ;;  %v871_v13 = vmax.f32 %v653_v63, 0.0 }
  0xf3   : > { %v655_v4 = vpop.f32.mrf.mxu0  ;;  %v783_v8 = vpop.f32.mrf.mxu1  ;;  %v903_v17 = vmax.f32 %v781_v2, 0.0 }
  0xf4   : > { %v874_v6 = vmax.f32 %v664_v0, 0.0  ;;  %v656_v7 = vadd.f32 %v2053_v35, %v655_v4  ;;  %v906_v10 = vmax.f32 %v792_v3, 0.0  ;;  %v784_v11 = vadd.f32 %v2053_v35, %v783_v8 }
  0xf5   : > { %v1800_v12 = vpop.f32.mrf.mxu0  ;;  %v1832_v16 = vpop.f32.mrf.mxu1 }
  0xf6   : > { %v1591_v14 = vpack.c.bf16 %v874_v6, %v873_v5  ;;  %v872_v15 = vmax.f32 %v656_v7, 0.0  ;;  %v1671_v18 = vpack.c.bf16 %v906_v10, %v905_v9  ;;  %v904_v19 = vmax.f32 %v784_v11, 0.0 }
  0xf7   : > { %v668_v20 = vpop.f32.mrf.mxu0  ;;  %v677_v22 = vadd.f32 %v1800_v12, %v2053_v35  ;;  %v796_v23 = vpop.f32.mrf.mxu1  ;;  %v805_v25 = vadd.f32 %v1832_v16, %v2053_v35 }
  0xf8   : > { %1719 = vst [vmem:[%s2067_s29 + $0x38] sm:$0xff] %v1591_v14   ;;  %v1586_v21 = vpack.c.bf16 %v872_v15, %v871_v13  ;;  %1735 = vst [vmem:[%s2067_s29 + $0xb8] sm:$0xff] %v1671_v18   ;;  %v1666_v24 = vpack.c.bf16 %v904_v19, %v903_v17  ;;  %v669_v27 = vadd.f32 %v2053_v35, %v668_v20 }
  0xf9   : > { %v1801_v26 = vpop.f32.mrf.mxu0  ;;  %v1833_v29 = vpop.f32.mrf.mxu1  ;;  %v797_v30 = vadd.f32 %v2053_v35, %v796_v23  ;;  %v877_v33 = vmax.f32 %v677_v22, 0.0  ;;  %v909_v38 = vmax.f32 %v805_v25, 0.0 }
  0xfa   : > { %1718 = vst [vmem:[%s2067_s29 + $0x30] sm:$0xff] %v1586_v21   ;;  %v680_v28 = vadd.f32 %v1801_v26, %v2053_v35  ;;  %1734 = vst [vmem:[%s2067_s29 + $0xb0] sm:$0xff] %v1666_v24   ;;  %v808_v31 = vadd.f32 %v1833_v29, %v2053_v35  ;;  %v875_v42 = vmax.f32 %v669_v27, 0.0 }
  0xfb   : > { %v671_v32 = vpop.f32.mrf.mxu0  ;;  %v799_v37 = vpop.f32.mrf.mxu1  ;;  %v907_v46 = vmax.f32 %v797_v30, 0.0 }
  0xfc   : > { %v878_v34 = vmax.f32 %v680_v28, 0.0  ;;  %v672_v36 = vadd.f32 %v2053_v35, %v671_v32  ;;  %v910_v39 = vmax.f32 %v808_v31, 0.0  ;;  %v800_v40 = vadd.f32 %v2053_v35, %v799_v37 }
  0xfd   : > { %v1804_v41 = vpop.f32.mrf.mxu0  ;;  %v1836_v45 = vpop.f32.mrf.mxu1 }
  0xfe   : > { %v1601_v43 = vpack.c.bf16 %v878_v34, %v877_v33  ;;  %v876_v44 = vmax.f32 %v672_v36, 0.0  ;;  %v1681_v47 = vpack.c.bf16 %v910_v39, %v909_v38  ;;  %v908_v48 = vmax.f32 %v800_v40, 0.0 }
  0xff   : > { %v684_v49 = vpop.f32.mrf.mxu0  ;;  %v693_v51 = vadd.f32 %v1804_v41, %v2053_v35  ;;  %v812_v52 = vpop.f32.mrf.mxu1  ;;  %v821_v54 = vadd.f32 %v1836_v45, %v2053_v35 }
 0x100   : > { %1721 = vst [vmem:[%s2067_s29 + $0x48] sm:$0xff] %v1601_v43   ;;  %v1596_v50 = vpack.c.bf16 %v876_v44, %v875_v42  ;;  %1737 = vst [vmem:[%s2067_s29 + $0xc8] sm:$0xff] %v1681_v47   ;;  %v1676_v53 = vpack.c.bf16 %v908_v48, %v907_v46  ;;  %v685_v56 = vadd.f32 %v2053_v35, %v684_v49 }
 0x101   : > { %v1805_v55 = vpop.f32.mrf.mxu0  ;;  %v1837_v58 = vpop.f32.mrf.mxu1  ;;  %v813_v59 = vadd.f32 %v2053_v35, %v812_v52  ;;  %v881_v62 = vmax.f32 %v693_v51, 0.0  ;;  %v913_v2 = vmax.f32 %v821_v54, 0.0 }
 0x102   : > { %1720 = vst [vmem:[%s2067_s29 + $0x40] sm:$0xff] %v1596_v50   ;;  %v696_v57 = vadd.f32 %v1805_v55, %v2053_v35  ;;  %1736 = vst [vmem:[%s2067_s29 + $0xc0] sm:$0xff] %v1676_v53   ;;  %v824_v60 = vadd.f32 %v1837_v58, %v2053_v35  ;;  %v879_v6 = vmax.f32 %v685_v56, 0.0 }
 0x103   : > { %v687_v61 = vpop.f32.mrf.mxu0  ;;  %v815_v1 = vpop.f32.mrf.mxu1  ;;  %v911_v10 = vmax.f32 %v813_v59, 0.0 }
 0x104   : > { %v882_v63 = vmax.f32 %v696_v57, 0.0  ;;  %v688_v0 = vadd.f32 %v2053_v35, %v687_v61  ;;  %v914_v3 = vmax.f32 %v824_v60, 0.0  ;;  %v816_v4 = vadd.f32 %v2053_v35, %v815_v1 }
 0x105   : > { %v1808_v5 = vpop.f32.mrf.mxu0  ;;  %v1840_v9 = vpop.f32.mrf.mxu1 }
 0x106   : > { %v1611_v7 = vpack.c.bf16 %v882_v63, %v881_v62  ;;  %v880_v8 = vmax.f32 %v688_v0, 0.0  ;;  %v1691_v11 = vpack.c.bf16 %v914_v3, %v913_v2  ;;  %v912_v12 = vmax.f32 %v816_v4, 0.0 }
 0x107   : > { %v700_v13 = vpop.f32.mrf.mxu0  ;;  %v709_v15 = vadd.f32 %v1808_v5, %v2053_v35  ;;  %v828_v16 = vpop.f32.mrf.mxu1  ;;  %v837_v18 = vadd.f32 %v1840_v9, %v2053_v35 }
 0x108   : > { %1723 = vst [vmem:[%s2067_s29 + $0x58] sm:$0xff] %v1611_v7   ;;  %v1606_v14 = vpack.c.bf16 %v880_v8, %v879_v6  ;;  %1739 = vst [vmem:[%s2067_s29 + $0xd8] sm:$0xff] %v1691_v11   ;;  %v1686_v17 = vpack.c.bf16 %v912_v12, %v911_v10  ;;  %v701_v20 = vadd.f32 %v2053_v35, %v700_v13 }
 0x109   : > { %v1809_v19 = vpop.f32.mrf.mxu0  ;;  %v1841_v22 = vpop.f32.mrf.mxu1  ;;  %v829_v23 = vadd.f32 %v2053_v35, %v828_v16  ;;  %v885_v26 = vmax.f32 %v709_v15, 0.0  ;;  %v917_v30 = vmax.f32 %v837_v18, 0.0 }
 0x10a   : > { %1722 = vst [vmem:[%s2067_s29 + $0x50] sm:$0xff] %v1606_v14   ;;  %v712_v21 = vadd.f32 %v1809_v19, %v2053_v35  ;;  %1738 = vst [vmem:[%s2067_s29 + $0xd0] sm:$0xff] %v1686_v17   ;;  %v840_v24 = vadd.f32 %v1841_v22, %v2053_v35  ;;  %v883_v34 = vmax.f32 %v701_v20, 0.0 }
 0x10b   : > { %v703_v25 = vpop.f32.mrf.mxu0  ;;  %v831_v29 = vpop.f32.mrf.mxu1  ;;  %v915_v39 = vmax.f32 %v829_v23, 0.0 }
 0x10c   : > { %v886_v27 = vmax.f32 %v712_v21, 0.0  ;;  %v704_v28 = vadd.f32 %v2053_v35, %v703_v25  ;;  %v918_v31 = vmax.f32 %v840_v24, 0.0  ;;  %v832_v32 = vadd.f32 %v2053_v35, %v831_v29 }
 0x10d   : > { %v1812_v33 = vpop.f32.mrf.mxu0  ;;  %v1844_v38 = vpop.f32.mrf.mxu1 }
 0x10e   : > { %v1621_v36 = vpack.c.bf16 %v886_v27, %v885_v26  ;;  %v884_v37 = vmax.f32 %v704_v28, 0.0  ;;  %v1701_v40 = vpack.c.bf16 %v918_v31, %v917_v30  ;;  %v916_v41 = vmax.f32 %v832_v32, 0.0 }
 0x10f   : > { %v716_v42 = vpop.f32.mrf.mxu0  ;;  %v725_v44 = vadd.f32 %v1812_v33, %v2053_v35  ;;  %v844_v45 = vpop.f32.mrf.mxu1  ;;  %v853_v47 = vadd.f32 %v1844_v38, %v2053_v35 }
 0x110   : > { %1725 = vst [vmem:[%s2067_s29 + $0x68] sm:$0xff] %v1621_v36   ;;  %v1616_v43 = vpack.c.bf16 %v884_v37, %v883_v34  ;;  %1741 = vst [vmem:[%s2067_s29 + $0xe8] sm:$0xff] %v1701_v40   ;;  %v1696_v46 = vpack.c.bf16 %v916_v41, %v915_v39  ;;  %v717_v49 = vadd.f32 %v2053_v35, %v716_v42 }
 0x111   : > { %v1813_v48 = vpop.f32.mrf.mxu0  ;;  %v1845_v51 = vpop.f32.mrf.mxu1  ;;  %v845_v52 = vadd.f32 %v2053_v35, %v844_v45  ;;  %v889_v55 = vmax.f32 %v725_v44, 0.0  ;;  %v921_v59 = vmax.f32 %v853_v47, 0.0 }
 0x112   : > { %1724 = vst [vmem:[%s2067_s29 + $0x60] sm:$0xff] %v1616_v43   ;;  %v728_v50 = vadd.f32 %v1813_v48, %v2053_v35  ;;  %1740 = vst [vmem:[%s2067_s29 + $0xe0] sm:$0xff] %v1696_v46   ;;  %v856_v53 = vadd.f32 %v1845_v51, %v2053_v35  ;;  %v887_v62 = vmax.f32 %v717_v49, 0.0 }
 0x113   : > { %v719_v54 = vpop.f32.mrf.mxu0  ;;  %v847_v58 = vpop.f32.mrf.mxu1  ;;  %v919_v1 = vmax.f32 %v845_v52, 0.0 }
 0x114   : > { %v890_v56 = vmax.f32 %v728_v50, 0.0  ;;  %v720_v57 = vadd.f32 %v2053_v35, %v719_v54  ;;  %v922_v60 = vmax.f32 %v856_v53, 0.0  ;;  %v848_v61 = vadd.f32 %v2053_v35, %v847_v58 }
 0x116   : > { %v1631_v63 = vpack.c.bf16 %v890_v56, %v889_v55  ;;  %v888_v0 = vmax.f32 %v720_v57, 0.0  ;;  %v1711_v2 = vpack.c.bf16 %v922_v60, %v921_v59  ;;  %v920_v3 = vmax.f32 %v848_v61, 0.0 }
 0x118   : > { %1727 = vst [vmem:[%s2067_s29 + $0x78] sm:$0xff] %v1631_v63   ;;  %v1626_v4 = vpack.c.bf16 %v888_v0, %v887_v62  ;;  %1743 = vst [vmem:[%s2067_s29 + $0xf8] sm:$0xff] %v1711_v2   ;;  %v1706_v5 = vpack.c.bf16 %v920_v3, %v919_v1 }
 0x11a   : > { %1726 = vst [vmem:[%s2067_s29 + $0x70] sm:$0xff] %v1626_v4   ;;  %1742 = vst [vmem:[%s2067_s29 + $0xf0] sm:$0xff] %v1706_v5  }
 0x11b PF: > { %s13_s14 = sadd.s32 1, %s1930_s14   ;;  %s2171_s12 = smov %s1926_s13 }
 0x11c   : > { %p10_p5 = scmp.ge.s32.totalorder %s13_s14, 195   ;;  %s2172_s13 = smov %s2174_s15 }
 0x11e   :  { %12 = sbr.rel (!%p10_p5) target bundleno = 2 (0x2), region = 68 }

// kernel: my_model_forward.9
= control target key start
LH: loop header
LB: loop body
LE: loop exit
PB: predicated region body
PF: predicated region fallthrough
CT: control target
= control target key end

     0   :  { %s1152_s15 = smov 0   ;;  %s1483_s0 = inlined_call_operand.vmem [shape: bf16[6656,128], index: 0, kind: input, shape index: {}]   ;;  %s1484_s1 = inlined_call_operand.vmem [shape: bf16[6656,128], index: 1, kind: input, shape index: {}]   ;;  %s1485_s2 = inlined_call_operand.vmem [shape: bf16[6656,128], index: 2, kind: input, shape index: {}]   ;;  %s1486_s3 = inlined_call_operand.vmem [shape: bf16[6656,128], index: 3, kind: input, shape index: {}]   ;;  %s1487_s4 = inlined_call_operand.vmem [shape: bf16[6656,128], index: 4, kind: output, shape index: {}]  }
   0x1 LB: > { %s871_s16 = sadd.s32 4294967295, %s1125_s15   ;;  %p875_p0 = scmp.ge.s32.totalorder %s1125_s15, 1  ;;  %s1125_s15 = sphi %s1152_s15, %s14_s15  }
   0x2   : > { %p196_p1 = scmp.lt.s32.totalorder %s1125_s15, 14 }
   0x4   : > { %p197_p2 = pnand %p875_p0, %p196_p1 }
   0x5   : > { %s876_s17 = sshll.u32 (!%p197_p2), %s871_s16, 6 }
   0x6   : > { %200 = sbr.rel (%p197_p2) target bundleno = 117 (0x75), region = 36  ;;  %p238_p3 = scmp.lt.s32.totalorder (!%p197_p2), %s876_s17, 831 }
   0xb   : > { %s1489_s17 = smov (!%p238_p3, %s876_s17), 831 }
   0xc   : > { %s1160_s18 = sshll.u32 %s1489_s17, 2 }
   0xd   : > { %s1166_s21 = scalar_lea.vmem %s1483_s0, %s1160_s18  ;;  %s1172_s24 = scalar_lea.vmem %s1484_s1, %s1160_s18 }
   0xe   : > { %s1178_s27 = scalar_lea.vmem %s1485_s2, %s1160_s18  ;;  %s1184_s30 = scalar_lea.vmem %s1486_s3, %s1160_s18  ;;  %v267_v0 = vld [vmem:[%s1166_s21] sm:$0xf]  ;;  %v268_v1 = vld [vmem:[%s1166_s21 + $0x4] sm:$0xf]  ;;  %v269_v10 = vld [vmem:[%s1166_s21 + $0x8] sm:$0xf] }
   0xf   : > { %v331_v2 = vld [vmem:[%s1172_s24] sm:$0xf]  ;;  %v332_v3 = vld [vmem:[%s1172_s24 + $0x4] sm:$0xf]  ;;  %v270_v13 = vld [vmem:[%s1166_s21 + $0xc] sm:$0xf]  ;;  %s1208_s7 = scalar_lea.vmem %s1487_s4, %s1160_s18 }
  0x10   : > { %v395_v4 = vmax.bf16 %v331_v2, %v267_v0  ;;  %v459_v5 = vld [vmem:[%s1178_s27] sm:$0xf]  ;;  %v460_v6 = vld [vmem:[%s1178_s27 + $0x4] sm:$0xf]  ;;  %v396_v7 = vmax.bf16 %v332_v3, %v268_v1  ;;  %v333_v14 = vld [vmem:[%s1172_s24 + $0x8] sm:$0xf] }
  0x11   : > { %v523_v8 = vld [vmem:[%s1184_s30] sm:$0xf]  ;;  %v524_v9 = vld [vmem:[%s1184_s30 + $0x4] sm:$0xf]  ;;  %v334_v15 = vld [vmem:[%s1172_s24 + $0xc] sm:$0xf]  ;;  %v397_v16 = vmax.bf16 %v333_v14, %v269_v10 }
  0x12   : > { %v587_v11 = vmax.bf16 %v523_v8, %v459_v5  ;;  %v588_v12 = vmax.bf16 %v524_v9, %v460_v6  ;;  %v398_v17 = vmax.bf16 %v334_v15, %v270_v13  ;;  %v461_v18 = vld [vmem:[%s1178_s27 + $0x8] sm:$0xf]  ;;  %v462_v19 = vld [vmem:[%s1178_s27 + $0xc] sm:$0xf]  ;;  %v271_v25 = vld [vmem:[%s1166_s21 + $0x10] sm:$0xf] }
  0x13   : > { %v525_v20 = vld [vmem:[%s1184_s30 + $0x8] sm:$0xf]  ;;  %v526_v23 = vld [vmem:[%s1184_s30 + $0xc] sm:$0xf]  ;;  %v272_v26 = vld [vmem:[%s1166_s21 + $0x14] sm:$0xf] }
  0x14   : > { %v651_v21 = vmax.bf16 %v587_v11, %v395_v4  ;;  %v652_v22 = vmax.bf16 %v588_v12, %v396_v7  ;;  %v589_v24 = vmax.bf16 %v525_v20, %v461_v18  ;;  %v590_v27 = vmax.bf16 %v526_v23, %v462_v19  ;;  %v335_v28 = vld [vmem:[%s1172_s24 + $0x10] sm:$0xf]  ;;  %v336_v29 = vld [vmem:[%s1172_s24 + $0x14] sm:$0xf]  ;;  %v273_v41 = vld [vmem:[%s1166_s21 + $0x18] sm:$0xf] }
  0x15   : > { %v463_v30 = vld [vmem:[%s1178_s27 + $0x10] sm:$0xf]  ;;  %v399_v33 = vmax.bf16 %v335_v28, %v271_v25  ;;  %v400_v34 = vmax.bf16 %v336_v29, %v272_v26  ;;  %v464_v35 = vld [vmem:[%s1178_s27 + $0x14] sm:$0xf]  ;;  %v274_v42 = vld [vmem:[%s1166_s21 + $0x1c] sm:$0xf] }
  0x16   : > { %v1048_v31 = vcombine.low %v651_v21, %v652_v22  ;;  %v653_v32 = vmax.bf16 %v589_v24, %v397_v16  ;;  %v527_v36 = vld [vmem:[%s1184_s30 + $0x10] sm:$0xf]  ;;  %v528_v37 = vld [vmem:[%s1184_s30 + $0x14] sm:$0xf]  ;;  %v654_v38 = vmax.bf16 %v590_v27, %v398_v17  ;;  %v337_v43 = vld [vmem:[%s1172_s24 + $0x18] sm:$0xf] }
  0x17   : > { %v591_v39 = vmax.bf16 %v527_v36, %v463_v30  ;;  %v592_v40 = vmax.bf16 %v528_v37, %v464_v35  ;;  %v338_v44 = vld [vmem:[%s1172_s24 + $0x1c] sm:$0xf]  ;;  %v401_v45 = vmax.bf16 %v337_v43, %v273_v41  ;;  %v465_v46 = vld [vmem:[%s1178_s27 + $0x18] sm:$0xf]  ;;  %v275_v54 = vld [vmem:[%s1166_s21 + $0x20] sm:$0xf] }
  0x18   : > { %892 = vst [vmem:[%s1208_s7] sm:$0xff] %v1048_v31   ;;  %v466_v47 = vld [vmem:[%s1178_s27 + $0x1c] sm:$0xf]  ;;  %v1049_v48 = vcombine.low %v653_v32, %v654_v38  ;;  %v402_v51 = vmax.bf16 %v338_v44, %v274_v42  ;;  %v529_v52 = vld [vmem:[%s1184_s30 + $0x18] sm:$0xf]  ;;  %v276_v57 = vld [vmem:[%s1166_s21 + $0x24] sm:$0xf] }
  0x19   : > { %v655_v49 = vmax.bf16 %v591_v39, %v399_v33  ;;  %v656_v50 = vmax.bf16 %v592_v40, %v400_v34  ;;  %v530_v53 = vld [vmem:[%s1184_s30 + $0x1c] sm:$0xf]  ;;  %v593_v55 = vmax.bf16 %v529_v52, %v465_v46  ;;  %v339_v58 = vld [vmem:[%s1172_s24 + $0x20] sm:$0xf]  ;;  %v340_v59 = vld [vmem:[%s1172_s24 + $0x24] sm:$0xf] }
  0x1a   : > { %v594_v56 = vmax.bf16 %v530_v53, %v466_v47  ;;  %1050 = vst [vmem:[%s1208_s7 + $0x8] sm:$0xff] %v1049_v48   ;;  %v403_v61 = vmax.bf16 %v339_v58, %v275_v54  ;;  %v404_v62 = vmax.bf16 %v340_v59, %v276_v57  ;;  %v467_v63 = vld [vmem:[%s1178_s27 + $0x20] sm:$0xf]  ;;  %v468_v0 = vld [vmem:[%s1178_s27 + $0x24] sm:$0xf] }
  0x1b   : > { %v1051_v60 = vcombine.low %v655_v49, %v656_v50  ;;  %v531_v1 = vld [vmem:[%s1184_s30 + $0x20] sm:$0xf]  ;;  %v657_v2 = vmax.bf16 %v593_v55, %v401_v45  ;;  %v532_v4 = vld [vmem:[%s1184_s30 + $0x24] sm:$0xf]  ;;  %v277_v6 = vld [vmem:[%s1166_s21 + $0x28] sm:$0xf] }
  0x1c   : > { %v658_v3 = vmax.bf16 %v594_v56, %v402_v51  ;;  %v595_v5 = vmax.bf16 %v531_v1, %v467_v63  ;;  %v278_v7 = vld [vmem:[%s1166_s21 + $0x2c] sm:$0xf]  ;;  %v596_v8 = vmax.bf16 %v532_v4, %v468_v0  ;;  %v341_v9 = vld [vmem:[%s1172_s24 + $0x28] sm:$0xf]  ;;  %v279_v22 = vld [vmem:[%s1166_s21 + $0x30] sm:$0xf] }
  0x1d   : > { %1052 = vst [vmem:[%s1208_s7 + $0x10] sm:$0xff] %v1051_v60   ;;  %v342_v10 = vld [vmem:[%s1172_s24 + $0x2c] sm:$0xf]  ;;  %v469_v11 = vld [vmem:[%s1178_s27 + $0x28] sm:$0xf]  ;;  %v405_v14 = vmax.bf16 %v341_v9, %v277_v6 }
  0x1e   : > { %v1053_v12 = vcombine.low %v657_v2, %v658_v3  ;;  %v659_v13 = vmax.bf16 %v595_v5, %v403_v61  ;;  %v406_v15 = vmax.bf16 %v342_v10, %v278_v7  ;;  %v470_v16 = vld [vmem:[%s1178_s27 + $0x2c] sm:$0xf]  ;;  %v533_v17 = vld [vmem:[%s1184_s30 + $0x28] sm:$0xf]  ;;  %v660_v19 = vmax.bf16 %v596_v8, %v404_v62  ;;  %v280_v23 = vld [vmem:[%s1166_s21 + $0x34] sm:$0xf] }
  0x1f   : > { %v534_v18 = vld [vmem:[%s1184_s30 + $0x2c] sm:$0xf]  ;;  %v597_v20 = vmax.bf16 %v533_v17, %v469_v11  ;;  %v343_v24 = vld [vmem:[%s1172_s24 + $0x30] sm:$0xf]  ;;  %v344_v25 = vld [vmem:[%s1172_s24 + $0x34] sm:$0xf] }
  0x20   : > { %v598_v21 = vmax.bf16 %v534_v18, %v470_v16  ;;  %1054 = vst [vmem:[%s1208_s7 + $0x18] sm:$0xff] %v1053_v12   ;;  %v407_v26 = vmax.bf16 %v343_v24, %v279_v22  ;;  %v471_v27 = vld [vmem:[%s1178_s27 + $0x30] sm:$0xf]  ;;  %v472_v28 = vld [vmem:[%s1178_s27 + $0x34] sm:$0xf]  ;;  %v1055_v29 = vcombine.low %v659_v13, %v660_v19  ;;  %v408_v32 = vmax.bf16 %v344_v25, %v280_v23 }
  0x21   : > { %v661_v30 = vmax.bf16 %v597_v20, %v405_v14  ;;  %v535_v33 = vld [vmem:[%s1184_s30 + $0x30] sm:$0xf]  ;;  %v536_v34 = vld [vmem:[%s1184_s30 + $0x34] sm:$0xf]  ;;  %v281_v35 = vld [vmem:[%s1166_s21 + $0x38] sm:$0xf] }
  0x22   : > { %v662_v31 = vmax.bf16 %v598_v21, %v406_v15  ;;  %v599_v36 = vmax.bf16 %v535_v33, %v471_v27  ;;  %v600_v37 = vmax.bf16 %v536_v34, %v472_v28  ;;  %v282_v38 = vld [vmem:[%s1166_s21 + $0x3c] sm:$0xf]  ;;  %v345_v39 = vld [vmem:[%s1172_s24 + $0x38] sm:$0xf]  ;;  %1056 = vst [vmem:[%s1208_s7 + $0x20] sm:$0xff] %v1055_v29  }
  0x23   : > { %v346_v40 = vld [vmem:[%s1172_s24 + $0x3c] sm:$0xf]  ;;  %v409_v42 = vmax.bf16 %v345_v39, %v281_v35  ;;  %v473_v44 = vld [vmem:[%s1178_s27 + $0x38] sm:$0xf]  ;;  %v283_v51 = vld [vmem:[%s1166_s21 + $0x40] sm:$0xf] }
  0x24   : > { %v1057_v41 = vcombine.low %v661_v30, %v662_v31  ;;  %v410_v43 = vmax.bf16 %v346_v40, %v282_v38  ;;  %v474_v45 = vld [vmem:[%s1178_s27 + $0x3c] sm:$0xf]  ;;  %v537_v46 = vld [vmem:[%s1184_s30 + $0x38] sm:$0xf]  ;;  %v663_v47 = vmax.bf16 %v599_v36, %v407_v26  ;;  %v664_v48 = vmax.bf16 %v600_v37, %v408_v32  ;;  %v284_v52 = vld [vmem:[%s1166_s21 + $0x44] sm:$0xf] }
  0x25   : > { %v538_v49 = vld [vmem:[%s1184_s30 + $0x3c] sm:$0xf]  ;;  %v601_v50 = vmax.bf16 %v537_v46, %v473_v44  ;;  %v347_v54 = vld [vmem:[%s1172_s24 + $0x40] sm:$0xf]  ;;  %v348_v55 = vld [vmem:[%s1172_s24 + $0x44] sm:$0xf] }
  0x26   : > { %1058 = vst [vmem:[%s1208_s7 + $0x28] sm:$0xff] %v1057_v41   ;;  %v602_v53 = vmax.bf16 %v538_v49, %v474_v45  ;;  %v475_v56 = vld [vmem:[%s1178_s27 + $0x40] sm:$0xf]  ;;  %v1059_v57 = vcombine.low %v663_v47, %v664_v48  ;;  %v411_v59 = vmax.bf16 %v347_v54, %v283_v51  ;;  %v412_v60 = vmax.bf16 %v348_v55, %v284_v52  ;;  %v476_v61 = vld [vmem:[%s1178_s27 + $0x44] sm:$0xf] }
  0x27   : > { %v665_v58 = vmax.bf16 %v601_v50, %v409_v42  ;;  %v539_v62 = vld [vmem:[%s1184_s30 + $0x40] sm:$0xf]  ;;  %v540_v63 = vld [vmem:[%s1184_s30 + $0x44] sm:$0xf]  ;;  %v285_v3 = vld [vmem:[%s1166_s21 + $0x48] sm:$0xf] }
  0x28   : > { %v666_v0 = vmax.bf16 %v602_v53, %v410_v43  ;;  %v603_v1 = vmax.bf16 %v539_v62, %v475_v56  ;;  %v604_v2 = vmax.bf16 %v540_v63, %v476_v61  ;;  %v286_v4 = vld [vmem:[%s1166_s21 + $0x4c] sm:$0xf]  ;;  %v349_v5 = vld [vmem:[%s1172_s24 + $0x48] sm:$0xf]  ;;  %1060 = vst [vmem:[%s1208_s7 + $0x30] sm:$0xff] %v1059_v57  }
  0x29   : > { %v350_v6 = vld [vmem:[%s1172_s24 + $0x4c] sm:$0xf]  ;;  %v413_v7 = vmax.bf16 %v349_v5, %v285_v3  ;;  %v477_v8 = vld [vmem:[%s1178_s27 + $0x48] sm:$0xf]  ;;  %v287_v16 = vld [vmem:[%s1166_s21 + $0x50] sm:$0xf] }
  0x2a   : > { %v478_v9 = vld [vmem:[%s1178_s27 + $0x4c] sm:$0xf]  ;;  %v1061_v10 = vcombine.low %v665_v58, %v666_v0  ;;  %v667_v11 = vmax.bf16 %v603_v1, %v411_v59  ;;  %v668_v12 = vmax.bf16 %v604_v2, %v412_v60  ;;  %v414_v13 = vmax.bf16 %v350_v6, %v286_v4  ;;  %v541_v14 = vld [vmem:[%s1184_s30 + $0x48] sm:$0xf]  ;;  %v288_v19 = vld [vmem:[%s1166_s21 + $0x54] sm:$0xf] }
  0x2b   : > { %v542_v15 = vld [vmem:[%s1184_s30 + $0x4c] sm:$0xf]  ;;  %v605_v17 = vmax.bf16 %v541_v14, %v477_v8  ;;  %v351_v20 = vld [vmem:[%s1172_s24 + $0x50] sm:$0xf]  ;;  %v352_v21 = vld [vmem:[%s1172_s24 + $0x54] sm:$0xf] }
  0x2c   : > { %v606_v18 = vmax.bf16 %v542_v15, %v478_v9  ;;  %1062 = vst [vmem:[%s1208_s7 + $0x38] sm:$0xff] %v1061_v10   ;;  %v1063_v22 = vcombine.low %v667_v11, %v668_v12  ;;  %v415_v23 = vmax.bf16 %v351_v20, %v287_v16  ;;  %v416_v24 = vmax.bf16 %v352_v21, %v288_v19  ;;  %v479_v25 = vld [vmem:[%s1178_s27 + $0x50] sm:$0xf]  ;;  %v480_v26 = vld [vmem:[%s1178_s27 + $0x54] sm:$0xf] }
  0x2d   : > { %v543_v27 = vld [vmem:[%s1184_s30 + $0x50] sm:$0xf]  ;;  %v669_v28 = vmax.bf16 %v605_v17, %v413_v7  ;;  %v544_v30 = vld [vmem:[%s1184_s30 + $0x54] sm:$0xf]  ;;  %v289_v32 = vld [vmem:[%s1166_s21 + $0x58] sm:$0xf] }
  0x2e   : > { %v670_v29 = vmax.bf16 %v606_v18, %v414_v13  ;;  %v607_v31 = vmax.bf16 %v543_v27, %v479_v25  ;;  %v290_v33 = vld [vmem:[%s1166_s21 + $0x5c] sm:$0xf]  ;;  %1064 = vst [vmem:[%s1208_s7 + $0x40] sm:$0xff] %v1063_v22   ;;  %v608_v34 = vmax.bf16 %v544_v30, %v480_v26  ;;  %v353_v35 = vld [vmem:[%s1172_s24 + $0x58] sm:$0xf] }
  0x2f   : > { %v354_v36 = vld [vmem:[%s1172_s24 + $0x5c] sm:$0xf]  ;;  %v481_v37 = vld [vmem:[%s1178_s27 + $0x58] sm:$0xf]  ;;  %v417_v40 = vmax.bf16 %v353_v35, %v289_v32  ;;  %v291_v48 = vld [vmem:[%s1166_s21 + $0x60] sm:$0xf] }
  0x30   : > { %v1065_v38 = vcombine.low %v669_v28, %v670_v29  ;;  %v671_v39 = vmax.bf16 %v607_v31, %v415_v23  ;;  %v418_v41 = vmax.bf16 %v354_v36, %v290_v33  ;;  %v482_v42 = vld [vmem:[%s1178_s27 + $0x5c] sm:$0xf]  ;;  %v545_v43 = vld [vmem:[%s1184_s30 + $0x58] sm:$0xf]  ;;  %v672_v45 = vmax.bf16 %v608_v34, %v416_v24  ;;  %v292_v49 = vld [vmem:[%s1166_s21 + $0x64] sm:$0xf] }
  0x31   : > { %v546_v44 = vld [vmem:[%s1184_s30 + $0x5c] sm:$0xf]  ;;  %v609_v46 = vmax.bf16 %v545_v43, %v481_v37  ;;  %v355_v50 = vld [vmem:[%s1172_s24 + $0x60] sm:$0xf]  ;;  %v356_v51 = vld [vmem:[%s1172_s24 + $0x64] sm:$0xf] }
  0x32   : > { %v610_v47 = vmax.bf16 %v546_v44, %v482_v42  ;;  %1066 = vst [vmem:[%s1208_s7 + $0x48] sm:$0xff] %v1065_v38   ;;  %v419_v52 = vmax.bf16 %v355_v50, %v291_v48  ;;  %v483_v53 = vld [vmem:[%s1178_s27 + $0x60] sm:$0xf]  ;;  %v484_v54 = vld [vmem:[%s1178_s27 + $0x64] sm:$0xf]  ;;  %v1067_v55 = vcombine.low %v671_v39, %v672_v45  ;;  %v420_v58 = vmax.bf16 %v356_v51, %v292_v49 }
  0x33   : > { %v673_v56 = vmax.bf16 %v609_v46, %v417_v40  ;;  %v547_v59 = vld [vmem:[%s1184_s30 + $0x60] sm:$0xf]  ;;  %v548_v60 = vld [vmem:[%s1184_s30 + $0x64] sm:$0xf]  ;;  %v293_v61 = vld [vmem:[%s1166_s21 + $0x68] sm:$0xf] }
  0x34   : > { %v674_v57 = vmax.bf16 %v610_v47, %v418_v41  ;;  %v611_v62 = vmax.bf16 %v547_v59, %v483_v53  ;;  %v612_v63 = vmax.bf16 %v548_v60, %v484_v54  ;;  %v294_v0 = vld [vmem:[%s1166_s21 + $0x6c] sm:$0xf]  ;;  %v357_v1 = vld [vmem:[%s1172_s24 + $0x68] sm:$0xf]  ;;  %1068 = vst [vmem:[%s1208_s7 + $0x50] sm:$0xff] %v1067_v55  }
  0x35   : > { %v358_v2 = vld [vmem:[%s1172_s24 + $0x6c] sm:$0xf]  ;;  %v421_v4 = vmax.bf16 %v357_v1, %v293_v61  ;;  %v485_v6 = vld [vmem:[%s1178_s27 + $0x68] sm:$0xf]  ;;  %v295_v13 = vld [vmem:[%s1166_s21 + $0x70] sm:$0xf] }
  0x36   : > { %v1069_v3 = vcombine.low %v673_v56, %v674_v57  ;;  %v422_v5 = vmax.bf16 %v358_v2, %v294_v0  ;;  %v486_v7 = vld [vmem:[%s1178_s27 + $0x6c] sm:$0xf]  ;;  %v549_v8 = vld [vmem:[%s1184_s30 + $0x68] sm:$0xf]  ;;  %v675_v9 = vmax.bf16 %v611_v62, %v419_v52  ;;  %v676_v10 = vmax.bf16 %v612_v63, %v420_v58  ;;  %v296_v14 = vld [vmem:[%s1166_s21 + $0x74] sm:$0xf] }
  0x37   : > { %v550_v11 = vld [vmem:[%s1184_s30 + $0x6c] sm:$0xf]  ;;  %v613_v12 = vmax.bf16 %v549_v8, %v485_v6  ;;  %v359_v16 = vld [vmem:[%s1172_s24 + $0x70] sm:$0xf]  ;;  %v360_v17 = vld [vmem:[%s1172_s24 + $0x74] sm:$0xf] }
  0x38   : > { %1070 = vst [vmem:[%s1208_s7 + $0x58] sm:$0xff] %v1069_v3   ;;  %v614_v15 = vmax.bf16 %v550_v11, %v486_v7  ;;  %v487_v18 = vld [vmem:[%s1178_s27 + $0x70] sm:$0xf]  ;;  %v1071_v19 = vcombine.low %v675_v9, %v676_v10  ;;  %v423_v21 = vmax.bf16 %v359_v16, %v295_v13  ;;  %v424_v22 = vmax.bf16 %v360_v17, %v296_v14  ;;  %v488_v23 = vld [vmem:[%s1178_s27 + $0x74] sm:$0xf] }
  0x39   : > { %v677_v20 = vmax.bf16 %v613_v12, %v421_v4  ;;  %v551_v24 = vld [vmem:[%s1184_s30 + $0x70] sm:$0xf]  ;;  %v552_v25 = vld [vmem:[%s1184_s30 + $0x74] sm:$0xf]  ;;  %v297_v29 = vld [vmem:[%s1166_s21 + $0x78] sm:$0xf] }
  0x3a   : > { %v678_v26 = vmax.bf16 %v614_v15, %v422_v5  ;;  %v615_v27 = vmax.bf16 %v551_v24, %v487_v18  ;;  %v616_v28 = vmax.bf16 %v552_v25, %v488_v23  ;;  %v298_v30 = vld [vmem:[%s1166_s21 + $0x7c] sm:$0xf]  ;;  %v361_v31 = vld [vmem:[%s1172_s24 + $0x78] sm:$0xf]  ;;  %1072 = vst [vmem:[%s1208_s7 + $0x60] sm:$0xff] %v1071_v19  }
  0x3b   : > { %v362_v32 = vld [vmem:[%s1172_s24 + $0x7c] sm:$0xf]  ;;  %v425_v33 = vmax.bf16 %v361_v31, %v297_v29  ;;  %v489_v34 = vld [vmem:[%s1178_s27 + $0x78] sm:$0xf]  ;;  %v299_v42 = vld [vmem:[%s1166_s21 + $0x80] sm:$0xf] }
  0x3c   : > { %v490_v35 = vld [vmem:[%s1178_s27 + $0x7c] sm:$0xf]  ;;  %v1073_v36 = vcombine.low %v677_v20, %v678_v26  ;;  %v679_v37 = vmax.bf16 %v615_v27, %v423_v21  ;;  %v680_v38 = vmax.bf16 %v616_v28, %v424_v22  ;;  %v426_v39 = vmax.bf16 %v362_v32, %v298_v30  ;;  %v553_v40 = vld [vmem:[%s1184_s30 + $0x78] sm:$0xf]  ;;  %v300_v45 = vld [vmem:[%s1166_s21 + $0x84] sm:$0xf] }
  0x3d   : > { %v554_v41 = vld [vmem:[%s1184_s30 + $0x7c] sm:$0xf]  ;;  %v617_v43 = vmax.bf16 %v553_v40, %v489_v34  ;;  %v363_v46 = vld [vmem:[%s1172_s24 + $0x80] sm:$0xf]  ;;  %v364_v47 = vld [vmem:[%s1172_s24 + $0x84] sm:$0xf] }
  0x3e   : > { %v618_v44 = vmax.bf16 %v554_v41, %v490_v35  ;;  %1074 = vst [vmem:[%s1208_s7 + $0x68] sm:$0xff] %v1073_v36   ;;  %v1075_v48 = vcombine.low %v679_v37, %v680_v38  ;;  %v427_v49 = vmax.bf16 %v363_v46, %v299_v42  ;;  %v428_v50 = vmax.bf16 %v364_v47, %v300_v45  ;;  %v491_v51 = vld [vmem:[%s1178_s27 + $0x80] sm:$0xf]  ;;  %v492_v52 = vld [vmem:[%s1178_s27 + $0x84] sm:$0xf] }
  0x3f   : > { %v555_v53 = vld [vmem:[%s1184_s30 + $0x80] sm:$0xf]  ;;  %v681_v54 = vmax.bf16 %v617_v43, %v425_v33  ;;  %v556_v56 = vld [vmem:[%s1184_s30 + $0x84] sm:$0xf]  ;;  %v301_v58 = vld [vmem:[%s1166_s21 + $0x88] sm:$0xf] }
  0x40   : > { %v682_v55 = vmax.bf16 %v618_v44, %v426_v39  ;;  %v619_v57 = vmax.bf16 %v555_v53, %v491_v51  ;;  %v302_v59 = vld [vmem:[%s1166_s21 + $0x8c] sm:$0xf]  ;;  %1076 = vst [vmem:[%s1208_s7 + $0x70] sm:$0xff] %v1075_v48   ;;  %v620_v60 = vmax.bf16 %v556_v56, %v492_v52  ;;  %v365_v61 = vld [vmem:[%s1172_s24 + $0x88] sm:$0xf] }
  0x41   : > { %v366_v62 = vld [vmem:[%s1172_s24 + $0x8c] sm:$0xf]  ;;  %v493_v63 = vld [vmem:[%s1178_s27 + $0x88] sm:$0xf]  ;;  %v429_v2 = vmax.bf16 %v365_v61, %v301_v58  ;;  %v303_v10 = vld [vmem:[%s1166_s21 + $0x90] sm:$0xf] }
  0x42   : > { %v1077_v0 = vcombine.low %v681_v54, %v682_v55  ;;  %v683_v1 = vmax.bf16 %v619_v57, %v427_v49  ;;  %v430_v3 = vmax.bf16 %v366_v62, %v302_v59  ;;  %v494_v4 = vld [vmem:[%s1178_s27 + $0x8c] sm:$0xf]  ;;  %v557_v5 = vld [vmem:[%s1184_s30 + $0x88] sm:$0xf]  ;;  %v684_v7 = vmax.bf16 %v620_v60, %v428_v50  ;;  %v304_v11 = vld [vmem:[%s1166_s21 + $0x94] sm:$0xf] }
  0x43   : > { %v558_v6 = vld [vmem:[%s1184_s30 + $0x8c] sm:$0xf]  ;;  %v621_v8 = vmax.bf16 %v557_v5, %v493_v63  ;;  %v367_v12 = vld [vmem:[%s1172_s24 + $0x90] sm:$0xf]  ;;  %v368_v13 = vld [vmem:[%s1172_s24 + $0x94] sm:$0xf] }
  0x44   : > { %v622_v9 = vmax.bf16 %v558_v6, %v494_v4  ;;  %1078 = vst [vmem:[%s1208_s7 + $0x78] sm:$0xff] %v1077_v0   ;;  %v431_v14 = vmax.bf16 %v367_v12, %v303_v10  ;;  %v495_v15 = vld [vmem:[%s1178_s27 + $0x90] sm:$0xf]  ;;  %v496_v16 = vld [vmem:[%s1178_s27 + $0x94] sm:$0xf]  ;;  %v1079_v17 = vcombine.low %v683_v1, %v684_v7  ;;  %v432_v20 = vmax.bf16 %v368_v13, %v304_v11 }
  0x45   : > { %v685_v18 = vmax.bf16 %v621_v8, %v429_v2  ;;  %v559_v21 = vld [vmem:[%s1184_s30 + $0x90] sm:$0xf]  ;;  %v560_v22 = vld [vmem:[%s1184_s30 + $0x94] sm:$0xf]  ;;  %v305_v23 = vld [vmem:[%s1166_s21 + $0x98] sm:$0xf] }
  0x46   : > { %v686_v19 = vmax.bf16 %v622_v9, %v430_v3  ;;  %v623_v24 = vmax.bf16 %v559_v21, %v495_v15  ;;  %v624_v25 = vmax.bf16 %v560_v22, %v496_v16  ;;  %v306_v26 = vld [vmem:[%s1166_s21 + $0x9c] sm:$0xf]  ;;  %v369_v27 = vld [vmem:[%s1172_s24 + $0x98] sm:$0xf]  ;;  %1080 = vst [vmem:[%s1208_s7 + $0x80] sm:$0xff] %v1079_v17  }
  0x47   : > { %v370_v28 = vld [vmem:[%s1172_s24 + $0x9c] sm:$0xf]  ;;  %v433_v30 = vmax.bf16 %v369_v27, %v305_v23  ;;  %v497_v32 = vld [vmem:[%s1178_s27 + $0x98] sm:$0xf]  ;;  %v307_v39 = vld [vmem:[%s1166_s21 + $0xa0] sm:$0xf] }
  0x48   : > { %v1081_v29 = vcombine.low %v685_v18, %v686_v19  ;;  %v434_v31 = vmax.bf16 %v370_v28, %v306_v26  ;;  %v498_v33 = vld [vmem:[%s1178_s27 + $0x9c] sm:$0xf]  ;;  %v561_v34 = vld [vmem:[%s1184_s30 + $0x98] sm:$0xf]  ;;  %v687_v35 = vmax.bf16 %v623_v24, %v431_v14  ;;  %v688_v36 = vmax.bf16 %v624_v25, %v432_v20  ;;  %v308_v40 = vld [vmem:[%s1166_s21 + $0xa4] sm:$0xf] }
  0x49   : > { %v562_v37 = vld [vmem:[%s1184_s30 + $0x9c] sm:$0xf]  ;;  %v625_v38 = vmax.bf16 %v561_v34, %v497_v32  ;;  %v371_v42 = vld [vmem:[%s1172_s24 + $0xa0] sm:$0xf]  ;;  %v372_v43 = vld [vmem:[%s1172_s24 + $0xa4] sm:$0xf] }
  0x4a   : > { %1082 = vst [vmem:[%s1208_s7 + $0x88] sm:$0xff] %v1081_v29   ;;  %v626_v41 = vmax.bf16 %v562_v37, %v498_v33  ;;  %v499_v44 = vld [vmem:[%s1178_s27 + $0xa0] sm:$0xf]  ;;  %v1083_v45 = vcombine.low %v687_v35, %v688_v36  ;;  %v435_v47 = vmax.bf16 %v371_v42, %v307_v39  ;;  %v436_v48 = vmax.bf16 %v372_v43, %v308_v40  ;;  %v500_v49 = vld [vmem:[%s1178_s27 + $0xa4] sm:$0xf] }
  0x4b   : > { %v689_v46 = vmax.bf16 %v625_v38, %v433_v30  ;;  %v563_v50 = vld [vmem:[%s1184_s30 + $0xa0] sm:$0xf]  ;;  %v564_v51 = vld [vmem:[%s1184_s30 + $0xa4] sm:$0xf]  ;;  %v309_v55 = vld [vmem:[%s1166_s21 + $0xa8] sm:$0xf] }
  0x4c   : > { %v690_v52 = vmax.bf16 %v626_v41, %v434_v31  ;;  %v627_v53 = vmax.bf16 %v563_v50, %v499_v44  ;;  %v628_v54 = vmax.bf16 %v564_v51, %v500_v49  ;;  %v310_v56 = vld [vmem:[%s1166_s21 + $0xac] sm:$0xf]  ;;  %v373_v57 = vld [vmem:[%s1172_s24 + $0xa8] sm:$0xf]  ;;  %1084 = vst [vmem:[%s1208_s7 + $0x90] sm:$0xff] %v1083_v45  }
  0x4d   : > { %v374_v58 = vld [vmem:[%s1172_s24 + $0xac] sm:$0xf]  ;;  %v437_v59 = vmax.bf16 %v373_v57, %v309_v55  ;;  %v501_v60 = vld [vmem:[%s1178_s27 + $0xa8] sm:$0xf]  ;;  %v311_v4 = vld [vmem:[%s1166_s21 + $0xb0] sm:$0xf] }
  0x4e   : > { %v502_v61 = vld [vmem:[%s1178_s27 + $0xac] sm:$0xf]  ;;  %v1085_v62 = vcombine.low %v689_v46, %v690_v52  ;;  %v691_v63 = vmax.bf16 %v627_v53, %v435_v47  ;;  %v692_v0 = vmax.bf16 %v628_v54, %v436_v48  ;;  %v438_v1 = vmax.bf16 %v374_v58, %v310_v56  ;;  %v565_v2 = vld [vmem:[%s1184_s30 + $0xa8] sm:$0xf]  ;;  %v312_v7 = vld [vmem:[%s1166_s21 + $0xb4] sm:$0xf] }
  0x4f   : > { %v566_v3 = vld [vmem:[%s1184_s30 + $0xac] sm:$0xf]  ;;  %v629_v5 = vmax.bf16 %v565_v2, %v501_v60  ;;  %v375_v8 = vld [vmem:[%s1172_s24 + $0xb0] sm:$0xf]  ;;  %v376_v9 = vld [vmem:[%s1172_s24 + $0xb4] sm:$0xf] }
  0x50   : > { %v630_v6 = vmax.bf16 %v566_v3, %v502_v61  ;;  %1086 = vst [vmem:[%s1208_s7 + $0x98] sm:$0xff] %v1085_v62   ;;  %v1087_v10 = vcombine.low %v691_v63, %v692_v0  ;;  %v439_v11 = vmax.bf16 %v375_v8, %v311_v4  ;;  %v440_v12 = vmax.bf16 %v376_v9, %v312_v7  ;;  %v503_v13 = vld [vmem:[%s1178_s27 + $0xb0] sm:$0xf]  ;;  %v504_v14 = vld [vmem:[%s1178_s27 + $0xb4] sm:$0xf] }
  0x51   : > { %v567_v15 = vld [vmem:[%s1184_s30 + $0xb0] sm:$0xf]  ;;  %v693_v16 = vmax.bf16 %v629_v5, %v437_v59  ;;  %v568_v18 = vld [vmem:[%s1184_s30 + $0xb4] sm:$0xf]  ;;  %v313_v20 = vld [vmem:[%s1166_s21 + $0xb8] sm:$0xf] }
  0x52   : > { %v694_v17 = vmax.bf16 %v630_v6, %v438_v1  ;;  %v631_v19 = vmax.bf16 %v567_v15, %v503_v13  ;;  %v314_v21 = vld [vmem:[%s1166_s21 + $0xbc] sm:$0xf]  ;;  %1088 = vst [vmem:[%s1208_s7 + $0xa0] sm:$0xff] %v1087_v10   ;;  %v632_v22 = vmax.bf16 %v568_v18, %v504_v14  ;;  %v377_v23 = vld [vmem:[%s1172_s24 + $0xb8] sm:$0xf] }
  0x53   : > { %v378_v24 = vld [vmem:[%s1172_s24 + $0xbc] sm:$0xf]  ;;  %v505_v25 = vld [vmem:[%s1178_s27 + $0xb8] sm:$0xf]  ;;  %v441_v28 = vmax.bf16 %v377_v23, %v313_v20  ;;  %v315_v36 = vld [vmem:[%s1166_s21 + $0xc0] sm:$0xf] }
  0x54   : > { %v1089_v26 = vcombine.low %v693_v16, %v694_v17  ;;  %v695_v27 = vmax.bf16 %v631_v19, %v439_v11  ;;  %v442_v29 = vmax.bf16 %v378_v24, %v314_v21  ;;  %v506_v30 = vld [vmem:[%s1178_s27 + $0xbc] sm:$0xf]  ;;  %v569_v31 = vld [vmem:[%s1184_s30 + $0xb8] sm:$0xf]  ;;  %v696_v33 = vmax.bf16 %v632_v22, %v440_v12  ;;  %v316_v37 = vld [vmem:[%s1166_s21 + $0xc4] sm:$0xf] }
  0x55   : > { %v570_v32 = vld [vmem:[%s1184_s30 + $0xbc] sm:$0xf]  ;;  %v633_v34 = vmax.bf16 %v569_v31, %v505_v25  ;;  %v379_v38 = vld [vmem:[%s1172_s24 + $0xc0] sm:$0xf]  ;;  %v380_v39 = vld [vmem:[%s1172_s24 + $0xc4] sm:$0xf] }
  0x56   : > { %v634_v35 = vmax.bf16 %v570_v32, %v506_v30  ;;  %1090 = vst [vmem:[%s1208_s7 + $0xa8] sm:$0xff] %v1089_v26   ;;  %v443_v40 = vmax.bf16 %v379_v38, %v315_v36  ;;  %v507_v41 = vld [vmem:[%s1178_s27 + $0xc0] sm:$0xf]  ;;  %v508_v42 = vld [vmem:[%s1178_s27 + $0xc4] sm:$0xf]  ;;  %v1091_v43 = vcombine.low %v695_v27, %v696_v33  ;;  %v444_v46 = vmax.bf16 %v380_v39, %v316_v37 }
  0x57   : > { %v697_v44 = vmax.bf16 %v633_v34, %v441_v28  ;;  %v571_v47 = vld [vmem:[%s1184_s30 + $0xc0] sm:$0xf]  ;;  %v572_v48 = vld [vmem:[%s1184_s30 + $0xc4] sm:$0xf]  ;;  %v317_v49 = vld [vmem:[%s1166_s21 + $0xc8] sm:$0xf] }
  0x58   : > { %v698_v45 = vmax.bf16 %v634_v35, %v442_v29  ;;  %v635_v50 = vmax.bf16 %v571_v47, %v507_v41  ;;  %v636_v51 = vmax.bf16 %v572_v48, %v508_v42  ;;  %v318_v52 = vld [vmem:[%s1166_s21 + $0xcc] sm:$0xf]  ;;  %v381_v53 = vld [vmem:[%s1172_s24 + $0xc8] sm:$0xf]  ;;  %1092 = vst [vmem:[%s1208_s7 + $0xb0] sm:$0xff] %v1091_v43  }
  0x59   : > { %v382_v54 = vld [vmem:[%s1172_s24 + $0xcc] sm:$0xf]  ;;  %v445_v56 = vmax.bf16 %v381_v53, %v317_v49  ;;  %v509_v58 = vld [vmem:[%s1178_s27 + $0xc8] sm:$0xf]  ;;  %v319_v1 = vld [vmem:[%s1166_s21 + $0xd0] sm:$0xf] }
  0x5a   : > { %v1093_v55 = vcombine.low %v697_v44, %v698_v45  ;;  %v446_v57 = vmax.bf16 %v382_v54, %v318_v52  ;;  %v510_v59 = vld [vmem:[%s1178_s27 + $0xcc] sm:$0xf]  ;;  %v573_v60 = vld [vmem:[%s1184_s30 + $0xc8] sm:$0xf]  ;;  %v699_v61 = vmax.bf16 %v635_v50, %v443_v40  ;;  %v700_v62 = vmax.bf16 %v636_v51, %v444_v46  ;;  %v320_v2 = vld [vmem:[%s1166_s21 + $0xd4] sm:$0xf] }
  0x5b   : > { %v574_v63 = vld [vmem:[%s1184_s30 + $0xcc] sm:$0xf]  ;;  %v637_v0 = vmax.bf16 %v573_v60, %v509_v58  ;;  %v383_v4 = vld [vmem:[%s1172_s24 + $0xd0] sm:$0xf]  ;;  %v384_v5 = vld [vmem:[%s1172_s24 + $0xd4] sm:$0xf] }
  0x5c   : > { %1094 = vst [vmem:[%s1208_s7 + $0xb8] sm:$0xff] %v1093_v55   ;;  %v638_v3 = vmax.bf16 %v574_v63, %v510_v59  ;;  %v511_v6 = vld [vmem:[%s1178_s27 + $0xd0] sm:$0xf]  ;;  %v1095_v7 = vcombine.low %v699_v61, %v700_v62  ;;  %v447_v9 = vmax.bf16 %v383_v4, %v319_v1  ;;  %v448_v10 = vmax.bf16 %v384_v5, %v320_v2  ;;  %v512_v11 = vld [vmem:[%s1178_s27 + $0xd4] sm:$0xf] }
  0x5d   : > { %v701_v8 = vmax.bf16 %v637_v0, %v445_v56  ;;  %v575_v12 = vld [vmem:[%s1184_s30 + $0xd0] sm:$0xf]  ;;  %v576_v13 = vld [vmem:[%s1184_s30 + $0xd4] sm:$0xf]  ;;  %v321_v17 = vld [vmem:[%s1166_s21 + $0xd8] sm:$0xf] }
  0x5e   : > { %v702_v14 = vmax.bf16 %v638_v3, %v446_v57  ;;  %v639_v15 = vmax.bf16 %v575_v12, %v511_v6  ;;  %v640_v16 = vmax.bf16 %v576_v13, %v512_v11  ;;  %v322_v18 = vld [vmem:[%s1166_s21 + $0xdc] sm:$0xf]  ;;  %v385_v19 = vld [vmem:[%s1172_s24 + $0xd8] sm:$0xf]  ;;  %1096 = vst [vmem:[%s1208_s7 + $0xc0] sm:$0xff] %v1095_v7  }
  0x5f   : > { %v386_v20 = vld [vmem:[%s1172_s24 + $0xdc] sm:$0xf]  ;;  %v449_v21 = vmax.bf16 %v385_v19, %v321_v17  ;;  %v513_v22 = vld [vmem:[%s1178_s27 + $0xd8] sm:$0xf]  ;;  %v323_v30 = vld [vmem:[%s1166_s21 + $0xe0] sm:$0xf] }
  0x60   : > { %v514_v23 = vld [vmem:[%s1178_s27 + $0xdc] sm:$0xf]  ;;  %v1097_v24 = vcombine.low %v701_v8, %v702_v14  ;;  %v703_v25 = vmax.bf16 %v639_v15, %v447_v9  ;;  %v704_v26 = vmax.bf16 %v640_v16, %v448_v10  ;;  %v450_v27 = vmax.bf16 %v386_v20, %v322_v18  ;;  %v577_v28 = vld [vmem:[%s1184_s30 + $0xd8] sm:$0xf]  ;;  %v324_v33 = vld [vmem:[%s1166_s21 + $0xe4] sm:$0xf] }
  0x61   : > { %v578_v29 = vld [vmem:[%s1184_s30 + $0xdc] sm:$0xf]  ;;  %v641_v31 = vmax.bf16 %v577_v28, %v513_v22  ;;  %v387_v34 = vld [vmem:[%s1172_s24 + $0xe0] sm:$0xf]  ;;  %v388_v35 = vld [vmem:[%s1172_s24 + $0xe4] sm:$0xf] }
  0x62   : > { %v642_v32 = vmax.bf16 %v578_v29, %v514_v23  ;;  %1098 = vst [vmem:[%s1208_s7 + $0xc8] sm:$0xff] %v1097_v24   ;;  %v1099_v36 = vcombine.low %v703_v25, %v704_v26  ;;  %v451_v37 = vmax.bf16 %v387_v34, %v323_v30  ;;  %v452_v38 = vmax.bf16 %v388_v35, %v324_v33  ;;  %v515_v39 = vld [vmem:[%s1178_s27 + $0xe0] sm:$0xf]  ;;  %v516_v40 = vld [vmem:[%s1178_s27 + $0xe4] sm:$0xf] }
  0x63   : > { %v579_v41 = vld [vmem:[%s1184_s30 + $0xe0] sm:$0xf]  ;;  %v705_v42 = vmax.bf16 %v641_v31, %v449_v21  ;;  %v580_v44 = vld [vmem:[%s1184_s30 + $0xe4] sm:$0xf]  ;;  %v325_v46 = vld [vmem:[%s1166_s21 + $0xe8] sm:$0xf] }
  0x64   : > { %v706_v43 = vmax.bf16 %v642_v32, %v450_v27  ;;  %v643_v45 = vmax.bf16 %v579_v41, %v515_v39  ;;  %v326_v47 = vld [vmem:[%s1166_s21 + $0xec] sm:$0xf]  ;;  %1100 = vst [vmem:[%s1208_s7 + $0xd0] sm:$0xff] %v1099_v36   ;;  %v644_v48 = vmax.bf16 %v580_v44, %v516_v40  ;;  %v389_v49 = vld [vmem:[%s1172_s24 + $0xe8] sm:$0xf] }
  0x65   : > { %v390_v50 = vld [vmem:[%s1172_s24 + $0xec] sm:$0xf]  ;;  %v517_v51 = vld [vmem:[%s1178_s27 + $0xe8] sm:$0xf]  ;;  %v453_v54 = vmax.bf16 %v389_v49, %v325_v46  ;;  %v327_v62 = vld [vmem:[%s1166_s21 + $0xf0] sm:$0xf] }
  0x66   : > { %v1101_v52 = vcombine.low %v705_v42, %v706_v43  ;;  %v707_v53 = vmax.bf16 %v643_v45, %v451_v37  ;;  %v454_v55 = vmax.bf16 %v390_v50, %v326_v47  ;;  %v518_v56 = vld [vmem:[%s1178_s27 + $0xec] sm:$0xf]  ;;  %v581_v57 = vld [vmem:[%s1184_s30 + $0xe8] sm:$0xf]  ;;  %v708_v59 = vmax.bf16 %v644_v48, %v452_v38  ;;  %v328_v63 = vld [vmem:[%s1166_s21 + $0xf4] sm:$0xf] }
  0x67   : > { %v582_v58 = vld [vmem:[%s1184_s30 + $0xec] sm:$0xf]  ;;  %v645_v60 = vmax.bf16 %v581_v57, %v517_v51  ;;  %v391_v0 = vld [vmem:[%s1172_s24 + $0xf0] sm:$0xf]  ;;  %v392_v1 = vld [vmem:[%s1172_s24 + $0xf4] sm:$0xf] }
  0x68   : > { %v646_v61 = vmax.bf16 %v582_v58, %v518_v56  ;;  %1102 = vst [vmem:[%s1208_s7 + $0xd8] sm:$0xff] %v1101_v52   ;;  %v455_v2 = vmax.bf16 %v391_v0, %v327_v62  ;;  %v519_v3 = vld [vmem:[%s1178_s27 + $0xf0] sm:$0xf]  ;;  %v520_v4 = vld [vmem:[%s1178_s27 + $0xf4] sm:$0xf]  ;;  %v1103_v5 = vcombine.low %v707_v53, %v708_v59  ;;  %v456_v8 = vmax.bf16 %v392_v1, %v328_v63 }
  0x69   : > { %v709_v6 = vmax.bf16 %v645_v60, %v453_v54  ;;  %v583_v9 = vld [vmem:[%s1184_s30 + $0xf0] sm:$0xf]  ;;  %v584_v10 = vld [vmem:[%s1184_s30 + $0xf4] sm:$0xf]  ;;  %v329_v11 = vld [vmem:[%s1166_s21 + $0xf8] sm:$0xf] }
  0x6a   : > { %v710_v7 = vmax.bf16 %v646_v61, %v454_v55  ;;  %v647_v12 = vmax.bf16 %v583_v9, %v519_v3  ;;  %v648_v13 = vmax.bf16 %v584_v10, %v520_v4  ;;  %v330_v14 = vld [vmem:[%s1166_s21 + $0xfc] sm:$0xf]  ;;  %v393_v15 = vld [vmem:[%s1172_s24 + $0xf8] sm:$0xf]  ;;  %1104 = vst [vmem:[%s1208_s7 + $0xe0] sm:$0xff] %v1103_v5  }
  0x6b   : > { %v394_v16 = vld [vmem:[%s1172_s24 + $0xfc] sm:$0xf]  ;;  %v457_v18 = vmax.bf16 %v393_v15, %v329_v11  ;;  %v521_v20 = vld [vmem:[%s1178_s27 + $0xf8] sm:$0xf] }
  0x6c   : > { %v1105_v17 = vcombine.low %v709_v6, %v710_v7  ;;  %v458_v19 = vmax.bf16 %v394_v16, %v330_v14  ;;  %v522_v21 = vld [vmem:[%s1178_s27 + $0xfc] sm:$0xf]  ;;  %v585_v22 = vld [vmem:[%s1184_s30 + $0xf8] sm:$0xf]  ;;  %v711_v23 = vmax.bf16 %v647_v12, %v455_v2  ;;  %v712_v24 = vmax.bf16 %v648_v13, %v456_v8 }
  0x6d   : > { %v586_v25 = vld [vmem:[%s1184_s30 + $0xfc] sm:$0xf]  ;;  %v649_v26 = vmax.bf16 %v585_v22, %v521_v20 }
  0x6e   : > { %1106 = vst [vmem:[%s1208_s7 + $0xe8] sm:$0xff] %v1105_v17   ;;  %v650_v27 = vmax.bf16 %v586_v25, %v522_v21  ;;  %v1107_v28 = vcombine.low %v711_v23, %v712_v24 }
  0x6f   : > { %v713_v29 = vmax.bf16 %v649_v26, %v457_v18 }
  0x70   : > { %v714_v30 = vmax.bf16 %v650_v27, %v458_v19  ;;  %1108 = vst [vmem:[%s1208_s7 + $0xf0] sm:$0xff] %v1107_v28  }
  0x72   : > { %v1109_v31 = vcombine.low %v713_v29, %v714_v30 }
  0x74   : > { %1110 = vst [vmem:[%s1208_s7 + $0xf8] sm:$0xff] %v1109_v31  }
  0x75 PF: > { %s14_s15 = sadd.s32 1, %s1125_s15  }
  0x76   : > { %p11_p4 = scmp.ge.s32.totalorder %s14_s15, 15  }
  0x78   :  { %13 = sbr.rel (!%p11_p4) target bundleno = 1 (0x1), region = 75 }

// kernel: my_model_forward.10
= control target key start
LH: loop header
LB: loop body
LE: loop exit
PB: predicated region body
PF: predicated region fallthrough
CT: control target
= control target key end

     0   :  { %s2979_s12 = smov 0   ;;  %s2981_s13 = smov 0   ;;  %s3461_s0 = inlined_call_operand.vmem [shape: bf16[24064,288], index: 0, kind: input, shape index: {}]   ;;  %s3462_s1 = inlined_call_operand.vmem [shape: bf16[288,128], index: 1, kind: input, shape index: {}]   ;;  %s3463_s2 = inlined_call_operand.vmem [shape: f32[1,128], index: 2, kind: input, shape index: {}]   ;;  %s3464_s3 = inlined_call_operand.vmem [shape: bf16[24064,128], index: 3, kind: output, shape index: {}]  }
   0x1   :  { %s2983_s14 = smov 0  }
   0x2 LB: > { %s25_s15 = sadd.s32 1, %s2952_s13  ;;  %p2155_p0 = scmp.ge.s32.totalorder %s2956_s14, 1  ;;  %s2956_s14 = sphi %s2983_s14, %s13_s14   ;;  %s2952_s13 = sphi %s2981_s13, %s3466_s13   ;;  %s2948_s12 = sphi %s2979_s12, %s3465_s12  }
   0x3   : > { %p27_p1 = scmp.ge.s32.totalorder %s25_s15, 47  ;;  %p170_p2 = scmp.lt.s32.totalorder %s2956_s14, 48 }
   0x5   : > { %s3468_s15 = smov (%p27_p1, %s25_s15), 0  ;;  %p171_p3 = pnand %p2155_p0, %p170_p2 }
   0x6   : > { %s2156_s18 = sshll.u32 (!%p171_p3), %s2948_s12, 6 }
   0x7   : > { %174 = sbr.rel (%p171_p3) target bundleno = 467 (0x1d3), region = 32  ;;  %p206_p4 = scmp.lt.s32.totalorder (!%p171_p3), %s2156_s18, 3007 }
   0xc   : > { %v2788_v0 = vld [vmem:[%s3462_s1 + $0x38] sm:$0xff]   ;;  %v2958_v1 = vmov 0   ;;  %v2789_v2 = vld [vmem:[%s3462_s1 + $0x30] sm:$0xff]   ;;  %v2790_v3 = vld [vmem:[%s3462_s1 + $0x28] sm:$0xff]   ;;  %s3470_s18 = smov (!%p206_p4, %s2156_s18), 3007  ;;  %vm988_vm0 = vcmask 261120  }
   0xd   : > { %1085 = vmatprep.subr.bf16.mxu0 %v2958_v1  ;;  %2730 = vmatprep.subr.bf16.mxu1 %v2958_v1  ;;  %v2791_v4 = vld [vmem:[%s3462_s1 + $0x20] sm:$0xff]   ;;  %s2762_s25 = smul.u32 12, %s3470_s18  ;;  %v2792_v5 = vld [vmem:[%s3462_s1 + $0x18] sm:$0xff]   ;;  %v2793_v7 = vld [vmem:[%s3462_s1 + $0x10] sm:$0xff]   ;;  %s2159_s9 = sshll.u32 %s3470_s18, 2 }
   0xe   : > { %1086 = vmatpush1.bf16.msra.mxu0 %v2788_v0  ;;  %2746 = vmatpush1.bf16.msra.mxu1 %v2788_v0  ;;  %v2794_v9 = vld [vmem:[%s3462_s1 + $0x8] sm:$0xff]   ;;  %v2795_v10 = vld [vmem:[%s3462_s1] sm:$0xff]   ;;  %v2796_v11 = vld [vmem:[%s3462_s1 + $0x78] sm:$0xff]   ;;  %s3298_s12 = scalar_lea.vmem %s3464_s3, %s2159_s9 }
   0xf   : > { %1087 = vmatprep.subr.bf16.mxu0 %v2958_v1  ;;  %2731 = vmatprep.subr.bf16.mxu1 %v2958_v1  ;;  %s3026_s30 = scalar_lea.vmem %s3461_s0, %s2762_s25  ;;  %v2797_v12 = vld [vmem:[%s3462_s1 + $0x70] sm:$0xff]   ;;  %v2798_v13 = vld [vmem:[%s3462_s1 + $0x68] sm:$0xff]   ;;  %v2799_v14 = vld [vmem:[%s3462_s1 + $0x60] sm:$0xff]  }
  0x10   : > { %v2806_v6 = vld [vmem:[%s3026_s30 + $0x4] ss:$12 sps:$4 sm:$0xff]   ;;  %v2800_v15 = vld [vmem:[%s3462_s1 + $0x58] sm:$0xff]   ;;  %v2802_v17 = vld [vmem:[%s3462_s1 + $0x48] sm:$0xff]  }
  0x11   : > { %v2809_v8 = vld [vmem:[%s3026_s30 + $0x244] ss:$12 sps:$4 sm:$0xff]   ;;  %1117 = vmatprep.mubr.bf16.mxu0 %v2806_v6  ;;  %v2810_v19 = vld [vmem:[%s3462_s1 + $0x88] sm:$0xff]   ;;  %v2817_v27 = vld [vmem:[%s3026_s30 + $0x34] ss:$12 sps:$4 sm:$0xff]  }
  0x12   : > { %1088 = vmatpush1.bf16.msra.mxu0 %v2789_v2  ;;  %2747 = vmatpush1.bf16.msra.mxu1 %v2789_v2  ;;  %v2801_v16 = vld [vmem:[%s3462_s1 + $0x50] sm:$0xff]   ;;  %v2803_v18 = vld [vmem:[%s3462_s1 + $0x40] sm:$0xff]   ;;  %v2811_v22 = vld [vmem:[%s3026_s30 + $0x1c] ss:$12 sps:$4 sm:$0xff]  }
  0x13   : > { %1089 = vmatprep.subr.bf16.mxu0 %v2958_v1  ;;  %2732 = vmatprep.subr.bf16.mxu1 %v2958_v1  ;;  %v2804_v20 = vld [vmem:[%s3026_s30] ss:$12 sps:$4 sm:$0xff]   ;;  %v2813_v23 = vld [vmem:[%s3026_s30 + $0x25c] ss:$12 sps:$4 sm:$0xff]   ;;  %v2815_v25 = vld [vmem:[%s3026_s30 + $0x18] ss:$12 sps:$4 sm:$0xff]  }
  0x14   : > { %1309 = vmatprep.mubr.bf16.mxu1 %v2809_v8  ;;  %v2807_v21 = vld [vmem:[%s3026_s30 + $0x240] ss:$12 sps:$4 sm:$0xff]   ;;  %v2816_v26 = vld [vmem:[%s3026_s30 + $0x258] ss:$12 sps:$4 sm:$0xff]   ;;  %v2821_v29 = vld [vmem:[%s3026_s30 + $0x30] ss:$12 sps:$4 sm:$0xff]  }
  0x15   : > { %v2835_v24 = vld [vmem:[%s3462_s1 + $0x80] sm:$0xff]   ;;  %v2822_v30 = vld [vmem:[%s3026_s30 + $0x270] ss:$12 sps:$4 sm:$0xff]   ;;  %v2823_v31 = vld [vmem:[%s3026_s30 + $0x4c] ss:$12 sps:$4 sm:$0xff]  }
  0x16   : > { %1090 = vmatpush1.bf16.msra.mxu0 %v2790_v3  ;;  %2748 = vmatpush1.bf16.msra.mxu1 %v2790_v3  ;;  %v2819_v28 = vld [vmem:[%s3026_s30 + $0x274] ss:$12 sps:$4 sm:$0xff]   ;;  %v2825_v32 = vld [vmem:[%s3026_s30 + $0x28c] ss:$12 sps:$4 sm:$0xff]   ;;  %v2829_v35 = vld [vmem:[%s3026_s30 + $0x64] ss:$12 sps:$4 sm:$0xff]  }
  0x17   : > { %1091 = vmatprep.subr.bf16.mxu0 %v2958_v1  ;;  %2733 = vmatprep.subr.bf16.mxu1 %v2958_v1  ;;  %v2827_v33 = vld [vmem:[%s3026_s30 + $0x48] ss:$12 sps:$4 sm:$0xff]   ;;  %v2831_v36 = vld [vmem:[%s3026_s30 + $0x2a4] ss:$12 sps:$4 sm:$0xff]   ;;  %v2833_v37 = vld [vmem:[%s3026_s30 + $0x60] ss:$12 sps:$4 sm:$0xff]  }
  0x18   : > { %v2828_v34 = vld [vmem:[%s3026_s30 + $0x288] ss:$12 sps:$4 sm:$0xff]   ;;  %v2834_v38 = vld [vmem:[%s3026_s30 + $0x2a0] ss:$12 sps:$4 sm:$0xff]   ;;  %v2840_v41 = vld [vmem:[%s3026_s30 + $0x78] ss:$12 sps:$4 sm:$0xff]  }
  0x19   : > { %v2836_v39 = vld [vmem:[%s3026_s30 + $0x7c] ss:$12 sps:$4 sm:$0xff]   ;;  %v2841_v42 = vld [vmem:[%s3026_s30 + $0x2b8] ss:$12 sps:$4 sm:$0xff]   ;;  %v2842_v43 = vld [vmem:[%s3026_s30 + $0x94] ss:$12 sps:$4 sm:$0xff]  }
  0x1a   : > { %1092 = vmatpush1.bf16.msra.mxu0 %v2791_v4  ;;  %2749 = vmatpush1.bf16.msra.mxu1 %v2791_v4  ;;  %v2838_v40 = vld [vmem:[%s3026_s30 + $0x2bc] ss:$12 sps:$4 sm:$0xff]   ;;  %v2844_v44 = vld [vmem:[%s3026_s30 + $0x2d4] ss:$12 sps:$4 sm:$0xff]   ;;  %v2848_v47 = vld [vmem:[%s3026_s30 + $0xac] ss:$12 sps:$4 sm:$0xff]  }
  0x1b   : > { %1093 = vmatprep.subr.bf16.mxu0 %v2958_v1  ;;  %2734 = vmatprep.subr.bf16.mxu1 %v2958_v1  ;;  %v2846_v45 = vld [vmem:[%s3026_s30 + $0x90] ss:$12 sps:$4 sm:$0xff]   ;;  %v2850_v48 = vld [vmem:[%s3026_s30 + $0x2ec] ss:$12 sps:$4 sm:$0xff]   ;;  %v2852_v49 = vld [vmem:[%s3026_s30 + $0xa8] ss:$12 sps:$4 sm:$0xff]  }
  0x1c   : > { %v2847_v46 = vld [vmem:[%s3026_s30 + $0x2d0] ss:$12 sps:$4 sm:$0xff]   ;;  %v2853_v50 = vld [vmem:[%s3026_s30 + $0x2e8] ss:$12 sps:$4 sm:$0xff]   ;;  %v2857_v53 = vld [vmem:[%s3026_s30 + $0xc0] ss:$12 sps:$4 sm:$0xff]  }
  0x1d   : > { %v2854_v51 = vld [vmem:[%s3026_s30 + $0xc4] ss:$12 sps:$4 sm:$0xff]   ;;  %v2856_v52 = vld [vmem:[%s3026_s30 + $0x8] ss:$12 sps:$4 sm:$0xff]   ;;  %v2858_v54 = vld [vmem:[%s3026_s30 + $0x20] ss:$12 sps:$4 sm:$0xff]  }
  0x1e   : > { %1094 = vmatpush1.bf16.msra.mxu0 %v2792_v5  ;;  %2750 = vmatpush1.bf16.msra.mxu1 %v2792_v5  ;;  %v2859_v55 = vld [vmem:[%s3026_s30 + $0xdc] ss:$12 sps:$4 sm:$0xff]   ;;  %v2861_v56 = vld [vmem:[%s3026_s30 + $0x38] ss:$12 sps:$4 sm:$0xff]   ;;  %v2864_v59 = vld [vmem:[%s3026_s30 + $0xf4] ss:$12 sps:$4 sm:$0xff]  }
  0x1f   : > { %1095 = vmatprep.subr.bf16.mxu0 %v2958_v1  ;;  %2735 = vmatprep.subr.bf16.mxu1 %v2958_v1  ;;  %v2862_v57 = vld [vmem:[%s3026_s30 + $0xd8] ss:$12 sps:$4 sm:$0xff]   ;;  %v2863_v58 = vld [vmem:[%s3026_s30 + $0x50] ss:$12 sps:$4 sm:$0xff]   ;;  %v2866_v60 = vld [vmem:[%s3026_s30 + $0x68] ss:$12 sps:$4 sm:$0xff]  }
  0x20   : > { %v2867_v61 = vld [vmem:[%s3026_s30 + $0xf0] ss:$12 sps:$4 sm:$0xff]   ;;  %v2868_v62 = vld [vmem:[%s3026_s30 + $0x80] ss:$12 sps:$4 sm:$0xff]   ;;  %v2871_v0 = vld [vmem:[%s3026_s30 + $0x98] ss:$12 sps:$4 sm:$0xff]  }
  0x21   : > { %v2869_v63 = vld [vmem:[%s3026_s30 + $0x10c] ss:$12 sps:$4 sm:$0xff]   ;;  %v2873_v2 = vld [vmem:[%s3026_s30 + $0xb0] ss:$12 sps:$4 sm:$0xff]   ;;  %v2876_v4 = vld [vmem:[%s3026_s30 + $0xc8] ss:$12 sps:$4 sm:$0xff]  }
  0x22   : > { %1096 = vmatpush1.bf16.msra.mxu0 %v2793_v7  ;;  %2751 = vmatpush1.bf16.msra.mxu1 %v2793_v7  ;;  %v2874_v3 = vld [vmem:[%s3026_s30 + $0x124] ss:$12 sps:$4 sm:$0xff]   ;;  %v2877_v5 = vld [vmem:[%s3026_s30 + $0x120] ss:$12 sps:$4 sm:$0xff]   ;;  %v2879_v7 = vld [vmem:[%s3026_s30 + $0x13c] ss:$12 sps:$4 sm:$0xff]  }
  0x23   : > { %1097 = vmatprep.subr.bf16.mxu0 %v2958_v1  ;;  %2736 = vmatprep.subr.bf16.mxu1 %v2958_v1  ;;  %v2878_v6 = vld [vmem:[%s3026_s30 + $0xe0] ss:$12 sps:$4 sm:$0xff]   ;;  %v2881_v8 = vld [vmem:[%s3026_s30 + $0xf8] ss:$12 sps:$4 sm:$0xff]  }
  0x26   : > { %1098 = vmatpush1.bf16.msra.mxu0 %v2794_v9  ;;  %2752 = vmatpush1.bf16.msra.mxu1 %v2794_v9  ;;  %v2882_v9 = vld [vmem:[%s3026_s30 + $0x138] ss:$12 sps:$4 sm:$0xff]  }
  0x27   : > { %1099 = vmatprep.subr.bf16.mxu0 %v2958_v1  ;;  %2737 = vmatprep.subr.bf16.mxu1 %v2958_v1 }
  0x2a   : > { %1100 = vmatpush1.bf16.msra.mxu0 %v2795_v10  ;;  %2753 = vmatpush1.bf16.msra.mxu1 %v2795_v10  ;;  %v2883_v10 = vld [vmem:[%s3026_s30 + $0x110] ss:$12 sps:$4 sm:$0xff]  }
  0x2b   : > { %1101 = vmatprep.subr.bf16.mxu0 %v2958_v1  ;;  %2738 = vmatprep.subr.bf16.mxu1 %v2958_v1 }
  0x2e   : > { %1102 = vmatpush2.bf16.msra.mxu0 %v2796_v11  ;;  %2754 = vmatpush2.bf16.msra.mxu1 %v2796_v11  ;;  %v2884_v11 = vld [vmem:[%s3026_s30 + $0x154] ss:$12 sps:$4 sm:$0xff]  }
  0x2f   : > { %1103 = vmatprep.subr.bf16.mxu0 %v2958_v1  ;;  %2739 = vmatprep.subr.bf16.mxu1 %v2958_v1 }
  0x32   : > { %1104 = vmatpush2.bf16.msra.mxu0 %v2797_v12  ;;  %2755 = vmatpush2.bf16.msra.mxu1 %v2797_v12  ;;  %v2886_v12 = vld [vmem:[%s3026_s30 + $0x128] ss:$12 sps:$4 sm:$0xff]  }
  0x33   : > { %1105 = vmatprep.subr.bf16.mxu0 %v2958_v1  ;;  %2740 = vmatprep.subr.bf16.mxu1 %v2958_v1 }
  0x36   : > { %1106 = vmatpush2.bf16.msra.mxu0 %v2798_v13  ;;  %2756 = vmatpush2.bf16.msra.mxu1 %v2798_v13  ;;  %v2887_v13 = vld [vmem:[%s3026_s30 + $0x150] ss:$12 sps:$4 sm:$0xff]  }
  0x37   : > { %1107 = vmatprep.subr.bf16.mxu0 %v2958_v1  ;;  %2741 = vmatprep.subr.bf16.mxu1 %v2958_v1 }
  0x3a   : > { %1108 = vmatpush2.bf16.msra.mxu0 %v2799_v14  ;;  %2757 = vmatpush2.bf16.msra.mxu1 %v2799_v14  ;;  %v2888_v14 = vld [vmem:[%s3026_s30 + $0x140] ss:$12 sps:$4 sm:$0xff]  }
  0x3b   : > { %1109 = vmatprep.subr.bf16.mxu0 %v2958_v1  ;;  %2742 = vmatprep.subr.bf16.mxu1 %v2958_v1 }
  0x3e   : > { %1110 = vmatpush2.bf16.msra.mxu0 %v2800_v15  ;;  %2758 = vmatpush2.bf16.msra.mxu1 %v2800_v15  ;;  %v2889_v15 = vld [vmem:[%s3026_s30 + $0x16c] ss:$12 sps:$4 sm:$0xff]  }
  0x3f   : > { %1111 = vmatprep.subr.bf16.mxu0 %v2958_v1  ;;  %2743 = vmatprep.subr.bf16.mxu1 %v2958_v1 }
  0x42   : > { %1112 = vmatpush2.bf16.msra.mxu0 %v2801_v16  ;;  %2759 = vmatpush2.bf16.msra.mxu1 %v2801_v16  ;;  %v2891_v16 = vld [vmem:[%s3026_s30 + $0x158] ss:$12 sps:$4 sm:$0xff]  }
  0x43   : > { %1113 = vmatprep.subr.bf16.mxu0 %v2958_v1  ;;  %2744 = vmatprep.subr.bf16.mxu1 %v2958_v1 }
  0x46   : > { %1114 = vmatpush2.bf16.msra.mxu0 %v2802_v17  ;;  %2760 = vmatpush2.bf16.msra.mxu1 %v2802_v17  ;;  %v2892_v17 = vld [vmem:[%s3026_s30 + $0x168] ss:$12 sps:$4 sm:$0xff]  }
  0x47   : > { %1115 = vmatprep.subr.bf16.mxu0 %v2958_v1  ;;  %2745 = vmatprep.subr.bf16.mxu1 %v2958_v1  ;;  %v2872_v1 = vld [vmem:[%s3026_s30 + $0x108] ss:$12 sps:$4 sm:$0xff]  }
  0x4a   : > { %1116 = vmatpush2.bf16.msra.mxu0 %v2803_v18  ;;  %2761 = vmatpush2.bf16.msra.mxu1 %v2803_v18  ;;  %v2893_v18 = vld [vmem:[%s3026_s30 + $0x170] ss:$12 sps:$4 sm:$0xff]  }
  0x4b   : > { %2662 = vmatprep.subr.bf16.mxu1 %v2810_v19 }
  0x4d   : > { %1118 = vmatmul.mubr.bf16.vlgmr.msra.gmra.mxu0 %v2804_v20  ;;  %1310 = vmatmul.mubr.bf16.vlgmr.msra.gmra.mxu1 %v2807_v21  ;;  %v2896_v20 = vld [vmem:[%s3026_s30 + $0x188] ss:$12 sps:$4 sm:$0xff]   ;;  %v2897_v21 = vld [vmem:[%s3026_s30 + $0x180] ss:$12 sps:$4 sm:$0xff]  }
  0x4e   : > { %2663 = vmatpush3.bf16.msra.mxu1 %v2810_v19  ;;  %1125 = vmatprep.mubr.bf16.mxu0 %v2811_v22  ;;  %v2894_v19 = vld [vmem:[%s3026_s30 + $0x184] ss:$12 sps:$4 sm:$0xff]   ;;  %v2898_v22 = vld [vmem:[%s3026_s30 + $0x1a0] ss:$12 sps:$4 sm:$0xff]  }
  0x4f   : > { %1317 = vmatprep.mubr.bf16.mxu1 %v2813_v23  ;;  %2664 = vmatprep.subr.bf16.mxu1 %v2835_v24  ;;  %v2899_v23 = vld [vmem:[%s3026_s30 + $0x19c] ss:$12 sps:$4 sm:$0xff]  }
  0x52   : > { %2665 = vmatpush3.bf16.msra.mxu1 %v2835_v24  ;;  %v2901_v24 = vld [vmem:[%s3026_s30 + $0x1b8] ss:$12 sps:$4 sm:$0xff]  }
  0x55   : > { %1126 = vmatmul.mubr.bf16.gmra.mxu0 %v2815_v25  ;;  %1318 = vmatmul.mubr.bf16.gmra.mxu1 %v2816_v26  ;;  %v2902_v25 = vld [vmem:[%s3026_s30 + $0x198] ss:$12 sps:$4 sm:$0xff]   ;;  %v2903_v26 = vld [vmem:[%s3026_s30 + $0x1d0] ss:$12 sps:$4 sm:$0xff]  }
  0x56   : > { %1133 = vmatprep.mubr.bf16.mxu0 %v2817_v27  ;;  %1325 = vmatprep.mubr.bf16.mxu1 %v2819_v28  ;;  %v2904_v27 = vld [vmem:[%s3026_s30 + $0x1b4] ss:$12 sps:$4 sm:$0xff]  }
  0x57   : > { %v2906_v28 = vld [vmem:[%s3026_s30 + $0x1e8] ss:$12 sps:$4 sm:$0xff]  }
  0x5d   : > { %1134 = vmatmul.mubr.bf16.gmra.mxu0 %v2821_v29  ;;  %1326 = vmatmul.mubr.bf16.gmra.mxu1 %v2822_v30  ;;  %v2907_v29 = vld [vmem:[%s3026_s30 + $0x1b0] ss:$12 sps:$4 sm:$0xff]   ;;  %v2908_v30 = vld [vmem:[%s3026_s30 + $0x200] ss:$12 sps:$4 sm:$0xff]  }
  0x5e   : > { %1141 = vmatprep.mubr.bf16.mxu0 %v2823_v31  ;;  %1333 = vmatprep.mubr.bf16.mxu1 %v2825_v32  ;;  %v2909_v31 = vld [vmem:[%s3026_s30 + $0x1cc] ss:$12 sps:$4 sm:$0xff]  }
  0x5f   : > { %v2911_v32 = vld [vmem:[%s3026_s30 + $0x218] ss:$12 sps:$4 sm:$0xff]  }
  0x65   : > { %1142 = vmatmul.mubr.bf16.gmra.mxu0 %v2827_v33  ;;  %1334 = vmatmul.mubr.bf16.gmra.mxu1 %v2828_v34  ;;  %v2912_v33 = vld [vmem:[%s3026_s30 + $0x1c8] ss:$12 sps:$4 sm:$0xff]   ;;  %v2913_v34 = vld [vmem:[%s3026_s30 + $0x230] ss:$12 sps:$4 sm:$0xff]  }
  0x66   : > { %1149 = vmatprep.mubr.bf16.mxu0 %v2829_v35  ;;  %1341 = vmatprep.mubr.bf16.mxu1 %v2831_v36  ;;  %v2914_v35 = vld [vmem:[%s3026_s30 + $0x1e4] ss:$12 sps:$4 sm:$0xff]   ;;  %v2916_v36 = vld [vmem:[%s3026_s30 + $0x248] ss:$12 sps:$4 sm:$0xff]  }
  0x6d   : > { %1150 = vmatmul.mubr.bf16.gmra.mxu0 %v2833_v37  ;;  %1342 = vmatmul.mubr.bf16.gmra.mxu1 %v2834_v38  ;;  %v2917_v37 = vld [vmem:[%s3026_s30 + $0x1e0] ss:$12 sps:$4 sm:$0xff]  }
  0x6e   : > { %1157 = vmatprep.mubr.bf16.mxu0 %v2836_v39  ;;  %1349 = vmatprep.mubr.bf16.mxu1 %v2838_v40  ;;  %v2918_v38 = vld [vmem:[%s3026_s30 + $0x260] ss:$12 sps:$4 sm:$0xff]   ;;  %v2919_v39 = vld [vmem:[%s3026_s30 + $0x1fc] ss:$12 sps:$4 sm:$0xff]   ;;  %v2921_v40 = vld [vmem:[%s3026_s30 + $0x278] ss:$12 sps:$4 sm:$0xff]  }
  0x75   : > { %1158 = vmatmul.mubr.bf16.gmra.mxu0 %v2840_v41  ;;  %1350 = vmatmul.mubr.bf16.gmra.mxu1 %v2841_v42  ;;  %v2922_v41 = vld [vmem:[%s3026_s30 + $0x1f8] ss:$12 sps:$4 sm:$0xff]   ;;  %v2923_v42 = vld [vmem:[%s3026_s30 + $0x290] ss:$12 sps:$4 sm:$0xff]  }
  0x76   : > { %1165 = vmatprep.mubr.bf16.mxu0 %v2842_v43  ;;  %1357 = vmatprep.mubr.bf16.mxu1 %v2844_v44  ;;  %v2924_v43 = vld [vmem:[%s3026_s30 + $0x214] ss:$12 sps:$4 sm:$0xff]  }
  0x77   : > { %v2926_v44 = vld [vmem:[%s3026_s30 + $0x2a8] ss:$12 sps:$4 sm:$0xff]  }
  0x7d   : > { %1166 = vmatmul.mubr.bf16.gmra.mxu0 %v2846_v45  ;;  %1358 = vmatmul.mubr.bf16.gmra.mxu1 %v2847_v46  ;;  %v2927_v45 = vld [vmem:[%s3026_s30 + $0x210] ss:$12 sps:$4 sm:$0xff]   ;;  %v2928_v46 = vld [vmem:[%s3026_s30 + $0x2c0] ss:$12 sps:$4 sm:$0xff]  }
  0x7e   : > { %1173 = vmatprep.mubr.bf16.mxu0 %v2848_v47  ;;  %1365 = vmatprep.mubr.bf16.mxu1 %v2850_v48  ;;  %v2929_v47 = vld [vmem:[%s3026_s30 + $0x22c] ss:$12 sps:$4 sm:$0xff]  }
  0x7f   : > { %v2931_v48 = vld [vmem:[%s3026_s30 + $0x2d8] ss:$12 sps:$4 sm:$0xff]  }
  0x85   : > { %1174 = vmatmul.mubr.bf16.gmra.mxu0 %v2852_v49  ;;  %1366 = vmatmul.mubr.bf16.gmra.mxu1 %v2853_v50  ;;  %v2932_v49 = vld [vmem:[%s3026_s30 + $0x228] ss:$12 sps:$4 sm:$0xff]   ;;  %v2933_v50 = vld [vmem:[%s3026_s30 + $0x2f0] ss:$12 sps:$4 sm:$0xff]  }
  0x86   : > { %1181 = vmatprep.mubr.bf16.mxu0 %v2854_v51  ;;  %2666 = vmatprep.mubr.msk.bf16.mxu1 %vm988_vm0, %v2856_v52 }
  0x8d   : > { %1182 = vmatmul.mubr.bf16.gmra.mxu0 %v2857_v53  ;;  %2667 = vmatmul.mubr.msk.bf16.vlgmr.msra.gmra.mxu1 %vm988_vm0, %v2858_v54 }
  0x8e   : > { %1189 = vmatprep.mubr.bf16.mxu0 %v2859_v55  ;;  %2670 = vmatprep.mubr.msk.bf16.mxu1 %vm988_vm0, %v2861_v56 }
  0x95   : > { %1190 = vmatmul.mubr.bf16.gmra.mxu0 %v2862_v57  ;;  %2671 = vmatmul.mubr.msk.bf16.gmra.mxu1 %vm988_vm0, %v2863_v58 }
  0x96   : > { %1197 = vmatprep.mubr.bf16.mxu0 %v2864_v59  ;;  %2674 = vmatprep.mubr.msk.bf16.mxu1 %vm988_vm0, %v2866_v60 }
  0x9d   : > { %1198 = vmatmul.mubr.bf16.gmra.mxu0 %v2867_v61  ;;  %2675 = vmatmul.mubr.msk.bf16.gmra.mxu1 %vm988_vm0, %v2868_v62 }
  0x9e   : > { %1205 = vmatprep.mubr.bf16.mxu0 %v2869_v63  ;;  %2678 = vmatprep.mubr.msk.bf16.mxu1 %vm988_vm0, %v2871_v0 }
  0xa5   : > { %1206 = vmatmul.mubr.bf16.gmra.mxu0 %v2872_v1  ;;  %2679 = vmatmul.mubr.msk.bf16.gmra.mxu1 %vm988_vm0, %v2873_v2 }
  0xa6   : > { %1213 = vmatprep.mubr.bf16.mxu0 %v2874_v3  ;;  %2682 = vmatprep.mubr.msk.bf16.mxu1 %vm988_vm0, %v2876_v4 }
  0xad   : > { %1214 = vmatmul.mubr.bf16.gmra.mxu0 %v2877_v5  ;;  %2683 = vmatmul.mubr.msk.bf16.gmra.mxu1 %vm988_vm0, %v2878_v6 }
  0xae   : > { %1221 = vmatprep.mubr.bf16.mxu0 %v2879_v7  ;;  %2686 = vmatprep.mubr.msk.bf16.mxu1 %vm988_vm0, %v2881_v8 }
  0xb5   : > { %1222 = vmatmul.mubr.bf16.gmra.mxu0 %v2882_v9  ;;  %2687 = vmatmul.mubr.msk.bf16.gmra.mxu1 %vm988_vm0, %v2883_v10 }
  0xb6   : > { %1229 = vmatprep.mubr.bf16.mxu0 %v2884_v11  ;;  %2690 = vmatprep.mubr.msk.bf16.mxu1 %vm988_vm0, %v2886_v12 }
  0xbd   : > { %1230 = vmatmul.mubr.bf16.gmra.mxu0 %v2887_v13  ;;  %2691 = vmatmul.mubr.msk.bf16.gmra.mxu1 %vm988_vm0, %v2888_v14 }
  0xbe   : > { %1237 = vmatprep.mubr.bf16.mxu0 %v2889_v15  ;;  %2694 = vmatprep.mubr.msk.bf16.mxu1 %vm988_vm0, %v2891_v16 }
  0xc5   : > { %1238 = vmatmul.mubr.bf16.gmra.mxu0 %v2892_v17  ;;  %2695 = vmatmul.mubr.msk.bf16.gmra.mxu1 %vm988_vm0, %v2893_v18 }
  0xc6   : > { %1245 = vmatprep.mubr.bf16.mxu0 %v2894_v19  ;;  %2698 = vmatprep.mubr.msk.bf16.mxu1 %vm988_vm0, %v2896_v20 }
  0xcd   : > { %1246 = vmatmul.mubr.bf16.gmra.mxu0 %v2897_v21  ;;  %2699 = vmatmul.mubr.msk.bf16.gmra.mxu1 %vm988_vm0, %v2898_v22 }
  0xce   : > { %1253 = vmatprep.mubr.bf16.mxu0 %v2899_v23  ;;  %2702 = vmatprep.mubr.msk.bf16.mxu1 %vm988_vm0, %v2901_v24 }
  0xd5   : > { %1254 = vmatmul.mubr.bf16.gmra.mxu0 %v2902_v25  ;;  %2703 = vmatmul.mubr.msk.bf16.gmra.mxu1 %vm988_vm0, %v2903_v26 }
  0xd6   : > { %1261 = vmatprep.mubr.bf16.mxu0 %v2904_v27  ;;  %2706 = vmatprep.mubr.msk.bf16.mxu1 %vm988_vm0, %v2906_v28 }
  0xdd   : > { %1262 = vmatmul.mubr.bf16.gmra.mxu0 %v2907_v29  ;;  %2707 = vmatmul.mubr.msk.bf16.gmra.mxu1 %vm988_vm0, %v2908_v30 }
  0xde   : > { %1269 = vmatprep.mubr.bf16.mxu0 %v2909_v31  ;;  %2710 = vmatprep.mubr.msk.bf16.mxu1 %vm988_vm0, %v2911_v32 }
  0xe5   : > { %1270 = vmatmul.mubr.bf16.gmra.mxu0 %v2912_v33  ;;  %2711 = vmatmul.mubr.msk.bf16.gmra.mxu1 %vm988_vm0, %v2913_v34 }
  0xe6   : > { %1277 = vmatprep.mubr.bf16.mxu0 %v2914_v35  ;;  %2714 = vmatprep.mubr.msk.bf16.mxu1 %vm988_vm0, %v2916_v36 }
  0xed   : > { %1278 = vmatmul.mubr.bf16.gmra.mxu0 %v2917_v37  ;;  %2715 = vmatmul.mubr.msk.bf16.gmra.mxu1 %vm988_vm0, %v2918_v38 }
  0xee   : > { %1285 = vmatprep.mubr.bf16.mxu0 %v2919_v39  ;;  %2718 = vmatprep.mubr.msk.bf16.mxu1 %vm988_vm0, %v2921_v40 }
  0xf5   : > { %1286 = vmatmul.mubr.bf16.gmra.mxu0 %v2922_v41  ;;  %2719 = vmatmul.mubr.msk.bf16.gmra.mxu1 %vm988_vm0, %v2923_v42 }
  0xf6   : > { %1293 = vmatprep.mubr.bf16.mxu0 %v2924_v43  ;;  %2722 = vmatprep.mubr.msk.bf16.mxu1 %vm988_vm0, %v2926_v44 }
  0xfd   : > { %1294 = vmatmul.mubr.bf16.gmra.mxu0 %v2927_v45  ;;  %2723 = vmatmul.mubr.msk.bf16.gmra.mxu1 %vm988_vm0, %v2928_v46 }
  0xfe   : > { %1301 = vmatprep.mubr.bf16.mxu0 %v2929_v47  ;;  %2726 = vmatprep.mubr.msk.bf16.mxu1 %vm988_vm0, %v2931_v48 }
 0x105   : > { %1302 = vmatmul.mubr.bf16.gmra.mxu0 %v2932_v49  ;;  %2727 = vmatmul.mubr.msk.bf16.gmra.mxu1 %vm988_vm0, %v2933_v50 }
 0x10d   : > { %v3219_v51 = vpop.f32.mrf.mxu0  ;;  %v3221_v52 = vpop.f32.mrf.mxu1 }
 0x10f   : > { %v1121_v53 = vpop.f32.mrf.mxu0  ;;  %v1313_v54 = vpop.f32.mrf.mxu1 }
 0x110   : > { %v3282_v53 = vld [vmem:[%s3463_s2] ss:$0 sm:$0xff] }
 0x111   : > { %v3223_v55 = vpop.f32.mrf.mxu0  ;;  %v3225_v56 = vpop.f32.mrf.mxu1 }
 0x113   : > { %v1124_v57 = vpop.f32.mrf.mxu0  ;;  %v1316_v58 = vpop.f32.mrf.mxu1 }
 0x115   : > { %v1127_v59 = vpop.f32.mrf.mxu0  ;;  %v3227_v60 = vpop.f32.mrf.mxu1 }
 0x116   : > { %v1128_v58 = vadd.f32 %v3282_v53, %v1127_v59 }
 0x117   : > { %v1129_v61 = vpop.f32.mrf.mxu0  ;;  %v1321_v62 = vpop.f32.mrf.mxu1 }
 0x119   : > { %v1130_v63 = vpop.f32.mrf.mxu0  ;;  %v3229_v0 = vpop.f32.mrf.mxu1 }
 0x11b   : > { %v1132_v1 = vpop.f32.mrf.mxu0  ;;  %v1324_v2 = vpop.f32.mrf.mxu1 }
 0x11c   : > { %v1120_v1 = vadd.f32 %v3282_v53, %v3219_v51  ;;  %v1131_v2 = vadd.f32 %v3282_v53, %v1130_v63 }
 0x11d   : > { %v3231_v3 = vpop.f32.mrf.mxu0  ;;  %v3233_v4 = vpop.f32.mrf.mxu1 }
 0x11f   : > { %v1137_v5 = vpop.f32.mrf.mxu0  ;;  %v1329_v6 = vpop.f32.mrf.mxu1 }
 0x121   : > { %v3235_v7 = vpop.f32.mrf.mxu0  ;;  %v3237_v8 = vpop.f32.mrf.mxu1 }
 0x123   : > { %v1140_v9 = vpop.f32.mrf.mxu0  ;;  %v1332_v10 = vpop.f32.mrf.mxu1 }
 0x124   : > { %v1123_v10 = vadd.f32 %v3282_v53, %v3223_v55 }
 0x125   : > { %v3239_v11 = vpop.f32.mrf.mxu0  ;;  %v3241_v12 = vpop.f32.mrf.mxu1 }
 0x126   : > { %v1144_v55 = vadd.f32 %v3282_v53, %v3239_v11  ;;  %v1139_v11 = vadd.f32 %v3282_v53, %v3235_v7 }
 0x127   : > { %v1145_v13 = vpop.f32.mrf.mxu0  ;;  %v1337_v14 = vpop.f32.mrf.mxu1 }
 0x129   : > { %v3243_v15 = vpop.f32.mrf.mxu0  ;;  %v3245_v16 = vpop.f32.mrf.mxu1 }
 0x12b   : > { %v1148_v17 = vpop.f32.mrf.mxu0  ;;  %v1340_v18 = vpop.f32.mrf.mxu1 }
 0x12d   : > { %v3247_v19 = vpop.f32.mrf.mxu0  ;;  %v3249_v20 = vpop.f32.mrf.mxu1 }
 0x12f   : > { %v1153_v21 = vpop.f32.mrf.mxu0  ;;  %v1345_v22 = vpop.f32.mrf.mxu1 }
 0x131   : > { %v3251_v23 = vpop.f32.mrf.mxu0  ;;  %v3253_v24 = vpop.f32.mrf.mxu1 }
 0x133   : > { %v1156_v25 = vpop.f32.mrf.mxu0  ;;  %v1348_v26 = vpop.f32.mrf.mxu1 }
 0x135   : > { %v3255_v27 = vpop.f32.mrf.mxu0  ;;  %v3257_v28 = vpop.f32.mrf.mxu1 }
 0x137   : > { %v1161_v29 = vpop.f32.mrf.mxu0  ;;  %v1353_v30 = vpop.f32.mrf.mxu1 }
 0x139   : > { %v3259_v31 = vpop.f32.mrf.mxu0  ;;  %v3261_v32 = vpop.f32.mrf.mxu1 }
 0x13b   : > { %v1164_v33 = vpop.f32.mrf.mxu0  ;;  %v1356_v34 = vpop.f32.mrf.mxu1 }
 0x13c   : > { %v1136_v34 = vadd.f32 %v3282_v53, %v3231_v3 }
 0x13d   : > { %v3263_v35 = vpop.f32.mrf.mxu0  ;;  %v3265_v36 = vpop.f32.mrf.mxu1 }
 0x13f   : > { %v1169_v37 = vpop.f32.mrf.mxu0  ;;  %v1361_v38 = vpop.f32.mrf.mxu1 }
 0x140   : > { %v1147_v37 = vadd.f32 %v3282_v53, %v3243_v15 }
 0x141   : > { %v3267_v39 = vpop.f32.mrf.mxu0  ;;  %v3269_v40 = vpop.f32.mrf.mxu1 }
 0x143   : > { %v1172_v41 = vpop.f32.mrf.mxu0  ;;  %v1364_v42 = vpop.f32.mrf.mxu1 }
 0x145   : > { %v3271_v43 = vpop.f32.mrf.mxu0  ;;  %v3273_v44 = vpop.f32.mrf.mxu1 }
 0x147   : > { %v1177_v45 = vpop.f32.mrf.mxu0  ;;  %v1369_v46 = vpop.f32.mrf.mxu1 }
 0x149   : > { %v3275_v47 = vpop.f32.mrf.mxu0  ;;  %v3277_v48 = vpop.f32.mrf.mxu1 }
 0x14b   : > { %v1180_v49 = vpop.f32.mrf.mxu0  ;;  %v1372_v50 = vpop.f32.mrf.mxu1 }
 0x14d   : > { %v3284_v54 = vpop.f32.mrf.mxu0  ;;  %v2668_v57 = vpop.f32.mrf.mxu1 }
 0x14e   : > { %v1417_v5 = vadd.f32 %v2668_v57, %v1128_v58 }
 0x14f   : > { %v1185_v61 = vpop.f32.mrf.mxu0  ;;  %v1408_v62 = vpop.f32.mrf.mxu1 }
 0x150   : > { %v1409_v13 = vadd.f32 %v1408_v62, %v1120_v1  ;;  %v1665_v59 = vmax.f32 %v1417_v5, 0.0  ;;  %v1160_v1 = vadd.f32 %v3282_v53, %v3255_v27  ;;  %v1155_v27 = vadd.f32 %v3282_v53, %v3251_v23 }
 0x151   : > { %v3290_v6 = vpop.f32.mrf.mxu0  ;;  %v2669_v9 = vpop.f32.mrf.mxu1 }
 0x152   : > { %v1420_v14 = vadd.f32 %v2669_v9, %v1131_v2  ;;  %v1663_v25 = vmax.f32 %v1409_v13, 0.0  ;;  %v1152_v13 = vadd.f32 %v3282_v53, %v3247_v19 }
 0x153   : > { %v1188_v17 = vpop.f32.mrf.mxu0  ;;  %v1411_v18 = vpop.f32.mrf.mxu1 }
 0x154   : > { %v1666_v21 = vmax.f32 %v1420_v14, 0.0  ;;  %v1412_v22 = vadd.f32 %v1411_v18, %v1123_v10  ;;  %v1163_v14 = vadd.f32 %v3282_v53, %v3259_v31 }
 0x155   : > { %v3300_v51 = vpop.f32.mrf.mxu0  ;;  %v2672_v63 = vpop.f32.mrf.mxu1 }
 0x156   : > { %v2445_v26 = vpack.c.bf16 %v1666_v21, %v1665_v59  ;;  %v1664_v29 = vmax.f32 %v1412_v22, 0.0  ;;  %v1433_v41 = vadd.f32 %v2672_v63, %v1144_v55 }
 0x157   : > { %v1193_v30 = vpop.f32.mrf.mxu0  ;;  %v1424_v33 = vpop.f32.mrf.mxu1 }
 0x158   : > { %2597 = vst [vmem:[%s3298_s12 + $0x8] sm:$0xff] %v2445_v26   ;;  %v2440_v38 = vpack.c.bf16 %v1664_v29, %v1663_v25  ;;  %v1425_v46 = vadd.f32 %v1424_v33, %v1136_v34  ;;  %v1669_v58 = vmax.f32 %v1433_v41, 0.0  ;;  %v1176_v33 = vadd.f32 %v3282_v53, %v3271_v43 }
 0x159   : > { %v3309_v42 = vpop.f32.mrf.mxu0  ;;  %v2673_v45 = vpop.f32.mrf.mxu1 }
 0x15a   : > { %2441 = vst [vmem:[%s3298_s12] sm:$0xff] %v2440_v38   ;;  %v1436_v49 = vadd.f32 %v2673_v45, %v1147_v37  ;;  %v1667_v2 = vmax.f32 %v1425_v46, 0.0  ;;  %v1168_v45 = vadd.f32 %v3282_v53, %v3263_v35 }
 0x15b   : > { %v1196_v50 = vpop.f32.mrf.mxu0  ;;  %v1427_v57 = vpop.f32.mrf.mxu1 }
 0x15c   : > { %v1670_v3 = vmax.f32 %v1436_v49, 0.0  ;;  %v1428_v61 = vadd.f32 %v1427_v57, %v1139_v11  ;;  %v1179_v11 = vadd.f32 %v3282_v53, %v3275_v47 }
 0x15d   : > { %v3314_v62 = vpop.f32.mrf.mxu0  ;;  %v2676_v15 = vpop.f32.mrf.mxu1 }
 0x15e   : > { %v2455_v5 = vpack.c.bf16 %v1670_v3, %v1669_v58  ;;  %v1668_v9 = vmax.f32 %v1428_v61, 0.0  ;;  %v1449_v18 = vadd.f32 %v2676_v15, %v1160_v1  ;;  %v1171_v58 = vadd.f32 %v3282_v53, %v3267_v39 }
 0x15f   : > { %v1201_v7 = vpop.f32.mrf.mxu0  ;;  %v1440_v10 = vpop.f32.mrf.mxu1 }
 0x160   : > { %2599 = vst [vmem:[%s3298_s12 + $0x18] sm:$0xff] %v2455_v5   ;;  %v2450_v17 = vpack.c.bf16 %v1668_v9, %v1667_v2  ;;  %v1441_v22 = vadd.f32 %v1440_v10, %v1152_v13  ;;  %v1673_v26 = vmax.f32 %v1449_v18, 0.0  ;;  %v1192_v9 = vadd.f32 %v3282_v53, %v3300_v51 }
 0x161   : > { %v3323_v59 = vpop.f32.mrf.mxu0  ;;  %v2677_v21 = vpop.f32.mrf.mxu1  ;;  %v1195_v18 = vadd.f32 %v3282_v53, %v3309_v42 }
 0x162   : > { %2598 = vst [vmem:[%s3298_s12 + $0x10] sm:$0xff] %v2450_v17   ;;  %v1452_v63 = vadd.f32 %v2677_v21, %v1163_v14  ;;  %v1671_v34 = vmax.f32 %v1441_v22, 0.0  ;;  %v1184_v17 = vadd.f32 %v3282_v53, %v3284_v54 }
 0x163   : > { %v1204_v55 = vpop.f32.mrf.mxu0  ;;  %v1443_v25 = vpop.f32.mrf.mxu1 }
 0x164   : > { %v1674_v19 = vmax.f32 %v1452_v63, 0.0  ;;  %v1444_v29 = vadd.f32 %v1443_v25, %v1155_v27  ;;  %v1187_v55 = vadd.f32 %v3282_v53, %v3290_v6  ;;  %v1200_v6 = vadd.f32 %v3282_v53, %v3314_v62 }
 0x165   : > { %v1207_v30 = vpop.f32.mrf.mxu0  ;;  %v2680_v31 = vpop.f32.mrf.mxu1 }
 0x166   : > { %v2465_v37 = vpack.c.bf16 %v1674_v19, %v1673_v26  ;;  %v1672_v38 = vmax.f32 %v1444_v29, 0.0  ;;  %v1465_v49 = vadd.f32 %v2680_v31, %v1176_v33 }
 0x167   : > { %v1209_v41 = vpop.f32.mrf.mxu0  ;;  %v1456_v23 = vpop.f32.mrf.mxu1 }
 0x168   : > { %2601 = vst [vmem:[%s3298_s12 + $0x28] sm:$0xff] %v2465_v37   ;;  %v2460_v46 = vpack.c.bf16 %v1672_v38, %v1671_v34  ;;  %v1457_v43 = vadd.f32 %v1456_v23, %v1168_v45  ;;  %v1677_v1 = vmax.f32 %v1465_v49, 0.0  ;;  %v1208_v34 = vadd.f32 %v3282_v53, %v1207_v30 }
 0x169   : > { %v1210_v50 = vpop.f32.mrf.mxu0  ;;  %v2681_v57 = vpop.f32.mrf.mxu1 }
 0x16a   : > { %2600 = vst [vmem:[%s3298_s12 + $0x20] sm:$0xff] %v2460_v46   ;;  %v1468_v3 = vadd.f32 %v2681_v57, %v1179_v11  ;;  %v1675_v7 = vmax.f32 %v1457_v43, 0.0  ;;  %v1211_v11 = vadd.f32 %v3282_v53, %v1210_v50  ;;  %v1203_v43 = vadd.f32 %v3282_v53, %v3323_v59 }
 0x16b   : > { %v1212_v61 = vpop.f32.mrf.mxu0  ;;  %v1459_v15 = vpop.f32.mrf.mxu1 }
 0x16c   : > { %v1678_v2 = vmax.f32 %v1468_v3, 0.0  ;;  %v1460_v35 = vadd.f32 %v1459_v15, %v1171_v58 }
 0x16d   : > { %v1215_v5 = vpop.f32.mrf.mxu0  ;;  %v2684_v47 = vpop.f32.mrf.mxu1 }
 0x16e   : > { %v2475_v10 = vpack.c.bf16 %v1678_v2, %v1677_v1  ;;  %v1676_v13 = vmax.f32 %v1460_v35, 0.0  ;;  %v1481_v27 = vadd.f32 %v2684_v47, %v1192_v9  ;;  %v1216_v59 = vadd.f32 %v3282_v53, %v1215_v5 }
 0x16f   : > { %v1217_v14 = vpop.f32.mrf.mxu0  ;;  %v1472_v39 = vpop.f32.mrf.mxu1 }
 0x170   : > { %2603 = vst [vmem:[%s3298_s12 + $0x38] sm:$0xff] %v2475_v10   ;;  %v2470_v21 = vpack.c.bf16 %v1676_v13, %v1675_v7  ;;  %v1473_v51 = vadd.f32 %v1472_v39, %v1184_v17  ;;  %v1681_v29 = vmax.f32 %v1481_v27, 0.0 }
 0x171   : > { %v1218_v22 = vpop.f32.mrf.mxu0  ;;  %v2685_v63 = vpop.f32.mrf.mxu1 }
 0x172   : > { %2602 = vst [vmem:[%s3298_s12 + $0x30] sm:$0xff] %v2470_v21   ;;  %v1484_v25 = vadd.f32 %v2685_v63, %v1195_v18  ;;  %v1679_v37 = vmax.f32 %v1473_v51, 0.0  ;;  %v1219_v63 = vadd.f32 %v3282_v53, %v1218_v22 }
 0x173   : > { %v1220_v26 = vpop.f32.mrf.mxu0  ;;  %v1475_v19 = vpop.f32.mrf.mxu1 }
 0x174   : > { %v1682_v31 = vmax.f32 %v1484_v25, 0.0  ;;  %v1476_v54 = vadd.f32 %v1475_v19, %v1187_v55 }
 0x175   : > { %v1223_v33 = vpop.f32.mrf.mxu0  ;;  %v2688_v42 = vpop.f32.mrf.mxu1 }
 0x176   : > { %v2485_v38 = vpack.c.bf16 %v1682_v31, %v1681_v29  ;;  %v1680_v41 = vmax.f32 %v1476_v54, 0.0  ;;  %v1497_v49 = vadd.f32 %v2688_v42, %v1208_v34  ;;  %v1224_v47 = vadd.f32 %v3282_v53, %v1223_v33 }
 0x177   : > { %v1225_v23 = vpop.f32.mrf.mxu0  ;;  %v1488_v45 = vpop.f32.mrf.mxu1 }
 0x178   : > { %2605 = vst [vmem:[%s3298_s12 + $0x48] sm:$0xff] %v2485_v38   ;;  %v2480_v46 = vpack.c.bf16 %v1680_v41, %v1679_v37  ;;  %v1489_v30 = vadd.f32 %v1488_v45, %v1200_v6  ;;  %v1685_v1 = vmax.f32 %v1497_v49, 0.0 }
 0x179   : > { %v1226_v57 = vpop.f32.mrf.mxu0  ;;  %v2689_v58 = vpop.f32.mrf.mxu1 }
 0x17a   : > { %2604 = vst [vmem:[%s3298_s12 + $0x40] sm:$0xff] %v2480_v46   ;;  %v1500_v3 = vadd.f32 %v2689_v58, %v1211_v11  ;;  %v1683_v9 = vmax.f32 %v1489_v30, 0.0  ;;  %v1227_v39 = vadd.f32 %v3282_v53, %v1226_v57 }
 0x17b   : > { %v1228_v61 = vpop.f32.mrf.mxu0  ;;  %v1491_v15 = vpop.f32.mrf.mxu1 }
 0x17c   : > { %v1686_v2 = vmax.f32 %v1500_v3, 0.0  ;;  %v1492_v35 = vadd.f32 %v1491_v15, %v1203_v43 }
 0x17d   : > { %v1231_v62 = vpop.f32.mrf.mxu0  ;;  %v2692_v50 = vpop.f32.mrf.mxu1 }
 0x17e   : > { %v2495_v7 = vpack.c.bf16 %v1686_v2, %v1685_v1  ;;  %v1684_v10 = vmax.f32 %v1492_v35, 0.0  ;;  %v1513_v18 = vadd.f32 %v2692_v50, %v1224_v47  ;;  %v1232_v22 = vadd.f32 %v3282_v53, %v1231_v62 }
 0x17f   : > { %v1233_v13 = vpop.f32.mrf.mxu0  ;;  %v1504_v14 = vpop.f32.mrf.mxu1 }
 0x180   : > { %2607 = vst [vmem:[%s3298_s12 + $0x58] sm:$0xff] %v2495_v7   ;;  %v2490_v17 = vpack.c.bf16 %v1684_v10, %v1683_v9  ;;  %v1505_v55 = vadd.f32 %v1504_v14, %v1216_v59  ;;  %v1689_v19 = vmax.f32 %v1513_v18, 0.0 }
 0x181   : > { %v1234_v21 = vpop.f32.mrf.mxu0  ;;  %v2693_v27 = vpop.f32.mrf.mxu1 }
 0x182   : > { %2606 = vst [vmem:[%s3298_s12 + $0x50] sm:$0xff] %v2490_v17   ;;  %v1516_v51 = vadd.f32 %v2693_v27, %v1227_v39  ;;  %v1687_v33 = vmax.f32 %v1505_v55, 0.0  ;;  %v1235_v46 = vadd.f32 %v3282_v53, %v1234_v21 }
 0x183   : > { %v1236_v25 = vpop.f32.mrf.mxu0  ;;  %v1507_v26 = vpop.f32.mrf.mxu1 }
 0x184   : > { %v1690_v29 = vmax.f32 %v1516_v51, 0.0  ;;  %v1508_v31 = vadd.f32 %v1507_v26, %v1219_v63 }
 0x185   : > { %v1239_v5 = vpop.f32.mrf.mxu0  ;;  %v2696_v54 = vpop.f32.mrf.mxu1 }
 0x186   : > { %v2505_v42 = vpack.c.bf16 %v1690_v29, %v1689_v19  ;;  %v1688_v34 = vmax.f32 %v1508_v31, 0.0  ;;  %v1240_v37 = vadd.f32 %v3282_v53, %v1239_v5 }
 0x187   : > { %v1241_v38 = vpop.f32.mrf.mxu0  ;;  %v1520_v41 = vpop.f32.mrf.mxu1 }
 0x188   : > { %2609 = vst [vmem:[%s3298_s12 + $0x68] sm:$0xff] %v2505_v42   ;;  %v2500_v23 = vpack.c.bf16 %v1688_v34, %v1687_v33  ;;  %v1529_v45 = vadd.f32 %v2696_v54, %v1240_v37  ;;  %v1521_v49 = vadd.f32 %v1520_v41, %v1232_v22 }
 0x189   : > { %v1242_v6 = vpop.f32.mrf.mxu0  ;;  %v2697_v11 = vpop.f32.mrf.mxu1 }
 0x18a   : > { %2608 = vst [vmem:[%s3298_s12 + $0x60] sm:$0xff] %v2500_v23   ;;  %v1243_v57 = vadd.f32 %v3282_v53, %v1242_v6  ;;  %v1693_v61 = vmax.f32 %v1529_v45, 0.0  ;;  %v1691_v2 = vmax.f32 %v1521_v49, 0.0 }
 0x18b   : > { %v1244_v58 = vpop.f32.mrf.mxu0  ;;  %v1523_v43 = vpop.f32.mrf.mxu1 }
 0x18c   : > { %v1532_v30 = vadd.f32 %v2697_v11, %v1243_v57  ;;  %v1524_v3 = vadd.f32 %v1523_v43, %v1235_v46 }
 0x18d   : > { %v1247_v15 = vpop.f32.mrf.mxu0  ;;  %v2700_v1 = vpop.f32.mrf.mxu1 }
 0x18e   : > { %v1694_v35 = vmax.f32 %v1532_v30, 0.0  ;;  %v1692_v62 = vmax.f32 %v1524_v3, 0.0  ;;  %v1248_v50 = vadd.f32 %v3282_v53, %v1247_v15 }
 0x18f   : > { %v1249_v47 = vpop.f32.mrf.mxu0  ;;  %v1536_v9 = vpop.f32.mrf.mxu1 }
 0x190   : > { %v2515_v7 = vpack.c.bf16 %v1694_v35, %v1693_v61  ;;  %v2510_v10 = vpack.c.bf16 %v1692_v62, %v1691_v2  ;;  %v1537_v59 = vadd.f32 %v1536_v9, %v1248_v50 }
 0x191   : > { %v1250_v13 = vpop.f32.mrf.mxu0  ;;  %v2701_v14 = vpop.f32.mrf.mxu1 }
 0x192   : > { %2611 = vst [vmem:[%s3298_s12 + $0x78] sm:$0xff] %v2515_v7   ;;  %2610 = vst [vmem:[%s3298_s12 + $0x70] sm:$0xff] %v2510_v10   ;;  %v1251_v39 = vadd.f32 %v3282_v53, %v1250_v13  ;;  %v1695_v55 = vmax.f32 %v1537_v59, 0.0 }
 0x193   : > { %v1252_v17 = vpop.f32.mrf.mxu0  ;;  %v1539_v18 = vpop.f32.mrf.mxu1 }
 0x194   : > { %v1540_v21 = vadd.f32 %v1539_v18, %v1251_v39 }
 0x195   : > { %v1255_v27 = vpop.f32.mrf.mxu0  ;;  %v2704_v63 = vpop.f32.mrf.mxu1 }
 0x196   : > { %v1696_v51 = vmax.f32 %v1540_v21, 0.0  ;;  %v1256_v25 = vadd.f32 %v3282_v53, %v1255_v27  ;;  %v1320_v27 = vadd.f32 %v3282_v53, %v3227_v60  ;;  %v1315_v60 = vadd.f32 %v3282_v53, %v3225_v56 }
 0x197   : > { %v1257_v26 = vpop.f32.mrf.mxu0  ;;  %v1552_v19 = vpop.f32.mrf.mxu1 }
 0x198   : > { %v2520_v29 = vpack.c.bf16 %v1696_v51, %v1695_v55  ;;  %v1545_v54 = vadd.f32 %v2700_v1, %v1256_v25  ;;  %v1312_v26 = vadd.f32 %v3282_v53, %v3221_v52 }
 0x199   : > { %v1258_v31 = vpop.f32.mrf.mxu0  ;;  %v2705_v5 = vpop.f32.mrf.mxu1 }
 0x19a   : > { %2612 = vst [vmem:[%s3298_s12 + $0x80] sm:$0xff] %v2520_v29   ;;  %v1259_v33 = vadd.f32 %v3282_v53, %v1258_v31  ;;  %v1697_v22 = vmax.f32 %v1545_v54, 0.0  ;;  %v1323_v29 = vadd.f32 %v3282_v53, %v3229_v0 }
 0x19b   : > { %v1260_v42 = vpop.f32.mrf.mxu0  ;;  %v1555_v34 = vpop.f32.mrf.mxu1 }
 0x19c   : > { %v1548_v37 = vadd.f32 %v2701_v14, %v1259_v33 }
 0x19d   : > { %v1263_v38 = vpop.f32.mrf.mxu0  ;;  %v3375_v41 = vpop.f32.mrf.mxu1 }
 0x19e   : > { %v1698_v23 = vmax.f32 %v1548_v37, 0.0  ;;  %v1264_v45 = vadd.f32 %v3282_v53, %v1263_v38 }
 0x19f   : > { %v1265_v6 = vpop.f32.mrf.mxu0  ;;  %v1568_v11 = vpop.f32.mrf.mxu1 }
 0x1a0   : > { %v2525_v46 = vpack.c.bf16 %v1698_v23, %v1697_v22  ;;  %v1553_v58 = vadd.f32 %v1552_v19, %v1264_v45 }
 0x1a1   : > { %v1266_v49 = vpop.f32.mrf.mxu0  ;;  %v3378_v57 = vpop.f32.mrf.mxu1 }
 0x1a2   : > { %2613 = vst [vmem:[%s3298_s12 + $0x88] sm:$0xff] %v2525_v46   ;;  %v1267_v43 = vadd.f32 %v3282_v53, %v1266_v49  ;;  %v1699_v2 = vmax.f32 %v1553_v58, 0.0 }
 0x1a3   : > { %v1268_v30 = vpop.f32.mrf.mxu0  ;;  %v1571_v3 = vpop.f32.mrf.mxu1 }
 0x1a4   : > { %v1556_v61 = vadd.f32 %v1555_v34, %v1267_v43 }
 0x1a5   : > { %v1271_v15 = vpop.f32.mrf.mxu0  ;;  %v3382_v1 = vpop.f32.mrf.mxu1 }
 0x1a6   : > { %v1700_v35 = vmax.f32 %v1556_v61, 0.0  ;;  %v1272_v62 = vadd.f32 %v3282_v53, %v1271_v15 }
 0x1a7   : > { %v1273_v50 = vpop.f32.mrf.mxu0  ;;  %v3385_v47 = vpop.f32.mrf.mxu1 }
 0x1a8   : > { %v2530_v9 = vpack.c.bf16 %v1700_v35, %v1699_v2  ;;  %v1561_v13 = vadd.f32 %v2704_v63, %v1272_v62  ;;  %v1339_v62 = vadd.f32 %v3282_v53, %v3245_v16 }
 0x1a9   : > { %v1274_v7 = vpop.f32.mrf.mxu0  ;;  %v3387_v10 = vpop.f32.mrf.mxu1 }
 0x1aa   : > { %2614 = vst [vmem:[%s3298_s12 + $0x90] sm:$0xff] %v2530_v9   ;;  %v1275_v14 = vadd.f32 %v3282_v53, %v1274_v7  ;;  %v1701_v55 = vmax.f32 %v1561_v13, 0.0 }
 0x1ab   : > { %v1276_v59 = vpop.f32.mrf.mxu0  ;;  %v3391_v39 = vpop.f32.mrf.mxu1 }
 0x1ac   : > { %v1564_v17 = vadd.f32 %v2705_v5, %v1275_v14 }
 0x1ad   : > { %v1279_v18 = vpop.f32.mrf.mxu0  ;;  %v2716_v21 = vpop.f32.mrf.mxu1 }
 0x1ae   : > { %v1702_v51 = vmax.f32 %v1564_v17, 0.0  ;;  %v1280_v25 = vadd.f32 %v3282_v53, %v1279_v18  ;;  %v1609_v5 = vadd.f32 %v2716_v21, %v1320_v27  ;;  %v1331_v17 = vadd.f32 %v3282_v53, %v3237_v8 }
 0x1af   : > { %v1281_v63 = vpop.f32.mrf.mxu0  ;;  %v1600_v19 = vpop.f32.mrf.mxu1 }
 0x1b0   : > { %v2535_v31 = vpack.c.bf16 %v1702_v51, %v1701_v55  ;;  %v1569_v54 = vadd.f32 %v1568_v11, %v1280_v25  ;;  %v1601_v33 = vadd.f32 %v1600_v19, %v1312_v26  ;;  %v1713_v23 = vmax.f32 %v1609_v5, 0.0 }
 0x1b1   : > { %v1282_v42 = vpop.f32.mrf.mxu0  ;;  %v2717_v34 = vpop.f32.mrf.mxu1  ;;  %v1336_v11 = vadd.f32 %v3282_v53, %v3241_v12 }
 0x1b2   : > { %2615 = vst [vmem:[%s3298_s12 + $0x98] sm:$0xff] %v2535_v31   ;;  %v1283_v37 = vadd.f32 %v3282_v53, %v1282_v42  ;;  %v1612_v38 = vadd.f32 %v2717_v34, %v1323_v29  ;;  %v1703_v46 = vmax.f32 %v1569_v54, 0.0  ;;  %v1711_v49 = vmax.f32 %v1601_v33, 0.0 }
 0x1b3   : > { %v1284_v22 = vpop.f32.mrf.mxu0  ;;  %v1603_v52 = vpop.f32.mrf.mxu1  ;;  %v1355_v34 = vadd.f32 %v3282_v53, %v3261_v32 }
 0x1b4   : > { %v1572_v45 = vadd.f32 %v1571_v3, %v1283_v37  ;;  %v1714_v6 = vmax.f32 %v1612_v38, 0.0  ;;  %v1604_v0 = vadd.f32 %v1603_v52, %v1315_v60  ;;  %v1328_v3 = vadd.f32 %v3282_v53, %v3233_v4 }
 0x1b5   : > { %v1287_v58 = vpop.f32.mrf.mxu0  ;;  %v2720_v43 = vpop.f32.mrf.mxu1 }
 0x1b6   : > { %v1704_v30 = vmax.f32 %v1572_v45, 0.0  ;;  %v2565_v56 = vpack.c.bf16 %v1714_v6, %v1713_v23  ;;  %v1712_v61 = vmax.f32 %v1604_v0, 0.0  ;;  %v1288_v15 = vadd.f32 %v3282_v53, %v1287_v58 }
 0x1b7   : > { %v1289_v2 = vpop.f32.mrf.mxu0  ;;  %v1616_v35 = vpop.f32.mrf.mxu1  ;;  %v1625_v9 = vadd.f32 %v2720_v43, %v1336_v11  ;;  %v1347_v45 = vadd.f32 %v3282_v53, %v3253_v24 }
 0x1b8   : > { %v2540_v12 = vpack.c.bf16 %v1704_v30, %v1703_v46  ;;  %2621 = vst [vmem:[%s3298_s12 + $0xc8] sm:$0xff] %v2565_v56   ;;  %v2560_v50 = vpack.c.bf16 %v1712_v61, %v1711_v49  ;;  %v1577_v7 = vadd.f32 %v3375_v41, %v1288_v15  ;;  %v1617_v13 = vadd.f32 %v1616_v35, %v1328_v3 }
 0x1b9   : > { %v1290_v14 = vpop.f32.mrf.mxu0  ;;  %v2721_v59 = vpop.f32.mrf.mxu1  ;;  %v1717_v16 = vmax.f32 %v1625_v9, 0.0  ;;  %v1352_v41 = vadd.f32 %v3282_v53, %v3257_v28 }
 0x1ba   : > { %2616 = vst [vmem:[%s3298_s12 + $0xa0] sm:$0xff] %v2540_v12   ;;  %2620 = vst [vmem:[%s3298_s12 + $0xc0] sm:$0xff] %v2560_v50   ;;  %v1291_v4 = vadd.f32 %v3282_v53, %v1290_v14  ;;  %v1628_v18 = vadd.f32 %v2721_v59, %v1339_v62  ;;  %v1705_v26 = vmax.f32 %v1577_v7, 0.0  ;;  %v1715_v63 = vmax.f32 %v1617_v13, 0.0 }
 0x1bb   : > { %v1292_v21 = vpop.f32.mrf.mxu0  ;;  %v1619_v27 = vpop.f32.mrf.mxu1  ;;  %v1371_v12 = vadd.f32 %v3282_v53, %v3277_v48  ;;  %v1363_v59 = vadd.f32 %v3282_v53, %v3269_v40 }
 0x1bc   : > { %v1580_v55 = vadd.f32 %v3378_v57, %v1291_v4  ;;  %v1718_v51 = vmax.f32 %v1628_v18, 0.0  ;;  %v1620_v25 = vadd.f32 %v1619_v27, %v1331_v17  ;;  %v1344_v57 = vadd.f32 %v3282_v53, %v3249_v20 }
 0x1bd   : > { %v1295_v19 = vpop.f32.mrf.mxu0  ;;  %v2724_v8 = vpop.f32.mrf.mxu1 }
 0x1be   : > { %v1706_v29 = vmax.f32 %v1580_v55, 0.0  ;;  %v2575_v31 = vpack.c.bf16 %v1718_v51, %v1717_v16  ;;  %v1716_v5 = vmax.f32 %v1620_v25, 0.0  ;;  %v1296_v54 = vadd.f32 %v3282_v53, %v1295_v19 }
 0x1bf   : > { %v1297_v33 = vpop.f32.mrf.mxu0  ;;  %v1632_v42 = vpop.f32.mrf.mxu1  ;;  %v1641_v37 = vadd.f32 %v2724_v8, %v1352_v41 }
 0x1c0   : > { %v2545_v28 = vpack.c.bf16 %v1706_v29, %v1705_v26  ;;  %2623 = vst [vmem:[%s3298_s12 + $0xd8] sm:$0xff] %v2575_v31   ;;  %v2570_v60 = vpack.c.bf16 %v1716_v5, %v1715_v63  ;;  %v1585_v38 = vadd.f32 %v3385_v47, %v1296_v54  ;;  %v1633_v22 = vadd.f32 %v1632_v42, %v1344_v57 }
 0x1c1   : > { %v1298_v52 = vpop.f32.mrf.mxu0  ;;  %v2725_v23 = vpop.f32.mrf.mxu1  ;;  %v1721_v32 = vmax.f32 %v1641_v37, 0.0  ;;  %v1368_v47 = vadd.f32 %v3282_v53, %v3273_v44 }
 0x1c2   : > { %2617 = vst [vmem:[%s3298_s12 + $0xa8] sm:$0xff] %v2545_v28   ;;  %2622 = vst [vmem:[%s3298_s12 + $0xd0] sm:$0xff] %v2570_v60   ;;  %v1299_v20 = vadd.f32 %v3282_v53, %v1298_v52  ;;  %v1644_v6 = vadd.f32 %v2725_v23, %v1355_v34  ;;  %v1707_v43 = vmax.f32 %v1585_v38, 0.0  ;;  %v1719_v30 = vmax.f32 %v1633_v22, 0.0 }
 0x1c3   : > { %v1300_v0 = vpop.f32.mrf.mxu0  ;;  %v1635_v11 = vpop.f32.mrf.mxu1 }
 0x1c4   : > { %v1588_v46 = vadd.f32 %v3391_v39, %v1299_v20  ;;  %v1722_v49 = vmax.f32 %v1644_v6, 0.0  ;;  %v1636_v58 = vadd.f32 %v1635_v11, %v1347_v45  ;;  %v1360_v39 = vadd.f32 %v3282_v53, %v3265_v36 }
 0x1c5   : > { %v1303_v56 = vpop.f32.mrf.mxu0  ;;  %v2728_v24 = vpop.f32.mrf.mxu1 }
 0x1c6   : > { %v1708_v61 = vmax.f32 %v1588_v46, 0.0  ;;  %v2585_v15 = vpack.c.bf16 %v1722_v49, %v1721_v32  ;;  %v1720_v3 = vmax.f32 %v1636_v58, 0.0  ;;  %v1304_v2 = vadd.f32 %v3282_v53, %v1303_v56 }
 0x1c7   : > { %v1305_v35 = vpop.f32.mrf.mxu0  ;;  %v1648_v62 = vpop.f32.mrf.mxu1  ;;  %v1657_v9 = vadd.f32 %v2728_v24, %v1368_v47 }
 0x1c8   : > { %v2550_v44 = vpack.c.bf16 %v1708_v61, %v1707_v43  ;;  %2625 = vst [vmem:[%s3298_s12 + $0xe8] sm:$0xff] %v2585_v15   ;;  %v2580_v50 = vpack.c.bf16 %v1720_v3, %v1719_v30  ;;  %v1593_v7 = vadd.f32 %v3382_v1, %v1304_v2  ;;  %v1649_v36 = vadd.f32 %v1648_v62, %v1360_v39 }
 0x1c9   : > { %v1306_v13 = vpop.f32.mrf.mxu0  ;;  %v2729_v14 = vpop.f32.mrf.mxu1  ;;  %v1725_v21 = vmax.f32 %v1657_v9, 0.0 }
 0x1ca   : > { %2618 = vst [vmem:[%s3298_s12 + $0xb0] sm:$0xff] %v2550_v44   ;;  %2624 = vst [vmem:[%s3298_s12 + $0xe0] sm:$0xff] %v2580_v50   ;;  %v1307_v17 = vadd.f32 %v3282_v53, %v1306_v13  ;;  %v1660_v4 = vadd.f32 %v2729_v14, %v1371_v12  ;;  %v1709_v55 = vmax.f32 %v1593_v7, 0.0  ;;  %v1723_v51 = vmax.f32 %v1649_v36, 0.0 }
 0x1cb   : > { %v1308_v48 = vpop.f32.mrf.mxu0  ;;  %v1651_v18 = vpop.f32.mrf.mxu1 }
 0x1cc   : > { %v1596_v27 = vadd.f32 %v3387_v10, %v1307_v17  ;;  %v1726_v1 = vmax.f32 %v1660_v4, 0.0  ;;  %v1652_v16 = vadd.f32 %v1651_v18, %v1363_v59 }
 0x1ce   : > { %v1710_v25 = vmax.f32 %v1596_v27, 0.0  ;;  %v2595_v40 = vpack.c.bf16 %v1726_v1, %v1725_v21  ;;  %v1724_v41 = vmax.f32 %v1652_v16, 0.0 }
 0x1d0   : > { %v2555_v26 = vpack.c.bf16 %v1710_v25, %v1709_v55  ;;  %2627 = vst [vmem:[%s3298_s12 + $0xf8] sm:$0xff] %v2595_v40   ;;  %v2590_v63 = vpack.c.bf16 %v1724_v41, %v1723_v51 }
 0x1d2   : > { %2619 = vst [vmem:[%s3298_s12 + $0xb8] sm:$0xff] %v2555_v26   ;;  %2626 = vst [vmem:[%s3298_s12 + $0xf0] sm:$0xff] %v2590_v63  }
 0x1d3 PF: > { %s13_s14 = sadd.s32 1, %s2956_s14   ;;  %s3465_s12 = smov %s2952_s13 }
 0x1d4   : > { %p10_p5 = scmp.ge.s32.totalorder %s13_s14, 49   ;;  %s3466_s13 = smov %s3468_s15 }
 0x1d6   :  { %12 = sbr.rel (!%p10_p5) target bundleno = 2 (0x2), region = 68 }

// kernel: my_model_forward.11
= control target key start
LH: loop header
LB: loop body
LE: loop exit
PB: predicated region body
PF: predicated region fallthrough
CT: control target
= control target key end

     0   :  { %s1152_s15 = smov 0   ;;  %s1483_s0 = inlined_call_operand.vmem [shape: bf16[3072,128], index: 0, kind: input, shape index: {}]   ;;  %s1484_s1 = inlined_call_operand.vmem [shape: bf16[3072,128], index: 1, kind: input, shape index: {}]   ;;  %s1485_s2 = inlined_call_operand.vmem [shape: bf16[3072,128], index: 2, kind: input, shape index: {}]   ;;  %s1486_s3 = inlined_call_operand.vmem [shape: bf16[3072,128], index: 3, kind: input, shape index: {}]   ;;  %s1487_s4 = inlined_call_operand.vmem [shape: bf16[3072,128], index: 4, kind: output, shape index: {}]  }
   0x1 LB: > { %s871_s16 = sadd.s32 4294967295, %s1125_s15   ;;  %p875_p0 = scmp.ge.s32.totalorder %s1125_s15, 1  ;;  %s1125_s15 = sphi %s1152_s15, %s14_s15  }
   0x2   : > { %p196_p1 = scmp.lt.s32.totalorder %s1125_s15, 7 }
   0x4   : > { %p197_p2 = pnand %p875_p0, %p196_p1 }
   0x5   : > { %s876_s17 = sshll.u32 (!%p197_p2), %s871_s16, 6 }
   0x6   : > { %200 = sbr.rel (%p197_p2) target bundleno = 117 (0x75), region = 36  ;;  %p238_p3 = scmp.lt.s32.totalorder (!%p197_p2), %s876_s17, 383 }
   0xb   : > { %s1489_s17 = smov (!%p238_p3, %s876_s17), 383 }
   0xc   : > { %s1160_s18 = sshll.u32 %s1489_s17, 2 }
   0xd   : > { %s1166_s21 = scalar_lea.vmem %s1483_s0, %s1160_s18  ;;  %s1172_s24 = scalar_lea.vmem %s1484_s1, %s1160_s18 }
   0xe   : > { %s1178_s27 = scalar_lea.vmem %s1485_s2, %s1160_s18  ;;  %s1184_s30 = scalar_lea.vmem %s1486_s3, %s1160_s18  ;;  %v267_v0 = vld [vmem:[%s1166_s21] sm:$0xf]  ;;  %v268_v1 = vld [vmem:[%s1166_s21 + $0x4] sm:$0xf]  ;;  %v269_v10 = vld [vmem:[%s1166_s21 + $0x8] sm:$0xf] }
   0xf   : > { %v331_v2 = vld [vmem:[%s1172_s24] sm:$0xf]  ;;  %v332_v3 = vld [vmem:[%s1172_s24 + $0x4] sm:$0xf]  ;;  %v270_v13 = vld [vmem:[%s1166_s21 + $0xc] sm:$0xf]  ;;  %s1208_s7 = scalar_lea.vmem %s1487_s4, %s1160_s18 }
  0x10   : > { %v395_v4 = vmax.bf16 %v331_v2, %v267_v0  ;;  %v459_v5 = vld [vmem:[%s1178_s27] sm:$0xf]  ;;  %v460_v6 = vld [vmem:[%s1178_s27 + $0x4] sm:$0xf]  ;;  %v396_v7 = vmax.bf16 %v332_v3, %v268_v1  ;;  %v333_v14 = vld [vmem:[%s1172_s24 + $0x8] sm:$0xf] }
  0x11   : > { %v523_v8 = vld [vmem:[%s1184_s30] sm:$0xf]  ;;  %v524_v9 = vld [vmem:[%s1184_s30 + $0x4] sm:$0xf]  ;;  %v334_v15 = vld [vmem:[%s1172_s24 + $0xc] sm:$0xf]  ;;  %v397_v16 = vmax.bf16 %v333_v14, %v269_v10 }
  0x12   : > { %v587_v11 = vmax.bf16 %v523_v8, %v459_v5  ;;  %v588_v12 = vmax.bf16 %v524_v9, %v460_v6  ;;  %v398_v17 = vmax.bf16 %v334_v15, %v270_v13  ;;  %v461_v18 = vld [vmem:[%s1178_s27 + $0x8] sm:$0xf]  ;;  %v462_v19 = vld [vmem:[%s1178_s27 + $0xc] sm:$0xf]  ;;  %v271_v25 = vld [vmem:[%s1166_s21 + $0x10] sm:$0xf] }
  0x13   : > { %v525_v20 = vld [vmem:[%s1184_s30 + $0x8] sm:$0xf]  ;;  %v526_v23 = vld [vmem:[%s1184_s30 + $0xc] sm:$0xf]  ;;  %v272_v26 = vld [vmem:[%s1166_s21 + $0x14] sm:$0xf] }
  0x14   : > { %v651_v21 = vmax.bf16 %v587_v11, %v395_v4  ;;  %v652_v22 = vmax.bf16 %v588_v12, %v396_v7  ;;  %v589_v24 = vmax.bf16 %v525_v20, %v461_v18  ;;  %v590_v27 = vmax.bf16 %v526_v23, %v462_v19  ;;  %v335_v28 = vld [vmem:[%s1172_s24 + $0x10] sm:$0xf]  ;;  %v336_v29 = vld [vmem:[%s1172_s24 + $0x14] sm:$0xf]  ;;  %v273_v41 = vld [vmem:[%s1166_s21 + $0x18] sm:$0xf] }
  0x15   : > { %v463_v30 = vld [vmem:[%s1178_s27 + $0x10] sm:$0xf]  ;;  %v399_v33 = vmax.bf16 %v335_v28, %v271_v25  ;;  %v400_v34 = vmax.bf16 %v336_v29, %v272_v26  ;;  %v464_v35 = vld [vmem:[%s1178_s27 + $0x14] sm:$0xf]  ;;  %v274_v42 = vld [vmem:[%s1166_s21 + $0x1c] sm:$0xf] }
  0x16   : > { %v1048_v31 = vcombine.low %v651_v21, %v652_v22  ;;  %v653_v32 = vmax.bf16 %v589_v24, %v397_v16  ;;  %v527_v36 = vld [vmem:[%s1184_s30 + $0x10] sm:$0xf]  ;;  %v528_v37 = vld [vmem:[%s1184_s30 + $0x14] sm:$0xf]  ;;  %v654_v38 = vmax.bf16 %v590_v27, %v398_v17  ;;  %v337_v43 = vld [vmem:[%s1172_s24 + $0x18] sm:$0xf] }
  0x17   : > { %v591_v39 = vmax.bf16 %v527_v36, %v463_v30  ;;  %v592_v40 = vmax.bf16 %v528_v37, %v464_v35  ;;  %v338_v44 = vld [vmem:[%s1172_s24 + $0x1c] sm:$0xf]  ;;  %v401_v45 = vmax.bf16 %v337_v43, %v273_v41  ;;  %v465_v46 = vld [vmem:[%s1178_s27 + $0x18] sm:$0xf]  ;;  %v275_v54 = vld [vmem:[%s1166_s21 + $0x20] sm:$0xf] }
  0x18   : > { %892 = vst [vmem:[%s1208_s7] sm:$0xff] %v1048_v31   ;;  %v466_v47 = vld [vmem:[%s1178_s27 + $0x1c] sm:$0xf]  ;;  %v1049_v48 = vcombine.low %v653_v32, %v654_v38  ;;  %v402_v51 = vmax.bf16 %v338_v44, %v274_v42  ;;  %v529_v52 = vld [vmem:[%s1184_s30 + $0x18] sm:$0xf]  ;;  %v276_v57 = vld [vmem:[%s1166_s21 + $0x24] sm:$0xf] }
  0x19   : > { %v655_v49 = vmax.bf16 %v591_v39, %v399_v33  ;;  %v656_v50 = vmax.bf16 %v592_v40, %v400_v34  ;;  %v530_v53 = vld [vmem:[%s1184_s30 + $0x1c] sm:$0xf]  ;;  %v593_v55 = vmax.bf16 %v529_v52, %v465_v46  ;;  %v339_v58 = vld [vmem:[%s1172_s24 + $0x20] sm:$0xf]  ;;  %v340_v59 = vld [vmem:[%s1172_s24 + $0x24] sm:$0xf] }
  0x1a   : > { %v594_v56 = vmax.bf16 %v530_v53, %v466_v47  ;;  %1050 = vst [vmem:[%s1208_s7 + $0x8] sm:$0xff] %v1049_v48   ;;  %v403_v61 = vmax.bf16 %v339_v58, %v275_v54  ;;  %v404_v62 = vmax.bf16 %v340_v59, %v276_v57  ;;  %v467_v63 = vld [vmem:[%s1178_s27 + $0x20] sm:$0xf]  ;;  %v468_v0 = vld [vmem:[%s1178_s27 + $0x24] sm:$0xf] }
  0x1b   : > { %v1051_v60 = vcombine.low %v655_v49, %v656_v50  ;;  %v531_v1 = vld [vmem:[%s1184_s30 + $0x20] sm:$0xf]  ;;  %v657_v2 = vmax.bf16 %v593_v55, %v401_v45  ;;  %v532_v4 = vld [vmem:[%s1184_s30 + $0x24] sm:$0xf]  ;;  %v277_v6 = vld [vmem:[%s1166_s21 + $0x28] sm:$0xf] }
  0x1c   : > { %v658_v3 = vmax.bf16 %v594_v56, %v402_v51  ;;  %v595_v5 = vmax.bf16 %v531_v1, %v467_v63  ;;  %v278_v7 = vld [vmem:[%s1166_s21 + $0x2c] sm:$0xf]  ;;  %v596_v8 = vmax.bf16 %v532_v4, %v468_v0  ;;  %v341_v9 = vld [vmem:[%s1172_s24 + $0x28] sm:$0xf]  ;;  %v279_v22 = vld [vmem:[%s1166_s21 + $0x30] sm:$0xf] }
  0x1d   : > { %1052 = vst [vmem:[%s1208_s7 + $0x10] sm:$0xff] %v1051_v60   ;;  %v342_v10 = vld [vmem:[%s1172_s24 + $0x2c] sm:$0xf]  ;;  %v469_v11 = vld [vmem:[%s1178_s27 + $0x28] sm:$0xf]  ;;  %v405_v14 = vmax.bf16 %v341_v9, %v277_v6 }
  0x1e   : > { %v1053_v12 = vcombine.low %v657_v2, %v658_v3  ;;  %v659_v13 = vmax.bf16 %v595_v5, %v403_v61  ;;  %v406_v15 = vmax.bf16 %v342_v10, %v278_v7  ;;  %v470_v16 = vld [vmem:[%s1178_s27 + $0x2c] sm:$0xf]  ;;  %v533_v17 = vld [vmem:[%s1184_s30 + $0x28] sm:$0xf]  ;;  %v660_v19 = vmax.bf16 %v596_v8, %v404_v62  ;;  %v280_v23 = vld [vmem:[%s1166_s21 + $0x34] sm:$0xf] }
  0x1f   : > { %v534_v18 = vld [vmem:[%s1184_s30 + $0x2c] sm:$0xf]  ;;  %v597_v20 = vmax.bf16 %v533_v17, %v469_v11  ;;  %v343_v24 = vld [vmem:[%s1172_s24 + $0x30] sm:$0xf]  ;;  %v344_v25 = vld [vmem:[%s1172_s24 + $0x34] sm:$0xf] }
  0x20   : > { %v598_v21 = vmax.bf16 %v534_v18, %v470_v16  ;;  %1054 = vst [vmem:[%s1208_s7 + $0x18] sm:$0xff] %v1053_v12   ;;  %v407_v26 = vmax.bf16 %v343_v24, %v279_v22  ;;  %v471_v27 = vld [vmem:[%s1178_s27 + $0x30] sm:$0xf]  ;;  %v472_v28 = vld [vmem:[%s1178_s27 + $0x34] sm:$0xf]  ;;  %v1055_v29 = vcombine.low %v659_v13, %v660_v19  ;;  %v408_v32 = vmax.bf16 %v344_v25, %v280_v23 }
  0x21   : > { %v661_v30 = vmax.bf16 %v597_v20, %v405_v14  ;;  %v535_v33 = vld [vmem:[%s1184_s30 + $0x30] sm:$0xf]  ;;  %v536_v34 = vld [vmem:[%s1184_s30 + $0x34] sm:$0xf]  ;;  %v281_v35 = vld [vmem:[%s1166_s21 + $0x38] sm:$0xf] }
  0x22   : > { %v662_v31 = vmax.bf16 %v598_v21, %v406_v15  ;;  %v599_v36 = vmax.bf16 %v535_v33, %v471_v27  ;;  %v600_v37 = vmax.bf16 %v536_v34, %v472_v28  ;;  %v282_v38 = vld [vmem:[%s1166_s21 + $0x3c] sm:$0xf]  ;;  %v345_v39 = vld [vmem:[%s1172_s24 + $0x38] sm:$0xf]  ;;  %1056 = vst [vmem:[%s1208_s7 + $0x20] sm:$0xff] %v1055_v29  }
  0x23   : > { %v346_v40 = vld [vmem:[%s1172_s24 + $0x3c] sm:$0xf]  ;;  %v409_v42 = vmax.bf16 %v345_v39, %v281_v35  ;;  %v473_v44 = vld [vmem:[%s1178_s27 + $0x38] sm:$0xf]  ;;  %v283_v51 = vld [vmem:[%s1166_s21 + $0x40] sm:$0xf] }
  0x24   : > { %v1057_v41 = vcombine.low %v661_v30, %v662_v31  ;;  %v410_v43 = vmax.bf16 %v346_v40, %v282_v38  ;;  %v474_v45 = vld [vmem:[%s1178_s27 + $0x3c] sm:$0xf]  ;;  %v537_v46 = vld [vmem:[%s1184_s30 + $0x38] sm:$0xf]  ;;  %v663_v47 = vmax.bf16 %v599_v36, %v407_v26  ;;  %v664_v48 = vmax.bf16 %v600_v37, %v408_v32  ;;  %v284_v52 = vld [vmem:[%s1166_s21 + $0x44] sm:$0xf] }
  0x25   : > { %v538_v49 = vld [vmem:[%s1184_s30 + $0x3c] sm:$0xf]  ;;  %v601_v50 = vmax.bf16 %v537_v46, %v473_v44  ;;  %v347_v54 = vld [vmem:[%s1172_s24 + $0x40] sm:$0xf]  ;;  %v348_v55 = vld [vmem:[%s1172_s24 + $0x44] sm:$0xf] }
  0x26   : > { %1058 = vst [vmem:[%s1208_s7 + $0x28] sm:$0xff] %v1057_v41   ;;  %v602_v53 = vmax.bf16 %v538_v49, %v474_v45  ;;  %v475_v56 = vld [vmem:[%s1178_s27 + $0x40] sm:$0xf]  ;;  %v1059_v57 = vcombine.low %v663_v47, %v664_v48  ;;  %v411_v59 = vmax.bf16 %v347_v54, %v283_v51  ;;  %v412_v60 = vmax.bf16 %v348_v55, %v284_v52  ;;  %v476_v61 = vld [vmem:[%s1178_s27 + $0x44] sm:$0xf] }
  0x27   : > { %v665_v58 = vmax.bf16 %v601_v50, %v409_v42  ;;  %v539_v62 = vld [vmem:[%s1184_s30 + $0x40] sm:$0xf]  ;;  %v540_v63 = vld [vmem:[%s1184_s30 + $0x44] sm:$0xf]  ;;  %v285_v3 = vld [vmem:[%s1166_s21 + $0x48] sm:$0xf] }
  0x28   : > { %v666_v0 = vmax.bf16 %v602_v53, %v410_v43  ;;  %v603_v1 = vmax.bf16 %v539_v62, %v475_v56  ;;  %v604_v2 = vmax.bf16 %v540_v63, %v476_v61  ;;  %v286_v4 = vld [vmem:[%s1166_s21 + $0x4c] sm:$0xf]  ;;  %v349_v5 = vld [vmem:[%s1172_s24 + $0x48] sm:$0xf]  ;;  %1060 = vst [vmem:[%s1208_s7 + $0x30] sm:$0xff] %v1059_v57  }
  0x29   : > { %v350_v6 = vld [vmem:[%s1172_s24 + $0x4c] sm:$0xf]  ;;  %v413_v7 = vmax.bf16 %v349_v5, %v285_v3  ;;  %v477_v8 = vld [vmem:[%s1178_s27 + $0x48] sm:$0xf]  ;;  %v287_v16 = vld [vmem:[%s1166_s21 + $0x50] sm:$0xf] }
  0x2a   : > { %v478_v9 = vld [vmem:[%s1178_s27 + $0x4c] sm:$0xf]  ;;  %v1061_v10 = vcombine.low %v665_v58, %v666_v0  ;;  %v667_v11 = vmax.bf16 %v603_v1, %v411_v59  ;;  %v668_v12 = vmax.bf16 %v604_v2, %v412_v60  ;;  %v414_v13 = vmax.bf16 %v350_v6, %v286_v4  ;;  %v541_v14 = vld [vmem:[%s1184_s30 + $0x48] sm:$0xf]  ;;  %v288_v19 = vld [vmem:[%s1166_s21 + $0x54] sm:$0xf] }
  0x2b   : > { %v542_v15 = vld [vmem:[%s1184_s30 + $0x4c] sm:$0xf]  ;;  %v605_v17 = vmax.bf16 %v541_v14, %v477_v8  ;;  %v351_v20 = vld [vmem:[%s1172_s24 + $0x50] sm:$0xf]  ;;  %v352_v21 = vld [vmem:[%s1172_s24 + $0x54] sm:$0xf] }
  0x2c   : > { %v606_v18 = vmax.bf16 %v542_v15, %v478_v9  ;;  %1062 = vst [vmem:[%s1208_s7 + $0x38] sm:$0xff] %v1061_v10   ;;  %v1063_v22 = vcombine.low %v667_v11, %v668_v12  ;;  %v415_v23 = vmax.bf16 %v351_v20, %v287_v16  ;;  %v416_v24 = vmax.bf16 %v352_v21, %v288_v19  ;;  %v479_v25 = vld [vmem:[%s1178_s27 + $0x50] sm:$0xf]  ;;  %v480_v26 = vld [vmem:[%s1178_s27 + $0x54] sm:$0xf] }
  0x2d   : > { %v543_v27 = vld [vmem:[%s1184_s30 + $0x50] sm:$0xf]  ;;  %v669_v28 = vmax.bf16 %v605_v17, %v413_v7  ;;  %v544_v30 = vld [vmem:[%s1184_s30 + $0x54] sm:$0xf]  ;;  %v289_v32 = vld [vmem:[%s1166_s21 + $0x58] sm:$0xf] }
  0x2e   : > { %v670_v29 = vmax.bf16 %v606_v18, %v414_v13  ;;  %v607_v31 = vmax.bf16 %v543_v27, %v479_v25  ;;  %v290_v33 = vld [vmem:[%s1166_s21 + $0x5c] sm:$0xf]  ;;  %1064 = vst [vmem:[%s1208_s7 + $0x40] sm:$0xff] %v1063_v22   ;;  %v608_v34 = vmax.bf16 %v544_v30, %v480_v26  ;;  %v353_v35 = vld [vmem:[%s1172_s24 + $0x58] sm:$0xf] }
  0x2f   : > { %v354_v36 = vld [vmem:[%s1172_s24 + $0x5c] sm:$0xf]  ;;  %v481_v37 = vld [vmem:[%s1178_s27 + $0x58] sm:$0xf]  ;;  %v417_v40 = vmax.bf16 %v353_v35, %v289_v32  ;;  %v291_v48 = vld [vmem:[%s1166_s21 + $0x60] sm:$0xf] }
  0x30   : > { %v1065_v38 = vcombine.low %v669_v28, %v670_v29  ;;  %v671_v39 = vmax.bf16 %v607_v31, %v415_v23  ;;  %v418_v41 = vmax.bf16 %v354_v36, %v290_v33  ;;  %v482_v42 = vld [vmem:[%s1178_s27 + $0x5c] sm:$0xf]  ;;  %v545_v43 = vld [vmem:[%s1184_s30 + $0x58] sm:$0xf]  ;;  %v672_v45 = vmax.bf16 %v608_v34, %v416_v24  ;;  %v292_v49 = vld [vmem:[%s1166_s21 + $0x64] sm:$0xf] }
  0x31   : > { %v546_v44 = vld [vmem:[%s1184_s30 + $0x5c] sm:$0xf]  ;;  %v609_v46 = vmax.bf16 %v545_v43, %v481_v37  ;;  %v355_v50 = vld [vmem:[%s1172_s24 + $0x60] sm:$0xf]  ;;  %v356_v51 = vld [vmem:[%s1172_s24 + $0x64] sm:$0xf] }
  0x32   : > { %v610_v47 = vmax.bf16 %v546_v44, %v482_v42  ;;  %1066 = vst [vmem:[%s1208_s7 + $0x48] sm:$0xff] %v1065_v38   ;;  %v419_v52 = vmax.bf16 %v355_v50, %v291_v48  ;;  %v483_v53 = vld [vmem:[%s1178_s27 + $0x60] sm:$0xf]  ;;  %v484_v54 = vld [vmem:[%s1178_s27 + $0x64] sm:$0xf]  ;;  %v1067_v55 = vcombine.low %v671_v39, %v672_v45  ;;  %v420_v58 = vmax.bf16 %v356_v51, %v292_v49 }
  0x33   : > { %v673_v56 = vmax.bf16 %v609_v46, %v417_v40  ;;  %v547_v59 = vld [vmem:[%s1184_s30 + $0x60] sm:$0xf]  ;;  %v548_v60 = vld [vmem:[%s1184_s30 + $0x64] sm:$0xf]  ;;  %v293_v61 = vld [vmem:[%s1166_s21 + $0x68] sm:$0xf] }
  0x34   : > { %v674_v57 = vmax.bf16 %v610_v47, %v418_v41  ;;  %v611_v62 = vmax.bf16 %v547_v59, %v483_v53  ;;  %v612_v63 = vmax.bf16 %v548_v60, %v484_v54  ;;  %v294_v0 = vld [vmem:[%s1166_s21 + $0x6c] sm:$0xf]  ;;  %v357_v1 = vld [vmem:[%s1172_s24 + $0x68] sm:$0xf]  ;;  %1068 = vst [vmem:[%s1208_s7 + $0x50] sm:$0xff] %v1067_v55  }
  0x35   : > { %v358_v2 = vld [vmem:[%s1172_s24 + $0x6c] sm:$0xf]  ;;  %v421_v4 = vmax.bf16 %v357_v1, %v293_v61  ;;  %v485_v6 = vld [vmem:[%s1178_s27 + $0x68] sm:$0xf]  ;;  %v295_v13 = vld [vmem:[%s1166_s21 + $0x70] sm:$0xf] }
  0x36   : > { %v1069_v3 = vcombine.low %v673_v56, %v674_v57  ;;  %v422_v5 = vmax.bf16 %v358_v2, %v294_v0  ;;  %v486_v7 = vld [vmem:[%s1178_s27 + $0x6c] sm:$0xf]  ;;  %v549_v8 = vld [vmem:[%s1184_s30 + $0x68] sm:$0xf]  ;;  %v675_v9 = vmax.bf16 %v611_v62, %v419_v52  ;;  %v676_v10 = vmax.bf16 %v612_v63, %v420_v58  ;;  %v296_v14 = vld [vmem:[%s1166_s21 + $0x74] sm:$0xf] }
  0x37   : > { %v550_v11 = vld [vmem:[%s1184_s30 + $0x6c] sm:$0xf]  ;;  %v613_v12 = vmax.bf16 %v549_v8, %v485_v6  ;;  %v359_v16 = vld [vmem:[%s1172_s24 + $0x70] sm:$0xf]  ;;  %v360_v17 = vld [vmem:[%s1172_s24 + $0x74] sm:$0xf] }
  0x38   : > { %1070 = vst [vmem:[%s1208_s7 + $0x58] sm:$0xff] %v1069_v3   ;;  %v614_v15 = vmax.bf16 %v550_v11, %v486_v7  ;;  %v487_v18 = vld [vmem:[%s1178_s27 + $0x70] sm:$0xf]  ;;  %v1071_v19 = vcombine.low %v675_v9, %v676_v10  ;;  %v423_v21 = vmax.bf16 %v359_v16, %v295_v13  ;;  %v424_v22 = vmax.bf16 %v360_v17, %v296_v14  ;;  %v488_v23 = vld [vmem:[%s1178_s27 + $0x74] sm:$0xf] }
  0x39   : > { %v677_v20 = vmax.bf16 %v613_v12, %v421_v4  ;;  %v551_v24 = vld [vmem:[%s1184_s30 + $0x70] sm:$0xf]  ;;  %v552_v25 = vld [vmem:[%s1184_s30 + $0x74] sm:$0xf]  ;;  %v297_v29 = vld [vmem:[%s1166_s21 + $0x78] sm:$0xf] }
  0x3a   : > { %v678_v26 = vmax.bf16 %v614_v15, %v422_v5  ;;  %v615_v27 = vmax.bf16 %v551_v24, %v487_v18  ;;  %v616_v28 = vmax.bf16 %v552_v25, %v488_v23  ;;  %v298_v30 = vld [vmem:[%s1166_s21 + $0x7c] sm:$0xf]  ;;  %v361_v31 = vld [vmem:[%s1172_s24 + $0x78] sm:$0xf]  ;;  %1072 = vst [vmem:[%s1208_s7 + $0x60] sm:$0xff] %v1071_v19  }
  0x3b   : > { %v362_v32 = vld [vmem:[%s1172_s24 + $0x7c] sm:$0xf]  ;;  %v425_v33 = vmax.bf16 %v361_v31, %v297_v29  ;;  %v489_v34 = vld [vmem:[%s1178_s27 + $0x78] sm:$0xf]  ;;  %v299_v42 = vld [vmem:[%s1166_s21 + $0x80] sm:$0xf] }
  0x3c   : > { %v490_v35 = vld [vmem:[%s1178_s27 + $0x7c] sm:$0xf]  ;;  %v1073_v36 = vcombine.low %v677_v20, %v678_v26  ;;  %v679_v37 = vmax.bf16 %v615_v27, %v423_v21  ;;  %v680_v38 = vmax.bf16 %v616_v28, %v424_v22  ;;  %v426_v39 = vmax.bf16 %v362_v32, %v298_v30  ;;  %v553_v40 = vld [vmem:[%s1184_s30 + $0x78] sm:$0xf]  ;;  %v300_v45 = vld [vmem:[%s1166_s21 + $0x84] sm:$0xf] }
  0x3d   : > { %v554_v41 = vld [vmem:[%s1184_s30 + $0x7c] sm:$0xf]  ;;  %v617_v43 = vmax.bf16 %v553_v40, %v489_v34  ;;  %v363_v46 = vld [vmem:[%s1172_s24 + $0x80] sm:$0xf]  ;;  %v364_v47 = vld [vmem:[%s1172_s24 + $0x84] sm:$0xf] }
  0x3e   : > { %v618_v44 = vmax.bf16 %v554_v41, %v490_v35  ;;  %1074 = vst [vmem:[%s1208_s7 + $0x68] sm:$0xff] %v1073_v36   ;;  %v1075_v48 = vcombine.low %v679_v37, %v680_v38  ;;  %v427_v49 = vmax.bf16 %v363_v46, %v299_v42  ;;  %v428_v50 = vmax.bf16 %v364_v47, %v300_v45  ;;  %v491_v51 = vld [vmem:[%s1178_s27 + $0x80] sm:$0xf]  ;;  %v492_v52 = vld [vmem:[%s1178_s27 + $0x84] sm:$0xf] }
  0x3f   : > { %v555_v53 = vld [vmem:[%s1184_s30 + $0x80] sm:$0xf]  ;;  %v681_v54 = vmax.bf16 %v617_v43, %v425_v33  ;;  %v556_v56 = vld [vmem:[%s1184_s30 + $0x84] sm:$0xf]  ;;  %v301_v58 = vld [vmem:[%s1166_s21 + $0x88] sm:$0xf] }
  0x40   : > { %v682_v55 = vmax.bf16 %v618_v44, %v426_v39  ;;  %v619_v57 = vmax.bf16 %v555_v53, %v491_v51  ;;  %v302_v59 = vld [vmem:[%s1166_s21 + $0x8c] sm:$0xf]  ;;  %1076 = vst [vmem:[%s1208_s7 + $0x70] sm:$0xff] %v1075_v48   ;;  %v620_v60 = vmax.bf16 %v556_v56, %v492_v52  ;;  %v365_v61 = vld [vmem:[%s1172_s24 + $0x88] sm:$0xf] }
  0x41   : > { %v366_v62 = vld [vmem:[%s1172_s24 + $0x8c] sm:$0xf]  ;;  %v493_v63 = vld [vmem:[%s1178_s27 + $0x88] sm:$0xf]  ;;  %v429_v2 = vmax.bf16 %v365_v61, %v301_v58  ;;  %v303_v10 = vld [vmem:[%s1166_s21 + $0x90] sm:$0xf] }
  0x42   : > { %v1077_v0 = vcombine.low %v681_v54, %v682_v55  ;;  %v683_v1 = vmax.bf16 %v619_v57, %v427_v49  ;;  %v430_v3 = vmax.bf16 %v366_v62, %v302_v59  ;;  %v494_v4 = vld [vmem:[%s1178_s27 + $0x8c] sm:$0xf]  ;;  %v557_v5 = vld [vmem:[%s1184_s30 + $0x88] sm:$0xf]  ;;  %v684_v7 = vmax.bf16 %v620_v60, %v428_v50  ;;  %v304_v11 = vld [vmem:[%s1166_s21 + $0x94] sm:$0xf] }
  0x43   : > { %v558_v6 = vld [vmem:[%s1184_s30 + $0x8c] sm:$0xf]  ;;  %v621_v8 = vmax.bf16 %v557_v5, %v493_v63  ;;  %v367_v12 = vld [vmem:[%s1172_s24 + $0x90] sm:$0xf]  ;;  %v368_v13 = vld [vmem:[%s1172_s24 + $0x94] sm:$0xf] }
  0x44   : > { %v622_v9 = vmax.bf16 %v558_v6, %v494_v4  ;;  %1078 = vst [vmem:[%s1208_s7 + $0x78] sm:$0xff] %v1077_v0   ;;  %v431_v14 = vmax.bf16 %v367_v12, %v303_v10  ;;  %v495_v15 = vld [vmem:[%s1178_s27 + $0x90] sm:$0xf]  ;;  %v496_v16 = vld [vmem:[%s1178_s27 + $0x94] sm:$0xf]  ;;  %v1079_v17 = vcombine.low %v683_v1, %v684_v7  ;;  %v432_v20 = vmax.bf16 %v368_v13, %v304_v11 }
  0x45   : > { %v685_v18 = vmax.bf16 %v621_v8, %v429_v2  ;;  %v559_v21 = vld [vmem:[%s1184_s30 + $0x90] sm:$0xf]  ;;  %v560_v22 = vld [vmem:[%s1184_s30 + $0x94] sm:$0xf]  ;;  %v305_v23 = vld [vmem:[%s1166_s21 + $0x98] sm:$0xf] }
  0x46   : > { %v686_v19 = vmax.bf16 %v622_v9, %v430_v3  ;;  %v623_v24 = vmax.bf16 %v559_v21, %v495_v15  ;;  %v624_v25 = vmax.bf16 %v560_v22, %v496_v16  ;;  %v306_v26 = vld [vmem:[%s1166_s21 + $0x9c] sm:$0xf]  ;;  %v369_v27 = vld [vmem:[%s1172_s24 + $0x98] sm:$0xf]  ;;  %1080 = vst [vmem:[%s1208_s7 + $0x80] sm:$0xff] %v1079_v17  }
  0x47   : > { %v370_v28 = vld [vmem:[%s1172_s24 + $0x9c] sm:$0xf]  ;;  %v433_v30 = vmax.bf16 %v369_v27, %v305_v23  ;;  %v497_v32 = vld [vmem:[%s1178_s27 + $0x98] sm:$0xf]  ;;  %v307_v39 = vld [vmem:[%s1166_s21 + $0xa0] sm:$0xf] }
  0x48   : > { %v1081_v29 = vcombine.low %v685_v18, %v686_v19  ;;  %v434_v31 = vmax.bf16 %v370_v28, %v306_v26  ;;  %v498_v33 = vld [vmem:[%s1178_s27 + $0x9c] sm:$0xf]  ;;  %v561_v34 = vld [vmem:[%s1184_s30 + $0x98] sm:$0xf]  ;;  %v687_v35 = vmax.bf16 %v623_v24, %v431_v14  ;;  %v688_v36 = vmax.bf16 %v624_v25, %v432_v20  ;;  %v308_v40 = vld [vmem:[%s1166_s21 + $0xa4] sm:$0xf] }
  0x49   : > { %v562_v37 = vld [vmem:[%s1184_s30 + $0x9c] sm:$0xf]  ;;  %v625_v38 = vmax.bf16 %v561_v34, %v497_v32  ;;  %v371_v42 = vld [vmem:[%s1172_s24 + $0xa0] sm:$0xf]  ;;  %v372_v43 = vld [vmem:[%s1172_s24 + $0xa4] sm:$0xf] }
  0x4a   : > { %1082 = vst [vmem:[%s1208_s7 + $0x88] sm:$0xff] %v1081_v29   ;;  %v626_v41 = vmax.bf16 %v562_v37, %v498_v33  ;;  %v499_v44 = vld [vmem:[%s1178_s27 + $0xa0] sm:$0xf]  ;;  %v1083_v45 = vcombine.low %v687_v35, %v688_v36  ;;  %v435_v47 = vmax.bf16 %v371_v42, %v307_v39  ;;  %v436_v48 = vmax.bf16 %v372_v43, %v308_v40  ;;  %v500_v49 = vld [vmem:[%s1178_s27 + $0xa4] sm:$0xf] }
  0x4b   : > { %v689_v46 = vmax.bf16 %v625_v38, %v433_v30  ;;  %v563_v50 = vld [vmem:[%s1184_s30 + $0xa0] sm:$0xf]  ;;  %v564_v51 = vld [vmem:[%s1184_s30 + $0xa4] sm:$0xf]  ;;  %v309_v55 = vld [vmem:[%s1166_s21 + $0xa8] sm:$0xf] }
  0x4c   : > { %v690_v52 = vmax.bf16 %v626_v41, %v434_v31  ;;  %v627_v53 = vmax.bf16 %v563_v50, %v499_v44  ;;  %v628_v54 = vmax.bf16 %v564_v51, %v500_v49  ;;  %v310_v56 = vld [vmem:[%s1166_s21 + $0xac] sm:$0xf]  ;;  %v373_v57 = vld [vmem:[%s1172_s24 + $0xa8] sm:$0xf]  ;;  %1084 = vst [vmem:[%s1208_s7 + $0x90] sm:$0xff] %v1083_v45  }
  0x4d   : > { %v374_v58 = vld [vmem:[%s1172_s24 + $0xac] sm:$0xf]  ;;  %v437_v59 = vmax.bf16 %v373_v57, %v309_v55  ;;  %v501_v60 = vld [vmem:[%s1178_s27 + $0xa8] sm:$0xf]  ;;  %v311_v4 = vld [vmem:[%s1166_s21 + $0xb0] sm:$0xf] }
  0x4e   : > { %v502_v61 = vld [vmem:[%s1178_s27 + $0xac] sm:$0xf]  ;;  %v1085_v62 = vcombine.low %v689_v46, %v690_v52  ;;  %v691_v63 = vmax.bf16 %v627_v53, %v435_v47  ;;  %v692_v0 = vmax.bf16 %v628_v54, %v436_v48  ;;  %v438_v1 = vmax.bf16 %v374_v58, %v310_v56  ;;  %v565_v2 = vld [vmem:[%s1184_s30 + $0xa8] sm:$0xf]  ;;  %v312_v7 = vld [vmem:[%s1166_s21 + $0xb4] sm:$0xf] }
  0x4f   : > { %v566_v3 = vld [vmem:[%s1184_s30 + $0xac] sm:$0xf]  ;;  %v629_v5 = vmax.bf16 %v565_v2, %v501_v60  ;;  %v375_v8 = vld [vmem:[%s1172_s24 + $0xb0] sm:$0xf]  ;;  %v376_v9 = vld [vmem:[%s1172_s24 + $0xb4] sm:$0xf] }
  0x50   : > { %v630_v6 = vmax.bf16 %v566_v3, %v502_v61  ;;  %1086 = vst [vmem:[%s1208_s7 + $0x98] sm:$0xff] %v1085_v62   ;;  %v1087_v10 = vcombine.low %v691_v63, %v692_v0  ;;  %v439_v11 = vmax.bf16 %v375_v8, %v311_v4  ;;  %v440_v12 = vmax.bf16 %v376_v9, %v312_v7  ;;  %v503_v13 = vld [vmem:[%s1178_s27 + $0xb0] sm:$0xf]  ;;  %v504_v14 = vld [vmem:[%s1178_s27 + $0xb4] sm:$0xf] }
  0x51   : > { %v567_v15 = vld [vmem:[%s1184_s30 + $0xb0] sm:$0xf]  ;;  %v693_v16 = vmax.bf16 %v629_v5, %v437_v59  ;;  %v568_v18 = vld [vmem:[%s1184_s30 + $0xb4] sm:$0xf]  ;;  %v313_v20 = vld [vmem:[%s1166_s21 + $0xb8] sm:$0xf] }
  0x52   : > { %v694_v17 = vmax.bf16 %v630_v6, %v438_v1  ;;  %v631_v19 = vmax.bf16 %v567_v15, %v503_v13  ;;  %v314_v21 = vld [vmem:[%s1166_s21 + $0xbc] sm:$0xf]  ;;  %1088 = vst [vmem:[%s1208_s7 + $0xa0] sm:$0xff] %v1087_v10   ;;  %v632_v22 = vmax.bf16 %v568_v18, %v504_v14  ;;  %v377_v23 = vld [vmem:[%s1172_s24 + $0xb8] sm:$0xf] }
  0x53   : > { %v378_v24 = vld [vmem:[%s1172_s24 + $0xbc] sm:$0xf]  ;;  %v505_v25 = vld [vmem:[%s1178_s27 + $0xb8] sm:$0xf]  ;;  %v441_v28 = vmax.bf16 %v377_v23, %v313_v20  ;;  %v315_v36 = vld [vmem:[%s1166_s21 + $0xc0] sm:$0xf] }
  0x54   : > { %v1089_v26 = vcombine.low %v693_v16, %v694_v17  ;;  %v695_v27 = vmax.bf16 %v631_v19, %v439_v11  ;;  %v442_v29 = vmax.bf16 %v378_v24, %v314_v21  ;;  %v506_v30 = vld [vmem:[%s1178_s27 + $0xbc] sm:$0xf]  ;;  %v569_v31 = vld [vmem:[%s1184_s30 + $0xb8] sm:$0xf]  ;;  %v696_v33 = vmax.bf16 %v632_v22, %v440_v12  ;;  %v316_v37 = vld [vmem:[%s1166_s21 + $0xc4] sm:$0xf] }
  0x55   : > { %v570_v32 = vld [vmem:[%s1184_s30 + $0xbc] sm:$0xf]  ;;  %v633_v34 = vmax.bf16 %v569_v31, %v505_v25  ;;  %v379_v38 = vld [vmem:[%s1172_s24 + $0xc0] sm:$0xf]  ;;  %v380_v39 = vld [vmem:[%s1172_s24 + $0xc4] sm:$0xf] }
  0x56   : > { %v634_v35 = vmax.bf16 %v570_v32, %v506_v30  ;;  %1090 = vst [vmem:[%s1208_s7 + $0xa8] sm:$0xff] %v1089_v26   ;;  %v443_v40 = vmax.bf16 %v379_v38, %v315_v36  ;;  %v507_v41 = vld [vmem:[%s1178_s27 + $0xc0] sm:$0xf]  ;;  %v508_v42 = vld [vmem:[%s1178_s27 + $0xc4] sm:$0xf]  ;;  %v1091_v43 = vcombine.low %v695_v27, %v696_v33  ;;  %v444_v46 = vmax.bf16 %v380_v39, %v316_v37 }
  0x57   : > { %v697_v44 = vmax.bf16 %v633_v34, %v441_v28  ;;  %v571_v47 = vld [vmem:[%s1184_s30 + $0xc0] sm:$0xf]  ;;  %v572_v48 = vld [vmem:[%s1184_s30 + $0xc4] sm:$0xf]  ;;  %v317_v49 = vld [vmem:[%s1166_s21 + $0xc8] sm:$0xf] }
  0x58   : > { %v698_v45 = vmax.bf16 %v634_v35, %v442_v29  ;;  %v635_v50 = vmax.bf16 %v571_v47, %v507_v41  ;;  %v636_v51 = vmax.bf16 %v572_v48, %v508_v42  ;;  %v318_v52 = vld [vmem:[%s1166_s21 + $0xcc] sm:$0xf]  ;;  %v381_v53 = vld [vmem:[%s1172_s24 + $0xc8] sm:$0xf]  ;;  %1092 = vst [vmem:[%s1208_s7 + $0xb0] sm:$0xff] %v1091_v43  }
  0x59   : > { %v382_v54 = vld [vmem:[%s1172_s24 + $0xcc] sm:$0xf]  ;;  %v445_v56 = vmax.bf16 %v381_v53, %v317_v49  ;;  %v509_v58 = vld [vmem:[%s1178_s27 + $0xc8] sm:$0xf]  ;;  %v319_v1 = vld [vmem:[%s1166_s21 + $0xd0] sm:$0xf] }
  0x5a   : > { %v1093_v55 = vcombine.low %v697_v44, %v698_v45  ;;  %v446_v57 = vmax.bf16 %v382_v54, %v318_v52  ;;  %v510_v59 = vld [vmem:[%s1178_s27 + $0xcc] sm:$0xf]  ;;  %v573_v60 = vld [vmem:[%s1184_s30 + $0xc8] sm:$0xf]  ;;  %v699_v61 = vmax.bf16 %v635_v50, %v443_v40  ;;  %v700_v62 = vmax.bf16 %v636_v51, %v444_v46  ;;  %v320_v2 = vld [vmem:[%s1166_s21 + $0xd4] sm:$0xf] }
  0x5b   : > { %v574_v63 = vld [vmem:[%s1184_s30 + $0xcc] sm:$0xf]  ;;  %v637_v0 = vmax.bf16 %v573_v60, %v509_v58  ;;  %v383_v4 = vld [vmem:[%s1172_s24 + $0xd0] sm:$0xf]  ;;  %v384_v5 = vld [vmem:[%s1172_s24 + $0xd4] sm:$0xf] }
  0x5c   : > { %1094 = vst [vmem:[%s1208_s7 + $0xb8] sm:$0xff] %v1093_v55   ;;  %v638_v3 = vmax.bf16 %v574_v63, %v510_v59  ;;  %v511_v6 = vld [vmem:[%s1178_s27 + $0xd0] sm:$0xf]  ;;  %v1095_v7 = vcombine.low %v699_v61, %v700_v62  ;;  %v447_v9 = vmax.bf16 %v383_v4, %v319_v1  ;;  %v448_v10 = vmax.bf16 %v384_v5, %v320_v2  ;;  %v512_v11 = vld [vmem:[%s1178_s27 + $0xd4] sm:$0xf] }
  0x5d   : > { %v701_v8 = vmax.bf16 %v637_v0, %v445_v56  ;;  %v575_v12 = vld [vmem:[%s1184_s30 + $0xd0] sm:$0xf]  ;;  %v576_v13 = vld [vmem:[%s1184_s30 + $0xd4] sm:$0xf]  ;;  %v321_v17 = vld [vmem:[%s1166_s21 + $0xd8] sm:$0xf] }
  0x5e   : > { %v702_v14 = vmax.bf16 %v638_v3, %v446_v57  ;;  %v639_v15 = vmax.bf16 %v575_v12, %v511_v6  ;;  %v640_v16 = vmax.bf16 %v576_v13, %v512_v11  ;;  %v322_v18 = vld [vmem:[%s1166_s21 + $0xdc] sm:$0xf]  ;;  %v385_v19 = vld [vmem:[%s1172_s24 + $0xd8] sm:$0xf]  ;;  %1096 = vst [vmem:[%s1208_s7 + $0xc0] sm:$0xff] %v1095_v7  }
  0x5f   : > { %v386_v20 = vld [vmem:[%s1172_s24 + $0xdc] sm:$0xf]  ;;  %v449_v21 = vmax.bf16 %v385_v19, %v321_v17  ;;  %v513_v22 = vld [vmem:[%s1178_s27 + $0xd8] sm:$0xf]  ;;  %v323_v30 = vld [vmem:[%s1166_s21 + $0xe0] sm:$0xf] }
  0x60   : > { %v514_v23 = vld [vmem:[%s1178_s27 + $0xdc] sm:$0xf]  ;;  %v1097_v24 = vcombine.low %v701_v8, %v702_v14  ;;  %v703_v25 = vmax.bf16 %v639_v15, %v447_v9  ;;  %v704_v26 = vmax.bf16 %v640_v16, %v448_v10  ;;  %v450_v27 = vmax.bf16 %v386_v20, %v322_v18  ;;  %v577_v28 = vld [vmem:[%s1184_s30 + $0xd8] sm:$0xf]  ;;  %v324_v33 = vld [vmem:[%s1166_s21 + $0xe4] sm:$0xf] }
  0x61   : > { %v578_v29 = vld [vmem:[%s1184_s30 + $0xdc] sm:$0xf]  ;;  %v641_v31 = vmax.bf16 %v577_v28, %v513_v22  ;;  %v387_v34 = vld [vmem:[%s1172_s24 + $0xe0] sm:$0xf]  ;;  %v388_v35 = vld [vmem:[%s1172_s24 + $0xe4] sm:$0xf] }
  0x62   : > { %v642_v32 = vmax.bf16 %v578_v29, %v514_v23  ;;  %1098 = vst [vmem:[%s1208_s7 + $0xc8] sm:$0xff] %v1097_v24   ;;  %v1099_v36 = vcombine.low %v703_v25, %v704_v26  ;;  %v451_v37 = vmax.bf16 %v387_v34, %v323_v30  ;;  %v452_v38 = vmax.bf16 %v388_v35, %v324_v33  ;;  %v515_v39 = vld [vmem:[%s1178_s27 + $0xe0] sm:$0xf]  ;;  %v516_v40 = vld [vmem:[%s1178_s27 + $0xe4] sm:$0xf] }
  0x63   : > { %v579_v41 = vld [vmem:[%s1184_s30 + $0xe0] sm:$0xf]  ;;  %v705_v42 = vmax.bf16 %v641_v31, %v449_v21  ;;  %v580_v44 = vld [vmem:[%s1184_s30 + $0xe4] sm:$0xf]  ;;  %v325_v46 = vld [vmem:[%s1166_s21 + $0xe8] sm:$0xf] }
  0x64   : > { %v706_v43 = vmax.bf16 %v642_v32, %v450_v27  ;;  %v643_v45 = vmax.bf16 %v579_v41, %v515_v39  ;;  %v326_v47 = vld [vmem:[%s1166_s21 + $0xec] sm:$0xf]  ;;  %1100 = vst [vmem:[%s1208_s7 + $0xd0] sm:$0xff] %v1099_v36   ;;  %v644_v48 = vmax.bf16 %v580_v44, %v516_v40  ;;  %v389_v49 = vld [vmem:[%s1172_s24 + $0xe8] sm:$0xf] }
  0x65   : > { %v390_v50 = vld [vmem:[%s1172_s24 + $0xec] sm:$0xf]  ;;  %v517_v51 = vld [vmem:[%s1178_s27 + $0xe8] sm:$0xf]  ;;  %v453_v54 = vmax.bf16 %v389_v49, %v325_v46  ;;  %v327_v62 = vld [vmem:[%s1166_s21 + $0xf0] sm:$0xf] }
  0x66   : > { %v1101_v52 = vcombine.low %v705_v42, %v706_v43  ;;  %v707_v53 = vmax.bf16 %v643_v45, %v451_v37  ;;  %v454_v55 = vmax.bf16 %v390_v50, %v326_v47  ;;  %v518_v56 = vld [vmem:[%s1178_s27 + $0xec] sm:$0xf]  ;;  %v581_v57 = vld [vmem:[%s1184_s30 + $0xe8] sm:$0xf]  ;;  %v708_v59 = vmax.bf16 %v644_v48, %v452_v38  ;;  %v328_v63 = vld [vmem:[%s1166_s21 + $0xf4] sm:$0xf] }
  0x67   : > { %v582_v58 = vld [vmem:[%s1184_s30 + $0xec] sm:$0xf]  ;;  %v645_v60 = vmax.bf16 %v581_v57, %v517_v51  ;;  %v391_v0 = vld [vmem:[%s1172_s24 + $0xf0] sm:$0xf]  ;;  %v392_v1 = vld [vmem:[%s1172_s24 + $0xf4] sm:$0xf] }
  0x68   : > { %v646_v61 = vmax.bf16 %v582_v58, %v518_v56  ;;  %1102 = vst [vmem:[%s1208_s7 + $0xd8] sm:$0xff] %v1101_v52   ;;  %v455_v2 = vmax.bf16 %v391_v0, %v327_v62  ;;  %v519_v3 = vld [vmem:[%s1178_s27 + $0xf0] sm:$0xf]  ;;  %v520_v4 = vld [vmem:[%s1178_s27 + $0xf4] sm:$0xf]  ;;  %v1103_v5 = vcombine.low %v707_v53, %v708_v59  ;;  %v456_v8 = vmax.bf16 %v392_v1, %v328_v63 }
  0x69   : > { %v709_v6 = vmax.bf16 %v645_v60, %v453_v54  ;;  %v583_v9 = vld [vmem:[%s1184_s30 + $0xf0] sm:$0xf]  ;;  %v584_v10 = vld [vmem:[%s1184_s30 + $0xf4] sm:$0xf]  ;;  %v329_v11 = vld [vmem:[%s1166_s21 + $0xf8] sm:$0xf] }
  0x6a   : > { %v710_v7 = vmax.bf16 %v646_v61, %v454_v55  ;;  %v647_v12 = vmax.bf16 %v583_v9, %v519_v3  ;;  %v648_v13 = vmax.bf16 %v584_v10, %v520_v4  ;;  %v330_v14 = vld [vmem:[%s1166_s21 + $0xfc] sm:$0xf]  ;;  %v393_v15 = vld [vmem:[%s1172_s24 + $0xf8] sm:$0xf]  ;;  %1104 = vst [vmem:[%s1208_s7 + $0xe0] sm:$0xff] %v1103_v5  }
  0x6b   : > { %v394_v16 = vld [vmem:[%s1172_s24 + $0xfc] sm:$0xf]  ;;  %v457_v18 = vmax.bf16 %v393_v15, %v329_v11  ;;  %v521_v20 = vld [vmem:[%s1178_s27 + $0xf8] sm:$0xf] }
  0x6c   : > { %v1105_v17 = vcombine.low %v709_v6, %v710_v7  ;;  %v458_v19 = vmax.bf16 %v394_v16, %v330_v14  ;;  %v522_v21 = vld [vmem:[%s1178_s27 + $0xfc] sm:$0xf]  ;;  %v585_v22 = vld [vmem:[%s1184_s30 + $0xf8] sm:$0xf]  ;;  %v711_v23 = vmax.bf16 %v647_v12, %v455_v2  ;;  %v712_v24 = vmax.bf16 %v648_v13, %v456_v8 }
  0x6d   : > { %v586_v25 = vld [vmem:[%s1184_s30 + $0xfc] sm:$0xf]  ;;  %v649_v26 = vmax.bf16 %v585_v22, %v521_v20 }
  0x6e   : > { %1106 = vst [vmem:[%s1208_s7 + $0xe8] sm:$0xff] %v1105_v17   ;;  %v650_v27 = vmax.bf16 %v586_v25, %v522_v21  ;;  %v1107_v28 = vcombine.low %v711_v23, %v712_v24 }
  0x6f   : > { %v713_v29 = vmax.bf16 %v649_v26, %v457_v18 }
  0x70   : > { %v714_v30 = vmax.bf16 %v650_v27, %v458_v19  ;;  %1108 = vst [vmem:[%s1208_s7 + $0xf0] sm:$0xff] %v1107_v28  }
  0x72   : > { %v1109_v31 = vcombine.low %v713_v29, %v714_v30 }
  0x74   : > { %1110 = vst [vmem:[%s1208_s7 + $0xf8] sm:$0xff] %v1109_v31  }
  0x75 PF: > { %s14_s15 = sadd.s32 1, %s1125_s15  }
  0x76   : > { %p11_p4 = scmp.ge.s32.totalorder %s14_s15, 8  }
  0x78   :  { %13 = sbr.rel (!%p11_p4) target bundleno = 1 (0x1), region = 75 }

// kernel: my_model_forward.12
= control target key start
LH: loop header
LB: loop body
LE: loop exit
PB: predicated region body
PF: predicated region fallthrough
CT: control target
= control target key end

     0   :  { %s3999_s12 = smov 0   ;;  %s4001_s13 = smov 0   ;;  %s4851_s0 = inlined_call_operand.vmem [shape: bf16[5632,576], index: 0, kind: input, shape index: {}]   ;;  %s4852_s1 = inlined_call_operand.vmem [shape: bf16[576,128], index: 1, kind: input, shape index: {}]   ;;  %s4853_s2 = inlined_call_operand.vmem [shape: f32[1,128], index: 2, kind: input, shape index: {}]   ;;  %s4854_s3 = inlined_call_operand.vmem [shape: bf16[5632,128], index: 3, kind: output, shape index: {}]  }
   0x1   :  { %s4003_s14 = smov 0  }
   0x2 LB: > { %s25_s15 = sadd.s32 1, %s3972_s13  ;;  %p2972_p0 = scmp.ge.s32.totalorder %s3976_s14, 1  ;;  %s3976_s14 = sphi %s4003_s14, %s13_s14   ;;  %s3972_s13 = sphi %s4001_s13, %s4890_s13   ;;  %s3968_s12 = sphi %s3999_s12, %s4889_s12  }
   0x3   : > { %p27_p1 = scmp.ge.s32.totalorder %s25_s15, 11  ;;  %p170_p2 = scmp.lt.s32.totalorder %s3976_s14, 12 }
   0x5   : > { %s4892_s15 = smov (%p27_p1, %s25_s15), 0  ;;  %p171_p3 = pnand %p2972_p0, %p170_p2 }
   0x7   : > { %174 = sbr.rel (%p171_p3) target bundleno = 595 (0x253), region = 32 }
   0xc   : > { %v3693_v0 = vld [vmem:[%s4852_s1 + $0x38] sm:$0xff]   ;;  %v3978_v1 = vmov 0   ;;  %s2973_s18 = sshll.u32 %s3968_s12, 6  ;;  %v3694_v2 = vld [vmem:[%s4852_s1 + $0x30] sm:$0xff]   ;;  %v3695_v3 = vld [vmem:[%s4852_s1 + $0x28] sm:$0xff]   ;;  %vm1516_vm0 = vcmask 523264  }
   0xd   : > { %1613 = vmatprep.subr.bf16.mxu0 %v3978_v1  ;;  %3635 = vmatprep.subr.bf16.mxu1 %v3978_v1  ;;  %p206_p4 = scmp.lt.s32.totalorder %s2973_s18, 703  ;;  %v3696_v4 = vld [vmem:[%s4852_s1 + $0x20] sm:$0xff]   ;;  %v3697_v5 = vld [vmem:[%s4852_s1 + $0x18] sm:$0xff]   ;;  %v3698_v7 = vld [vmem:[%s4852_s1 + $0x10] sm:$0xff]  }
   0xe   : > { %1614 = vmatpush1.bf16.msra.mxu0 %v3693_v0  ;;  %3651 = vmatpush1.bf16.msra.mxu1 %v3693_v0  ;;  %v3699_v9 = vld [vmem:[%s4852_s1 + $0x8] sm:$0xff]   ;;  %v3700_v10 = vld [vmem:[%s4852_s1] sm:$0xff]   ;;  %v3701_v11 = vld [vmem:[%s4852_s1 + $0x78] sm:$0xff]  }
   0xf   : > { %1615 = vmatprep.subr.bf16.mxu0 %v3978_v1  ;;  %3636 = vmatprep.subr.bf16.mxu1 %v3978_v1  ;;  %s4894_s18 = smov (!%p206_p4, %s2973_s18), 703  ;;  %v3702_v12 = vld [vmem:[%s4852_s1 + $0x70] sm:$0xff]   ;;  %v3703_v13 = vld [vmem:[%s4852_s1 + $0x68] sm:$0xff]   ;;  %v3704_v14 = vld [vmem:[%s4852_s1 + $0x60] sm:$0xff]  }
  0x10   : > { %s3667_s25 = smul.u32 20, %s4894_s18  ;;  %v3705_v15 = vld [vmem:[%s4852_s1 + $0x58] sm:$0xff]   ;;  %v3706_v16 = vld [vmem:[%s4852_s1 + $0x50] sm:$0xff]   ;;  %v3707_v17 = vld [vmem:[%s4852_s1 + $0x48] sm:$0xff]  }
  0x11   : > { %v3708_v18 = vld [vmem:[%s4852_s1 + $0x40] sm:$0xff]   ;;  %v3715_v19 = vld [vmem:[%s4852_s1 + $0x118] sm:$0xff]   ;;  %v3764_v25 = vld [vmem:[%s4852_s1 + $0x110] sm:$0xff]  }
  0x12   : > { %1616 = vmatpush1.bf16.msra.mxu0 %v3694_v2  ;;  %3652 = vmatpush1.bf16.msra.mxu1 %v3694_v2  ;;  %s4046_s30 = scalar_lea.vmem %s4851_s0, %s3667_s25  ;;  %v3716_v22 = vld [vmem:[%s4852_s1 + $0xb8] sm:$0xff]   ;;  %v3717_v26 = vld [vmem:[%s4852_s1 + $0xb0] sm:$0xff]   ;;  %v3724_v29 = vld [vmem:[%s4852_s1 + $0xa8] sm:$0xff]  }
  0x13   : > { %1617 = vmatprep.subr.bf16.mxu0 %v3978_v1  ;;  %3637 = vmatprep.subr.bf16.mxu1 %v3978_v1  ;;  %v3711_v6 = vld [vmem:[%s4046_s30 + $0x4] ss:$20 sps:$4 sm:$0xff]   ;;  %v3709_v20 = vld [vmem:[%s4046_s30] ss:$20 sps:$4 sm:$0xff]   ;;  %v3722_v27 = vld [vmem:[%s4046_s30 + $0x28] ss:$20 sps:$4 sm:$0xff]  }
  0x14   : > { %v3714_v8 = vld [vmem:[%s4046_s30 + $0x3c4] ss:$20 sps:$4 sm:$0xff]   ;;  %1645 = vmatprep.mubr.bf16.mxu0 %v3711_v6  ;;  %v3712_v21 = vld [vmem:[%s4046_s30 + $0x3c0] ss:$20 sps:$4 sm:$0xff]   ;;  %v3723_v28 = vld [vmem:[%s4046_s30 + $0x3e8] ss:$20 sps:$4 sm:$0xff]  }
  0x15   : > { %1837 = vmatprep.mubr.bf16.mxu1 %v3714_v8  ;;  %v3718_v23 = vld [vmem:[%s4046_s30 + $0x2c] ss:$20 sps:$4 sm:$0xff]   ;;  %v3726_v31 = vld [vmem:[%s4046_s30 + $0x54] ss:$20 sps:$4 sm:$0xff]   ;;  %v3730_v34 = vld [vmem:[%s4046_s30 + $0x50] ss:$20 sps:$4 sm:$0xff]  }
  0x16   : > { %1618 = vmatpush1.bf16.msra.mxu0 %v3695_v3  ;;  %3653 = vmatpush1.bf16.msra.mxu1 %v3695_v3  ;;  %v3720_v24 = vld [vmem:[%s4046_s30 + $0x3ec] ss:$20 sps:$4 sm:$0xff]   ;;  %v3728_v32 = vld [vmem:[%s4046_s30 + $0x414] ss:$20 sps:$4 sm:$0xff]   ;;  %v3731_v35 = vld [vmem:[%s4046_s30 + $0x410] ss:$20 sps:$4 sm:$0xff]  }
  0x17   : > { %1619 = vmatprep.subr.bf16.mxu0 %v3978_v1  ;;  %3638 = vmatprep.subr.bf16.mxu1 %v3978_v1  ;;  %v3805_v30 = vld [vmem:[%s4852_s1 + $0x108] sm:$0xff]   ;;  %v3725_v33 = vld [vmem:[%s4852_s1 + $0xa0] sm:$0xff]   ;;  %v3732_v36 = vld [vmem:[%s4852_s1 + $0x98] sm:$0xff]  }
  0x18   : > { %v3734_v37 = vld [vmem:[%s4046_s30 + $0x7c] ss:$20 sps:$4 sm:$0xff]   ;;  %v3738_v40 = vld [vmem:[%s4046_s30 + $0x78] ss:$20 sps:$4 sm:$0xff]   ;;  %v3842_v44 = vld [vmem:[%s4852_s1 + $0x100] sm:$0xff]  }
  0x19   : > { %v3736_v38 = vld [vmem:[%s4046_s30 + $0x43c] ss:$20 sps:$4 sm:$0xff]   ;;  %v3739_v41 = vld [vmem:[%s4046_s30 + $0x438] ss:$20 sps:$4 sm:$0xff]   ;;  %v3741_v46 = vld [vmem:[%s4852_s1 + $0x80] sm:$0xff]  }
  0x1a   : > { %1620 = vmatpush1.bf16.msra.mxu0 %v3696_v4  ;;  %3654 = vmatpush1.bf16.msra.mxu1 %v3696_v4  ;;  %v3733_v39 = vld [vmem:[%s4852_s1 + $0x90] sm:$0xff]   ;;  %v3740_v42 = vld [vmem:[%s4852_s1 + $0x88] sm:$0xff]   ;;  %v3742_v43 = vld [vmem:[%s4046_s30 + $0xa4] ss:$20 sps:$4 sm:$0xff]  }
  0x1b   : > { %1621 = vmatprep.subr.bf16.mxu0 %v3978_v1  ;;  %3639 = vmatprep.subr.bf16.mxu1 %v3978_v1  ;;  %v3744_v45 = vld [vmem:[%s4046_s30 + $0x464] ss:$20 sps:$4 sm:$0xff]   ;;  %v3746_v47 = vld [vmem:[%s4046_s30 + $0xa0] ss:$20 sps:$4 sm:$0xff]   ;;  %v3754_v53 = vld [vmem:[%s4046_s30 + $0xc8] ss:$20 sps:$4 sm:$0xff]  }
  0x1c   : > { %v3747_v48 = vld [vmem:[%s4046_s30 + $0x460] ss:$20 sps:$4 sm:$0xff]   ;;  %v3748_v49 = vld [vmem:[%s4852_s1 + $0xf8] sm:$0xff]   ;;  %v3756_v55 = vld [vmem:[%s4852_s1 + $0xe8] sm:$0xff]  }
  0x1d   : > { %v3750_v50 = vld [vmem:[%s4046_s30 + $0xcc] ss:$20 sps:$4 sm:$0xff]   ;;  %v3749_v52 = vld [vmem:[%s4852_s1 + $0xf0] sm:$0xff]   ;;  %v3755_v54 = vld [vmem:[%s4046_s30 + $0x488] ss:$20 sps:$4 sm:$0xff]  }
  0x1e   : > { %1622 = vmatpush1.bf16.msra.mxu0 %v3697_v5  ;;  %3655 = vmatpush1.bf16.msra.mxu1 %v3697_v5  ;;  %v3752_v51 = vld [vmem:[%s4046_s30 + $0x48c] ss:$20 sps:$4 sm:$0xff]   ;;  %v3758_v56 = vld [vmem:[%s4046_s30 + $0xf4] ss:$20 sps:$4 sm:$0xff]   ;;  %v3762_v59 = vld [vmem:[%s4046_s30 + $0xf0] ss:$20 sps:$4 sm:$0xff]  }
  0x1f   : > { %1623 = vmatprep.subr.bf16.mxu0 %v3978_v1  ;;  %3640 = vmatprep.subr.bf16.mxu1 %v3978_v1  ;;  %v3760_v57 = vld [vmem:[%s4046_s30 + $0x4b4] ss:$20 sps:$4 sm:$0xff]   ;;  %v3757_v58 = vld [vmem:[%s4852_s1 + $0xe0] sm:$0xff]   ;;  %v3765_v61 = vld [vmem:[%s4852_s1 + $0xd8] sm:$0xff]  }
  0x20   : > { %v3763_v60 = vld [vmem:[%s4046_s30 + $0x4b0] ss:$20 sps:$4 sm:$0xff]   ;;  %v3771_v2 = vld [vmem:[%s4046_s30 + $0x118] ss:$20 sps:$4 sm:$0xff]   ;;  %v3777_v8 = vld [vmem:[%s4046_s30 + $0x8] ss:$20 sps:$4 sm:$0xff]  }
  0x21   : > { %v3767_v62 = vld [vmem:[%s4046_s30 + $0x11c] ss:$20 sps:$4 sm:$0xff]   ;;  %v3772_v3 = vld [vmem:[%s4046_s30 + $0x4d8] ss:$20 sps:$4 sm:$0xff]  }
  0x22   : > { %1624 = vmatpush1.bf16.msra.mxu0 %v3698_v7  ;;  %3656 = vmatpush1.bf16.msra.mxu1 %v3698_v7  ;;  %v3769_v63 = vld [vmem:[%s4046_s30 + $0x4dc] ss:$20 sps:$4 sm:$0xff]   ;;  %v3773_v4 = vld [vmem:[%s4852_s1 + $0xc8] sm:$0xff]   ;;  %v3775_v5 = vld [vmem:[%s4046_s30 + $0x144] ss:$20 sps:$4 sm:$0xff]  }
  0x23   : > { %1625 = vmatprep.subr.bf16.mxu0 %v3978_v1  ;;  %3641 = vmatprep.subr.bf16.mxu1 %v3978_v1  ;;  %v3766_v0 = vld [vmem:[%s4852_s1 + $0xd0] sm:$0xff]   ;;  %v3779_v6 = vld [vmem:[%s4046_s30 + $0xc] ss:$20 sps:$4 sm:$0xff]  }
  0x24   : > { %v3774_v7 = vld [vmem:[%s4852_s1 + $0xc0] sm:$0xff]  }
  0x26   : > { %1626 = vmatpush1.bf16.msra.mxu0 %v3699_v9  ;;  %3657 = vmatpush1.bf16.msra.mxu1 %v3699_v9  ;;  %v3780_v9 = vld [vmem:[%s4046_s30 + $0x140] ss:$20 sps:$4 sm:$0xff]  }
  0x27   : > { %1627 = vmatprep.subr.bf16.mxu0 %v3978_v1  ;;  %3642 = vmatprep.subr.bf16.mxu1 %v3978_v1 }
  0x2a   : > { %1628 = vmatpush1.bf16.msra.mxu0 %v3700_v10  ;;  %3658 = vmatpush1.bf16.msra.mxu1 %v3700_v10  ;;  %v3781_v10 = vld [vmem:[%s4046_s30 + $0x16c] ss:$20 sps:$4 sm:$0xff]  }
  0x2b   : > { %1629 = vmatprep.subr.bf16.mxu0 %v3978_v1  ;;  %3643 = vmatprep.subr.bf16.mxu1 %v3978_v1 }
  0x2e   : > { %1630 = vmatpush2.bf16.msra.mxu0 %v3701_v11  ;;  %3659 = vmatpush2.bf16.msra.mxu1 %v3701_v11  ;;  %v3783_v11 = vld [vmem:[%s4046_s30 + $0x34] ss:$20 sps:$4 sm:$0xff]  }
  0x2f   : > { %1631 = vmatprep.subr.bf16.mxu0 %v3978_v1  ;;  %3644 = vmatprep.subr.bf16.mxu1 %v3978_v1 }
  0x32   : > { %1632 = vmatpush2.bf16.msra.mxu0 %v3702_v12  ;;  %3660 = vmatpush2.bf16.msra.mxu1 %v3702_v12  ;;  %v3785_v12 = vld [vmem:[%s4046_s30 + $0x168] ss:$20 sps:$4 sm:$0xff]  }
  0x33   : > { %1633 = vmatprep.subr.bf16.mxu0 %v3978_v1  ;;  %3645 = vmatprep.subr.bf16.mxu1 %v3978_v1 }
  0x36   : > { %1634 = vmatpush2.bf16.msra.mxu0 %v3703_v13  ;;  %3661 = vmatpush2.bf16.msra.mxu1 %v3703_v13  ;;  %v3786_v13 = vld [vmem:[%s4046_s30 + $0x30] ss:$20 sps:$4 sm:$0xff]  }
  0x37   : > { %1635 = vmatprep.subr.bf16.mxu0 %v3978_v1  ;;  %3646 = vmatprep.subr.bf16.mxu1 %v3978_v1 }
  0x3a   : > { %1636 = vmatpush2.bf16.msra.mxu0 %v3704_v14  ;;  %3662 = vmatpush2.bf16.msra.mxu1 %v3704_v14  ;;  %v3787_v14 = vld [vmem:[%s4046_s30 + $0x194] ss:$20 sps:$4 sm:$0xff]  }
  0x3b   : > { %1637 = vmatprep.subr.bf16.mxu0 %v3978_v1  ;;  %3647 = vmatprep.subr.bf16.mxu1 %v3978_v1 }
  0x3e   : > { %1638 = vmatpush2.bf16.msra.mxu0 %v3705_v15  ;;  %3663 = vmatpush2.bf16.msra.mxu1 %v3705_v15  ;;  %v3791_v15 = vld [vmem:[%s4046_s30 + $0x190] ss:$20 sps:$4 sm:$0xff]  }
  0x3f   : > { %1639 = vmatprep.subr.bf16.mxu0 %v3978_v1  ;;  %3648 = vmatprep.subr.bf16.mxu1 %v3978_v1 }
  0x42   : > { %1640 = vmatpush2.bf16.msra.mxu0 %v3706_v16  ;;  %3664 = vmatpush2.bf16.msra.mxu1 %v3706_v16  ;;  %v3792_v16 = vld [vmem:[%s4046_s30 + $0x58] ss:$20 sps:$4 sm:$0xff]  }
  0x43   : > { %1641 = vmatprep.subr.bf16.mxu0 %v3978_v1  ;;  %3649 = vmatprep.subr.bf16.mxu1 %v3978_v1 }
  0x46   : > { %1642 = vmatpush2.bf16.msra.mxu0 %v3707_v17  ;;  %3665 = vmatpush2.bf16.msra.mxu1 %v3707_v17  ;;  %v3793_v17 = vld [vmem:[%s4046_s30 + $0x1bc] ss:$20 sps:$4 sm:$0xff]  }
  0x47   : > { %1643 = vmatprep.subr.bf16.mxu0 %v3978_v1  ;;  %3650 = vmatprep.subr.bf16.mxu1 %v3978_v1 }
  0x4a   : > { %1644 = vmatpush2.bf16.msra.mxu0 %v3708_v18  ;;  %3666 = vmatpush2.bf16.msra.mxu1 %v3708_v18  ;;  %v3795_v18 = vld [vmem:[%s4046_s30 + $0x84] ss:$20 sps:$4 sm:$0xff]  }
  0x4b   : > { %1902 = vmatprep.subr.bf16.mxu1 %v3978_v1  ;;  %3563 = vmatprep.subr.bf16.mxu0 %v3715_v19 }
  0x4d   : > { %1646 = vmatmul.mubr.bf16.vlgmr.msra.gmra.mxu0 %v3709_v20  ;;  %1838 = vmatmul.mubr.bf16.vlgmr.msra.gmra.mxu1 %v3712_v21  ;;  %v3798_v20 = vld [vmem:[%s4046_s30 + $0x80] ss:$20 sps:$4 sm:$0xff]   ;;  %v3799_v21 = vld [vmem:[%s4046_s30 + $0x1e4] ss:$20 sps:$4 sm:$0xff]  }
  0x4e   : > { %1903 = vmatpush1.bf16.msra.mxu1 %v3716_v22  ;;  %3564 = vmatpush3.bf16.msra.mxu0 %v3715_v19  ;;  %v3797_v19 = vld [vmem:[%s4046_s30 + $0x1b8] ss:$20 sps:$4 sm:$0xff]  }
  0x4f   : > { %1904 = vmatprep.subr.bf16.mxu1 %v3978_v1  ;;  %1653 = vmatprep.mubr.bf16.mxu0 %v3718_v23  ;;  %v3801_v22 = vld [vmem:[%s4046_s30 + $0xac] ss:$20 sps:$4 sm:$0xff]  }
  0x50   : > { %1845 = vmatprep.mubr.bf16.mxu1 %v3720_v24  ;;  %3565 = vmatprep.subr.bf16.mxu0 %v3764_v25  ;;  %v3803_v23 = vld [vmem:[%s4046_s30 + $0x1e0] ss:$20 sps:$4 sm:$0xff]   ;;  %v3804_v24 = vld [vmem:[%s4046_s30 + $0xa8] ss:$20 sps:$4 sm:$0xff]  }
  0x52   : > { %1905 = vmatpush1.bf16.msra.mxu1 %v3717_v26  ;;  %3566 = vmatpush3.bf16.msra.mxu0 %v3764_v25  ;;  %v3806_v25 = vld [vmem:[%s4046_s30 + $0x20c] ss:$20 sps:$4 sm:$0xff]   ;;  %v3808_v26 = vld [vmem:[%s4046_s30 + $0xd4] ss:$20 sps:$4 sm:$0xff]  }
  0x53   : > { %1906 = vmatprep.subr.bf16.mxu1 %v3978_v1  ;;  %3567 = vmatprep.subr.bf16.mxu0 %v3805_v30 }
  0x55   : > { %1654 = vmatmul.mubr.bf16.gmra.mxu0 %v3722_v27  ;;  %1846 = vmatmul.mubr.bf16.gmra.mxu1 %v3723_v28  ;;  %v3810_v27 = vld [vmem:[%s4046_s30 + $0x208] ss:$20 sps:$4 sm:$0xff]   ;;  %v3811_v28 = vld [vmem:[%s4046_s30 + $0xd0] ss:$20 sps:$4 sm:$0xff]  }
  0x56   : > { %1907 = vmatpush1.bf16.msra.mxu1 %v3724_v29  ;;  %1661 = vmatprep.mubr.bf16.mxu0 %v3726_v31  ;;  %v3812_v29 = vld [vmem:[%s4046_s30 + $0x234] ss:$20 sps:$4 sm:$0xff]   ;;  %v3816_v31 = vld [vmem:[%s4046_s30 + $0x230] ss:$20 sps:$4 sm:$0xff]  }
  0x57   : > { %1908 = vmatprep.subr.bf16.mxu1 %v3978_v1  ;;  %1853 = vmatprep.mubr.bf16.mxu1 %v3728_v32  ;;  %v3817_v32 = vld [vmem:[%s4046_s30 + $0xf8] ss:$20 sps:$4 sm:$0xff]  }
  0x58   : > { %3568 = vmatpush3.bf16.msra.mxu0 %v3805_v30  ;;  %v3814_v30 = vld [vmem:[%s4046_s30 + $0xfc] ss:$20 sps:$4 sm:$0xff]  }
  0x59   : > { %3569 = vmatprep.subr.bf16.mxu0 %v3842_v44 }
  0x5a   : > { %1909 = vmatpush1.bf16.msra.mxu1 %v3725_v33  ;;  %v3818_v33 = vld [vmem:[%s4046_s30 + $0x25c] ss:$20 sps:$4 sm:$0xff]  }
  0x5b   : > { %1910 = vmatprep.subr.bf16.mxu1 %v3978_v1 }
  0x5c   : > { %3570 = vmatpush3.bf16.msra.mxu0 %v3842_v44  ;;  %v3835_v44 = vld [vmem:[%s4046_s30 + $0x170] ss:$20 sps:$4 sm:$0xff]  }
  0x5d   : > { %1662 = vmatmul.mubr.bf16.gmra.mxu0 %v3730_v34  ;;  %1854 = vmatmul.mubr.bf16.gmra.mxu1 %v3731_v35  ;;  %v3820_v34 = vld [vmem:[%s4046_s30 + $0x124] ss:$20 sps:$4 sm:$0xff]  }
  0x5e   : > { %1911 = vmatpush1.bf16.msra.mxu1 %v3732_v36  ;;  %1669 = vmatprep.mubr.bf16.mxu0 %v3734_v37  ;;  %v3822_v35 = vld [vmem:[%s4046_s30 + $0x258] ss:$20 sps:$4 sm:$0xff]   ;;  %v3823_v36 = vld [vmem:[%s4046_s30 + $0x120] ss:$20 sps:$4 sm:$0xff]  }
  0x5f   : > { %1912 = vmatprep.subr.bf16.mxu1 %v3978_v1  ;;  %1861 = vmatprep.mubr.bf16.mxu1 %v3736_v38  ;;  %v3824_v37 = vld [vmem:[%s4046_s30 + $0x284] ss:$20 sps:$4 sm:$0xff]   ;;  %v3826_v38 = vld [vmem:[%s4046_s30 + $0x14c] ss:$20 sps:$4 sm:$0xff]  }
  0x62   : > { %1913 = vmatpush1.bf16.msra.mxu1 %v3733_v39  ;;  %v3828_v39 = vld [vmem:[%s4046_s30 + $0x280] ss:$20 sps:$4 sm:$0xff]  }
  0x63   : > { %1914 = vmatprep.subr.bf16.mxu1 %v3978_v1 }
  0x65   : > { %1670 = vmatmul.mubr.bf16.gmra.mxu0 %v3738_v40  ;;  %1862 = vmatmul.mubr.bf16.gmra.mxu1 %v3739_v41  ;;  %v3829_v40 = vld [vmem:[%s4046_s30 + $0x148] ss:$20 sps:$4 sm:$0xff]   ;;  %v3830_v41 = vld [vmem:[%s4046_s30 + $0x2ac] ss:$20 sps:$4 sm:$0xff]  }
  0x66   : > { %1915 = vmatpush1.bf16.msra.mxu1 %v3740_v42  ;;  %1677 = vmatprep.mubr.bf16.mxu0 %v3742_v43  ;;  %v3832_v42 = vld [vmem:[%s4046_s30 + $0x174] ss:$20 sps:$4 sm:$0xff]  }
  0x67   : > { %1916 = vmatprep.subr.bf16.mxu1 %v3978_v1  ;;  %1869 = vmatprep.mubr.bf16.mxu1 %v3744_v45  ;;  %v3834_v43 = vld [vmem:[%s4046_s30 + $0x2a8] ss:$20 sps:$4 sm:$0xff]  }
  0x68   : > { %v3836_v45 = vld [vmem:[%s4046_s30 + $0x2d4] ss:$20 sps:$4 sm:$0xff]  }
  0x6a   : > { %1917 = vmatpush1.bf16.msra.mxu1 %v3741_v46  ;;  %v3838_v46 = vld [vmem:[%s4046_s30 + $0x19c] ss:$20 sps:$4 sm:$0xff]  }
  0x6b   : > { %1918 = vmatprep.subr.bf16.mxu1 %v3978_v1 }
  0x6d   : > { %1678 = vmatmul.mubr.bf16.gmra.mxu0 %v3746_v47  ;;  %1870 = vmatmul.mubr.bf16.gmra.mxu1 %v3747_v48  ;;  %v3840_v47 = vld [vmem:[%s4046_s30 + $0x2d0] ss:$20 sps:$4 sm:$0xff]   ;;  %v3841_v48 = vld [vmem:[%s4046_s30 + $0x198] ss:$20 sps:$4 sm:$0xff]  }
  0x6e   : > { %1919 = vmatpush2.bf16.msra.mxu1 %v3748_v49  ;;  %1685 = vmatprep.mubr.bf16.mxu0 %v3750_v50  ;;  %v3843_v49 = vld [vmem:[%s4046_s30 + $0x2fc] ss:$20 sps:$4 sm:$0xff]   ;;  %v3845_v50 = vld [vmem:[%s4046_s30 + $0x1c4] ss:$20 sps:$4 sm:$0xff]  }
  0x6f   : > { %1920 = vmatprep.subr.bf16.mxu1 %v3978_v1  ;;  %1877 = vmatprep.mubr.bf16.mxu1 %v3752_v51  ;;  %v3847_v51 = vld [vmem:[%s4046_s30 + $0x2f8] ss:$20 sps:$4 sm:$0xff]  }
  0x72   : > { %1921 = vmatpush2.bf16.msra.mxu1 %v3749_v52  ;;  %v3848_v52 = vld [vmem:[%s4046_s30 + $0x1c0] ss:$20 sps:$4 sm:$0xff]  }
  0x73   : > { %1922 = vmatprep.subr.bf16.mxu1 %v3978_v1 }
  0x75   : > { %1686 = vmatmul.mubr.bf16.gmra.mxu0 %v3754_v53  ;;  %1878 = vmatmul.mubr.bf16.gmra.mxu1 %v3755_v54  ;;  %v3849_v53 = vld [vmem:[%s4046_s30 + $0x324] ss:$20 sps:$4 sm:$0xff]   ;;  %v3851_v54 = vld [vmem:[%s4046_s30 + $0x1ec] ss:$20 sps:$4 sm:$0xff]  }
  0x76   : > { %1923 = vmatpush2.bf16.msra.mxu1 %v3756_v55  ;;  %1693 = vmatprep.mubr.bf16.mxu0 %v3758_v56  ;;  %v3853_v55 = vld [vmem:[%s4046_s30 + $0x320] ss:$20 sps:$4 sm:$0xff]   ;;  %v3854_v56 = vld [vmem:[%s4046_s30 + $0x1e8] ss:$20 sps:$4 sm:$0xff]  }
  0x77   : > { %1924 = vmatprep.subr.bf16.mxu1 %v3978_v1  ;;  %1885 = vmatprep.mubr.bf16.mxu1 %v3760_v57  ;;  %v3855_v57 = vld [vmem:[%s4046_s30 + $0x34c] ss:$20 sps:$4 sm:$0xff]  }
  0x7a   : > { %1925 = vmatpush2.bf16.msra.mxu1 %v3757_v58  ;;  %v3857_v58 = vld [vmem:[%s4046_s30 + $0x214] ss:$20 sps:$4 sm:$0xff]  }
  0x7b   : > { %1926 = vmatprep.subr.bf16.mxu1 %v3978_v1 }
  0x7d   : > { %1694 = vmatmul.mubr.bf16.gmra.mxu0 %v3762_v59  ;;  %1886 = vmatmul.mubr.bf16.gmra.mxu1 %v3763_v60  ;;  %v3859_v59 = vld [vmem:[%s4046_s30 + $0x348] ss:$20 sps:$4 sm:$0xff]   ;;  %v3860_v60 = vld [vmem:[%s4046_s30 + $0x210] ss:$20 sps:$4 sm:$0xff]  }
  0x7e   : > { %1927 = vmatpush2.bf16.msra.mxu1 %v3765_v61  ;;  %1701 = vmatprep.mubr.bf16.mxu0 %v3767_v62  ;;  %v3861_v61 = vld [vmem:[%s4046_s30 + $0x374] ss:$20 sps:$4 sm:$0xff]   ;;  %v3863_v62 = vld [vmem:[%s4046_s30 + $0x23c] ss:$20 sps:$4 sm:$0xff]  }
  0x7f   : > { %1928 = vmatprep.subr.bf16.mxu1 %v3978_v1  ;;  %1893 = vmatprep.mubr.bf16.mxu1 %v3769_v63  ;;  %v3865_v63 = vld [vmem:[%s4046_s30 + $0x370] ss:$20 sps:$4 sm:$0xff]  }
  0x82   : > { %1929 = vmatpush2.bf16.msra.mxu1 %v3766_v0  ;;  %v3866_v0 = vld [vmem:[%s4046_s30 + $0x238] ss:$20 sps:$4 sm:$0xff]  }
  0x83   : > { %1930 = vmatprep.subr.bf16.mxu1 %v3978_v1 }
  0x85   : > { %1702 = vmatmul.mubr.bf16.gmra.mxu0 %v3771_v2  ;;  %1894 = vmatmul.mubr.bf16.gmra.mxu1 %v3772_v3  ;;  %v3867_v2 = vld [vmem:[%s4046_s30 + $0x39c] ss:$20 sps:$4 sm:$0xff]   ;;  %v3869_v3 = vld [vmem:[%s4046_s30 + $0x264] ss:$20 sps:$4 sm:$0xff]  }
  0x86   : > { %1931 = vmatpush2.bf16.msra.mxu1 %v3773_v4  ;;  %1709 = vmatprep.mubr.bf16.mxu0 %v3775_v5  ;;  %v3871_v4 = vld [vmem:[%s4046_s30 + $0x398] ss:$20 sps:$4 sm:$0xff]   ;;  %v3872_v5 = vld [vmem:[%s4046_s30 + $0x260] ss:$20 sps:$4 sm:$0xff]  }
  0x87   : > { %1932 = vmatprep.subr.bf16.mxu1 %v3978_v1  ;;  %1934 = vmatprep.mubr.bf16.mxu1 %v3779_v6  ;;  %v3789_v1 = vld [vmem:[%s4046_s30 + $0x5c] ss:$20 sps:$4 sm:$0xff]   ;;  %v3873_v6 = vld [vmem:[%s4046_s30 + $0x28c] ss:$20 sps:$4 sm:$0xff]  }
  0x8a   : > { %1933 = vmatpush2.bf16.msra.mxu1 %v3774_v7  ;;  %v3875_v7 = vld [vmem:[%s4046_s30 + $0x10] ss:$20 sps:$4 sm:$0xff]  }
  0x8d   : > { %1710 = vmatmul.mubr.bf16.gmra.mxu0 %v3780_v9  ;;  %1935 = vmatmul.mubr.bf16.vlgmr.msra.gmra.mxu1 %v3777_v8  ;;  %v3876_v8 = vld [vmem:[%s4046_s30 + $0x288] ss:$20 sps:$4 sm:$0xff]   ;;  %v3877_v9 = vld [vmem:[%s4046_s30 + $0x38] ss:$20 sps:$4 sm:$0xff]  }
  0x8e   : > { %1717 = vmatprep.mubr.bf16.mxu0 %v3781_v10  ;;  %1942 = vmatprep.mubr.bf16.mxu1 %v3783_v11  ;;  %v3878_v10 = vld [vmem:[%s4046_s30 + $0x2b4] ss:$20 sps:$4 sm:$0xff]  }
  0x8f   : > { %v3880_v11 = vld [vmem:[%s4046_s30 + $0x60] ss:$20 sps:$4 sm:$0xff]  }
  0x95   : > { %1718 = vmatmul.mubr.bf16.gmra.mxu0 %v3785_v12  ;;  %1943 = vmatmul.mubr.bf16.gmra.mxu1 %v3786_v13 }
  0x96   : > { %1725 = vmatprep.mubr.bf16.mxu0 %v3787_v14  ;;  %1950 = vmatprep.mubr.bf16.mxu1 %v3789_v1 }
  0x9d   : > { %1726 = vmatmul.mubr.bf16.gmra.mxu0 %v3791_v15  ;;  %1951 = vmatmul.mubr.bf16.gmra.mxu1 %v3792_v16 }
  0x9e   : > { %1733 = vmatprep.mubr.bf16.mxu0 %v3793_v17  ;;  %1958 = vmatprep.mubr.bf16.mxu1 %v3795_v18  ;;  %v3881_v17 = vld [vmem:[%s4046_s30 + $0x2b0] ss:$20 sps:$4 sm:$0xff]   ;;  %v3882_v18 = vld [vmem:[%s4046_s30 + $0x88] ss:$20 sps:$4 sm:$0xff]  }
  0xa5   : > { %1734 = vmatmul.mubr.bf16.gmra.mxu0 %v3797_v19  ;;  %1959 = vmatmul.mubr.bf16.gmra.mxu1 %v3798_v20  ;;  %v3883_v19 = vld [vmem:[%s4046_s30 + $0x2dc] ss:$20 sps:$4 sm:$0xff]  }
  0xa6   : > { %1741 = vmatprep.mubr.bf16.mxu0 %v3799_v21  ;;  %1966 = vmatprep.mubr.bf16.mxu1 %v3801_v22  ;;  %v3885_v20 = vld [vmem:[%s4046_s30 + $0xb0] ss:$20 sps:$4 sm:$0xff]  }
  0xad   : > { %1742 = vmatmul.mubr.bf16.gmra.mxu0 %v3803_v23  ;;  %1967 = vmatmul.mubr.bf16.gmra.mxu1 %v3804_v24 }
  0xae   : > { %1749 = vmatprep.mubr.bf16.mxu0 %v3806_v25  ;;  %1974 = vmatprep.mubr.bf16.mxu1 %v3808_v26 }
  0xb5   : > { %1750 = vmatmul.mubr.bf16.gmra.mxu0 %v3810_v27  ;;  %1975 = vmatmul.mubr.bf16.gmra.mxu1 %v3811_v28 }
  0xb6   : > { %1757 = vmatprep.mubr.bf16.mxu0 %v3812_v29  ;;  %1982 = vmatprep.mubr.bf16.mxu1 %v3814_v30  ;;  %v3886_v29 = vld [vmem:[%s4046_s30 + $0x2d8] ss:$20 sps:$4 sm:$0xff]  }
  0xb7   : > { %v3887_v30 = vld [vmem:[%s4046_s30 + $0xd8] ss:$20 sps:$4 sm:$0xff]  }
  0xbd   : > { %1758 = vmatmul.mubr.bf16.gmra.mxu0 %v3816_v31  ;;  %1983 = vmatmul.mubr.bf16.gmra.mxu1 %v3817_v32  ;;  %v3888_v31 = vld [vmem:[%s4046_s30 + $0x304] ss:$20 sps:$4 sm:$0xff]   ;;  %v3890_v32 = vld [vmem:[%s4046_s30 + $0x100] ss:$20 sps:$4 sm:$0xff]  }
  0xbe   : > { %1765 = vmatprep.mubr.bf16.mxu0 %v3818_v33  ;;  %1990 = vmatprep.mubr.bf16.mxu1 %v3820_v34 }
  0xc5   : > { %1766 = vmatmul.mubr.bf16.gmra.mxu0 %v3822_v35  ;;  %1991 = vmatmul.mubr.bf16.gmra.mxu1 %v3823_v36 }
  0xc6   : > { %1773 = vmatprep.mubr.bf16.mxu0 %v3824_v37  ;;  %1998 = vmatprep.mubr.bf16.mxu1 %v3826_v38 }
  0xcd   : > { %1774 = vmatmul.mubr.bf16.gmra.mxu0 %v3828_v39  ;;  %1999 = vmatmul.mubr.bf16.gmra.mxu1 %v3829_v40 }
  0xce   : > { %1781 = vmatprep.mubr.bf16.mxu0 %v3830_v41  ;;  %2006 = vmatprep.mubr.bf16.mxu1 %v3832_v42  ;;  %v3891_v41 = vld [vmem:[%s4046_s30 + $0x300] ss:$20 sps:$4 sm:$0xff]   ;;  %v3892_v42 = vld [vmem:[%s4046_s30 + $0x128] ss:$20 sps:$4 sm:$0xff]  }
  0xd5   : > { %1782 = vmatmul.mubr.bf16.gmra.mxu0 %v3834_v43  ;;  %2007 = vmatmul.mubr.bf16.gmra.mxu1 %v3835_v44  ;;  %v3895_v43 = vld [vmem:[%s4046_s30 + $0x32c] ss:$20 sps:$4 sm:$0xff]   ;;  %v3896_v44 = vld [vmem:[%s4046_s30 + $0x150] ss:$20 sps:$4 sm:$0xff]  }
  0xd6   : > { %1789 = vmatprep.mubr.bf16.mxu0 %v3836_v45  ;;  %2014 = vmatprep.mubr.bf16.mxu1 %v3838_v46 }
  0xdd   : > { %1790 = vmatmul.mubr.bf16.gmra.mxu0 %v3840_v47  ;;  %2015 = vmatmul.mubr.bf16.gmra.mxu1 %v3841_v48 }
  0xde   : > { %1797 = vmatprep.mubr.bf16.mxu0 %v3843_v49  ;;  %2022 = vmatprep.mubr.bf16.mxu1 %v3845_v50 }
  0xe5   : > { %1798 = vmatmul.mubr.bf16.gmra.mxu0 %v3847_v51  ;;  %2023 = vmatmul.mubr.bf16.gmra.mxu1 %v3848_v52 }
  0xe6   : > { %1805 = vmatprep.mubr.bf16.mxu0 %v3849_v53  ;;  %2030 = vmatprep.mubr.bf16.mxu1 %v3851_v54  ;;  %v3893_v53 = vld [vmem:[%s4046_s30 + $0x328] ss:$20 sps:$4 sm:$0xff]   ;;  %v3897_v54 = vld [vmem:[%s4046_s30 + $0x178] ss:$20 sps:$4 sm:$0xff]  }
  0xed   : > { %1806 = vmatmul.mubr.bf16.gmra.mxu0 %v3853_v55  ;;  %2031 = vmatmul.mubr.bf16.gmra.mxu1 %v3854_v56  ;;  %v3900_v55 = vld [vmem:[%s4046_s30 + $0x354] ss:$20 sps:$4 sm:$0xff]  }
  0xee   : > { %1813 = vmatprep.mubr.bf16.mxu0 %v3855_v57  ;;  %2038 = vmatprep.mubr.bf16.mxu1 %v3857_v58  ;;  %v3901_v56 = vld [vmem:[%s4046_s30 + $0x1a0] ss:$20 sps:$4 sm:$0xff]  }
  0xf5   : > { %1814 = vmatmul.mubr.bf16.gmra.mxu0 %v3859_v59  ;;  %2039 = vmatmul.mubr.bf16.gmra.mxu1 %v3860_v60 }
  0xf6   : > { %1821 = vmatprep.mubr.bf16.mxu0 %v3861_v61  ;;  %2046 = vmatprep.mubr.bf16.mxu1 %v3863_v62 }
  0xfd   : > { %1822 = vmatmul.mubr.bf16.gmra.mxu0 %v3865_v63  ;;  %2047 = vmatmul.mubr.bf16.gmra.mxu1 %v3866_v0 }
  0xfe   : > { %1829 = vmatprep.mubr.bf16.mxu0 %v3867_v2  ;;  %2054 = vmatprep.mubr.bf16.mxu1 %v3869_v3  ;;  %v3898_v2 = vld [vmem:[%s4046_s30 + $0x350] ss:$20 sps:$4 sm:$0xff]   ;;  %v3902_v3 = vld [vmem:[%s4046_s30 + $0x1c8] ss:$20 sps:$4 sm:$0xff]  }
 0x105   : > { %1830 = vmatmul.mubr.bf16.gmra.mxu0 %v3871_v4  ;;  %2055 = vmatmul.mubr.bf16.gmra.mxu1 %v3872_v5  ;;  %v3905_v4 = vld [vmem:[%s4046_s30 + $0x37c] ss:$20 sps:$4 sm:$0xff]  }
 0x106   : > { %2062 = vmatprep.mubr.bf16.mxu1 %v3873_v6  ;;  %3571 = vmatprep.mubr.msk.bf16.mxu0 %vm1516_vm0, %v3875_v7  ;;  %v3906_v5 = vld [vmem:[%s4046_s30 + $0x1f0] ss:$20 sps:$4 sm:$0xff]  }
 0x10d   : > { %v4284_v12 = vpop.f32.mrf.mxu0  ;;  %v4286_v13 = vpop.f32.mrf.mxu1  ;;  %2063 = vmatmul.mubr.bf16.gmra.mxu1 %v3876_v8  ;;  %3572 = vmatmul.mubr.msk.bf16.vlgmr.msra.gmra.mxu0 %vm1516_vm0, %v3877_v9 }
 0x10e   : > { %4855 = vst [vmem:[#allocation2_spill] sm:$0xff] %v4286_v13  ;;  %2070 = vmatprep.mubr.bf16.mxu1 %v3878_v10  ;;  %3575 = vmatprep.mubr.msk.bf16.mxu0 %vm1516_vm0, %v3880_v11 }
 0x10f   : > { %v1649_v14 = vpop.f32.mrf.mxu0  ;;  %v1841_v1 = vpop.f32.mrf.mxu1 }
 0x111   : > { %v4290_v15 = vpop.f32.mrf.mxu0  ;;  %v4292_v16 = vpop.f32.mrf.mxu1 }
 0x112   : > { %4856 = vst [vmem:[#allocation3_spill] sm:$0xff] %v4292_v16 }
 0x113   : > { %v1652_v21 = vpop.f32.mrf.mxu0  ;;  %v1844_v22 = vpop.f32.mrf.mxu1 }
 0x115   : > { %v4298_v23 = vpop.f32.mrf.mxu0  ;;  %v4300_v24 = vpop.f32.mrf.mxu1  ;;  %2071 = vmatmul.mubr.bf16.gmra.mxu1 %v3881_v17  ;;  %3576 = vmatmul.mubr.msk.bf16.gmra.mxu0 %vm1516_vm0, %v3882_v18  ;;  %v3903_v17 = vld [vmem:[%s4046_s30 + $0x378] ss:$20 sps:$4 sm:$0xff]  }
 0x116   : > { %4857 = vst [vmem:[#allocation4_spill] sm:$0xff] %v4300_v24  ;;  %2078 = vmatprep.mubr.bf16.mxu1 %v3883_v19  ;;  %3579 = vmatprep.mubr.msk.bf16.mxu0 %vm1516_vm0, %v3885_v20  ;;  %v3907_v18 = vld [vmem:[%s4046_s30 + $0x218] ss:$20 sps:$4 sm:$0xff]   ;;  %v3911_v20 = vld [vmem:[%s4046_s30 + $0x240] ss:$20 sps:$4 sm:$0xff]  }
 0x117   : > { %v1657_v25 = vpop.f32.mrf.mxu0  ;;  %v1849_v26 = vpop.f32.mrf.mxu1  ;;  %v3910_v19 = vld [vmem:[%s4046_s30 + $0x3a4] ss:$20 sps:$4 sm:$0xff]  }
 0x119   : > { %v4304_v27 = vpop.f32.mrf.mxu0  ;;  %v4306_v28 = vpop.f32.mrf.mxu1 }
 0x11a   : > { %4858 = vst [vmem:[#allocation5_spill] sm:$0xff] %v4306_v28 }
 0x11b   : > { %v1660_v33 = vpop.f32.mrf.mxu0  ;;  %v1852_v34 = vpop.f32.mrf.mxu1 }
 0x11c   : > { %v3908_v33 = vld [vmem:[%s4046_s30 + $0x3a0] ss:$20 sps:$4 sm:$0xff]   ;;  %v3912_v34 = vld [vmem:[%s4046_s30 + $0x268] ss:$20 sps:$4 sm:$0xff]  }
 0x11d   : > { %v4312_v35 = vpop.f32.mrf.mxu0  ;;  %v4314_v36 = vpop.f32.mrf.mxu1  ;;  %2079 = vmatmul.mubr.bf16.gmra.mxu1 %v3886_v29  ;;  %3580 = vmatmul.mubr.msk.bf16.gmra.mxu0 %vm1516_vm0, %v3887_v30 }
 0x11e   : > { %4859 = vst [vmem:[#allocation6_spill] sm:$0xff] %v4314_v36  ;;  %2086 = vmatprep.mubr.bf16.mxu1 %v3888_v31  ;;  %3583 = vmatprep.mubr.msk.bf16.mxu0 %vm1516_vm0, %v3890_v32 }
 0x11f   : > { %v1665_v37 = vpop.f32.mrf.mxu0  ;;  %v1857_v38 = vpop.f32.mrf.mxu1 }
 0x120   : > { %v3915_v37 = vld [vmem:[%s4046_s30 + $0x3cc] ss:$20 sps:$4 sm:$0xff]   ;;  %v3916_v38 = vld [vmem:[%s4046_s30 + $0x290] ss:$20 sps:$4 sm:$0xff]  }
 0x121   : > { %v4318_v39 = vpop.f32.mrf.mxu0  ;;  %v4320_v40 = vpop.f32.mrf.mxu1 }
 0x122   : > { %4860 = vst [vmem:[#allocation7_spill] sm:$0xff] %v4320_v40 }
 0x123   : > { %v1668_v45 = vpop.f32.mrf.mxu0  ;;  %v1860_v46 = vpop.f32.mrf.mxu1 }
 0x125   : > { %v4326_v47 = vpop.f32.mrf.mxu0  ;;  %v4328_v48 = vpop.f32.mrf.mxu1  ;;  %2087 = vmatmul.mubr.bf16.gmra.mxu1 %v3891_v41  ;;  %3584 = vmatmul.mubr.msk.bf16.gmra.mxu0 %vm1516_vm0, %v3892_v42 }
 0x126   : > { %4861 = vst [vmem:[#allocation8_spill] sm:$0xff] %v4328_v48  ;;  %2094 = vmatprep.mubr.bf16.mxu1 %v3895_v43  ;;  %3587 = vmatprep.mubr.msk.bf16.mxu0 %vm1516_vm0, %v3896_v44 }
 0x127   : > { %v1673_v49 = vpop.f32.mrf.mxu0  ;;  %v1865_v50 = vpop.f32.mrf.mxu1 }
 0x128   : > { %v4391_v49 = vld [vmem:[%s4853_s2] ss:$0 sm:$0xff] }
 0x129   : > { %v4332_v51 = vpop.f32.mrf.mxu0  ;;  %v4334_v52 = vpop.f32.mrf.mxu1 }
 0x12a   : > { %4862 = vst [vmem:[#allocation9_spill] sm:$0xff] %v4334_v52 }
 0x12b   : > { %v1676_v57 = vpop.f32.mrf.mxu0  ;;  %v1868_v58 = vpop.f32.mrf.mxu1 }
 0x12c   : > { %v3921_v57 = vld [vmem:[%s4046_s30 + $0x2e0] ss:$20 sps:$4 sm:$0xff]  }
 0x12d   : > { %v4340_v59 = vpop.f32.mrf.mxu0  ;;  %v4342_v60 = vpop.f32.mrf.mxu1  ;;  %2095 = vmatmul.mubr.bf16.gmra.mxu1 %v3893_v53  ;;  %3588 = vmatmul.mubr.msk.bf16.gmra.mxu0 %vm1516_vm0, %v3897_v54  ;;  %v3913_v54 = vld [vmem:[%s4046_s30 + $0x3c8] ss:$20 sps:$4 sm:$0xff]  }
 0x12e   : > { %4863 = vst [vmem:[#allocation10_spill] sm:$0xff] %v4342_v60  ;;  %2102 = vmatprep.mubr.bf16.mxu1 %v3900_v55  ;;  %3591 = vmatprep.mubr.msk.bf16.mxu0 %vm1516_vm0, %v3901_v56  ;;  %v3917_v55 = vld [vmem:[%s4046_s30 + $0x2b8] ss:$20 sps:$4 sm:$0xff]   ;;  %v3920_v56 = vld [vmem:[%s4046_s30 + $0x3f4] ss:$20 sps:$4 sm:$0xff]  }
 0x12f   : > { %v1681_v61 = vpop.f32.mrf.mxu0  ;;  %v1873_v62 = vpop.f32.mrf.mxu1 }
 0x130   : > { %v1648_v62 = vadd.f32 %v4391_v49, %v4284_v12 }
 0x131   : > { %v4346_v63 = vpop.f32.mrf.mxu0  ;;  %v4348_v0 = vpop.f32.mrf.mxu1 }
 0x132   : > { %4864 = vst [vmem:[#allocation11_spill] sm:$0xff] %v4348_v0 }
 0x133   : > { %v1684_v6 = vpop.f32.mrf.mxu0  ;;  %v1876_v7 = vpop.f32.mrf.mxu1 }
 0x134   : > { %v1651_v7 = vadd.f32 %v4391_v49, %v4290_v15 }
 0x135   : > { %v4354_v8 = vpop.f32.mrf.mxu0  ;;  %v4356_v9 = vpop.f32.mrf.mxu1  ;;  %2103 = vmatmul.mubr.bf16.gmra.mxu1 %v3898_v2  ;;  %3592 = vmatmul.mubr.msk.bf16.gmra.mxu0 %vm1516_vm0, %v3902_v3 }
 0x136   : > { %4865 = vst [vmem:[#allocation12_spill] sm:$0xff] %v4356_v9  ;;  %2110 = vmatprep.mubr.bf16.mxu1 %v3905_v4  ;;  %3595 = vmatprep.mubr.msk.bf16.mxu0 %vm1516_vm0, %v3906_v5 }
 0x137   : > { %v1689_v10 = vpop.f32.mrf.mxu0  ;;  %v1881_v11 = vpop.f32.mrf.mxu1 }
 0x138   : > { %v3918_v11 = vld [vmem:[%s4046_s30 + $0x3f0] ss:$20 sps:$4 sm:$0xff]  }
 0x139   : > { %v4360_v14 = vpop.f32.mrf.mxu0  ;;  %v4362_v1 = vpop.f32.mrf.mxu1 }
 0x13a   : > { %4866 = vst [vmem:[#allocation13_spill] sm:$0xff] %v4362_v1 }
 0x13b   : > { %v1692_v21 = vpop.f32.mrf.mxu0  ;;  %v1884_v22 = vpop.f32.mrf.mxu1 }
 0x13d   : > { %v4368_v25 = vpop.f32.mrf.mxu0  ;;  %v4370_v26 = vpop.f32.mrf.mxu1  ;;  %2111 = vmatmul.mubr.bf16.gmra.mxu1 %v3903_v17  ;;  %3596 = vmatmul.mubr.msk.bf16.gmra.mxu0 %vm1516_vm0, %v3907_v18  ;;  %v3922_v17 = vld [vmem:[%s4046_s30 + $0x308] ss:$20 sps:$4 sm:$0xff]  }
 0x13e   : > { %4867 = vst [vmem:[#allocation14_spill] sm:$0xff] %v4370_v26  ;;  %2118 = vmatprep.mubr.bf16.mxu1 %v3910_v19  ;;  %3599 = vmatprep.mubr.msk.bf16.mxu0 %vm1516_vm0, %v3911_v20  ;;  %v3925_v19 = vld [vmem:[%s4046_s30 + $0x41c] ss:$20 sps:$4 sm:$0xff]  }
 0x13f   : > { %v1697_v29 = vpop.f32.mrf.mxu0  ;;  %v1889_v30 = vpop.f32.mrf.mxu1  ;;  %v3926_v20 = vld [vmem:[%s4046_s30 + $0x330] ss:$20 sps:$4 sm:$0xff]  }
 0x140   : > { %v1656_v29 = vadd.f32 %v4391_v49, %v4298_v23 }
 0x141   : > { %v4374_v31 = vpop.f32.mrf.mxu0  ;;  %v4376_v32 = vpop.f32.mrf.mxu1 }
 0x142   : > { %4868 = vst [vmem:[#allocation15_spill] sm:$0xff] %v4376_v32 }
 0x143   : > { %v1700_v41 = vpop.f32.mrf.mxu0  ;;  %v1892_v42 = vpop.f32.mrf.mxu1 }
 0x144   : > { %v3923_v42 = vld [vmem:[%s4046_s30 + $0x418] ss:$20 sps:$4 sm:$0xff]  }
 0x145   : > { %v4382_v43 = vpop.f32.mrf.mxu0  ;;  %v4384_v44 = vpop.f32.mrf.mxu1  ;;  %2119 = vmatmul.mubr.bf16.gmra.mxu1 %v3908_v33  ;;  %3600 = vmatmul.mubr.msk.bf16.gmra.mxu0 %vm1516_vm0, %v3912_v34 }
 0x146   : > { %4869 = vst [vmem:[#allocation16_spill] sm:$0xff] %v4384_v44  ;;  %2126 = vmatprep.mubr.bf16.mxu1 %v3915_v37  ;;  %3603 = vmatprep.mubr.msk.bf16.mxu0 %vm1516_vm0, %v3916_v38  ;;  %v1659_v38 = vadd.f32 %v4391_v49, %v4304_v27 }
 0x147   : > { %v1705_v45 = vpop.f32.mrf.mxu0  ;;  %v1897_v46 = vpop.f32.mrf.mxu1 }
 0x148   : > { %v3927_v45 = vld [vmem:[%s4046_s30 + $0x358] ss:$20 sps:$4 sm:$0xff]  }
 0x149   : > { %v4393_v50 = vpop.f32.mrf.mxu0  ;;  %v4395_v53 = vpop.f32.mrf.mxu1 }
 0x14a   : > { %4870 = vst [vmem:[#allocation17_spill] sm:$0xff] %v4395_v53 }
 0x14b   : > { %v1708_v58 = vpop.f32.mrf.mxu0  ;;  %v1900_v61 = vpop.f32.mrf.mxu1 }
 0x14c   : > { %v1664_v58 = vadd.f32 %v4391_v49, %v4312_v35 }
 0x14d   : > { %v4403_v2 = vpop.f32.mrf.mxu0  ;;  %v1936_v3 = vpop.f32.mrf.mxu1  ;;  %2127 = vmatmul.mubr.bf16.gmra.mxu1 %v3913_v54  ;;  %3604 = vmatmul.mubr.msk.bf16.gmra.mxu0 %vm1516_vm0, %v3917_v55  ;;  %v3930_v54 = vld [vmem:[%s4046_s30 + $0x444] ss:$20 sps:$4 sm:$0xff]   ;;  %v3931_v55 = vld [vmem:[%s4046_s30 + $0x380] ss:$20 sps:$4 sm:$0xff]  }
 0x14e   : > { %v4406_v4 = vadd.f32 %v1936_v3, %v1648_v62  ;;  %2134 = vmatprep.mubr.bf16.mxu1 %v3920_v56  ;;  %3607 = vmatprep.mubr.msk.bf16.mxu0 %vm1516_vm0, %v3921_v57 }
 0x14f   : > { %v1713_v5 = vpop.f32.mrf.mxu0  ;;  %v1938_v6 = vpop.f32.mrf.mxu1 }
 0x150   : > { %v1667_v6 = vadd.f32 %v4391_v49, %v4318_v39 }
 0x151   : > { %v4411_v10 = vpop.f32.mrf.mxu0  ;;  %v1939_v12 = vpop.f32.mrf.mxu1 }
 0x152   : > { %v4415_v18 = vadd.f32 %v1939_v12, %v1651_v7  ;;  %v3928_v12 = vld [vmem:[%s4046_s30 + $0x440] ss:$20 sps:$4 sm:$0xff]  }
 0x153   : > { %v1716_v21 = vpop.f32.mrf.mxu0  ;;  %v1941_v22 = vpop.f32.mrf.mxu1 }
 0x155   : > { %v4421_v30 = vpop.f32.mrf.mxu0  ;;  %v1944_v15 = vpop.f32.mrf.mxu1  ;;  %2135 = vmatmul.mubr.bf16.gmra.mxu1 %v3918_v11  ;;  %3608 = vmatmul.mubr.msk.bf16.gmra.mxu0 %vm1516_vm0, %v3922_v17  ;;  %v3932_v11 = vld [vmem:[%s4046_s30 + $0x3a8] ss:$20 sps:$4 sm:$0xff]  }
 0x156   : > { %v4424_v33 = vadd.f32 %v1944_v15, %v1656_v29  ;;  %2142 = vmatprep.mubr.bf16.mxu1 %v3925_v19  ;;  %3611 = vmatprep.mubr.msk.bf16.mxu0 %vm1516_vm0, %v3926_v20  ;;  %v3935_v19 = vld [vmem:[%s4046_s30 + $0x46c] ss:$20 sps:$4 sm:$0xff]   ;;  %v3936_v20 = vld [vmem:[%s4046_s30 + $0x3d0] ss:$20 sps:$4 sm:$0xff]   ;;  %v1672_v29 = vadd.f32 %v4391_v49, %v4326_v47 }
 0x157   : > { %v1721_v34 = vpop.f32.mrf.mxu0  ;;  %v1946_v37 = vpop.f32.mrf.mxu1 }
 0x159   : > { %v4429_v41 = vpop.f32.mrf.mxu0  ;;  %v1947_v23 = vpop.f32.mrf.mxu1 }
 0x15a   : > { %v4433_v46 = vadd.f32 %v1947_v23, %v1659_v38  ;;  %v1675_v23 = vadd.f32 %v4391_v49, %v4332_v51 }
 0x15b   : > { %v1724_v56 = vpop.f32.mrf.mxu0  ;;  %v1949_v57 = vpop.f32.mrf.mxu1 }
 0x15c   : > { %v3940_v56 = vld [vmem:[%s4046_s30 + $0x494] ss:$20 sps:$4 sm:$0xff]  }
 0x15d   : > { %v4439_v61 = vpop.f32.mrf.mxu0  ;;  %v1952_v27 = vpop.f32.mrf.mxu1  ;;  %2143 = vmatmul.mubr.bf16.gmra.mxu1 %v3923_v42  ;;  %3612 = vmatmul.mubr.msk.bf16.gmra.mxu0 %vm1516_vm0, %v3927_v45  ;;  %v3933_v45 = vld [vmem:[%s4046_s30 + $0x468] ss:$20 sps:$4 sm:$0xff]   ;;  %v3941_v57 = vld [vmem:[%s4046_s30 + $0x420] ss:$20 sps:$4 sm:$0xff]  }
 0x15e   : > { %v4442_v62 = vadd.f32 %v1952_v27, %v1664_v58  ;;  %2150 = vmatprep.mubr.bf16.mxu1 %v3930_v54  ;;  %3615 = vmatprep.mubr.msk.bf16.mxu0 %vm1516_vm0, %v3931_v55  ;;  %v3937_v54 = vld [vmem:[%s4046_s30 + $0x3f8] ss:$20 sps:$4 sm:$0xff]  }
 0x15f   : > { %v1729_v3 = vpop.f32.mrf.mxu0  ;;  %v1954_v5 = vpop.f32.mrf.mxu1 }
 0x160   : > { %v1680_v3 = vadd.f32 %v4391_v49, %v4340_v59 }
 0x161   : > { %v4447_v7 = vpop.f32.mrf.mxu0  ;;  %v1955_v35 = vpop.f32.mrf.mxu1 }
 0x162   : > { %v4451_v17 = vadd.f32 %v1955_v35, %v1667_v6 }
 0x163   : > { %v1732_v21 = vpop.f32.mrf.mxu0  ;;  %v1957_v22 = vpop.f32.mrf.mxu1 }
 0x164   : > { %v3942_v21 = vld [vmem:[%s4046_s30 + $0x448] ss:$20 sps:$4 sm:$0xff]  }
 0x165   : > { %v4457_v15 = vpop.f32.mrf.mxu0  ;;  %v1960_v39 = vpop.f32.mrf.mxu1  ;;  %2151 = vmatmul.mubr.bf16.gmra.mxu1 %v3928_v12  ;;  %3616 = vmatmul.mubr.msk.bf16.gmra.mxu0 %vm1516_vm0, %v3932_v11  ;;  %v1683_v11 = vadd.f32 %v4391_v49, %v4346_v63 }
 0x166   : > { %v4460_v34 = vadd.f32 %v1960_v39, %v1672_v29  ;;  %2158 = vmatprep.mubr.bf16.mxu1 %v3935_v19  ;;  %3619 = vmatprep.mubr.msk.bf16.mxu0 %vm1516_vm0, %v3936_v20  ;;  %v3938_v20 = vld [vmem:[%s4046_s30 + $0x490] ss:$20 sps:$4 sm:$0xff]  }
 0x167   : > { %v1737_v37 = vpop.f32.mrf.mxu0  ;;  %v1962_v38 = vpop.f32.mrf.mxu1  ;;  %v3945_v29 = vld [vmem:[%s4046_s30 + $0x4bc] ss:$20 sps:$4 sm:$0xff]  }
 0x168   : > { %v3946_v39 = vld [vmem:[%s4046_s30 + $0x470] ss:$20 sps:$4 sm:$0xff]  }
 0x169   : > { %v4465_v42 = vpop.f32.mrf.mxu0  ;;  %v1963_v47 = vpop.f32.mrf.mxu1 }
 0x16a   : > { %v4469_v55 = vadd.f32 %v1963_v47, %v1675_v23  ;;  %v1688_v23 = vadd.f32 %v4391_v49, %v4354_v8 }
 0x16b   : > { %v1740_v58 = vpop.f32.mrf.mxu0  ;;  %v1965_v27 = vpop.f32.mrf.mxu1 }
 0x16c   : > { %v3943_v27 = vld [vmem:[%s4046_s30 + $0x4b8] ss:$20 sps:$4 sm:$0xff]  }
 0x16d   : > { %v4475_v5 = vpop.f32.mrf.mxu0  ;;  %v1968_v51 = vpop.f32.mrf.mxu1  ;;  %2159 = vmatmul.mubr.bf16.gmra.mxu1 %v3933_v45  ;;  %3620 = vmatmul.mubr.msk.bf16.gmra.mxu0 %vm1516_vm0, %v3937_v54 }
 0x16e   : > { %v4478_v6 = vadd.f32 %v1968_v51, %v1680_v3  ;;  %2166 = vmatprep.mubr.bf16.mxu1 %v3940_v56  ;;  %3623 = vmatprep.mubr.msk.bf16.mxu0 %vm1516_vm0, %v3941_v57  ;;  %v1691_v57 = vadd.f32 %v4391_v49, %v4360_v14  ;;  %v3947_v3 = vld [vmem:[%s4046_s30 + $0x498] ss:$20 sps:$4 sm:$0xff]  }
 0x16f   : > { %v1745_v35 = vpop.f32.mrf.mxu0  ;;  %v1970_v12 = vpop.f32.mrf.mxu1 }
 0x170   : > { %v3950_v35 = vld [vmem:[%s4046_s30 + $0x4e4] ss:$20 sps:$4 sm:$0xff]   ;;  %v3951_v12 = vld [vmem:[%s4046_s30 + $0x4c0] ss:$20 sps:$4 sm:$0xff]  }
 0x171   : > { %v4483_v19 = vpop.f32.mrf.mxu0  ;;  %v1971_v59 = vpop.f32.mrf.mxu1 }
 0x172   : > { %v4487_v22 = vadd.f32 %v1971_v59, %v1683_v11 }
 0x173   : > { %v1748_v37 = vpop.f32.mrf.mxu0  ;;  %v1973_v38 = vpop.f32.mrf.mxu1 }
 0x174   : > { %v1699_v38 = vadd.f32 %v4391_v49, %v4374_v31 }
 0x175   : > { %v4493_v47 = vpop.f32.mrf.mxu0  ;;  %v1976_v63 = vpop.f32.mrf.mxu1  ;;  %2167 = vmatmul.mubr.bf16.gmra.mxu1 %v3938_v20  ;;  %3624 = vmatmul.mubr.msk.bf16.gmra.mxu0 %vm1516_vm0, %v3942_v21  ;;  %v1696_v20 = vadd.f32 %v4391_v49, %v4368_v25  ;;  %v3948_v25 = vld [vmem:[%s4046_s30 + $0x4e0] ss:$20 sps:$4 sm:$0xff]  }
 0x176   : > { %v4496_v45 = vadd.f32 %v1976_v63, %v1688_v23  ;;  %2174 = vmatprep.mubr.bf16.mxu1 %v3945_v29  ;;  %3627 = vmatprep.mubr.msk.bf16.mxu0 %vm1516_vm0, %v3946_v39 }
 0x177   : > { %v1753_v54 = vpop.f32.mrf.mxu0  ;;  %v1978_v56 = vpop.f32.mrf.mxu1 }
 0x178   : > { %v3952_v54 = vld [vmem:[%s4046_s30 + $0x4e8] ss:$20 sps:$4 sm:$0xff]   ;;  %s2976_s30 = sshll.u32 %s4894_s18, 2 }
 0x179   : > { %v4501_v58 = vpop.f32.mrf.mxu0  ;;  %v1979_v8 = vpop.f32.mrf.mxu1  ;;  %s4648_s4 = scalar_lea.vmem %s4854_s3, %s2976_s30 }
 0x17a   : > { %v4505_v51 = vadd.f32 %v1979_v8, %v1691_v57 }
 0x17b   : > { %v1756_v11 = vpop.f32.mrf.mxu0  ;;  %v1981_v59 = vpop.f32.mrf.mxu1 }
 0x17c   : > { %v1707_v59 = vadd.f32 %v4391_v49, %v4393_v50  ;;  %v1715_v50 = vadd.f32 %v4391_v49, %v4411_v10  ;;  %v1723_v10 = vadd.f32 %v4391_v49, %v4429_v41  ;;  %v1731_v41 = vadd.f32 %v4391_v49, %v4447_v7 }
 0x17d   : > { %v4511_v21 = vpop.f32.mrf.mxu0  ;;  %v1984_v29 = vpop.f32.mrf.mxu1  ;;  %2175 = vmatmul.mubr.bf16.gmra.mxu1 %v3943_v27  ;;  %3628 = vmatmul.mubr.msk.bf16.gmra.mxu0 %vm1516_vm0, %v3947_v3  ;;  %v1704_v27 = vadd.f32 %v4391_v49, %v4382_v43  ;;  %v1739_v7 = vadd.f32 %v4391_v49, %v4465_v42  ;;  %v1747_v42 = vadd.f32 %v4391_v49, %v4483_v19 }
 0x17e   : > { %v4514_v14 = vadd.f32 %v1984_v29, %v1696_v20  ;;  %2182 = vmatprep.mubr.bf16.mxu1 %v3950_v35  ;;  %3631 = vmatprep.mubr.msk.bf16.mxu0 %vm1516_vm0, %v3951_v12  ;;  %v1755_v19 = vadd.f32 %v4391_v49, %v4501_v58 }
 0x17f   : > { %v1761_v39 = vpop.f32.mrf.mxu0  ;;  %v1986_v37 = vpop.f32.mrf.mxu1 }
 0x181   : > { %v4519_v23 = vpop.f32.mrf.mxu0  ;;  %v1987_v63 = vpop.f32.mrf.mxu1 }
 0x182   : > { %v4523_v56 = vadd.f32 %v1987_v63, %v1699_v38  ;;  %v1712_v38 = vadd.f32 %v4391_v49, %v4403_v2  ;;  %v1720_v2 = vadd.f32 %v4391_v49, %v4421_v30  ;;  %v1728_v30 = vadd.f32 %v4391_v49, %v4439_v61 }
 0x183   : > { %v1764_v57 = vpop.f32.mrf.mxu0  ;;  %v1989_v8 = vpop.f32.mrf.mxu1  ;;  %v1736_v61 = vadd.f32 %v4391_v49, %v4457_v15  ;;  %v1744_v15 = vadd.f32 %v4391_v49, %v4475_v5  ;;  %v1752_v5 = vadd.f32 %v4391_v49, %v4493_v47  ;;  %v1760_v47 = vadd.f32 %v4391_v49, %v4511_v21 }
 0x184   : > { %v1763_v58 = vadd.f32 %v4391_v49, %v4519_v23 }
 0x185   : > { %v4527_v3 = vpop.f32.mrf.mxu0  ;;  %v1992_v35 = vpop.f32.mrf.mxu1  ;;  %2183 = vmatmul.mubr.bf16.gmra.mxu1 %v3948_v25  ;;  %3632 = vmatmul.mubr.msk.bf16.gmra.mxu0 %vm1516_vm0, %v3952_v54 }
 0x186   : > { %v4530_v12 = vadd.f32 %v1992_v35, %v1704_v27  ;;  %v1768_v21 = vadd.f32 %v4391_v49, %v4527_v3 }
 0x187   : > { %v1769_v31 = vpop.f32.mrf.mxu0  ;;  %v1994_v11 = vpop.f32.mrf.mxu1 }
 0x189   : > { %v4534_v20 = vpop.f32.mrf.mxu0  ;;  %v1995_v29 = vpop.f32.mrf.mxu1 }
 0x18a   : > { %v4536_v39 = vadd.f32 %v1995_v29, %v1707_v59 }
 0x18b   : > { %v1772_v37 = vpop.f32.mrf.mxu0  ;;  %v1997_v43 = vpop.f32.mrf.mxu1 }
 0x18d   : > { %v4540_v63 = vpop.f32.mrf.mxu0  ;;  %v2000_v25 = vpop.f32.mrf.mxu1 }
 0x18e   : > { %v4542_v54 = vadd.f32 %v2000_v25, %v1712_v38 }
 0x18f   : > { %v1777_v57 = vpop.f32.mrf.mxu0  ;;  %v2002_v8 = vpop.f32.mrf.mxu1 }
 0x191   : > { %v4546_v27 = vpop.f32.mrf.mxu0  ;;  %v2003_v35 = vpop.f32.mrf.mxu1 }
 0x192   : > { %v4548_v31 = vadd.f32 %v2003_v35, %v1715_v50 }
 0x193   : > { %v1780_v11 = vpop.f32.mrf.mxu0  ;;  %v2005_v59 = vpop.f32.mrf.mxu1 }
 0x195   : > { %v4552_v29 = vpop.f32.mrf.mxu0  ;;  %v2008_v37 = vpop.f32.mrf.mxu1 }
 0x196   : > { %v4554_v43 = vadd.f32 %v2008_v37, %v1720_v2 }
 0x197   : > { %v1785_v38 = vpop.f32.mrf.mxu0  ;;  %v2010_v25 = vpop.f32.mrf.mxu1 }
 0x199   : > { %v4558_v57 = vpop.f32.mrf.mxu0  ;;  %v2011_v8 = vpop.f32.mrf.mxu1 }
 0x19a   : > { %v4560_v50 = vadd.f32 %v2011_v8, %v1723_v10 }
 0x19b   : > { %v1788_v35 = vpop.f32.mrf.mxu0  ;;  %v2013_v11 = vpop.f32.mrf.mxu1 }
 0x19d   : > { %v4564_v59 = vpop.f32.mrf.mxu0  ;;  %v2016_v53 = vpop.f32.mrf.mxu1 }
 0x19e   : > { %v4566_v2 = vadd.f32 %v2016_v53, %v1728_v30 }
 0x19f   : > { %v1793_v37 = vpop.f32.mrf.mxu0  ;;  %v2018_v38 = vpop.f32.mrf.mxu1 }
 0x1a1   : > { %v4570_v25 = vpop.f32.mrf.mxu0  ;;  %v2019_v32 = vpop.f32.mrf.mxu1 }
 0x1a2   : > { %v4572_v10 = vadd.f32 %v2019_v32, %v1731_v41 }
 0x1a3   : > { %v1796_v8 = vpop.f32.mrf.mxu0  ;;  %v2021_v35 = vpop.f32.mrf.mxu1 }
 0x1a5   : > { %v4576_v11 = vpop.f32.mrf.mxu0  ;;  %v2024_v26 = vpop.f32.mrf.mxu1 }
 0x1a6   : > { %v4578_v53 = vadd.f32 %v2024_v26, %v1736_v61 }
 0x1a7   : > { %v1801_v30 = vpop.f32.mrf.mxu0  ;;  %v2026_v37 = vpop.f32.mrf.mxu1 }
 0x1a9   : > { %v4582_v38 = vpop.f32.mrf.mxu0  ;;  %v2027_v44 = vpop.f32.mrf.mxu1 }
 0x1aa   : > { %v4584_v32 = vadd.f32 %v2027_v44, %v1739_v7 }
 0x1ab   : > { %v1804_v41 = vpop.f32.mrf.mxu0  ;;  %v2029_v8 = vpop.f32.mrf.mxu1 }
 0x1ad   : > { %v4588_v35 = vpop.f32.mrf.mxu0  ;;  %v2032_v0 = vpop.f32.mrf.mxu1 }
 0x1ae   : > { %v4590_v26 = vadd.f32 %v2032_v0, %v1744_v15 }
 0x1af   : > { %v1809_v61 = vpop.f32.mrf.mxu0  ;;  %v2034_v30 = vpop.f32.mrf.mxu1 }
 0x1b1   : > { %v4594_v37 = vpop.f32.mrf.mxu0  ;;  %v2035_v1 = vpop.f32.mrf.mxu1 }
 0x1b2   : > { %v4596_v44 = vadd.f32 %v2035_v1, %v1747_v42 }
 0x1b3   : > { %v1812_v7 = vpop.f32.mrf.mxu0  ;;  %v2037_v41 = vpop.f32.mrf.mxu1 }
 0x1b5   : > { %v4600_v8 = vpop.f32.mrf.mxu0  ;;  %v2040_v60 = vpop.f32.mrf.mxu1 }
 0x1b6   : > { %v4602_v0 = vadd.f32 %v2040_v60, %v1752_v5 }
 0x1b7   : > { %v1817_v15 = vpop.f32.mrf.mxu0  ;;  %v2042_v61 = vpop.f32.mrf.mxu1 }
 0x1b9   : > { %v4606_v30 = vpop.f32.mrf.mxu0  ;;  %v2043_v9 = vpop.f32.mrf.mxu1 }
 0x1ba   : > { %v4608_v1 = vadd.f32 %v2043_v9, %v1755_v19 }
 0x1bb   : > { %v1820_v42 = vpop.f32.mrf.mxu0  ;;  %v2045_v7 = vpop.f32.mrf.mxu1 }
 0x1bd   : > { %v4612_v41 = vpop.f32.mrf.mxu0  ;;  %v2048_v40 = vpop.f32.mrf.mxu1 }
 0x1be   : > { %v4614_v60 = vadd.f32 %v2048_v40, %v1760_v47 }
 0x1bf   : > { %v1825_v5 = vpop.f32.mrf.mxu0  ;;  %v2050_v15 = vpop.f32.mrf.mxu1 }
 0x1c1   : > { %v4618_v61 = vpop.f32.mrf.mxu0  ;;  %v2051_v52 = vpop.f32.mrf.mxu1 }
 0x1c2   : > { %4871 = vst [vmem:[#allocation18_spill] sm:$0xff] %v4618_v61  ;;  %v4620_v9 = vadd.f32 %v2051_v52, %v1763_v58  ;;  %v1776_v58 = vadd.f32 %v4391_v49, %v4540_v63 }
 0x1c3   : > { %v1828_v19 = vpop.f32.mrf.mxu0  ;;  %v2053_v42 = vpop.f32.mrf.mxu1 }
 0x1c5   : > { %v4624_v7 = vpop.f32.mrf.mxu0  ;;  %v2056_v36 = vpop.f32.mrf.mxu1 }
 0x1c6   : > { %v4626_v40 = vadd.f32 %v2056_v36, %v1768_v21  ;;  %v1779_v36 = vadd.f32 %v4391_v49, %v4546_v27 }
 0x1c7   : > { %v1833_v47 = vpop.f32.mrf.mxu0  ;;  %v2058_v5 = vpop.f32.mrf.mxu1 }
 0x1c9   : > { %v4628_v15 = vpop.f32.mrf.mxu0  ;;  %v4630_v23 = vpop.f32.mrf.mxu1 }
 0x1cb   : > { %v1836_v48 = vpop.f32.mrf.mxu0  ;;  %v2061_v52 = vpop.f32.mrf.mxu1 }
 0x1cd   : > { %v2064_v19 = vpop.f32.mrf.mxu1  ;;  %v3573_v42 = vpop.f32.mrf.mxu0 }
 0x1ce   : > { %v4634_v3 = vadd.f32 %v2064_v19, %v1776_v58  ;;  %v2234_v21 = vadd.f32 %v3573_v42, %v4424_v33 }
 0x1cf   : > { %v2066_v16 = vpop.f32.mrf.mxu1  ;;  %v2225_v28 = vpop.f32.mrf.mxu0 }
 0x1d0   : > { %v2226_v13 = vadd.f32 %v2225_v28, %v4406_v4  ;;  %v2482_v58 = vmax.f32 %v2234_v21, 0.0 }
 0x1d1   : > { %v2067_v47 = vpop.f32.mrf.mxu1  ;;  %v3574_v5 = vpop.f32.mrf.mxu0 }
 0x1d2   : > { %v4640_v48 = vadd.f32 %v2067_v47, %v1779_v36  ;;  %v2237_v63 = vadd.f32 %v3574_v5, %v4433_v46  ;;  %v2480_v4 = vmax.f32 %v2226_v13, 0.0 }
 0x1d3   : > { %v2069_v52 = vpop.f32.mrf.mxu1  ;;  %v2228_v24 = vpop.f32.mrf.mxu0 }
 0x1d4   : > { %v2483_v19 = vmax.f32 %v2237_v63, 0.0  ;;  %v2229_v16 = vadd.f32 %v2228_v24, %v4415_v18 }
 0x1d5   : > { %v4650_v33 = vpop.f32.mrf.mxu1  ;;  %v3577_v28 = vpop.f32.mrf.mxu0 }
 0x1d6   : > { %v3344_v27 = vpack.c.bf16 %v2483_v19, %v2482_v58  ;;  %v2481_v42 = vmax.f32 %v2229_v16, 0.0  ;;  %v2250_v47 = vadd.f32 %v3577_v28, %v4460_v34 }
 0x1d7   : > { %v2074_v46 = vpop.f32.mrf.mxu1  ;;  %v2241_v36 = vpop.f32.mrf.mxu0 }
 0x1d8   : > { %3496 = vst [vmem:[%s4648_s4 + $0x8] sm:$0xff] %v3344_v27   ;;  %v3339_v21 = vpack.c.bf16 %v2481_v42, %v2480_v4  ;;  %v2242_v5 = vadd.f32 %v2241_v36, %v4442_v62  ;;  %v2486_v13 = vmax.f32 %v2250_v47, 0.0 }
 0x1d9   : > { %v4654_v24 = vpop.f32.mrf.mxu1  ;;  %v3578_v18 = vpop.f32.mrf.mxu0 }
 0x1da   : > { %3340 = vst [vmem:[%s4648_s4] sm:$0xff] %v3339_v21   ;;  %v2253_v63 = vadd.f32 %v3578_v18, %v4469_v55  ;;  %v2484_v34 = vmax.f32 %v2242_v5, 0.0 }
 0x1db   : > { %v2077_v52 = vpop.f32.mrf.mxu1  ;;  %v2244_v61 = vpop.f32.mrf.mxu0 }
 0x1dc   : > { %v2487_v58 = vmax.f32 %v2253_v63, 0.0  ;;  %v2245_v19 = vadd.f32 %v2244_v61, %v4451_v17 }
 0x1dd   : > { %v4660_v16 = vpop.f32.mrf.mxu1  ;;  %v3581_v4 = vpop.f32.mrf.mxu0 }
 0x1de   : > { %v3354_v28 = vpack.c.bf16 %v2487_v58, %v2486_v13  ;;  %v2485_v27 = vmax.f32 %v2245_v19, 0.0  ;;  %v2266_v62 = vadd.f32 %v3581_v4, %v4496_v45 }
 0x1df   : > { %v2082_v42 = vpop.f32.mrf.mxu1  ;;  %v2257_v46 = vpop.f32.mrf.mxu0 }
 0x1e0   : > { %3498 = vst [vmem:[%s4648_s4 + $0x18] sm:$0xff] %v3354_v28   ;;  %v3349_v21 = vpack.c.bf16 %v2485_v27, %v2484_v34  ;;  %v2258_v47 = vadd.f32 %v2257_v46, %v4478_v6  ;;  %v2490_v5 = vmax.f32 %v2266_v62, 0.0 }
 0x1e1   : > { %v4664_v55 = vpop.f32.mrf.mxu1  ;;  %v3582_v36 = vpop.f32.mrf.mxu0 }
 0x1e2   : > { %3497 = vst [vmem:[%s4648_s4 + $0x10] sm:$0xff] %v3349_v21   ;;  %v2269_v17 = vadd.f32 %v3582_v36, %v4505_v51  ;;  %v2488_v45 = vmax.f32 %v2258_v47, 0.0 }
 0x1e3   : > { %v2085_v61 = vpop.f32.mrf.mxu1  ;;  %v2260_v18 = vpop.f32.mrf.mxu0 }
 0x1e4   : > { %v2491_v63 = vmax.f32 %v2269_v17, 0.0  ;;  %v2261_v52 = vadd.f32 %v2260_v18, %v4487_v22 }
 0x1e5   : > { %v4670_v13 = vpop.f32.mrf.mxu1  ;;  %v3585_v58 = vpop.f32.mrf.mxu0 }
 0x1e6   : > { %v3364_v19 = vpack.c.bf16 %v2491_v63, %v2490_v5  ;;  %v2489_v4 = vmax.f32 %v2261_v52, 0.0  ;;  %v2282_v6 = vadd.f32 %v3585_v58, %v4530_v12 }
 0x1e7   : > { %v2090_v34 = vpop.f32.mrf.mxu1  ;;  %v2273_v28 = vpop.f32.mrf.mxu0 }
 0x1e8   : > { %3500 = vst [vmem:[%s4648_s4 + $0x28] sm:$0xff] %v3364_v19   ;;  %v3359_v27 = vpack.c.bf16 %v2489_v4, %v2488_v45  ;;  %v2274_v46 = vadd.f32 %v2273_v28, %v4514_v14  ;;  %v2494_v36 = vmax.f32 %v2282_v6, 0.0 }
 0x1e9   : > { %v4674_v51 = vpop.f32.mrf.mxu1  ;;  %v3586_v42 = vpop.f32.mrf.mxu0 }
 0x1ea   : > { %3499 = vst [vmem:[%s4648_s4 + $0x20] sm:$0xff] %v3359_v27   ;;  %v2285_v22 = vadd.f32 %v3586_v42, %v4536_v39  ;;  %v2492_v12 = vmax.f32 %v2274_v46, 0.0 }
 0x1eb   : > { %v2093_v21 = vpop.f32.mrf.mxu1  ;;  %v2276_v62 = vpop.f32.mrf.mxu0 }
 0x1ec   : > { %v2495_v47 = vmax.f32 %v2285_v22, 0.0  ;;  %v2277_v17 = vadd.f32 %v2276_v62, %v4523_v56 }
 0x1ed   : > { %v4680_v61 = vpop.f32.mrf.mxu1  ;;  %v3589_v18 = vpop.f32.mrf.mxu0 }
 0x1ee   : > { %v3374_v5 = vpack.c.bf16 %v2495_v47, %v2494_v36  ;;  %v2493_v63 = vmax.f32 %v2277_v17, 0.0  ;;  %v2298_v14 = vadd.f32 %v3589_v18, %v4554_v43 }
 0x1ef   : > { %v2098_v52 = vpop.f32.mrf.mxu1  ;;  %v2289_v58 = vpop.f32.mrf.mxu0 }
 0x1f0   : > { %3502 = vst [vmem:[%s4648_s4 + $0x38] sm:$0xff] %v3374_v5   ;;  %v3369_v45 = vpack.c.bf16 %v2493_v63, %v2492_v12  ;;  %v2290_v4 = vadd.f32 %v2289_v58, %v4542_v54  ;;  %v2498_v27 = vmax.f32 %v2298_v14, 0.0 }
 0x1f1   : > { %v4684_v39 = vpop.f32.mrf.mxu1  ;;  %v3590_v19 = vpop.f32.mrf.mxu0 }
 0x1f2   : > { %3501 = vst [vmem:[%s4648_s4 + $0x30] sm:$0xff] %v3369_v45   ;;  %v2301_v56 = vadd.f32 %v3590_v19, %v4560_v50  ;;  %v2496_v43 = vmax.f32 %v2290_v4, 0.0 }
 0x1f3   : > { %v2101_v34 = vpop.f32.mrf.mxu1  ;;  %v2292_v28 = vpop.f32.mrf.mxu0 }
 0x1f4   : > { %v2499_v6 = vmax.f32 %v2301_v56, 0.0  ;;  %v2293_v42 = vadd.f32 %v2292_v28, %v4548_v31 }
 0x1f5   : > { %v4690_v46 = vpop.f32.mrf.mxu1  ;;  %v3593_v22 = vpop.f32.mrf.mxu0 }
 0x1f6   : > { %v3384_v21 = vpack.c.bf16 %v2499_v6, %v2498_v27  ;;  %v2497_v62 = vmax.f32 %v2293_v42, 0.0  ;;  %v2314_v54 = vadd.f32 %v3593_v22, %v4578_v53 }
 0x1f7   : > { %v2106_v36 = vpop.f32.mrf.mxu1  ;;  %v2305_v47 = vpop.f32.mrf.mxu0 }
 0x1f8   : > { %3504 = vst [vmem:[%s4648_s4 + $0x48] sm:$0xff] %v3384_v21   ;;  %v3379_v17 = vpack.c.bf16 %v2497_v62, %v2496_v43  ;;  %v2306_v12 = vadd.f32 %v2305_v47, %v4566_v2  ;;  %v2502_v52 = vmax.f32 %v2314_v54, 0.0 }
 0x1f9   : > { %v4694_v50 = vpop.f32.mrf.mxu1  ;;  %v3594_v18 = vpop.f32.mrf.mxu0 }
 0x1fa   : > { %3503 = vst [vmem:[%s4648_s4 + $0x40] sm:$0xff] %v3379_v17   ;;  %v2317_v31 = vadd.f32 %v3594_v18, %v4584_v32  ;;  %v2500_v53 = vmax.f32 %v2306_v12, 0.0 }
 0x1fb   : > { %v2109_v5 = vpop.f32.mrf.mxu1  ;;  %v2308_v63 = vpop.f32.mrf.mxu0 }
 0x1fc   : > { %v2503_v58 = vmax.f32 %v2317_v31, 0.0  ;;  %v2309_v45 = vadd.f32 %v2308_v63, %v4572_v10 }
 0x1fd   : > { %v4700_v14 = vpop.f32.mrf.mxu1  ;;  %v3597_v19 = vpop.f32.mrf.mxu0 }
 0x1fe   : > { %v3394_v4 = vpack.c.bf16 %v2503_v58, %v2502_v52  ;;  %v2501_v56 = vmax.f32 %v2309_v45, 0.0  ;;  %v2330_v2 = vadd.f32 %v3597_v19, %v4602_v0  ;;  %v1771_v0 = vadd.f32 %v4391_v49, %v4534_v20 }
 0x1ff   : > { %v2114_v34 = vpop.f32.mrf.mxu1  ;;  %v2321_v28 = vpop.f32.mrf.mxu0 }
 0x200   : > { %3506 = vst [vmem:[%s4648_s4 + $0x58] sm:$0xff] %v3394_v4   ;;  %v3389_v27 = vpack.c.bf16 %v2501_v56, %v2500_v53  ;;  %v2322_v42 = vadd.f32 %v2321_v28, %v4590_v26  ;;  %v2506_v21 = vmax.f32 %v2330_v2, 0.0  ;;  %v1784_v53 = vadd.f32 %v4391_v49, %v4552_v29 }
 0x201   : > { %v4704_v32 = vpop.f32.mrf.mxu1  ;;  %v3598_v6 = vpop.f32.mrf.mxu0 }
 0x202   : > { %3505 = vst [vmem:[%s4648_s4 + $0x50] sm:$0xff] %v3389_v27   ;;  %v2333_v10 = vadd.f32 %v3598_v6, %v4608_v1  ;;  %v2504_v54 = vmax.f32 %v2322_v42, 0.0  ;;  %v2060_v1 = vadd.f32 %v4630_v23, %v1771_v0 }
 0x203   : > { %v2117_v22 = vpop.f32.mrf.mxu1  ;;  %v2324_v43 = vpop.f32.mrf.mxu0 }
 0x204   : > { %v2507_v62 = vmax.f32 %v2333_v10, 0.0  ;;  %v2325_v36 = vadd.f32 %v2324_v43, %v4596_v44 }
 0x205   : > { %v4710_v47 = vpop.f32.mrf.mxu1  ;;  %v3601_v17 = vpop.f32.mrf.mxu0 }
 0x206   : > { %v3404_v18 = vpack.c.bf16 %v2507_v62, %v2506_v21  ;;  %v2505_v12 = vmax.f32 %v2325_v36, 0.0  ;;  %v2346_v63 = vadd.f32 %v3601_v17, %v4626_v40  ;;  %v1787_v40 = vadd.f32 %v4391_v49, %v4558_v57 }
 0x207   : > { %v2122_v26 = vpop.f32.mrf.mxu1  ;;  %v2337_v31 = vpop.f32.mrf.mxu0 }
 0x208   : > { %3508 = vst [vmem:[%s4648_s4 + $0x68] sm:$0xff] %v3404_v18   ;;  %v3399_v5 = vpack.c.bf16 %v2505_v12, %v2504_v54  ;;  %v2338_v58 = vadd.f32 %v2337_v31, %v4614_v60  ;;  %v2510_v4 = vmax.f32 %v2346_v63, 0.0  ;;  %v2073_v60 = vadd.f32 %v4650_v33, %v1784_v53 }
 0x209   : > { %v4717_v52 = vpop.f32.mrf.mxu1  ;;  %v3602_v44 = vpop.f32.mrf.mxu0  ;;  %v2076_v29 = vadd.f32 %v4654_v24, %v1787_v40  ;;  %v1800_v33 = vadd.f32 %v4391_v49, %v4576_v11  ;;  %v1792_v18 = vadd.f32 %v4391_v49, %v4564_v59  ;;  %v1803_v12 = vadd.f32 %v4391_v49, %v4582_v38 }
 0x20a   : > { %3507 = vst [vmem:[%s4648_s4 + $0x60] sm:$0xff] %v3399_v5   ;;  %v2349_v45 = vadd.f32 %v3602_v44, %v2060_v1  ;;  %v2508_v27 = vmax.f32 %v2338_v58, 0.0  ;;  %v1795_v63 = vadd.f32 %v4391_v49, %v4570_v25  ;;  %v1816_v25 = vadd.f32 %v4391_v49, %v4600_v8 }
 0x20b   : > { %v2125_v19 = vpop.f32.mrf.mxu1  ;;  %v2340_v20 = vpop.f32.mrf.mxu0  ;;  %v2089_v31 = vadd.f32 %v4670_v13, %v1800_v33  ;;  %v2081_v58 = vadd.f32 %v4660_v16, %v1792_v18  ;;  %v2092_v59 = vadd.f32 %v4674_v51, %v1803_v12  ;;  %v1811_v8 = vadd.f32 %v4391_v49, %v4594_v37 }
 0x20c   : > { %v2511_v56 = vmax.f32 %v2349_v45, 0.0  ;;  %v2341_v23 = vadd.f32 %v2340_v20, %v4620_v9  ;;  %v2084_v13 = vadd.f32 %v4664_v55, %v1795_v63  ;;  %v1832_v37 = vadd.f32 %v4391_v49, %v4624_v7 }
 0x20d   : > { %v4726_v34 = vpop.f32.mrf.mxu1  ;;  %v3605_v28 = vpop.f32.mrf.mxu0  ;;  %v1835_v18 = vadd.f32 %v4391_v49, %v4628_v15 }
 0x20e   : > { %v3414_v2 = vpack.c.bf16 %v2511_v56, %v2510_v4  ;;  %v2509_v6 = vmax.f32 %v2341_v23, 0.0  ;;  %v2362_v43 = vadd.f32 %v3605_v28, %v2073_v60  ;;  %v1808_v28 = vadd.f32 %v4391_v49, %v4588_v35 }
 0x20f   : > { %v2130_v42 = vpop.f32.mrf.mxu1  ;;  %v2353_v10 = vpop.f32.mrf.mxu0  ;;  %v1819_v60 = vadd.f32 %v4391_v49, %v4606_v30 }
 0x210   : > { %3510 = vst [vmem:[%s4648_s4 + $0x78] sm:$0xff] %v3414_v2   ;;  %v3409_v22 = vpack.c.bf16 %v2509_v6, %v2508_v27  ;;  %v2354_v57 = vadd.f32 %v2353_v10, %v4634_v3  ;;  %v2514_v0 = vmax.f32 %v2362_v43, 0.0  ;;  %v2105_v2 = vadd.f32 %v4690_v46, %v1816_v25  ;;  %v4874_v25 = vld [vmem:[#allocation2_spill] sm:$0xff] }
 0x211   : > { %v4731_v9 = vpop.f32.mrf.mxu1  ;;  %v3606_v21 = vpop.f32.mrf.mxu0  ;;  %v2097_v43 = vadd.f32 %v4680_v61, %v1808_v28  ;;  %v2108_v35 = vadd.f32 %v4694_v50, %v1819_v60  ;;  %v2100_v46 = vadd.f32 %v4684_v39, %v1811_v8 }
 0x212   : > { %3509 = vst [vmem:[%s4648_s4 + $0x70] sm:$0xff] %v3409_v22   ;;  %v2365_v62 = vadd.f32 %v3606_v21, %v2076_v29  ;;  %v2512_v1 = vmax.f32 %v2354_v57, 0.0 }
 0x213   : > { %v2133_v36 = vpop.f32.mrf.mxu1  ;;  %v2356_v17 = vpop.f32.mrf.mxu0 }
 0x214   : > { %v2515_v54 = vmax.f32 %v2365_v62, 0.0  ;;  %v2357_v24 = vadd.f32 %v2356_v17, %v4640_v48 }
 0x215   : > { %v4742_v26 = vpop.f32.mrf.mxu1  ;;  %v3609_v3 = vpop.f32.mrf.mxu0 }
 0x216   : > { %v3424_v5 = vpack.c.bf16 %v2515_v54, %v2514_v0  ;;  %v2513_v11 = vmax.f32 %v2357_v24, 0.0  ;;  %v2378_v45 = vadd.f32 %v3609_v3, %v2089_v31  ;;  %v1824_v24 = vadd.f32 %v4391_v49, %v4612_v41 }
 0x217   : > { %v2138_v44 = vpop.f32.mrf.mxu1  ;;  %v2369_v48 = vpop.f32.mrf.mxu0  ;;  %v2121_v3 = vadd.f32 %v4710_v47, %v1832_v37  ;;  %v2124_v41 = vadd.f32 %v4717_v52, %v1835_v18 }
 0x218   : > { %3512 = vst [vmem:[%s4648_s4 + $0x88] sm:$0xff] %v3424_v5   ;;  %v3419_v38 = vpack.c.bf16 %v2513_v11, %v2512_v1  ;;  %v2370_v53 = vadd.f32 %v2369_v48, %v2081_v58  ;;  %v2518_v40 = vmax.f32 %v2378_v45, 0.0  ;;  %v4872_v11 = vld [vmem:[#allocation18_spill] sm:$0xff]  ;;  %v2113_v48 = vadd.f32 %v4700_v14, %v1824_v24  ;;  %v4873_v14 = vld [vmem:[#allocation4_spill] sm:$0xff]  ;;  %v4879_v24 = vld [vmem:[#allocation9_spill] sm:$0xff] }
 0x219   : > { %v4750_v19 = vpop.f32.mrf.mxu1  ;;  %v3610_v20 = vpop.f32.mrf.mxu0  ;;  %v1827_v7 = vadd.f32 %v4391_v49, %v4872_v11  ;;  %v4789_v49 = vld [vmem:[%s4853_s2] ss:$0 sm:$0xff]  ;;  %v4880_v11 = vld [vmem:[#allocation7_spill] sm:$0xff] }
 0x21a   : > { %3511 = vst [vmem:[%s4648_s4 + $0x80] sm:$0xff] %v3419_v38   ;;  %v2381_v4 = vadd.f32 %v3610_v20, %v2092_v59  ;;  %v2516_v6 = vmax.f32 %v2370_v53, 0.0  ;;  %v1848_v52 = vadd.f32 %v4789_v49, %v4873_v14  ;;  %v1867_v18 = vadd.f32 %v4789_v49, %v4879_v24  ;;  %v4881_v14 = vld [vmem:[#allocation12_spill] sm:$0xff] }
 0x21b   : > { %v2141_v56 = vpop.f32.mrf.mxu1  ;;  %v2372_v23 = vpop.f32.mrf.mxu0  ;;  %v2116_v45 = vadd.f32 %v4704_v32, %v1827_v7  ;;  %v1840_v32 = vadd.f32 %v4789_v49, %v4874_v25  ;;  %v1859_v7 = vadd.f32 %v4789_v49, %v4880_v11  ;;  %v4883_v25 = vld [vmem:[#allocation13_spill] sm:$0xff] }
 0x21c   : > { %v2519_v16 = vmax.f32 %v2381_v4, 0.0  ;;  %v2373_v51 = vadd.f32 %v2372_v23, %v2084_v13  ;;  %v2137_v60 = vadd.f32 %v4742_v26, %v1848_v52  ;;  %v1880_v52 = vadd.f32 %v4789_v49, %v4881_v14 }
 0x21d   : > { %v4760_v27 = vpop.f32.mrf.mxu1  ;;  %v3613_v55 = vpop.f32.mrf.mxu0 }
 0x21e   : > { %v3434_v42 = vpack.c.bf16 %v2519_v16, %v2518_v40  ;;  %v2517_v10 = vmax.f32 %v2373_v51, 0.0  ;;  %v2394_v21 = vadd.f32 %v3613_v55, %v2105_v2  ;;  %v4875_v40 = vld [vmem:[#allocation5_spill] sm:$0xff] }
 0x21f   : > { %v2146_v29 = vpop.f32.mrf.mxu1  ;;  %v2385_v22 = vpop.f32.mrf.mxu0  ;;  %v1851_v16 = vadd.f32 %v4789_v49, %v4875_v40 }
 0x220   : > { %3514 = vst [vmem:[%s4648_s4 + $0x98] sm:$0xff] %v3434_v42   ;;  %v3429_v30 = vpack.c.bf16 %v2517_v10, %v2516_v6  ;;  %v2386_v36 = vadd.f32 %v2385_v22, %v2097_v43  ;;  %v2522_v54 = vmax.f32 %v2394_v21, 0.0  ;;  %v4876_v42 = vld [vmem:[#allocation3_spill] sm:$0xff]  ;;  %v2129_v22 = vadd.f32 %v4726_v34, %v1840_v32 }
 0x221   : > { %v4768_v57 = vpop.f32.mrf.mxu1  ;;  %v3614_v62 = vpop.f32.mrf.mxu0  ;;  %v1843_v10 = vadd.f32 %v4789_v49, %v4876_v42  ;;  %v2140_v43 = vadd.f32 %v4750_v19, %v1851_v16  ;;  %v4878_v19 = vld [vmem:[#allocation6_spill] sm:$0xff]  ;;  %v1883_v32 = vadd.f32 %v4789_v49, %v4883_v25 }
 0x222   : > { %3513 = vst [vmem:[%s4648_s4 + $0x90] sm:$0xff] %v3429_v30   ;;  %v2397_v17 = vadd.f32 %v3614_v62, %v2108_v35  ;;  %v2520_v31 = vmax.f32 %v2386_v36, 0.0 }
 0x223   : > { %v2149_v33 = vpop.f32.mrf.mxu1  ;;  %v2388_v0 = vpop.f32.mrf.mxu0 }
 0x224   : > { %v2523_v61 = vmax.f32 %v2397_v17, 0.0  ;;  %v2389_v50 = vadd.f32 %v2388_v0, %v2100_v46  ;;  %v2132_v46 = vadd.f32 %v4731_v9, %v1843_v10  ;;  %v4877_v0 = vld [vmem:[#allocation8_spill] sm:$0xff] }
 0x225   : > { %v2152_v12 = vpop.f32.mrf.mxu1  ;;  %v3617_v39 = vpop.f32.mrf.mxu0  ;;  %v1864_v37 = vadd.f32 %v4789_v49, %v4877_v0 }
 0x226   : > { %v3444_v1 = vpack.c.bf16 %v2523_v61, %v2522_v54  ;;  %v2521_v5 = vmax.f32 %v2389_v50, 0.0  ;;  %v2410_v15 = vadd.f32 %v3617_v39, %v2121_v3  ;;  %v1856_v50 = vadd.f32 %v4789_v49, %v4878_v19 }
 0x227   : > { %v2154_v63 = vpop.f32.mrf.mxu1  ;;  %v2401_v44 = vpop.f32.mrf.mxu0  ;;  %v2153_v3 = vadd.f32 %v2152_v12, %v1864_v37 }
 0x228   : > { %3516 = vst [vmem:[%s4648_s4 + $0xa8] sm:$0xff] %v3444_v1   ;;  %v3439_v58 = vpack.c.bf16 %v2521_v5, %v2520_v31  ;;  %v2402_v47 = vadd.f32 %v2401_v44, %v2113_v48  ;;  %v2526_v4 = vmax.f32 %v2410_v15, 0.0  ;;  %v2145_v48 = vadd.f32 %v4760_v27, %v1856_v50 }
 0x229   : > { %v2155_v59 = vpop.f32.mrf.mxu1  ;;  %v3618_v38 = vpop.f32.mrf.mxu0 }
 0x22a   : > { %3515 = vst [vmem:[%s4648_s4 + $0xa0] sm:$0xff] %v3439_v58   ;;  %v2413_v20 = vadd.f32 %v3618_v38, %v2124_v41  ;;  %v2524_v55 = vmax.f32 %v2402_v47, 0.0  ;;  %v2156_v41 = vadd.f32 %v2155_v59, %v1867_v18  ;;  %v2148_v47 = vadd.f32 %v4768_v57, %v1859_v7  ;;  %v4882_v59 = vld [vmem:[#allocation10_spill] sm:$0xff] }
 0x22b   : > { %v2157_v13 = vpop.f32.mrf.mxu1  ;;  %v2404_v53 = vpop.f32.mrf.mxu0 }
 0x22c   : > { %v2527_v56 = vmax.f32 %v2413_v20, 0.0  ;;  %v2405_v23 = vadd.f32 %v2404_v53, %v2116_v45 }
 0x22d   : > { %v4797_v51 = vpop.f32.mrf.mxu1  ;;  %v3621_v28 = vpop.f32.mrf.mxu0 }
 0x22e   : > { %v3454_v2 = vpack.c.bf16 %v2527_v56, %v2526_v4  ;;  %v2525_v6 = vmax.f32 %v2405_v23, 0.0  ;;  %v2426_v30 = vadd.f32 %v3621_v28, %v2137_v60  ;;  %v1872_v23 = vadd.f32 %v4789_v49, %v4882_v59 }
 0x22f   : > { %v2162_v8 = vpop.f32.mrf.mxu1  ;;  %v2417_v29 = vpop.f32.mrf.mxu0 }
 0x230   : > { %3518 = vst [vmem:[%s4648_s4 + $0xb8] sm:$0xff] %v3454_v2   ;;  %v3449_v35 = vpack.c.bf16 %v2525_v6, %v2524_v55  ;;  %v2418_v26 = vadd.f32 %v2417_v29, %v2129_v22  ;;  %v2530_v54 = vmax.f32 %v2426_v30, 0.0  ;;  %v4884_v2 = vld [vmem:[#allocation11_spill] sm:$0xff]  ;;  %v2161_v8 = vadd.f32 %v4797_v51, %v1872_v23  ;;  %v4886_v51 = vld [vmem:[#allocation14_spill] sm:$0xff] }
 0x231   : > { %v2163_v21 = vpop.f32.mrf.mxu1  ;;  %v3622_v62 = vpop.f32.mrf.mxu0  ;;  %v1875_v6 = vadd.f32 %v4789_v49, %v4884_v2 }
 0x232   : > { %3517 = vst [vmem:[%s4648_s4 + $0xb0] sm:$0xff] %v3449_v35   ;;  %v2429_v36 = vadd.f32 %v3622_v62, %v2140_v43  ;;  %v2528_v31 = vmax.f32 %v2418_v26, 0.0 }
 0x233   : > { %v2165_v17 = vpop.f32.mrf.mxu1  ;;  %v2420_v33 = vpop.f32.mrf.mxu0  ;;  %v2164_v62 = vadd.f32 %v2163_v21, %v1875_v6 }
 0x234   : > { %v2531_v34 = vmax.f32 %v2429_v36, 0.0  ;;  %v2421_v61 = vadd.f32 %v2420_v33, %v2132_v46  ;;  %v4885_v33 = vld [vmem:[#allocation16_spill] sm:$0xff] }
 0x235   : > { %v2168_v39 = vpop.f32.mrf.mxu1  ;;  %v3625_v9 = vpop.f32.mrf.mxu0  ;;  %v1896_v0 = vadd.f32 %v4789_v49, %v4885_v33 }
 0x236   : > { %v3464_v1 = vpack.c.bf16 %v2531_v34, %v2530_v54  ;;  %v2529_v5 = vmax.f32 %v2421_v61, 0.0  ;;  %v2442_v15 = vadd.f32 %v3625_v9, %v2153_v3  ;;  %v2169_v16 = vadd.f32 %v2168_v39, %v1880_v52 }
 0x237   : > { %v2170_v63 = vpop.f32.mrf.mxu1  ;;  %v2433_v44 = vpop.f32.mrf.mxu0  ;;  %v1888_v61 = vadd.f32 %v4789_v49, %v4886_v51 }
 0x238   : > { %3520 = vst [vmem:[%s4648_s4 + $0xc8] sm:$0xff] %v3464_v1   ;;  %v3459_v58 = vpack.c.bf16 %v2529_v5, %v2528_v31  ;;  %v2434_v12 = vadd.f32 %v2433_v44, %v2145_v48  ;;  %v2534_v4 = vmax.f32 %v2442_v15, 0.0  ;;  %v4887_v31 = vld [vmem:[#allocation15_spill] sm:$0xff]  ;;  %v4888_v5 = vld [vmem:[#allocation17_spill] sm:$0xff] }
 0x239   : > { %v2171_v38 = vpop.f32.mrf.mxu1  ;;  %v3626_v45 = vpop.f32.mrf.mxu0  ;;  %v1891_v1 = vadd.f32 %v4789_v49, %v4887_v31  ;;  %v1899_v11 = vadd.f32 %v4789_v49, %v4888_v5 }
 0x23a   : > { %3519 = vst [vmem:[%s4648_s4 + $0xc0] sm:$0xff] %v3459_v58   ;;  %v2445_v20 = vadd.f32 %v3626_v45, %v2156_v41  ;;  %v2532_v28 = vmax.f32 %v2434_v12, 0.0  ;;  %v2172_v29 = vadd.f32 %v2171_v38, %v1883_v32 }
 0x23b   : > { %v2173_v13 = vpop.f32.mrf.mxu1  ;;  %v2436_v53 = vpop.f32.mrf.mxu0 }
 0x23c   : > { %v2535_v56 = vmax.f32 %v2445_v20, 0.0  ;;  %v2437_v27 = vadd.f32 %v2436_v53, %v2148_v47 }
 0x23d   : > { %v2176_v40 = vpop.f32.mrf.mxu1  ;;  %v3629_v57 = vpop.f32.mrf.mxu0 }
 0x23e   : > { %v3474_v60 = vpack.c.bf16 %v2535_v56, %v2534_v4  ;;  %v2533_v55 = vmax.f32 %v2437_v27, 0.0  ;;  %v2458_v43 = vadd.f32 %v3629_v57, %v2169_v16  ;;  %v2177_v7 = vadd.f32 %v2176_v40, %v1888_v61 }
 0x23f   : > { %v2178_v42 = vpop.f32.mrf.mxu1  ;;  %v2449_v10 = vpop.f32.mrf.mxu0 }
 0x240   : > { %3522 = vst [vmem:[%s4648_s4 + $0xd8] sm:$0xff] %v3474_v60   ;;  %v3469_v22 = vpack.c.bf16 %v2533_v55, %v2532_v28  ;;  %v2450_v46 = vadd.f32 %v2449_v10, %v2161_v8  ;;  %v2538_v37 = vmax.f32 %v2458_v43, 0.0 }
 0x241   : > { %v2179_v35 = vpop.f32.mrf.mxu1  ;;  %v3630_v30 = vpop.f32.mrf.mxu0 }
 0x242   : > { %3521 = vst [vmem:[%s4648_s4 + $0xd0] sm:$0xff] %v3469_v22   ;;  %v2461_v26 = vadd.f32 %v3630_v30, %v2172_v29  ;;  %v2536_v24 = vmax.f32 %v2450_v46, 0.0  ;;  %v2180_v41 = vadd.f32 %v2179_v35, %v1891_v1 }
 0x243   : > { %v2181_v36 = vpop.f32.mrf.mxu1  ;;  %v2452_v17 = vpop.f32.mrf.mxu0 }
 0x244   : > { %v2539_v54 = vmax.f32 %v2461_v26, 0.0  ;;  %v2453_v34 = vadd.f32 %v2452_v17, %v2164_v62 }
 0x245   : > { %v2184_v19 = vpop.f32.mrf.mxu1  ;;  %v3633_v50 = vpop.f32.mrf.mxu0 }
 0x246   : > { %v3484_v21 = vpack.c.bf16 %v2539_v54, %v2538_v37  ;;  %v2537_v18 = vmax.f32 %v2453_v34, 0.0  ;;  %v2185_v39 = vadd.f32 %v2184_v19, %v1896_v0 }
 0x247   : > { %v2186_v9 = vpop.f32.mrf.mxu1  ;;  %v2465_v3 = vpop.f32.mrf.mxu0 }
 0x248   : > { %3524 = vst [vmem:[%s4648_s4 + $0xe8] sm:$0xff] %v3484_v21   ;;  %v3479_v63 = vpack.c.bf16 %v2537_v18, %v2536_v24  ;;  %v2474_v58 = vadd.f32 %v3633_v50, %v2185_v39  ;;  %v2466_v15 = vadd.f32 %v2465_v3, %v2177_v7 }
 0x249   : > { %v2187_v44 = vpop.f32.mrf.mxu1  ;;  %v3634_v48 = vpop.f32.mrf.mxu0 }
 0x24a   : > { %3523 = vst [vmem:[%s4648_s4 + $0xe0] sm:$0xff] %v3479_v63   ;;  %v2188_v38 = vadd.f32 %v2187_v44, %v1899_v11  ;;  %v2542_v13 = vmax.f32 %v2474_v58, 0.0  ;;  %v2540_v53 = vmax.f32 %v2466_v15, 0.0 }
 0x24b   : > { %v2189_v45 = vpop.f32.mrf.mxu1  ;;  %v2468_v47 = vpop.f32.mrf.mxu0 }
 0x24c   : > { %v2477_v12 = vadd.f32 %v3634_v48, %v2188_v38  ;;  %v2469_v20 = vadd.f32 %v2468_v47, %v2180_v41 }
 0x24e   : > { %v2543_v14 = vmax.f32 %v2477_v12, 0.0  ;;  %v2541_v49 = vmax.f32 %v2469_v20, 0.0 }
 0x250   : > { %v3494_v52 = vpack.c.bf16 %v2543_v14, %v2542_v13  ;;  %v3489_v4 = vpack.c.bf16 %v2541_v49, %v2540_v53 }
 0x252   : > { %3526 = vst [vmem:[%s4648_s4 + $0xf8] sm:$0xff] %v3494_v52   ;;  %3525 = vst [vmem:[%s4648_s4 + $0xf0] sm:$0xff] %v3489_v4  }
 0x253 PF: > { %s13_s14 = sadd.s32 1, %s3976_s14   ;;  %s4889_s12 = smov %s3972_s13 }
 0x254   : > { %p10_p5 = scmp.ge.s32.totalorder %s13_s14, 13   ;;  %s4890_s13 = smov %s4892_s15 }
 0x256   :  { %12 = sbr.rel (!%p10_p5) target bundleno = 2 (0x2), region = 68 }

// kernel: my_model_forward.13
= control target key start
LH: loop header
LB: loop body
LE: loop exit
PB: predicated region body
PF: predicated region fallthrough
CT: control target
= control target key end

     0   :  { %s1152_s15 = smov 0   ;;  %s1483_s0 = inlined_call_operand.vmem [shape: bf16[1536,128], index: 0, kind: input, shape index: {}]   ;;  %s1484_s1 = inlined_call_operand.vmem [shape: bf16[1536,128], index: 1, kind: input, shape index: {}]   ;;  %s1485_s2 = inlined_call_operand.vmem [shape: bf16[1536,128], index: 2, kind: input, shape index: {}]   ;;  %s1486_s3 = inlined_call_operand.vmem [shape: bf16[1536,128], index: 3, kind: input, shape index: {}]   ;;  %s1487_s4 = inlined_call_operand.vmem [shape: bf16[1536,128], index: 4, kind: output, shape index: {}]  }
   0x1 LB: > { %s871_s16 = sadd.s32 4294967295, %s1125_s15   ;;  %p875_p0 = scmp.ge.s32.totalorder %s1125_s15, 1  ;;  %s1125_s15 = sphi %s1152_s15, %s14_s15  }
   0x2   : > { %p196_p1 = scmp.lt.s32.totalorder %s1125_s15, 4 }
   0x4   : > { %p197_p2 = pnand %p875_p0, %p196_p1 }
   0x5   : > { %s876_s17 = sshll.u32 (!%p197_p2), %s871_s16, 6 }
   0x6   : > { %200 = sbr.rel (%p197_p2) target bundleno = 117 (0x75), region = 36  ;;  %p238_p3 = scmp.lt.s32.totalorder (!%p197_p2), %s876_s17, 191 }
   0xb   : > { %s1489_s17 = smov (!%p238_p3, %s876_s17), 191 }
   0xc   : > { %s1160_s18 = sshll.u32 %s1489_s17, 2 }
   0xd   : > { %s1166_s21 = scalar_lea.vmem %s1483_s0, %s1160_s18  ;;  %s1172_s24 = scalar_lea.vmem %s1484_s1, %s1160_s18 }
   0xe   : > { %s1178_s27 = scalar_lea.vmem %s1485_s2, %s1160_s18  ;;  %s1184_s30 = scalar_lea.vmem %s1486_s3, %s1160_s18  ;;  %v267_v0 = vld [vmem:[%s1166_s21] sm:$0xf]  ;;  %v268_v1 = vld [vmem:[%s1166_s21 + $0x4] sm:$0xf]  ;;  %v269_v10 = vld [vmem:[%s1166_s21 + $0x8] sm:$0xf] }
   0xf   : > { %v331_v2 = vld [vmem:[%s1172_s24] sm:$0xf]  ;;  %v332_v3 = vld [vmem:[%s1172_s24 + $0x4] sm:$0xf]  ;;  %v270_v13 = vld [vmem:[%s1166_s21 + $0xc] sm:$0xf]  ;;  %s1208_s7 = scalar_lea.vmem %s1487_s4, %s1160_s18 }
  0x10   : > { %v395_v4 = vmax.bf16 %v331_v2, %v267_v0  ;;  %v459_v5 = vld [vmem:[%s1178_s27] sm:$0xf]  ;;  %v460_v6 = vld [vmem:[%s1178_s27 + $0x4] sm:$0xf]  ;;  %v396_v7 = vmax.bf16 %v332_v3, %v268_v1  ;;  %v333_v14 = vld [vmem:[%s1172_s24 + $0x8] sm:$0xf] }
  0x11   : > { %v523_v8 = vld [vmem:[%s1184_s30] sm:$0xf]  ;;  %v524_v9 = vld [vmem:[%s1184_s30 + $0x4] sm:$0xf]  ;;  %v334_v15 = vld [vmem:[%s1172_s24 + $0xc] sm:$0xf]  ;;  %v397_v16 = vmax.bf16 %v333_v14, %v269_v10 }
  0x12   : > { %v587_v11 = vmax.bf16 %v523_v8, %v459_v5  ;;  %v588_v12 = vmax.bf16 %v524_v9, %v460_v6  ;;  %v398_v17 = vmax.bf16 %v334_v15, %v270_v13  ;;  %v461_v18 = vld [vmem:[%s1178_s27 + $0x8] sm:$0xf]  ;;  %v462_v19 = vld [vmem:[%s1178_s27 + $0xc] sm:$0xf]  ;;  %v271_v25 = vld [vmem:[%s1166_s21 + $0x10] sm:$0xf] }
  0x13   : > { %v525_v20 = vld [vmem:[%s1184_s30 + $0x8] sm:$0xf]  ;;  %v526_v23 = vld [vmem:[%s1184_s30 + $0xc] sm:$0xf]  ;;  %v272_v26 = vld [vmem:[%s1166_s21 + $0x14] sm:$0xf] }
  0x14   : > { %v651_v21 = vmax.bf16 %v587_v11, %v395_v4  ;;  %v652_v22 = vmax.bf16 %v588_v12, %v396_v7  ;;  %v589_v24 = vmax.bf16 %v525_v20, %v461_v18  ;;  %v590_v27 = vmax.bf16 %v526_v23, %v462_v19  ;;  %v335_v28 = vld [vmem:[%s1172_s24 + $0x10] sm:$0xf]  ;;  %v336_v29 = vld [vmem:[%s1172_s24 + $0x14] sm:$0xf]  ;;  %v273_v41 = vld [vmem:[%s1166_s21 + $0x18] sm:$0xf] }
  0x15   : > { %v463_v30 = vld [vmem:[%s1178_s27 + $0x10] sm:$0xf]  ;;  %v399_v33 = vmax.bf16 %v335_v28, %v271_v25  ;;  %v400_v34 = vmax.bf16 %v336_v29, %v272_v26  ;;  %v464_v35 = vld [vmem:[%s1178_s27 + $0x14] sm:$0xf]  ;;  %v274_v42 = vld [vmem:[%s1166_s21 + $0x1c] sm:$0xf] }
  0x16   : > { %v1048_v31 = vcombine.low %v651_v21, %v652_v22  ;;  %v653_v32 = vmax.bf16 %v589_v24, %v397_v16  ;;  %v527_v36 = vld [vmem:[%s1184_s30 + $0x10] sm:$0xf]  ;;  %v528_v37 = vld [vmem:[%s1184_s30 + $0x14] sm:$0xf]  ;;  %v654_v38 = vmax.bf16 %v590_v27, %v398_v17  ;;  %v337_v43 = vld [vmem:[%s1172_s24 + $0x18] sm:$0xf] }
  0x17   : > { %v591_v39 = vmax.bf16 %v527_v36, %v463_v30  ;;  %v592_v40 = vmax.bf16 %v528_v37, %v464_v35  ;;  %v338_v44 = vld [vmem:[%s1172_s24 + $0x1c] sm:$0xf]  ;;  %v401_v45 = vmax.bf16 %v337_v43, %v273_v41  ;;  %v465_v46 = vld [vmem:[%s1178_s27 + $0x18] sm:$0xf]  ;;  %v275_v54 = vld [vmem:[%s1166_s21 + $0x20] sm:$0xf] }
  0x18   : > { %892 = vst [vmem:[%s1208_s7] sm:$0xff] %v1048_v31   ;;  %v466_v47 = vld [vmem:[%s1178_s27 + $0x1c] sm:$0xf]  ;;  %v1049_v48 = vcombine.low %v653_v32, %v654_v38  ;;  %v402_v51 = vmax.bf16 %v338_v44, %v274_v42  ;;  %v529_v52 = vld [vmem:[%s1184_s30 + $0x18] sm:$0xf]  ;;  %v276_v57 = vld [vmem:[%s1166_s21 + $0x24] sm:$0xf] }
  0x19   : > { %v655_v49 = vmax.bf16 %v591_v39, %v399_v33  ;;  %v656_v50 = vmax.bf16 %v592_v40, %v400_v34  ;;  %v530_v53 = vld [vmem:[%s1184_s30 + $0x1c] sm:$0xf]  ;;  %v593_v55 = vmax.bf16 %v529_v52, %v465_v46  ;;  %v339_v58 = vld [vmem:[%s1172_s24 + $0x20] sm:$0xf]  ;;  %v340_v59 = vld [vmem:[%s1172_s24 + $0x24] sm:$0xf] }
  0x1a   : > { %v594_v56 = vmax.bf16 %v530_v53, %v466_v47  ;;  %1050 = vst [vmem:[%s1208_s7 + $0x8] sm:$0xff] %v1049_v48   ;;  %v403_v61 = vmax.bf16 %v339_v58, %v275_v54  ;;  %v404_v62 = vmax.bf16 %v340_v59, %v276_v57  ;;  %v467_v63 = vld [vmem:[%s1178_s27 + $0x20] sm:$0xf]  ;;  %v468_v0 = vld [vmem:[%s1178_s27 + $0x24] sm:$0xf] }
  0x1b   : > { %v1051_v60 = vcombine.low %v655_v49, %v656_v50  ;;  %v531_v1 = vld [vmem:[%s1184_s30 + $0x20] sm:$0xf]  ;;  %v657_v2 = vmax.bf16 %v593_v55, %v401_v45  ;;  %v532_v4 = vld [vmem:[%s1184_s30 + $0x24] sm:$0xf]  ;;  %v277_v6 = vld [vmem:[%s1166_s21 + $0x28] sm:$0xf] }
  0x1c   : > { %v658_v3 = vmax.bf16 %v594_v56, %v402_v51  ;;  %v595_v5 = vmax.bf16 %v531_v1, %v467_v63  ;;  %v278_v7 = vld [vmem:[%s1166_s21 + $0x2c] sm:$0xf]  ;;  %v596_v8 = vmax.bf16 %v532_v4, %v468_v0  ;;  %v341_v9 = vld [vmem:[%s1172_s24 + $0x28] sm:$0xf]  ;;  %v279_v22 = vld [vmem:[%s1166_s21 + $0x30] sm:$0xf] }
  0x1d   : > { %1052 = vst [vmem:[%s1208_s7 + $0x10] sm:$0xff] %v1051_v60   ;;  %v342_v10 = vld [vmem:[%s1172_s24 + $0x2c] sm:$0xf]  ;;  %v469_v11 = vld [vmem:[%s1178_s27 + $0x28] sm:$0xf]  ;;  %v405_v14 = vmax.bf16 %v341_v9, %v277_v6 }
  0x1e   : > { %v1053_v12 = vcombine.low %v657_v2, %v658_v3  ;;  %v659_v13 = vmax.bf16 %v595_v5, %v403_v61  ;;  %v406_v15 = vmax.bf16 %v342_v10, %v278_v7  ;;  %v470_v16 = vld [vmem:[%s1178_s27 + $0x2c] sm:$0xf]  ;;  %v533_v17 = vld [vmem:[%s1184_s30 + $0x28] sm:$0xf]  ;;  %v660_v19 = vmax.bf16 %v596_v8, %v404_v62  ;;  %v280_v23 = vld [vmem:[%s1166_s21 + $0x34] sm:$0xf] }
  0x1f   : > { %v534_v18 = vld [vmem:[%s1184_s30 + $0x2c] sm:$0xf]  ;;  %v597_v20 = vmax.bf16 %v533_v17, %v469_v11  ;;  %v343_v24 = vld [vmem:[%s1172_s24 + $0x30] sm:$0xf]  ;;  %v344_v25 = vld [vmem:[%s1172_s24 + $0x34] sm:$0xf] }
  0x20   : > { %v598_v21 = vmax.bf16 %v534_v18, %v470_v16  ;;  %1054 = vst [vmem:[%s1208_s7 + $0x18] sm:$0xff] %v1053_v12   ;;  %v407_v26 = vmax.bf16 %v343_v24, %v279_v22  ;;  %v471_v27 = vld [vmem:[%s1178_s27 + $0x30] sm:$0xf]  ;;  %v472_v28 = vld [vmem:[%s1178_s27 + $0x34] sm:$0xf]  ;;  %v1055_v29 = vcombine.low %v659_v13, %v660_v19  ;;  %v408_v32 = vmax.bf16 %v344_v25, %v280_v23 }
  0x21   : > { %v661_v30 = vmax.bf16 %v597_v20, %v405_v14  ;;  %v535_v33 = vld [vmem:[%s1184_s30 + $0x30] sm:$0xf]  ;;  %v536_v34 = vld [vmem:[%s1184_s30 + $0x34] sm:$0xf]  ;;  %v281_v35 = vld [vmem:[%s1166_s21 + $0x38] sm:$0xf] }
  0x22   : > { %v662_v31 = vmax.bf16 %v598_v21, %v406_v15  ;;  %v599_v36 = vmax.bf16 %v535_v33, %v471_v27  ;;  %v600_v37 = vmax.bf16 %v536_v34, %v472_v28  ;;  %v282_v38 = vld [vmem:[%s1166_s21 + $0x3c] sm:$0xf]  ;;  %v345_v39 = vld [vmem:[%s1172_s24 + $0x38] sm:$0xf]  ;;  %1056 = vst [vmem:[%s1208_s7 + $0x20] sm:$0xff] %v1055_v29  }
  0x23   : > { %v346_v40 = vld [vmem:[%s1172_s24 + $0x3c] sm:$0xf]  ;;  %v409_v42 = vmax.bf16 %v345_v39, %v281_v35  ;;  %v473_v44 = vld [vmem:[%s1178_s27 + $0x38] sm:$0xf]  ;;  %v283_v51 = vld [vmem:[%s1166_s21 + $0x40] sm:$0xf] }
  0x24   : > { %v1057_v41 = vcombine.low %v661_v30, %v662_v31  ;;  %v410_v43 = vmax.bf16 %v346_v40, %v282_v38  ;;  %v474_v45 = vld [vmem:[%s1178_s27 + $0x3c] sm:$0xf]  ;;  %v537_v46 = vld [vmem:[%s1184_s30 + $0x38] sm:$0xf]  ;;  %v663_v47 = vmax.bf16 %v599_v36, %v407_v26  ;;  %v664_v48 = vmax.bf16 %v600_v37, %v408_v32  ;;  %v284_v52 = vld [vmem:[%s1166_s21 + $0x44] sm:$0xf] }
  0x25   : > { %v538_v49 = vld [vmem:[%s1184_s30 + $0x3c] sm:$0xf]  ;;  %v601_v50 = vmax.bf16 %v537_v46, %v473_v44  ;;  %v347_v54 = vld [vmem:[%s1172_s24 + $0x40] sm:$0xf]  ;;  %v348_v55 = vld [vmem:[%s1172_s24 + $0x44] sm:$0xf] }
  0x26   : > { %1058 = vst [vmem:[%s1208_s7 + $0x28] sm:$0xff] %v1057_v41   ;;  %v602_v53 = vmax.bf16 %v538_v49, %v474_v45  ;;  %v475_v56 = vld [vmem:[%s1178_s27 + $0x40] sm:$0xf]  ;;  %v1059_v57 = vcombine.low %v663_v47, %v664_v48  ;;  %v411_v59 = vmax.bf16 %v347_v54, %v283_v51  ;;  %v412_v60 = vmax.bf16 %v348_v55, %v284_v52  ;;  %v476_v61 = vld [vmem:[%s1178_s27 + $0x44] sm:$0xf] }
  0x27   : > { %v665_v58 = vmax.bf16 %v601_v50, %v409_v42  ;;  %v539_v62 = vld [vmem:[%s1184_s30 + $0x40] sm:$0xf]  ;;  %v540_v63 = vld [vmem:[%s1184_s30 + $0x44] sm:$0xf]  ;;  %v285_v3 = vld [vmem:[%s1166_s21 + $0x48] sm:$0xf] }
  0x28   : > { %v666_v0 = vmax.bf16 %v602_v53, %v410_v43  ;;  %v603_v1 = vmax.bf16 %v539_v62, %v475_v56  ;;  %v604_v2 = vmax.bf16 %v540_v63, %v476_v61  ;;  %v286_v4 = vld [vmem:[%s1166_s21 + $0x4c] sm:$0xf]  ;;  %v349_v5 = vld [vmem:[%s1172_s24 + $0x48] sm:$0xf]  ;;  %1060 = vst [vmem:[%s1208_s7 + $0x30] sm:$0xff] %v1059_v57  }
  0x29   : > { %v350_v6 = vld [vmem:[%s1172_s24 + $0x4c] sm:$0xf]  ;;  %v413_v7 = vmax.bf16 %v349_v5, %v285_v3  ;;  %v477_v8 = vld [vmem:[%s1178_s27 + $0x48] sm:$0xf]  ;;  %v287_v16 = vld [vmem:[%s1166_s21 + $0x50] sm:$0xf] }
  0x2a   : > { %v478_v9 = vld [vmem:[%s1178_s27 + $0x4c] sm:$0xf]  ;;  %v1061_v10 = vcombine.low %v665_v58, %v666_v0  ;;  %v667_v11 = vmax.bf16 %v603_v1, %v411_v59  ;;  %v668_v12 = vmax.bf16 %v604_v2, %v412_v60  ;;  %v414_v13 = vmax.bf16 %v350_v6, %v286_v4  ;;  %v541_v14 = vld [vmem:[%s1184_s30 + $0x48] sm:$0xf]  ;;  %v288_v19 = vld [vmem:[%s1166_s21 + $0x54] sm:$0xf] }
  0x2b   : > { %v542_v15 = vld [vmem:[%s1184_s30 + $0x4c] sm:$0xf]  ;;  %v605_v17 = vmax.bf16 %v541_v14, %v477_v8  ;;  %v351_v20 = vld [vmem:[%s1172_s24 + $0x50] sm:$0xf]  ;;  %v352_v21 = vld [vmem:[%s1172_s24 + $0x54] sm:$0xf] }
  0x2c   : > { %v606_v18 = vmax.bf16 %v542_v15, %v478_v9  ;;  %1062 = vst [vmem:[%s1208_s7 + $0x38] sm:$0xff] %v1061_v10   ;;  %v1063_v22 = vcombine.low %v667_v11, %v668_v12  ;;  %v415_v23 = vmax.bf16 %v351_v20, %v287_v16  ;;  %v416_v24 = vmax.bf16 %v352_v21, %v288_v19  ;;  %v479_v25 = vld [vmem:[%s1178_s27 + $0x50] sm:$0xf]  ;;  %v480_v26 = vld [vmem:[%s1178_s27 + $0x54] sm:$0xf] }
  0x2d   : > { %v543_v27 = vld [vmem:[%s1184_s30 + $0x50] sm:$0xf]  ;;  %v669_v28 = vmax.bf16 %v605_v17, %v413_v7  ;;  %v544_v30 = vld [vmem:[%s1184_s30 + $0x54] sm:$0xf]  ;;  %v289_v32 = vld [vmem:[%s1166_s21 + $0x58] sm:$0xf] }
  0x2e   : > { %v670_v29 = vmax.bf16 %v606_v18, %v414_v13  ;;  %v607_v31 = vmax.bf16 %v543_v27, %v479_v25  ;;  %v290_v33 = vld [vmem:[%s1166_s21 + $0x5c] sm:$0xf]  ;;  %1064 = vst [vmem:[%s1208_s7 + $0x40] sm:$0xff] %v1063_v22   ;;  %v608_v34 = vmax.bf16 %v544_v30, %v480_v26  ;;  %v353_v35 = vld [vmem:[%s1172_s24 + $0x58] sm:$0xf] }
  0x2f   : > { %v354_v36 = vld [vmem:[%s1172_s24 + $0x5c] sm:$0xf]  ;;  %v481_v37 = vld [vmem:[%s1178_s27 + $0x58] sm:$0xf]  ;;  %v417_v40 = vmax.bf16 %v353_v35, %v289_v32  ;;  %v291_v48 = vld [vmem:[%s1166_s21 + $0x60] sm:$0xf] }
  0x30   : > { %v1065_v38 = vcombine.low %v669_v28, %v670_v29  ;;  %v671_v39 = vmax.bf16 %v607_v31, %v415_v23  ;;  %v418_v41 = vmax.bf16 %v354_v36, %v290_v33  ;;  %v482_v42 = vld [vmem:[%s1178_s27 + $0x5c] sm:$0xf]  ;;  %v545_v43 = vld [vmem:[%s1184_s30 + $0x58] sm:$0xf]  ;;  %v672_v45 = vmax.bf16 %v608_v34, %v416_v24  ;;  %v292_v49 = vld [vmem:[%s1166_s21 + $0x64] sm:$0xf] }
  0x31   : > { %v546_v44 = vld [vmem:[%s1184_s30 + $0x5c] sm:$0xf]  ;;  %v609_v46 = vmax.bf16 %v545_v43, %v481_v37  ;;  %v355_v50 = vld [vmem:[%s1172_s24 + $0x60] sm:$0xf]  ;;  %v356_v51 = vld [vmem:[%s1172_s24 + $0x64] sm:$0xf] }
  0x32   : > { %v610_v47 = vmax.bf16 %v546_v44, %v482_v42  ;;  %1066 = vst [vmem:[%s1208_s7 + $0x48] sm:$0xff] %v1065_v38   ;;  %v419_v52 = vmax.bf16 %v355_v50, %v291_v48  ;;  %v483_v53 = vld [vmem:[%s1178_s27 + $0x60] sm:$0xf]  ;;  %v484_v54 = vld [vmem:[%s1178_s27 + $0x64] sm:$0xf]  ;;  %v1067_v55 = vcombine.low %v671_v39, %v672_v45  ;;  %v420_v58 = vmax.bf16 %v356_v51, %v292_v49 }
  0x33   : > { %v673_v56 = vmax.bf16 %v609_v46, %v417_v40  ;;  %v547_v59 = vld [vmem:[%s1184_s30 + $0x60] sm:$0xf]  ;;  %v548_v60 = vld [vmem:[%s1184_s30 + $0x64] sm:$0xf]  ;;  %v293_v61 = vld [vmem:[%s1166_s21 + $0x68] sm:$0xf] }
  0x34   : > { %v674_v57 = vmax.bf16 %v610_v47, %v418_v41  ;;  %v611_v62 = vmax.bf16 %v547_v59, %v483_v53  ;;  %v612_v63 = vmax.bf16 %v548_v60, %v484_v54  ;;  %v294_v0 = vld [vmem:[%s1166_s21 + $0x6c] sm:$0xf]  ;;  %v357_v1 = vld [vmem:[%s1172_s24 + $0x68] sm:$0xf]  ;;  %1068 = vst [vmem:[%s1208_s7 + $0x50] sm:$0xff] %v1067_v55  }
  0x35   : > { %v358_v2 = vld [vmem:[%s1172_s24 + $0x6c] sm:$0xf]  ;;  %v421_v4 = vmax.bf16 %v357_v1, %v293_v61  ;;  %v485_v6 = vld [vmem:[%s1178_s27 + $0x68] sm:$0xf]  ;;  %v295_v13 = vld [vmem:[%s1166_s21 + $0x70] sm:$0xf] }
  0x36   : > { %v1069_v3 = vcombine.low %v673_v56, %v674_v57  ;;  %v422_v5 = vmax.bf16 %v358_v2, %v294_v0  ;;  %v486_v7 = vld [vmem:[%s1178_s27 + $0x6c] sm:$0xf]  ;;  %v549_v8 = vld [vmem:[%s1184_s30 + $0x68] sm:$0xf]  ;;  %v675_v9 = vmax.bf16 %v611_v62, %v419_v52  ;;  %v676_v10 = vmax.bf16 %v612_v63, %v420_v58  ;;  %v296_v14 = vld [vmem:[%s1166_s21 + $0x74] sm:$0xf] }
  0x37   : > { %v550_v11 = vld [vmem:[%s1184_s30 + $0x6c] sm:$0xf]  ;;  %v613_v12 = vmax.bf16 %v549_v8, %v485_v6  ;;  %v359_v16 = vld [vmem:[%s1172_s24 + $0x70] sm:$0xf]  ;;  %v360_v17 = vld [vmem:[%s1172_s24 + $0x74] sm:$0xf] }
  0x38   : > { %1070 = vst [vmem:[%s1208_s7 + $0x58] sm:$0xff] %v1069_v3   ;;  %v614_v15 = vmax.bf16 %v550_v11, %v486_v7  ;;  %v487_v18 = vld [vmem:[%s1178_s27 + $0x70] sm:$0xf]  ;;  %v1071_v19 = vcombine.low %v675_v9, %v676_v10  ;;  %v423_v21 = vmax.bf16 %v359_v16, %v295_v13  ;;  %v424_v22 = vmax.bf16 %v360_v17, %v296_v14  ;;  %v488_v23 = vld [vmem:[%s1178_s27 + $0x74] sm:$0xf] }
  0x39   : > { %v677_v20 = vmax.bf16 %v613_v12, %v421_v4  ;;  %v551_v24 = vld [vmem:[%s1184_s30 + $0x70] sm:$0xf]  ;;  %v552_v25 = vld [vmem:[%s1184_s30 + $0x74] sm:$0xf]  ;;  %v297_v29 = vld [vmem:[%s1166_s21 + $0x78] sm:$0xf] }
  0x3a   : > { %v678_v26 = vmax.bf16 %v614_v15, %v422_v5  ;;  %v615_v27 = vmax.bf16 %v551_v24, %v487_v18  ;;  %v616_v28 = vmax.bf16 %v552_v25, %v488_v23  ;;  %v298_v30 = vld [vmem:[%s1166_s21 + $0x7c] sm:$0xf]  ;;  %v361_v31 = vld [vmem:[%s1172_s24 + $0x78] sm:$0xf]  ;;  %1072 = vst [vmem:[%s1208_s7 + $0x60] sm:$0xff] %v1071_v19  }
  0x3b   : > { %v362_v32 = vld [vmem:[%s1172_s24 + $0x7c] sm:$0xf]  ;;  %v425_v33 = vmax.bf16 %v361_v31, %v297_v29  ;;  %v489_v34 = vld [vmem:[%s1178_s27 + $0x78] sm:$0xf]  ;;  %v299_v42 = vld [vmem:[%s1166_s21 + $0x80] sm:$0xf] }
  0x3c   : > { %v490_v35 = vld [vmem:[%s1178_s27 + $0x7c] sm:$0xf]  ;;  %v1073_v36 = vcombine.low %v677_v20, %v678_v26  ;;  %v679_v37 = vmax.bf16 %v615_v27, %v423_v21  ;;  %v680_v38 = vmax.bf16 %v616_v28, %v424_v22  ;;  %v426_v39 = vmax.bf16 %v362_v32, %v298_v30  ;;  %v553_v40 = vld [vmem:[%s1184_s30 + $0x78] sm:$0xf]  ;;  %v300_v45 = vld [vmem:[%s1166_s21 + $0x84] sm:$0xf] }
  0x3d   : > { %v554_v41 = vld [vmem:[%s1184_s30 + $0x7c] sm:$0xf]  ;;  %v617_v43 = vmax.bf16 %v553_v40, %v489_v34  ;;  %v363_v46 = vld [vmem:[%s1172_s24 + $0x80] sm:$0xf]  ;;  %v364_v47 = vld [vmem:[%s1172_s24 + $0x84] sm:$0xf] }
  0x3e   : > { %v618_v44 = vmax.bf16 %v554_v41, %v490_v35  ;;  %1074 = vst [vmem:[%s1208_s7 + $0x68] sm:$0xff] %v1073_v36   ;;  %v1075_v48 = vcombine.low %v679_v37, %v680_v38  ;;  %v427_v49 = vmax.bf16 %v363_v46, %v299_v42  ;;  %v428_v50 = vmax.bf16 %v364_v47, %v300_v45  ;;  %v491_v51 = vld [vmem:[%s1178_s27 + $0x80] sm:$0xf]  ;;  %v492_v52 = vld [vmem:[%s1178_s27 + $0x84] sm:$0xf] }
  0x3f   : > { %v555_v53 = vld [vmem:[%s1184_s30 + $0x80] sm:$0xf]  ;;  %v681_v54 = vmax.bf16 %v617_v43, %v425_v33  ;;  %v556_v56 = vld [vmem:[%s1184_s30 + $0x84] sm:$0xf]  ;;  %v301_v58 = vld [vmem:[%s1166_s21 + $0x88] sm:$0xf] }
  0x40   : > { %v682_v55 = vmax.bf16 %v618_v44, %v426_v39  ;;  %v619_v57 = vmax.bf16 %v555_v53, %v491_v51  ;;  %v302_v59 = vld [vmem:[%s1166_s21 + $0x8c] sm:$0xf]  ;;  %1076 = vst [vmem:[%s1208_s7 + $0x70] sm:$0xff] %v1075_v48   ;;  %v620_v60 = vmax.bf16 %v556_v56, %v492_v52  ;;  %v365_v61 = vld [vmem:[%s1172_s24 + $0x88] sm:$0xf] }
  0x41   : > { %v366_v62 = vld [vmem:[%s1172_s24 + $0x8c] sm:$0xf]  ;;  %v493_v63 = vld [vmem:[%s1178_s27 + $0x88] sm:$0xf]  ;;  %v429_v2 = vmax.bf16 %v365_v61, %v301_v58  ;;  %v303_v10 = vld [vmem:[%s1166_s21 + $0x90] sm:$0xf] }
  0x42   : > { %v1077_v0 = vcombine.low %v681_v54, %v682_v55  ;;  %v683_v1 = vmax.bf16 %v619_v57, %v427_v49  ;;  %v430_v3 = vmax.bf16 %v366_v62, %v302_v59  ;;  %v494_v4 = vld [vmem:[%s1178_s27 + $0x8c] sm:$0xf]  ;;  %v557_v5 = vld [vmem:[%s1184_s30 + $0x88] sm:$0xf]  ;;  %v684_v7 = vmax.bf16 %v620_v60, %v428_v50  ;;  %v304_v11 = vld [vmem:[%s1166_s21 + $0x94] sm:$0xf] }
  0x43   : > { %v558_v6 = vld [vmem:[%s1184_s30 + $0x8c] sm:$0xf]  ;;  %v621_v8 = vmax.bf16 %v557_v5, %v493_v63  ;;  %v367_v12 = vld [vmem:[%s1172_s24 + $0x90] sm:$0xf]  ;;  %v368_v13 = vld [vmem:[%s1172_s24 + $0x94] sm:$0xf] }
  0x44   : > { %v622_v9 = vmax.bf16 %v558_v6, %v494_v4  ;;  %1078 = vst [vmem:[%s1208_s7 + $0x78] sm:$0xff] %v1077_v0   ;;  %v431_v14 = vmax.bf16 %v367_v12, %v303_v10  ;;  %v495_v15 = vld [vmem:[%s1178_s27 + $0x90] sm:$0xf]  ;;  %v496_v16 = vld [vmem:[%s1178_s27 + $0x94] sm:$0xf]  ;;  %v1079_v17 = vcombine.low %v683_v1, %v684_v7  ;;  %v432_v20 = vmax.bf16 %v368_v13, %v304_v11 }
  0x45   : > { %v685_v18 = vmax.bf16 %v621_v8, %v429_v2  ;;  %v559_v21 = vld [vmem:[%s1184_s30 + $0x90] sm:$0xf]  ;;  %v560_v22 = vld [vmem:[%s1184_s30 + $0x94] sm:$0xf]  ;;  %v305_v23 = vld [vmem:[%s1166_s21 + $0x98] sm:$0xf] }
  0x46   : > { %v686_v19 = vmax.bf16 %v622_v9, %v430_v3  ;;  %v623_v24 = vmax.bf16 %v559_v21, %v495_v15  ;;  %v624_v25 = vmax.bf16 %v560_v22, %v496_v16  ;;  %v306_v26 = vld [vmem:[%s1166_s21 + $0x9c] sm:$0xf]  ;;  %v369_v27 = vld [vmem:[%s1172_s24 + $0x98] sm:$0xf]  ;;  %1080 = vst [vmem:[%s1208_s7 + $0x80] sm:$0xff] %v1079_v17  }
  0x47   : > { %v370_v28 = vld [vmem:[%s1172_s24 + $0x9c] sm:$0xf]  ;;  %v433_v30 = vmax.bf16 %v369_v27, %v305_v23  ;;  %v497_v32 = vld [vmem:[%s1178_s27 + $0x98] sm:$0xf]  ;;  %v307_v39 = vld [vmem:[%s1166_s21 + $0xa0] sm:$0xf] }
  0x48   : > { %v1081_v29 = vcombine.low %v685_v18, %v686_v19  ;;  %v434_v31 = vmax.bf16 %v370_v28, %v306_v26  ;;  %v498_v33 = vld [vmem:[%s1178_s27 + $0x9c] sm:$0xf]  ;;  %v561_v34 = vld [vmem:[%s1184_s30 + $0x98] sm:$0xf]  ;;  %v687_v35 = vmax.bf16 %v623_v24, %v431_v14  ;;  %v688_v36 = vmax.bf16 %v624_v25, %v432_v20  ;;  %v308_v40 = vld [vmem:[%s1166_s21 + $0xa4] sm:$0xf] }
  0x49   : > { %v562_v37 = vld [vmem:[%s1184_s30 + $0x9c] sm:$0xf]  ;;  %v625_v38 = vmax.bf16 %v561_v34, %v497_v32  ;;  %v371_v42 = vld [vmem:[%s1172_s24 + $0xa0] sm:$0xf]  ;;  %v372_v43 = vld [vmem:[%s1172_s24 + $0xa4] sm:$0xf] }
  0x4a   : > { %1082 = vst [vmem:[%s1208_s7 + $0x88] sm:$0xff] %v1081_v29   ;;  %v626_v41 = vmax.bf16 %v562_v37, %v498_v33  ;;  %v499_v44 = vld [vmem:[%s1178_s27 + $0xa0] sm:$0xf]  ;;  %v1083_v45 = vcombine.low %v687_v35, %v688_v36  ;;  %v435_v47 = vmax.bf16 %v371_v42, %v307_v39  ;;  %v436_v48 = vmax.bf16 %v372_v43, %v308_v40  ;;  %v500_v49 = vld [vmem:[%s1178_s27 + $0xa4] sm:$0xf] }
  0x4b   : > { %v689_v46 = vmax.bf16 %v625_v38, %v433_v30  ;;  %v563_v50 = vld [vmem:[%s1184_s30 + $0xa0] sm:$0xf]  ;;  %v564_v51 = vld [vmem:[%s1184_s30 + $0xa4] sm:$0xf]  ;;  %v309_v55 = vld [vmem:[%s1166_s21 + $0xa8] sm:$0xf] }
  0x4c   : > { %v690_v52 = vmax.bf16 %v626_v41, %v434_v31  ;;  %v627_v53 = vmax.bf16 %v563_v50, %v499_v44  ;;  %v628_v54 = vmax.bf16 %v564_v51, %v500_v49  ;;  %v310_v56 = vld [vmem:[%s1166_s21 + $0xac] sm:$0xf]  ;;  %v373_v57 = vld [vmem:[%s1172_s24 + $0xa8] sm:$0xf]  ;;  %1084 = vst [vmem:[%s1208_s7 + $0x90] sm:$0xff] %v1083_v45  }
  0x4d   : > { %v374_v58 = vld [vmem:[%s1172_s24 + $0xac] sm:$0xf]  ;;  %v437_v59 = vmax.bf16 %v373_v57, %v309_v55  ;;  %v501_v60 = vld [vmem:[%s1178_s27 + $0xa8] sm:$0xf]  ;;  %v311_v4 = vld [vmem:[%s1166_s21 + $0xb0] sm:$0xf] }
  0x4e   : > { %v502_v61 = vld [vmem:[%s1178_s27 + $0xac] sm:$0xf]  ;;  %v1085_v62 = vcombine.low %v689_v46, %v690_v52  ;;  %v691_v63 = vmax.bf16 %v627_v53, %v435_v47  ;;  %v692_v0 = vmax.bf16 %v628_v54, %v436_v48  ;;  %v438_v1 = vmax.bf16 %v374_v58, %v310_v56  ;;  %v565_v2 = vld [vmem:[%s1184_s30 + $0xa8] sm:$0xf]  ;;  %v312_v7 = vld [vmem:[%s1166_s21 + $0xb4] sm:$0xf] }
  0x4f   : > { %v566_v3 = vld [vmem:[%s1184_s30 + $0xac] sm:$0xf]  ;;  %v629_v5 = vmax.bf16 %v565_v2, %v501_v60  ;;  %v375_v8 = vld [vmem:[%s1172_s24 + $0xb0] sm:$0xf]  ;;  %v376_v9 = vld [vmem:[%s1172_s24 + $0xb4] sm:$0xf] }
  0x50   : > { %v630_v6 = vmax.bf16 %v566_v3, %v502_v61  ;;  %1086 = vst [vmem:[%s1208_s7 + $0x98] sm:$0xff] %v1085_v62   ;;  %v1087_v10 = vcombine.low %v691_v63, %v692_v0  ;;  %v439_v11 = vmax.bf16 %v375_v8, %v311_v4  ;;  %v440_v12 = vmax.bf16 %v376_v9, %v312_v7  ;;  %v503_v13 = vld [vmem:[%s1178_s27 + $0xb0] sm:$0xf]  ;;  %v504_v14 = vld [vmem:[%s1178_s27 + $0xb4] sm:$0xf] }
  0x51   : > { %v567_v15 = vld [vmem:[%s1184_s30 + $0xb0] sm:$0xf]  ;;  %v693_v16 = vmax.bf16 %v629_v5, %v437_v59  ;;  %v568_v18 = vld [vmem:[%s1184_s30 + $0xb4] sm:$0xf]  ;;  %v313_v20 = vld [vmem:[%s1166_s21 + $0xb8] sm:$0xf] }
  0x52   : > { %v694_v17 = vmax.bf16 %v630_v6, %v438_v1  ;;  %v631_v19 = vmax.bf16 %v567_v15, %v503_v13  ;;  %v314_v21 = vld [vmem:[%s1166_s21 + $0xbc] sm:$0xf]  ;;  %1088 = vst [vmem:[%s1208_s7 + $0xa0] sm:$0xff] %v1087_v10   ;;  %v632_v22 = vmax.bf16 %v568_v18, %v504_v14  ;;  %v377_v23 = vld [vmem:[%s1172_s24 + $0xb8] sm:$0xf] }
  0x53   : > { %v378_v24 = vld [vmem:[%s1172_s24 + $0xbc] sm:$0xf]  ;;  %v505_v25 = vld [vmem:[%s1178_s27 + $0xb8] sm:$0xf]  ;;  %v441_v28 = vmax.bf16 %v377_v23, %v313_v20  ;;  %v315_v36 = vld [vmem:[%s1166_s21 + $0xc0] sm:$0xf] }
  0x54   : > { %v1089_v26 = vcombine.low %v693_v16, %v694_v17  ;;  %v695_v27 = vmax.bf16 %v631_v19, %v439_v11  ;;  %v442_v29 = vmax.bf16 %v378_v24, %v314_v21  ;;  %v506_v30 = vld [vmem:[%s1178_s27 + $0xbc] sm:$0xf]  ;;  %v569_v31 = vld [vmem:[%s1184_s30 + $0xb8] sm:$0xf]  ;;  %v696_v33 = vmax.bf16 %v632_v22, %v440_v12  ;;  %v316_v37 = vld [vmem:[%s1166_s21 + $0xc4] sm:$0xf] }
  0x55   : > { %v570_v32 = vld [vmem:[%s1184_s30 + $0xbc] sm:$0xf]  ;;  %v633_v34 = vmax.bf16 %v569_v31, %v505_v25  ;;  %v379_v38 = vld [vmem:[%s1172_s24 + $0xc0] sm:$0xf]  ;;  %v380_v39 = vld [vmem:[%s1172_s24 + $0xc4] sm:$0xf] }
  0x56   : > { %v634_v35 = vmax.bf16 %v570_v32, %v506_v30  ;;  %1090 = vst [vmem:[%s1208_s7 + $0xa8] sm:$0xff] %v1089_v26   ;;  %v443_v40 = vmax.bf16 %v379_v38, %v315_v36  ;;  %v507_v41 = vld [vmem:[%s1178_s27 + $0xc0] sm:$0xf]  ;;  %v508_v42 = vld [vmem:[%s1178_s27 + $0xc4] sm:$0xf]  ;;  %v1091_v43 = vcombine.low %v695_v27, %v696_v33  ;;  %v444_v46 = vmax.bf16 %v380_v39, %v316_v37 }
  0x57   : > { %v697_v44 = vmax.bf16 %v633_v34, %v441_v28  ;;  %v571_v47 = vld [vmem:[%s1184_s30 + $0xc0] sm:$0xf]  ;;  %v572_v48 = vld [vmem:[%s1184_s30 + $0xc4] sm:$0xf]  ;;  %v317_v49 = vld [vmem:[%s1166_s21 + $0xc8] sm:$0xf] }
  0x58   : > { %v698_v45 = vmax.bf16 %v634_v35, %v442_v29  ;;  %v635_v50 = vmax.bf16 %v571_v47, %v507_v41  ;;  %v636_v51 = vmax.bf16 %v572_v48, %v508_v42  ;;  %v318_v52 = vld [vmem:[%s1166_s21 + $0xcc] sm:$0xf]  ;;  %v381_v53 = vld [vmem:[%s1172_s24 + $0xc8] sm:$0xf]  ;;  %1092 = vst [vmem:[%s1208_s7 + $0xb0] sm:$0xff] %v1091_v43  }
  0x59   : > { %v382_v54 = vld [vmem:[%s1172_s24 + $0xcc] sm:$0xf]  ;;  %v445_v56 = vmax.bf16 %v381_v53, %v317_v49  ;;  %v509_v58 = vld [vmem:[%s1178_s27 + $0xc8] sm:$0xf]  ;;  %v319_v1 = vld [vmem:[%s1166_s21 + $0xd0] sm:$0xf] }
  0x5a   : > { %v1093_v55 = vcombine.low %v697_v44, %v698_v45  ;;  %v446_v57 = vmax.bf16 %v382_v54, %v318_v52  ;;  %v510_v59 = vld [vmem:[%s1178_s27 + $0xcc] sm:$0xf]  ;;  %v573_v60 = vld [vmem:[%s1184_s30 + $0xc8] sm:$0xf]  ;;  %v699_v61 = vmax.bf16 %v635_v50, %v443_v40  ;;  %v700_v62 = vmax.bf16 %v636_v51, %v444_v46  ;;  %v320_v2 = vld [vmem:[%s1166_s21 + $0xd4] sm:$0xf] }
  0x5b   : > { %v574_v63 = vld [vmem:[%s1184_s30 + $0xcc] sm:$0xf]  ;;  %v637_v0 = vmax.bf16 %v573_v60, %v509_v58  ;;  %v383_v4 = vld [vmem:[%s1172_s24 + $0xd0] sm:$0xf]  ;;  %v384_v5 = vld [vmem:[%s1172_s24 + $0xd4] sm:$0xf] }
  0x5c   : > { %1094 = vst [vmem:[%s1208_s7 + $0xb8] sm:$0xff] %v1093_v55   ;;  %v638_v3 = vmax.bf16 %v574_v63, %v510_v59  ;;  %v511_v6 = vld [vmem:[%s1178_s27 + $0xd0] sm:$0xf]  ;;  %v1095_v7 = vcombine.low %v699_v61, %v700_v62  ;;  %v447_v9 = vmax.bf16 %v383_v4, %v319_v1  ;;  %v448_v10 = vmax.bf16 %v384_v5, %v320_v2  ;;  %v512_v11 = vld [vmem:[%s1178_s27 + $0xd4] sm:$0xf] }
  0x5d   : > { %v701_v8 = vmax.bf16 %v637_v0, %v445_v56  ;;  %v575_v12 = vld [vmem:[%s1184_s30 + $0xd0] sm:$0xf]  ;;  %v576_v13 = vld [vmem:[%s1184_s30 + $0xd4] sm:$0xf]  ;;  %v321_v17 = vld [vmem:[%s1166_s21 + $0xd8] sm:$0xf] }
  0x5e   : > { %v702_v14 = vmax.bf16 %v638_v3, %v446_v57  ;;  %v639_v15 = vmax.bf16 %v575_v12, %v511_v6  ;;  %v640_v16 = vmax.bf16 %v576_v13, %v512_v11  ;;  %v322_v18 = vld [vmem:[%s1166_s21 + $0xdc] sm:$0xf]  ;;  %v385_v19 = vld [vmem:[%s1172_s24 + $0xd8] sm:$0xf]  ;;  %1096 = vst [vmem:[%s1208_s7 + $0xc0] sm:$0xff] %v1095_v7  }
  0x5f   : > { %v386_v20 = vld [vmem:[%s1172_s24 + $0xdc] sm:$0xf]  ;;  %v449_v21 = vmax.bf16 %v385_v19, %v321_v17  ;;  %v513_v22 = vld [vmem:[%s1178_s27 + $0xd8] sm:$0xf]  ;;  %v323_v30 = vld [vmem:[%s1166_s21 + $0xe0] sm:$0xf] }
  0x60   : > { %v514_v23 = vld [vmem:[%s1178_s27 + $0xdc] sm:$0xf]  ;;  %v1097_v24 = vcombine.low %v701_v8, %v702_v14  ;;  %v703_v25 = vmax.bf16 %v639_v15, %v447_v9  ;;  %v704_v26 = vmax.bf16 %v640_v16, %v448_v10  ;;  %v450_v27 = vmax.bf16 %v386_v20, %v322_v18  ;;  %v577_v28 = vld [vmem:[%s1184_s30 + $0xd8] sm:$0xf]  ;;  %v324_v33 = vld [vmem:[%s1166_s21 + $0xe4] sm:$0xf] }
  0x61   : > { %v578_v29 = vld [vmem:[%s1184_s30 + $0xdc] sm:$0xf]  ;;  %v641_v31 = vmax.bf16 %v577_v28, %v513_v22  ;;  %v387_v34 = vld [vmem:[%s1172_s24 + $0xe0] sm:$0xf]  ;;  %v388_v35 = vld [vmem:[%s1172_s24 + $0xe4] sm:$0xf] }
  0x62   : > { %v642_v32 = vmax.bf16 %v578_v29, %v514_v23  ;;  %1098 = vst [vmem:[%s1208_s7 + $0xc8] sm:$0xff] %v1097_v24   ;;  %v1099_v36 = vcombine.low %v703_v25, %v704_v26  ;;  %v451_v37 = vmax.bf16 %v387_v34, %v323_v30  ;;  %v452_v38 = vmax.bf16 %v388_v35, %v324_v33  ;;  %v515_v39 = vld [vmem:[%s1178_s27 + $0xe0] sm:$0xf]  ;;  %v516_v40 = vld [vmem:[%s1178_s27 + $0xe4] sm:$0xf] }
  0x63   : > { %v579_v41 = vld [vmem:[%s1184_s30 + $0xe0] sm:$0xf]  ;;  %v705_v42 = vmax.bf16 %v641_v31, %v449_v21  ;;  %v580_v44 = vld [vmem:[%s1184_s30 + $0xe4] sm:$0xf]  ;;  %v325_v46 = vld [vmem:[%s1166_s21 + $0xe8] sm:$0xf] }
  0x64   : > { %v706_v43 = vmax.bf16 %v642_v32, %v450_v27  ;;  %v643_v45 = vmax.bf16 %v579_v41, %v515_v39  ;;  %v326_v47 = vld [vmem:[%s1166_s21 + $0xec] sm:$0xf]  ;;  %1100 = vst [vmem:[%s1208_s7 + $0xd0] sm:$0xff] %v1099_v36   ;;  %v644_v48 = vmax.bf16 %v580_v44, %v516_v40  ;;  %v389_v49 = vld [vmem:[%s1172_s24 + $0xe8] sm:$0xf] }
  0x65   : > { %v390_v50 = vld [vmem:[%s1172_s24 + $0xec] sm:$0xf]  ;;  %v517_v51 = vld [vmem:[%s1178_s27 + $0xe8] sm:$0xf]  ;;  %v453_v54 = vmax.bf16 %v389_v49, %v325_v46  ;;  %v327_v62 = vld [vmem:[%s1166_s21 + $0xf0] sm:$0xf] }
  0x66   : > { %v1101_v52 = vcombine.low %v705_v42, %v706_v43  ;;  %v707_v53 = vmax.bf16 %v643_v45, %v451_v37  ;;  %v454_v55 = vmax.bf16 %v390_v50, %v326_v47  ;;  %v518_v56 = vld [vmem:[%s1178_s27 + $0xec] sm:$0xf]  ;;  %v581_v57 = vld [vmem:[%s1184_s30 + $0xe8] sm:$0xf]  ;;  %v708_v59 = vmax.bf16 %v644_v48, %v452_v38  ;;  %v328_v63 = vld [vmem:[%s1166_s21 + $0xf4] sm:$0xf] }
  0x67   : > { %v582_v58 = vld [vmem:[%s1184_s30 + $0xec] sm:$0xf]  ;;  %v645_v60 = vmax.bf16 %v581_v57, %v517_v51  ;;  %v391_v0 = vld [vmem:[%s1172_s24 + $0xf0] sm:$0xf]  ;;  %v392_v1 = vld [vmem:[%s1172_s24 + $0xf4] sm:$0xf] }
  0x68   : > { %v646_v61 = vmax.bf16 %v582_v58, %v518_v56  ;;  %1102 = vst [vmem:[%s1208_s7 + $0xd8] sm:$0xff] %v1101_v52   ;;  %v455_v2 = vmax.bf16 %v391_v0, %v327_v62  ;;  %v519_v3 = vld [vmem:[%s1178_s27 + $0xf0] sm:$0xf]  ;;  %v520_v4 = vld [vmem:[%s1178_s27 + $0xf4] sm:$0xf]  ;;  %v1103_v5 = vcombine.low %v707_v53, %v708_v59  ;;  %v456_v8 = vmax.bf16 %v392_v1, %v328_v63 }
  0x69   : > { %v709_v6 = vmax.bf16 %v645_v60, %v453_v54  ;;  %v583_v9 = vld [vmem:[%s1184_s30 + $0xf0] sm:$0xf]  ;;  %v584_v10 = vld [vmem:[%s1184_s30 + $0xf4] sm:$0xf]  ;;  %v329_v11 = vld [vmem:[%s1166_s21 + $0xf8] sm:$0xf] }
  0x6a   : > { %v710_v7 = vmax.bf16 %v646_v61, %v454_v55  ;;  %v647_v12 = vmax.bf16 %v583_v9, %v519_v3  ;;  %v648_v13 = vmax.bf16 %v584_v10, %v520_v4  ;;  %v330_v14 = vld [vmem:[%s1166_s21 + $0xfc] sm:$0xf]  ;;  %v393_v15 = vld [vmem:[%s1172_s24 + $0xf8] sm:$0xf]  ;;  %1104 = vst [vmem:[%s1208_s7 + $0xe0] sm:$0xff] %v1103_v5  }
  0x6b   : > { %v394_v16 = vld [vmem:[%s1172_s24 + $0xfc] sm:$0xf]  ;;  %v457_v18 = vmax.bf16 %v393_v15, %v329_v11  ;;  %v521_v20 = vld [vmem:[%s1178_s27 + $0xf8] sm:$0xf] }
  0x6c   : > { %v1105_v17 = vcombine.low %v709_v6, %v710_v7  ;;  %v458_v19 = vmax.bf16 %v394_v16, %v330_v14  ;;  %v522_v21 = vld [vmem:[%s1178_s27 + $0xfc] sm:$0xf]  ;;  %v585_v22 = vld [vmem:[%s1184_s30 + $0xf8] sm:$0xf]  ;;  %v711_v23 = vmax.bf16 %v647_v12, %v455_v2  ;;  %v712_v24 = vmax.bf16 %v648_v13, %v456_v8 }
  0x6d   : > { %v586_v25 = vld [vmem:[%s1184_s30 + $0xfc] sm:$0xf]  ;;  %v649_v26 = vmax.bf16 %v585_v22, %v521_v20 }
  0x6e   : > { %1106 = vst [vmem:[%s1208_s7 + $0xe8] sm:$0xff] %v1105_v17   ;;  %v650_v27 = vmax.bf16 %v586_v25, %v522_v21  ;;  %v1107_v28 = vcombine.low %v711_v23, %v712_v24 }
  0x6f   : > { %v713_v29 = vmax.bf16 %v649_v26, %v457_v18 }
  0x70   : > { %v714_v30 = vmax.bf16 %v650_v27, %v458_v19  ;;  %1108 = vst [vmem:[%s1208_s7 + $0xf0] sm:$0xff] %v1107_v28  }
  0x72   : > { %v1109_v31 = vcombine.low %v713_v29, %v714_v30 }
  0x74   : > { %1110 = vst [vmem:[%s1208_s7 + $0xf8] sm:$0xff] %v1109_v31  }
  0x75 PF: > { %s14_s15 = sadd.s32 1, %s1125_s15  }
  0x76   : > { %p11_p4 = scmp.ge.s32.totalorder %s14_s15, 5  }
  0x78   :  { %13 = sbr.rel (!%p11_p4) target bundleno = 1 (0x1), region = 75 }

// kernel: my_model_forward.14
= control target key start
LH: loop header
LB: loop body
LE: loop exit
PB: predicated region body
PF: predicated region fallthrough
CT: control target
= control target key end

     0   :  { %s8285_s0 = inlined_call_operand.vmem [shape: bf16[16,86528], index: 0, kind: input, shape index: {}]   ;;  %s8286_s1 = inlined_call_operand.vmem [shape: bf16[86528,512], index: 1, kind: input, shape index: {}]   ;;  %s8287_s2 = inlined_call_operand.vmem [shape: f32[1,512], index: 2, kind: input, shape index: {}]   ;;  %s8288_s3 = inlined_call_operand.vmem [shape: bf16[16,512], index: 3, kind: output, shape index: {}]  }
   0x1   :  { %8290 = sst [smem:[#allocation7_spill]] %s8285_s0 }
   0x2   :  { %8291 = sst [smem:[#allocation8_spill]] %s8286_s1 }
   0x3   :  { %s6769_s12 = smov 0   ;;  %s6771_s13 = smov 0  }
   0x4   :  { %s6773_s14 = smov 0   ;;  %s6775_s15 = smov 0  }
   0x5   :  { %s6777_s16 = smov 0   ;;  %s6779_s17 = smov 0  }
   0x6   :  { %s6781_s18 = smov 0   ;;  %s6783_s19 = smov 0  }
   0x7   :  { %s6785_s20 = smov 0   ;;  %s6787_s21 = smov 0  }
   0x8   :  { %s6789_s22 = smov 0  }
   0x9 LB: > { %s5437_s23 = sadd.s32 4294967295, %s6746_s22   ;;  %s25_s24 = sadd.s32 1, %s6738_s20  ;;  %s6746_s22 = sphi %s6789_s22, %s13_s22   ;;  %s6742_s21 = sphi %s6787_s21, %s8308_s21   ;;  %s6738_s20 = sphi %s6785_s20, %s8307_s20   ;;  %s6734_s19 = sphi %s6783_s19, %s8306_s19   ;;  %s6730_s18 = sphi %s6781_s18, %s8305_s18   ;;  %s6726_s17 = sphi %s6779_s17, %s8304_s17   ;;  %s6722_s16 = sphi %s6777_s16, %s8303_s16   ;;  %s6718_s15 = sphi %s6775_s15, %s8302_s15   ;;  %s6714_s14 = sphi %s6773_s14, %s8301_s14   ;;  %s6710_s13 = sphi %s6771_s13, %s8300_s13   ;;  %s6706_s12 = sphi %s6769_s12, %s8299_s12  }
   0xa   : > { %p26_p0 = scmp.ge.s32.totalorder %s25_s24, 26  ;;  %s28_s25 = sadd.s32 1, %s6742_s21 }
   0xb   : > { %s41_s26 = sadd.s32 1, %s6726_s17  ;;  %p48_p1 = scmp.ne.s32.totalorder %s6726_s17, %s6722_s16 }
   0xc   : > { %s8310_s24 = smov (%p26_p0, %s25_s24), 0  ;;  %s8312_s25 = smov (!%p26_p0, %s28_s25), %s6742_s21 }
   0xd   : > { %s37_s27 = ssub.s32 %s6738_s20, %s8310_s24  ;;  %p49_p2 = scmp.eq.s32.totalorder %s6746_s22, 0 }
   0xe   : > { %p30_p3 = scmp.ge.s32.totalorder %s8312_s25, 2  ;;  %p39_p4 = scmp.eq.s32.totalorder %s37_s27, 0 }
   0xf   : > { %p6836_p5 = por %p49_p2, %p48_p1  ;;  %s69_s29 = sadd.s32 1, %s6718_s15 }
  0x10   : > { %s8314_s25 = smov (%p30_p3, %s8312_s25), 0  ;;  %p76_p6 = scmp.ne.s32.totalorder %s6718_s15, %s6714_s14 }
  0x11   : > { %8293 = sst [smem:[#allocation6_spill]] %s8314_s25  ;;  %s65_s4 = ssub.s32 %s6742_s21, %s8314_s25 }
  0x12   : > { %s6844_s30 = scalar_select %p39_p4, %s6726_s17, %s41_s26  }
  0x13   : > { %s66_s5 = sor.u32 %s65_s4, %s37_s27  ;;  %p121_p7 = scmp.eq.s32.totalorder %s65_s4, 0 }
  0x14   : > { %p67_p8 = scmp.eq.s32.totalorder %s66_s5, 0  ;;  %p6850_p9 = por %p76_p6, %p49_p2 }
  0x15   : > { %s123_s7 = sadd.s32 1, %s6710_s13  ;;  %p133_p10 = scmp.ne.s32.totalorder %s6710_s13, %s6706_s12 }
  0x16   : > { %s6858_s8 = scalar_select %p67_p8, %s6718_s15, %s69_s29  }
  0x17   : > { %s6861_s9 = scalar_select %p121_p7, %s6710_s13, %s123_s7  }
  0x18   : > { %p134_p11 = scmp.eq.s32.totalorder %s5437_s23, 51  ;;  %p5440_p13 = scmp.ge.s32.totalorder %s6746_s22, 52 }
  0x1a   : > { %p6863_p12 = por %p134_p11, %p133_p10  ;;  %156 = sbr.rel (%p5440_p13) target bundleno = 271 (0x10f), region = 16 }
  0x1f   : > { %159 = sbr.rel (!%p6836_p5) target bundleno = 53 (0x35), region = 20  ;;  %s161_s11 = sand.u32 (%p6836_p5), 1, %s6726_s17  }
  0x20   : > { %s5899_s26 = smul.u32 (%p6836_p5), 104, %s6738_s20  ;;  %s8296_s0 = sld [smem:[#allocation7_spill]] (%p6836_p5) }
  0x21   : > { %s5904_s27 = smul.u32 (%p6836_p5), 208, %s161_s11 }
  0x23   : > { %s6880_s23 = scalar_lea.vmem (%p6836_p5), [#allocation3], %s5904_s27 }
  0x26   : > { %s6875_s5 = scalar_lea.vmem %s8296_s0, %s5899_s26 }
  0x27   : > { %v182_v0 = vld [vmem:[%s6875_s5] sm:$0xff]  ;;  %v184_v1 = vld [vmem:[%s6875_s5 + $0x8] sm:$0xff]  ;;  %v186_v2 = vld [vmem:[%s6875_s5 + $0x10] sm:$0xff] }
  0x28   : > { %183 = vst [vmem:[%s6880_s23] sm:$0xff] %v182_v0  ;;  %185 = vst [vmem:[%s6880_s23 + $0x8] sm:$0xff] %v184_v1  ;;  %v188_v3 = vld [vmem:[%s6875_s5 + $0x18] sm:$0xff]  ;;  %v190_v4 = vld [vmem:[%s6875_s5 + $0x20] sm:$0xff] }
  0x29   : > { %187 = vst [vmem:[%s6880_s23 + $0x10] sm:$0xff] %v186_v2  ;;  %v192_v5 = vld [vmem:[%s6875_s5 + $0x28] sm:$0xff]  ;;  %189 = vst [vmem:[%s6880_s23 + $0x18] sm:$0xff] %v188_v3  ;;  %v194_v6 = vld [vmem:[%s6875_s5 + $0x30] sm:$0xff] }
  0x2a   : > { %191 = vst [vmem:[%s6880_s23 + $0x20] sm:$0xff] %v190_v4  ;;  %193 = vst [vmem:[%s6880_s23 + $0x28] sm:$0xff] %v192_v5  ;;  %v196_v7 = vld [vmem:[%s6875_s5 + $0x38] sm:$0xff]  ;;  %v198_v8 = vld [vmem:[%s6875_s5 + $0x40] sm:$0xff] }
  0x2b   : > { %195 = vst [vmem:[%s6880_s23 + $0x30] sm:$0xff] %v194_v6  ;;  %197 = vst [vmem:[%s6880_s23 + $0x38] sm:$0xff] %v196_v7  ;;  %v200_v9 = vld [vmem:[%s6875_s5 + $0x48] sm:$0xff]  ;;  %v202_v10 = vld [vmem:[%s6875_s5 + $0x50] sm:$0xff] }
  0x2c   : > { %199 = vst [vmem:[%s6880_s23 + $0x40] sm:$0xff] %v198_v8  ;;  %v204_v11 = vld [vmem:[%s6875_s5 + $0x58] sm:$0xff]  ;;  %201 = vst [vmem:[%s6880_s23 + $0x48] sm:$0xff] %v200_v9  ;;  %v206_v12 = vld [vmem:[%s6875_s5 + $0x60] sm:$0xff] }
  0x2d   : > { %203 = vst [vmem:[%s6880_s23 + $0x50] sm:$0xff] %v202_v10  ;;  %205 = vst [vmem:[%s6880_s23 + $0x58] sm:$0xff] %v204_v11  ;;  %v208_v13 = vld [vmem:[%s6875_s5 + $0xa90] sm:$0xff]  ;;  %v210_v14 = vld [vmem:[%s6875_s5 + $0xa98] sm:$0xff] }
  0x2e   : > { %207 = vst [vmem:[%s6880_s23 + $0x60] sm:$0xff] %v206_v12  ;;  %209 = vst [vmem:[%s6880_s23 + $0x68] sm:$0xff] %v208_v13  ;;  %v212_v15 = vld [vmem:[%s6875_s5 + $0xaa0] sm:$0xff]  ;;  %v214_v16 = vld [vmem:[%s6875_s5 + $0xaa8] sm:$0xff] }
  0x2f   : > { %211 = vst [vmem:[%s6880_s23 + $0x70] sm:$0xff] %v210_v14  ;;  %v216_v17 = vld [vmem:[%s6875_s5 + $0xab0] sm:$0xff]  ;;  %213 = vst [vmem:[%s6880_s23 + $0x78] sm:$0xff] %v212_v15  ;;  %v218_v18 = vld [vmem:[%s6875_s5 + $0xab8] sm:$0xff] }
  0x30   : > { %215 = vst [vmem:[%s6880_s23 + $0x80] sm:$0xff] %v214_v16  ;;  %217 = vst [vmem:[%s6880_s23 + $0x88] sm:$0xff] %v216_v17  ;;  %v220_v19 = vld [vmem:[%s6875_s5 + $0xac0] sm:$0xff]  ;;  %v222_v20 = vld [vmem:[%s6875_s5 + $0xac8] sm:$0xff] }
  0x31   : > { %219 = vst [vmem:[%s6880_s23 + $0x90] sm:$0xff] %v218_v18  ;;  %221 = vst [vmem:[%s6880_s23 + $0x98] sm:$0xff] %v220_v19  ;;  %v224_v21 = vld [vmem:[%s6875_s5 + $0xad0] sm:$0xff]  ;;  %v226_v22 = vld [vmem:[%s6875_s5 + $0xad8] sm:$0xff] }
  0x32   : > { %223 = vst [vmem:[%s6880_s23 + $0xa0] sm:$0xff] %v222_v20  ;;  %v228_v23 = vld [vmem:[%s6875_s5 + $0xae0] sm:$0xff]  ;;  %225 = vst [vmem:[%s6880_s23 + $0xa8] sm:$0xff] %v224_v21  ;;  %v230_v24 = vld [vmem:[%s6875_s5 + $0xae8] sm:$0xff] }
  0x33   : > { %227 = vst [vmem:[%s6880_s23 + $0xb0] sm:$0xff] %v226_v22  ;;  %229 = vst [vmem:[%s6880_s23 + $0xb8] sm:$0xff] %v228_v23  ;;  %v232_v25 = vld [vmem:[%s6875_s5 + $0xaf0] sm:$0xff] }
  0x34   : > { %231 = vst [vmem:[%s6880_s23 + $0xc0] sm:$0xff] %v230_v24  ;;  %233 = vst [vmem:[%s6880_s23 + $0xc8] sm:$0xff] %v232_v25 }
  0x35 PF: > { %239 = sbr.rel (!%p6850_p9) target bundleno = 271 (0x10f), region = 43  ;;  %s241_s28 = sand.u32 (%p6850_p9), 1, %s6718_s15  }
  0x36   : > { %s5905_s7 = smul.u32 (%p6850_p9), 3328, %s241_s28  ;;  %s5442_s11 = sshll.u32 (%p6850_p9), %s6742_s21, 1 }
  0x37   : > { %s5900_s26 = smul.u32 (%p6850_p9), 1664, %s6738_s20  ;;  %s8297_s1 = sld [smem:[#allocation8_spill]] (%p6850_p9) }
  0x38   : > { %s6944_s6 = scalar_lea.vmem (%p6850_p9), [#allocation4], %s5905_s7 }
  0x39   : > { %s247_s27 = sadd.s32 (%p6850_p9), %s5900_s26, %s5442_s11 }
  0x3a   : > { %s5444_s29 = sshll.u32 %s247_s27, 2 }
  0x3d   : > { %s6939_s25 = scalar_lea.vmem %s8297_s1, %s5444_s29 }
  0x3e   : > { %v1108_v26 = vld [vmem:[%s6939_s25] sm:$0xff]  ;;  %v1110_v27 = vld [vmem:[%s6939_s25 + $0x10] sm:$0xff] }
  0x3f   : > { %v1112_v28 = vld [vmem:[%s6939_s25 + $0x20] sm:$0xff]  ;;  %1109 = vst [vmem:[%s6944_s6] sm:$0xff] %v1108_v26  ;;  %1111 = vst [vmem:[%s6944_s6 + $0x8] sm:$0xff] %v1110_v27  ;;  %v1114_v29 = vld [vmem:[%s6939_s25 + $0x30] sm:$0xff] }
  0x40   : > { %1113 = vst [vmem:[%s6944_s6 + $0x10] sm:$0xff] %v1112_v28  ;;  %v1116_v30 = vld [vmem:[%s6939_s25 + $0x40] sm:$0xff]  ;;  %v1118_v31 = vld [vmem:[%s6939_s25 + $0x50] sm:$0xff]  ;;  %1115 = vst [vmem:[%s6944_s6 + $0x18] sm:$0xff] %v1114_v29 }
  0x41   : > { %1117 = vst [vmem:[%s6944_s6 + $0x20] sm:$0xff] %v1116_v30  ;;  %1119 = vst [vmem:[%s6944_s6 + $0x28] sm:$0xff] %v1118_v31  ;;  %v1120_v32 = vld [vmem:[%s6939_s25 + $0x60] sm:$0xff]  ;;  %v1122_v33 = vld [vmem:[%s6939_s25 + $0x70] sm:$0xff] }
  0x42   : > { %v1124_v34 = vld [vmem:[%s6939_s25 + $0x80] sm:$0xff]  ;;  %1121 = vst [vmem:[%s6944_s6 + $0x30] sm:$0xff] %v1120_v32  ;;  %1123 = vst [vmem:[%s6944_s6 + $0x38] sm:$0xff] %v1122_v33  ;;  %v1126_v35 = vld [vmem:[%s6939_s25 + $0x90] sm:$0xff] }
  0x43   : > { %1125 = vst [vmem:[%s6944_s6 + $0x40] sm:$0xff] %v1124_v34  ;;  %v1128_v36 = vld [vmem:[%s6939_s25 + $0xa0] sm:$0xff]  ;;  %v1130_v37 = vld [vmem:[%s6939_s25 + $0xb0] sm:$0xff]  ;;  %1127 = vst [vmem:[%s6944_s6 + $0x48] sm:$0xff] %v1126_v35 }
  0x44   : > { %1129 = vst [vmem:[%s6944_s6 + $0x50] sm:$0xff] %v1128_v36  ;;  %1131 = vst [vmem:[%s6944_s6 + $0x58] sm:$0xff] %v1130_v37  ;;  %v1132_v38 = vld [vmem:[%s6939_s25 + $0xc0] sm:$0xff]  ;;  %v1134_v39 = vld [vmem:[%s6939_s25 + $0xd0] sm:$0xff] }
  0x45   : > { %v1136_v40 = vld [vmem:[%s6939_s25 + $0xe0] sm:$0xff]  ;;  %1133 = vst [vmem:[%s6944_s6 + $0x60] sm:$0xff] %v1132_v38  ;;  %1135 = vst [vmem:[%s6944_s6 + $0x68] sm:$0xff] %v1134_v39  ;;  %v1138_v41 = vld [vmem:[%s6939_s25 + $0xf0] sm:$0xff] }
  0x46   : > { %1137 = vst [vmem:[%s6944_s6 + $0x70] sm:$0xff] %v1136_v40  ;;  %v1140_v42 = vld [vmem:[%s6939_s25 + $0x100] sm:$0xff]  ;;  %v1142_v43 = vld [vmem:[%s6939_s25 + $0x110] sm:$0xff]  ;;  %1139 = vst [vmem:[%s6944_s6 + $0x78] sm:$0xff] %v1138_v41 }
  0x47   : > { %1141 = vst [vmem:[%s6944_s6 + $0x80] sm:$0xff] %v1140_v42  ;;  %1143 = vst [vmem:[%s6944_s6 + $0x88] sm:$0xff] %v1142_v43  ;;  %v1144_v44 = vld [vmem:[%s6939_s25 + $0x120] sm:$0xff]  ;;  %v1146_v45 = vld [vmem:[%s6939_s25 + $0x130] sm:$0xff] }
  0x48   : > { %v1148_v46 = vld [vmem:[%s6939_s25 + $0x140] sm:$0xff]  ;;  %1145 = vst [vmem:[%s6944_s6 + $0x90] sm:$0xff] %v1144_v44  ;;  %1147 = vst [vmem:[%s6944_s6 + $0x98] sm:$0xff] %v1146_v45  ;;  %v1150_v47 = vld [vmem:[%s6939_s25 + $0x150] sm:$0xff] }
  0x49   : > { %1149 = vst [vmem:[%s6944_s6 + $0xa0] sm:$0xff] %v1148_v46  ;;  %v1152_v48 = vld [vmem:[%s6939_s25 + $0x160] sm:$0xff]  ;;  %v1154_v49 = vld [vmem:[%s6939_s25 + $0x170] sm:$0xff]  ;;  %1151 = vst [vmem:[%s6944_s6 + $0xa8] sm:$0xff] %v1150_v47 }
  0x4a   : > { %1153 = vst [vmem:[%s6944_s6 + $0xb0] sm:$0xff] %v1152_v48  ;;  %1155 = vst [vmem:[%s6944_s6 + $0xb8] sm:$0xff] %v1154_v49  ;;  %v1156_v50 = vld [vmem:[%s6939_s25 + $0x180] sm:$0xff]  ;;  %v1158_v51 = vld [vmem:[%s6939_s25 + $0x190] sm:$0xff] }
  0x4b   : > { %v1160_v52 = vld [vmem:[%s6939_s25 + $0x1a0] sm:$0xff]  ;;  %1157 = vst [vmem:[%s6944_s6 + $0xc0] sm:$0xff] %v1156_v50  ;;  %1159 = vst [vmem:[%s6944_s6 + $0xc8] sm:$0xff] %v1158_v51  ;;  %v1162_v53 = vld [vmem:[%s6939_s25 + $0x1b0] sm:$0xff] }
  0x4c   : > { %1161 = vst [vmem:[%s6944_s6 + $0xd0] sm:$0xff] %v1160_v52  ;;  %v1164_v54 = vld [vmem:[%s6939_s25 + $0x1c0] sm:$0xff]  ;;  %v1166_v55 = vld [vmem:[%s6939_s25 + $0x1d0] sm:$0xff]  ;;  %1163 = vst [vmem:[%s6944_s6 + $0xd8] sm:$0xff] %v1162_v53 }
  0x4d   : > { %1165 = vst [vmem:[%s6944_s6 + $0xe0] sm:$0xff] %v1164_v54  ;;  %1167 = vst [vmem:[%s6944_s6 + $0xe8] sm:$0xff] %v1166_v55  ;;  %v1168_v56 = vld [vmem:[%s6939_s25 + $0x1e0] sm:$0xff]  ;;  %v1170_v57 = vld [vmem:[%s6939_s25 + $0x1f0] sm:$0xff] }
  0x4e   : > { %v1172_v58 = vld [vmem:[%s6939_s25 + $0x200] sm:$0xff]  ;;  %1169 = vst [vmem:[%s6944_s6 + $0xf0] sm:$0xff] %v1168_v56  ;;  %1171 = vst [vmem:[%s6944_s6 + $0xf8] sm:$0xff] %v1170_v57  ;;  %v1174_v59 = vld [vmem:[%s6939_s25 + $0x210] sm:$0xff] }
  0x4f   : > { %1173 = vst [vmem:[%s6944_s6 + $0x100] sm:$0xff] %v1172_v58  ;;  %v1176_v60 = vld [vmem:[%s6939_s25 + $0x220] sm:$0xff]  ;;  %v1178_v61 = vld [vmem:[%s6939_s25 + $0x230] sm:$0xff]  ;;  %1175 = vst [vmem:[%s6944_s6 + $0x108] sm:$0xff] %v1174_v59 }
  0x50   : > { %1177 = vst [vmem:[%s6944_s6 + $0x110] sm:$0xff] %v1176_v60  ;;  %1179 = vst [vmem:[%s6944_s6 + $0x118] sm:$0xff] %v1178_v61  ;;  %v1180_v62 = vld [vmem:[%s6939_s25 + $0x240] sm:$0xff]  ;;  %v1182_v63 = vld [vmem:[%s6939_s25 + $0x250] sm:$0xff] }
  0x51   : > { %v1184_v0 = vld [vmem:[%s6939_s25 + $0x260] sm:$0xff]  ;;  %1181 = vst [vmem:[%s6944_s6 + $0x120] sm:$0xff] %v1180_v62  ;;  %1183 = vst [vmem:[%s6944_s6 + $0x128] sm:$0xff] %v1182_v63  ;;  %v1186_v1 = vld [vmem:[%s6939_s25 + $0x270] sm:$0xff] }
  0x52   : > { %1185 = vst [vmem:[%s6944_s6 + $0x130] sm:$0xff] %v1184_v0  ;;  %v1188_v2 = vld [vmem:[%s6939_s25 + $0x280] sm:$0xff]  ;;  %v1190_v3 = vld [vmem:[%s6939_s25 + $0x290] sm:$0xff]  ;;  %1187 = vst [vmem:[%s6944_s6 + $0x138] sm:$0xff] %v1186_v1 }
  0x53   : > { %1189 = vst [vmem:[%s6944_s6 + $0x140] sm:$0xff] %v1188_v2  ;;  %1191 = vst [vmem:[%s6944_s6 + $0x148] sm:$0xff] %v1190_v3  ;;  %v1192_v4 = vld [vmem:[%s6939_s25 + $0x2a0] sm:$0xff]  ;;  %v1194_v5 = vld [vmem:[%s6939_s25 + $0x2b0] sm:$0xff] }
  0x54   : > { %v1196_v6 = vld [vmem:[%s6939_s25 + $0x2c0] sm:$0xff]  ;;  %1193 = vst [vmem:[%s6944_s6 + $0x150] sm:$0xff] %v1192_v4  ;;  %1195 = vst [vmem:[%s6944_s6 + $0x158] sm:$0xff] %v1194_v5  ;;  %v1198_v7 = vld [vmem:[%s6939_s25 + $0x2d0] sm:$0xff] }
  0x55   : > { %1197 = vst [vmem:[%s6944_s6 + $0x160] sm:$0xff] %v1196_v6  ;;  %v1200_v8 = vld [vmem:[%s6939_s25 + $0x2e0] sm:$0xff]  ;;  %v1202_v9 = vld [vmem:[%s6939_s25 + $0x2f0] sm:$0xff]  ;;  %1199 = vst [vmem:[%s6944_s6 + $0x168] sm:$0xff] %v1198_v7 }
  0x56   : > { %1201 = vst [vmem:[%s6944_s6 + $0x170] sm:$0xff] %v1200_v8  ;;  %1203 = vst [vmem:[%s6944_s6 + $0x178] sm:$0xff] %v1202_v9  ;;  %v1204_v10 = vld [vmem:[%s6939_s25 + $0x300] sm:$0xff]  ;;  %v1206_v11 = vld [vmem:[%s6939_s25 + $0x310] sm:$0xff] }
  0x57   : > { %v1208_v12 = vld [vmem:[%s6939_s25 + $0x320] sm:$0xff]  ;;  %1205 = vst [vmem:[%s6944_s6 + $0x180] sm:$0xff] %v1204_v10  ;;  %1207 = vst [vmem:[%s6944_s6 + $0x188] sm:$0xff] %v1206_v11  ;;  %v1210_v13 = vld [vmem:[%s6939_s25 + $0x330] sm:$0xff] }
  0x58   : > { %1209 = vst [vmem:[%s6944_s6 + $0x190] sm:$0xff] %v1208_v12  ;;  %v1212_v14 = vld [vmem:[%s6939_s25 + $0x340] sm:$0xff]  ;;  %v1214_v15 = vld [vmem:[%s6939_s25 + $0x350] sm:$0xff]  ;;  %1211 = vst [vmem:[%s6944_s6 + $0x198] sm:$0xff] %v1210_v13 }
  0x59   : > { %1213 = vst [vmem:[%s6944_s6 + $0x1a0] sm:$0xff] %v1212_v14  ;;  %1215 = vst [vmem:[%s6944_s6 + $0x1a8] sm:$0xff] %v1214_v15  ;;  %v1216_v16 = vld [vmem:[%s6939_s25 + $0x360] sm:$0xff]  ;;  %v1218_v17 = vld [vmem:[%s6939_s25 + $0x370] sm:$0xff] }
  0x5a   : > { %v1220_v18 = vld [vmem:[%s6939_s25 + $0x380] sm:$0xff]  ;;  %1217 = vst [vmem:[%s6944_s6 + $0x1b0] sm:$0xff] %v1216_v16  ;;  %1219 = vst [vmem:[%s6944_s6 + $0x1b8] sm:$0xff] %v1218_v17  ;;  %v1222_v19 = vld [vmem:[%s6939_s25 + $0x390] sm:$0xff] }
  0x5b   : > { %1221 = vst [vmem:[%s6944_s6 + $0x1c0] sm:$0xff] %v1220_v18  ;;  %v1224_v20 = vld [vmem:[%s6939_s25 + $0x3a0] sm:$0xff]  ;;  %v1226_v21 = vld [vmem:[%s6939_s25 + $0x3b0] sm:$0xff]  ;;  %1223 = vst [vmem:[%s6944_s6 + $0x1c8] sm:$0xff] %v1222_v19 }
  0x5c   : > { %1225 = vst [vmem:[%s6944_s6 + $0x1d0] sm:$0xff] %v1224_v20  ;;  %1227 = vst [vmem:[%s6944_s6 + $0x1d8] sm:$0xff] %v1226_v21  ;;  %v1228_v22 = vld [vmem:[%s6939_s25 + $0x3c0] sm:$0xff]  ;;  %v1230_v23 = vld [vmem:[%s6939_s25 + $0x3d0] sm:$0xff] }
  0x5d   : > { %v1232_v24 = vld [vmem:[%s6939_s25 + $0x3e0] sm:$0xff]  ;;  %1229 = vst [vmem:[%s6944_s6 + $0x1e0] sm:$0xff] %v1228_v22  ;;  %1231 = vst [vmem:[%s6944_s6 + $0x1e8] sm:$0xff] %v1230_v23  ;;  %v1234_v25 = vld [vmem:[%s6939_s25 + $0x3f0] sm:$0xff] }
  0x5e   : > { %1233 = vst [vmem:[%s6944_s6 + $0x1f0] sm:$0xff] %v1232_v24  ;;  %v1236_v26 = vld [vmem:[%s6939_s25 + $0x400] sm:$0xff]  ;;  %v1238_v27 = vld [vmem:[%s6939_s25 + $0x410] sm:$0xff]  ;;  %1235 = vst [vmem:[%s6944_s6 + $0x1f8] sm:$0xff] %v1234_v25 }
  0x5f   : > { %1237 = vst [vmem:[%s6944_s6 + $0x200] sm:$0xff] %v1236_v26  ;;  %1239 = vst [vmem:[%s6944_s6 + $0x208] sm:$0xff] %v1238_v27  ;;  %v1240_v28 = vld [vmem:[%s6939_s25 + $0x420] sm:$0xff]  ;;  %v1242_v29 = vld [vmem:[%s6939_s25 + $0x430] sm:$0xff] }
  0x60   : > { %v1244_v30 = vld [vmem:[%s6939_s25 + $0x440] sm:$0xff]  ;;  %1241 = vst [vmem:[%s6944_s6 + $0x210] sm:$0xff] %v1240_v28  ;;  %1243 = vst [vmem:[%s6944_s6 + $0x218] sm:$0xff] %v1242_v29  ;;  %v1246_v31 = vld [vmem:[%s6939_s25 + $0x450] sm:$0xff] }
  0x61   : > { %1245 = vst [vmem:[%s6944_s6 + $0x220] sm:$0xff] %v1244_v30  ;;  %v1248_v32 = vld [vmem:[%s6939_s25 + $0x460] sm:$0xff]  ;;  %v1250_v33 = vld [vmem:[%s6939_s25 + $0x470] sm:$0xff]  ;;  %1247 = vst [vmem:[%s6944_s6 + $0x228] sm:$0xff] %v1246_v31 }
  0x62   : > { %1249 = vst [vmem:[%s6944_s6 + $0x230] sm:$0xff] %v1248_v32  ;;  %1251 = vst [vmem:[%s6944_s6 + $0x238] sm:$0xff] %v1250_v33  ;;  %v1252_v34 = vld [vmem:[%s6939_s25 + $0x480] sm:$0xff]  ;;  %v1254_v35 = vld [vmem:[%s6939_s25 + $0x490] sm:$0xff] }
  0x63   : > { %v1256_v36 = vld [vmem:[%s6939_s25 + $0x4a0] sm:$0xff]  ;;  %1253 = vst [vmem:[%s6944_s6 + $0x240] sm:$0xff] %v1252_v34  ;;  %1255 = vst [vmem:[%s6944_s6 + $0x248] sm:$0xff] %v1254_v35  ;;  %v1258_v37 = vld [vmem:[%s6939_s25 + $0x4b0] sm:$0xff] }
  0x64   : > { %1257 = vst [vmem:[%s6944_s6 + $0x250] sm:$0xff] %v1256_v36  ;;  %v1260_v38 = vld [vmem:[%s6939_s25 + $0x4c0] sm:$0xff]  ;;  %v1262_v39 = vld [vmem:[%s6939_s25 + $0x4d0] sm:$0xff]  ;;  %1259 = vst [vmem:[%s6944_s6 + $0x258] sm:$0xff] %v1258_v37 }
  0x65   : > { %1261 = vst [vmem:[%s6944_s6 + $0x260] sm:$0xff] %v1260_v38  ;;  %1263 = vst [vmem:[%s6944_s6 + $0x268] sm:$0xff] %v1262_v39  ;;  %v1264_v40 = vld [vmem:[%s6939_s25 + $0x4e0] sm:$0xff]  ;;  %v1266_v41 = vld [vmem:[%s6939_s25 + $0x4f0] sm:$0xff] }
  0x66   : > { %v1268_v42 = vld [vmem:[%s6939_s25 + $0x500] sm:$0xff]  ;;  %1265 = vst [vmem:[%s6944_s6 + $0x270] sm:$0xff] %v1264_v40  ;;  %1267 = vst [vmem:[%s6944_s6 + $0x278] sm:$0xff] %v1266_v41  ;;  %v1270_v43 = vld [vmem:[%s6939_s25 + $0x510] sm:$0xff] }
  0x67   : > { %1269 = vst [vmem:[%s6944_s6 + $0x280] sm:$0xff] %v1268_v42  ;;  %v1272_v44 = vld [vmem:[%s6939_s25 + $0x520] sm:$0xff]  ;;  %v1274_v45 = vld [vmem:[%s6939_s25 + $0x530] sm:$0xff]  ;;  %1271 = vst [vmem:[%s6944_s6 + $0x288] sm:$0xff] %v1270_v43 }
  0x68   : > { %1273 = vst [vmem:[%s6944_s6 + $0x290] sm:$0xff] %v1272_v44  ;;  %1275 = vst [vmem:[%s6944_s6 + $0x298] sm:$0xff] %v1274_v45  ;;  %v1276_v46 = vld [vmem:[%s6939_s25 + $0x540] sm:$0xff]  ;;  %v1278_v47 = vld [vmem:[%s6939_s25 + $0x550] sm:$0xff] }
  0x69   : > { %v1280_v48 = vld [vmem:[%s6939_s25 + $0x560] sm:$0xff]  ;;  %1277 = vst [vmem:[%s6944_s6 + $0x2a0] sm:$0xff] %v1276_v46  ;;  %1279 = vst [vmem:[%s6944_s6 + $0x2a8] sm:$0xff] %v1278_v47  ;;  %v1282_v49 = vld [vmem:[%s6939_s25 + $0x570] sm:$0xff] }
  0x6a   : > { %1281 = vst [vmem:[%s6944_s6 + $0x2b0] sm:$0xff] %v1280_v48  ;;  %v1284_v50 = vld [vmem:[%s6939_s25 + $0x580] sm:$0xff]  ;;  %v1286_v51 = vld [vmem:[%s6939_s25 + $0x590] sm:$0xff]  ;;  %1283 = vst [vmem:[%s6944_s6 + $0x2b8] sm:$0xff] %v1282_v49 }
  0x6b   : > { %1285 = vst [vmem:[%s6944_s6 + $0x2c0] sm:$0xff] %v1284_v50  ;;  %1287 = vst [vmem:[%s6944_s6 + $0x2c8] sm:$0xff] %v1286_v51  ;;  %v1288_v52 = vld [vmem:[%s6939_s25 + $0x5a0] sm:$0xff]  ;;  %v1290_v53 = vld [vmem:[%s6939_s25 + $0x5b0] sm:$0xff] }
  0x6c   : > { %v1292_v54 = vld [vmem:[%s6939_s25 + $0x5c0] sm:$0xff]  ;;  %1289 = vst [vmem:[%s6944_s6 + $0x2d0] sm:$0xff] %v1288_v52  ;;  %1291 = vst [vmem:[%s6944_s6 + $0x2d8] sm:$0xff] %v1290_v53  ;;  %v1294_v55 = vld [vmem:[%s6939_s25 + $0x5d0] sm:$0xff] }
  0x6d   : > { %1293 = vst [vmem:[%s6944_s6 + $0x2e0] sm:$0xff] %v1292_v54  ;;  %v1296_v56 = vld [vmem:[%s6939_s25 + $0x5e0] sm:$0xff]  ;;  %v1298_v57 = vld [vmem:[%s6939_s25 + $0x5f0] sm:$0xff]  ;;  %1295 = vst [vmem:[%s6944_s6 + $0x2e8] sm:$0xff] %v1294_v55 }
  0x6e   : > { %1297 = vst [vmem:[%s6944_s6 + $0x2f0] sm:$0xff] %v1296_v56  ;;  %1299 = vst [vmem:[%s6944_s6 + $0x2f8] sm:$0xff] %v1298_v57  ;;  %v1300_v58 = vld [vmem:[%s6939_s25 + $0x600] sm:$0xff]  ;;  %v1302_v59 = vld [vmem:[%s6939_s25 + $0x610] sm:$0xff] }
  0x6f   : > { %v1304_v60 = vld [vmem:[%s6939_s25 + $0x620] sm:$0xff]  ;;  %1301 = vst [vmem:[%s6944_s6 + $0x300] sm:$0xff] %v1300_v58  ;;  %1303 = vst [vmem:[%s6944_s6 + $0x308] sm:$0xff] %v1302_v59  ;;  %v1306_v61 = vld [vmem:[%s6939_s25 + $0x630] sm:$0xff] }
  0x70   : > { %1305 = vst [vmem:[%s6944_s6 + $0x310] sm:$0xff] %v1304_v60  ;;  %v1308_v62 = vld [vmem:[%s6939_s25 + $0x640] sm:$0xff]  ;;  %v1310_v63 = vld [vmem:[%s6939_s25 + $0x650] sm:$0xff]  ;;  %1307 = vst [vmem:[%s6944_s6 + $0x318] sm:$0xff] %v1306_v61 }
  0x71   : > { %1309 = vst [vmem:[%s6944_s6 + $0x320] sm:$0xff] %v1308_v62  ;;  %1311 = vst [vmem:[%s6944_s6 + $0x328] sm:$0xff] %v1310_v63  ;;  %v1312_v0 = vld [vmem:[%s6939_s25 + $0x660] sm:$0xff]  ;;  %v1314_v1 = vld [vmem:[%s6939_s25 + $0x670] sm:$0xff] }
  0x72   : > { %v1316_v2 = vld [vmem:[%s6939_s25 + $0x680] sm:$0xff]  ;;  %1313 = vst [vmem:[%s6944_s6 + $0x330] sm:$0xff] %v1312_v0  ;;  %1315 = vst [vmem:[%s6944_s6 + $0x338] sm:$0xff] %v1314_v1  ;;  %v1318_v3 = vld [vmem:[%s6939_s25 + $0x690] sm:$0xff] }
  0x73   : > { %1317 = vst [vmem:[%s6944_s6 + $0x340] sm:$0xff] %v1316_v2  ;;  %v1320_v4 = vld [vmem:[%s6939_s25 + $0x6a0] sm:$0xff]  ;;  %v1322_v5 = vld [vmem:[%s6939_s25 + $0x6b0] sm:$0xff]  ;;  %1319 = vst [vmem:[%s6944_s6 + $0x348] sm:$0xff] %v1318_v3 }
  0x74   : > { %1321 = vst [vmem:[%s6944_s6 + $0x350] sm:$0xff] %v1320_v4  ;;  %1323 = vst [vmem:[%s6944_s6 + $0x358] sm:$0xff] %v1322_v5  ;;  %v1324_v6 = vld [vmem:[%s6939_s25 + $0x6c0] sm:$0xff]  ;;  %v1326_v7 = vld [vmem:[%s6939_s25 + $0x6d0] sm:$0xff] }
  0x75   : > { %v1328_v8 = vld [vmem:[%s6939_s25 + $0x6e0] sm:$0xff]  ;;  %1325 = vst [vmem:[%s6944_s6 + $0x360] sm:$0xff] %v1324_v6  ;;  %1327 = vst [vmem:[%s6944_s6 + $0x368] sm:$0xff] %v1326_v7  ;;  %v1330_v9 = vld [vmem:[%s6939_s25 + $0x6f0] sm:$0xff] }
  0x76   : > { %1329 = vst [vmem:[%s6944_s6 + $0x370] sm:$0xff] %v1328_v8  ;;  %v1332_v10 = vld [vmem:[%s6939_s25 + $0x700] sm:$0xff]  ;;  %v1334_v11 = vld [vmem:[%s6939_s25 + $0x710] sm:$0xff]  ;;  %1331 = vst [vmem:[%s6944_s6 + $0x378] sm:$0xff] %v1330_v9 }
  0x77   : > { %1333 = vst [vmem:[%s6944_s6 + $0x380] sm:$0xff] %v1332_v10  ;;  %1335 = vst [vmem:[%s6944_s6 + $0x388] sm:$0xff] %v1334_v11  ;;  %v1336_v12 = vld [vmem:[%s6939_s25 + $0x720] sm:$0xff]  ;;  %v1338_v13 = vld [vmem:[%s6939_s25 + $0x730] sm:$0xff] }
  0x78   : > { %v1340_v14 = vld [vmem:[%s6939_s25 + $0x740] sm:$0xff]  ;;  %1337 = vst [vmem:[%s6944_s6 + $0x390] sm:$0xff] %v1336_v12  ;;  %1339 = vst [vmem:[%s6944_s6 + $0x398] sm:$0xff] %v1338_v13  ;;  %v1342_v15 = vld [vmem:[%s6939_s25 + $0x750] sm:$0xff] }
  0x79   : > { %1341 = vst [vmem:[%s6944_s6 + $0x3a0] sm:$0xff] %v1340_v14  ;;  %v1344_v16 = vld [vmem:[%s6939_s25 + $0x760] sm:$0xff]  ;;  %v1346_v17 = vld [vmem:[%s6939_s25 + $0x770] sm:$0xff]  ;;  %1343 = vst [vmem:[%s6944_s6 + $0x3a8] sm:$0xff] %v1342_v15 }
  0x7a   : > { %1345 = vst [vmem:[%s6944_s6 + $0x3b0] sm:$0xff] %v1344_v16  ;;  %1347 = vst [vmem:[%s6944_s6 + $0x3b8] sm:$0xff] %v1346_v17  ;;  %v1348_v18 = vld [vmem:[%s6939_s25 + $0x780] sm:$0xff]  ;;  %v1350_v19 = vld [vmem:[%s6939_s25 + $0x790] sm:$0xff] }
  0x7b   : > { %v1352_v20 = vld [vmem:[%s6939_s25 + $0x7a0] sm:$0xff]  ;;  %1349 = vst [vmem:[%s6944_s6 + $0x3c0] sm:$0xff] %v1348_v18  ;;  %1351 = vst [vmem:[%s6944_s6 + $0x3c8] sm:$0xff] %v1350_v19  ;;  %v1354_v21 = vld [vmem:[%s6939_s25 + $0x7b0] sm:$0xff] }
  0x7c   : > { %1353 = vst [vmem:[%s6944_s6 + $0x3d0] sm:$0xff] %v1352_v20  ;;  %v1356_v22 = vld [vmem:[%s6939_s25 + $0x7c0] sm:$0xff]  ;;  %v1358_v23 = vld [vmem:[%s6939_s25 + $0x7d0] sm:$0xff]  ;;  %1355 = vst [vmem:[%s6944_s6 + $0x3d8] sm:$0xff] %v1354_v21 }
  0x7d   : > { %1357 = vst [vmem:[%s6944_s6 + $0x3e0] sm:$0xff] %v1356_v22  ;;  %1359 = vst [vmem:[%s6944_s6 + $0x3e8] sm:$0xff] %v1358_v23  ;;  %v1360_v24 = vld [vmem:[%s6939_s25 + $0x7e0] sm:$0xff]  ;;  %v1362_v25 = vld [vmem:[%s6939_s25 + $0x7f0] sm:$0xff] }
  0x7e   : > { %v1364_v26 = vld [vmem:[%s6939_s25 + $0x800] sm:$0xff]  ;;  %1361 = vst [vmem:[%s6944_s6 + $0x3f0] sm:$0xff] %v1360_v24  ;;  %1363 = vst [vmem:[%s6944_s6 + $0x3f8] sm:$0xff] %v1362_v25  ;;  %v1366_v27 = vld [vmem:[%s6939_s25 + $0x810] sm:$0xff] }
  0x7f   : > { %1365 = vst [vmem:[%s6944_s6 + $0x400] sm:$0xff] %v1364_v26  ;;  %v1368_v28 = vld [vmem:[%s6939_s25 + $0x820] sm:$0xff]  ;;  %v1370_v29 = vld [vmem:[%s6939_s25 + $0x830] sm:$0xff]  ;;  %1367 = vst [vmem:[%s6944_s6 + $0x408] sm:$0xff] %v1366_v27 }
  0x80   : > { %1369 = vst [vmem:[%s6944_s6 + $0x410] sm:$0xff] %v1368_v28  ;;  %1371 = vst [vmem:[%s6944_s6 + $0x418] sm:$0xff] %v1370_v29  ;;  %v1372_v30 = vld [vmem:[%s6939_s25 + $0x840] sm:$0xff]  ;;  %v1374_v31 = vld [vmem:[%s6939_s25 + $0x850] sm:$0xff] }
  0x81   : > { %v1376_v32 = vld [vmem:[%s6939_s25 + $0x860] sm:$0xff]  ;;  %1373 = vst [vmem:[%s6944_s6 + $0x420] sm:$0xff] %v1372_v30  ;;  %1375 = vst [vmem:[%s6944_s6 + $0x428] sm:$0xff] %v1374_v31  ;;  %v1378_v33 = vld [vmem:[%s6939_s25 + $0x870] sm:$0xff] }
  0x82   : > { %1377 = vst [vmem:[%s6944_s6 + $0x430] sm:$0xff] %v1376_v32  ;;  %v1380_v34 = vld [vmem:[%s6939_s25 + $0x880] sm:$0xff]  ;;  %v1382_v35 = vld [vmem:[%s6939_s25 + $0x890] sm:$0xff]  ;;  %1379 = vst [vmem:[%s6944_s6 + $0x438] sm:$0xff] %v1378_v33 }
  0x83   : > { %1381 = vst [vmem:[%s6944_s6 + $0x440] sm:$0xff] %v1380_v34  ;;  %1383 = vst [vmem:[%s6944_s6 + $0x448] sm:$0xff] %v1382_v35  ;;  %v1384_v36 = vld [vmem:[%s6939_s25 + $0x8a0] sm:$0xff]  ;;  %v1386_v37 = vld [vmem:[%s6939_s25 + $0x8b0] sm:$0xff] }
  0x84   : > { %v1388_v38 = vld [vmem:[%s6939_s25 + $0x8c0] sm:$0xff]  ;;  %1385 = vst [vmem:[%s6944_s6 + $0x450] sm:$0xff] %v1384_v36  ;;  %1387 = vst [vmem:[%s6944_s6 + $0x458] sm:$0xff] %v1386_v37  ;;  %v1390_v39 = vld [vmem:[%s6939_s25 + $0x8d0] sm:$0xff] }
  0x85   : > { %1389 = vst [vmem:[%s6944_s6 + $0x460] sm:$0xff] %v1388_v38  ;;  %v1392_v40 = vld [vmem:[%s6939_s25 + $0x8e0] sm:$0xff]  ;;  %v1394_v41 = vld [vmem:[%s6939_s25 + $0x8f0] sm:$0xff]  ;;  %1391 = vst [vmem:[%s6944_s6 + $0x468] sm:$0xff] %v1390_v39 }
  0x86   : > { %1393 = vst [vmem:[%s6944_s6 + $0x470] sm:$0xff] %v1392_v40  ;;  %1395 = vst [vmem:[%s6944_s6 + $0x478] sm:$0xff] %v1394_v41  ;;  %v1396_v42 = vld [vmem:[%s6939_s25 + $0x900] sm:$0xff]  ;;  %v1398_v43 = vld [vmem:[%s6939_s25 + $0x910] sm:$0xff] }
  0x87   : > { %v1400_v44 = vld [vmem:[%s6939_s25 + $0x920] sm:$0xff]  ;;  %1397 = vst [vmem:[%s6944_s6 + $0x480] sm:$0xff] %v1396_v42  ;;  %1399 = vst [vmem:[%s6944_s6 + $0x488] sm:$0xff] %v1398_v43  ;;  %v1402_v45 = vld [vmem:[%s6939_s25 + $0x930] sm:$0xff] }
  0x88   : > { %1401 = vst [vmem:[%s6944_s6 + $0x490] sm:$0xff] %v1400_v44  ;;  %v1404_v46 = vld [vmem:[%s6939_s25 + $0x940] sm:$0xff]  ;;  %v1406_v47 = vld [vmem:[%s6939_s25 + $0x950] sm:$0xff]  ;;  %1403 = vst [vmem:[%s6944_s6 + $0x498] sm:$0xff] %v1402_v45 }
  0x89   : > { %1405 = vst [vmem:[%s6944_s6 + $0x4a0] sm:$0xff] %v1404_v46  ;;  %1407 = vst [vmem:[%s6944_s6 + $0x4a8] sm:$0xff] %v1406_v47  ;;  %v1408_v48 = vld [vmem:[%s6939_s25 + $0x960] sm:$0xff]  ;;  %v1410_v49 = vld [vmem:[%s6939_s25 + $0x970] sm:$0xff] }
  0x8a   : > { %v1412_v50 = vld [vmem:[%s6939_s25 + $0x980] sm:$0xff]  ;;  %1409 = vst [vmem:[%s6944_s6 + $0x4b0] sm:$0xff] %v1408_v48  ;;  %1411 = vst [vmem:[%s6944_s6 + $0x4b8] sm:$0xff] %v1410_v49  ;;  %v1414_v51 = vld [vmem:[%s6939_s25 + $0x990] sm:$0xff] }
  0x8b   : > { %1413 = vst [vmem:[%s6944_s6 + $0x4c0] sm:$0xff] %v1412_v50  ;;  %v1416_v52 = vld [vmem:[%s6939_s25 + $0x9a0] sm:$0xff]  ;;  %v1418_v53 = vld [vmem:[%s6939_s25 + $0x9b0] sm:$0xff]  ;;  %1415 = vst [vmem:[%s6944_s6 + $0x4c8] sm:$0xff] %v1414_v51 }
  0x8c   : > { %1417 = vst [vmem:[%s6944_s6 + $0x4d0] sm:$0xff] %v1416_v52  ;;  %1419 = vst [vmem:[%s6944_s6 + $0x4d8] sm:$0xff] %v1418_v53  ;;  %v1420_v54 = vld [vmem:[%s6939_s25 + $0x9c0] sm:$0xff]  ;;  %v1422_v55 = vld [vmem:[%s6939_s25 + $0x9d0] sm:$0xff] }
  0x8d   : > { %v1424_v56 = vld [vmem:[%s6939_s25 + $0x9e0] sm:$0xff]  ;;  %1421 = vst [vmem:[%s6944_s6 + $0x4e0] sm:$0xff] %v1420_v54  ;;  %1423 = vst [vmem:[%s6944_s6 + $0x4e8] sm:$0xff] %v1422_v55  ;;  %v1426_v57 = vld [vmem:[%s6939_s25 + $0x9f0] sm:$0xff] }
  0x8e   : > { %1425 = vst [vmem:[%s6944_s6 + $0x4f0] sm:$0xff] %v1424_v56  ;;  %v1428_v58 = vld [vmem:[%s6939_s25 + $0xa00] sm:$0xff]  ;;  %v1430_v59 = vld [vmem:[%s6939_s25 + $0xa10] sm:$0xff]  ;;  %1427 = vst [vmem:[%s6944_s6 + $0x4f8] sm:$0xff] %v1426_v57 }
  0x8f   : > { %1429 = vst [vmem:[%s6944_s6 + $0x500] sm:$0xff] %v1428_v58  ;;  %1431 = vst [vmem:[%s6944_s6 + $0x508] sm:$0xff] %v1430_v59  ;;  %v1432_v60 = vld [vmem:[%s6939_s25 + $0xa20] sm:$0xff]  ;;  %v1434_v61 = vld [vmem:[%s6939_s25 + $0xa30] sm:$0xff] }
  0x90   : > { %v1436_v62 = vld [vmem:[%s6939_s25 + $0xa40] sm:$0xff]  ;;  %1433 = vst [vmem:[%s6944_s6 + $0x510] sm:$0xff] %v1432_v60  ;;  %1435 = vst [vmem:[%s6944_s6 + $0x518] sm:$0xff] %v1434_v61  ;;  %v1438_v63 = vld [vmem:[%s6939_s25 + $0xa50] sm:$0xff] }
  0x91   : > { %1437 = vst [vmem:[%s6944_s6 + $0x520] sm:$0xff] %v1436_v62  ;;  %v1440_v0 = vld [vmem:[%s6939_s25 + $0xa60] sm:$0xff]  ;;  %v1442_v1 = vld [vmem:[%s6939_s25 + $0xa70] sm:$0xff]  ;;  %1439 = vst [vmem:[%s6944_s6 + $0x528] sm:$0xff] %v1438_v63 }
  0x92   : > { %1441 = vst [vmem:[%s6944_s6 + $0x530] sm:$0xff] %v1440_v0  ;;  %1443 = vst [vmem:[%s6944_s6 + $0x538] sm:$0xff] %v1442_v1  ;;  %v1444_v2 = vld [vmem:[%s6939_s25 + $0xa80] sm:$0xff]  ;;  %v1446_v3 = vld [vmem:[%s6939_s25 + $0xa90] sm:$0xff] }
  0x93   : > { %v1448_v4 = vld [vmem:[%s6939_s25 + $0xaa0] sm:$0xff]  ;;  %1445 = vst [vmem:[%s6944_s6 + $0x540] sm:$0xff] %v1444_v2  ;;  %1447 = vst [vmem:[%s6944_s6 + $0x548] sm:$0xff] %v1446_v3  ;;  %v1450_v5 = vld [vmem:[%s6939_s25 + $0xab0] sm:$0xff] }
  0x94   : > { %1449 = vst [vmem:[%s6944_s6 + $0x550] sm:$0xff] %v1448_v4  ;;  %v1452_v6 = vld [vmem:[%s6939_s25 + $0xac0] sm:$0xff]  ;;  %v1454_v7 = vld [vmem:[%s6939_s25 + $0xad0] sm:$0xff]  ;;  %1451 = vst [vmem:[%s6944_s6 + $0x558] sm:$0xff] %v1450_v5 }
  0x95   : > { %1453 = vst [vmem:[%s6944_s6 + $0x560] sm:$0xff] %v1452_v6  ;;  %1455 = vst [vmem:[%s6944_s6 + $0x568] sm:$0xff] %v1454_v7  ;;  %v1456_v8 = vld [vmem:[%s6939_s25 + $0xae0] sm:$0xff]  ;;  %v1458_v9 = vld [vmem:[%s6939_s25 + $0xaf0] sm:$0xff] }
  0x96   : > { %v1460_v10 = vld [vmem:[%s6939_s25 + $0xb00] sm:$0xff]  ;;  %1457 = vst [vmem:[%s6944_s6 + $0x570] sm:$0xff] %v1456_v8  ;;  %1459 = vst [vmem:[%s6944_s6 + $0x578] sm:$0xff] %v1458_v9  ;;  %v1462_v11 = vld [vmem:[%s6939_s25 + $0xb10] sm:$0xff] }
  0x97   : > { %1461 = vst [vmem:[%s6944_s6 + $0x580] sm:$0xff] %v1460_v10  ;;  %v1464_v12 = vld [vmem:[%s6939_s25 + $0xb20] sm:$0xff]  ;;  %v1466_v13 = vld [vmem:[%s6939_s25 + $0xb30] sm:$0xff]  ;;  %1463 = vst [vmem:[%s6944_s6 + $0x588] sm:$0xff] %v1462_v11 }
  0x98   : > { %1465 = vst [vmem:[%s6944_s6 + $0x590] sm:$0xff] %v1464_v12  ;;  %1467 = vst [vmem:[%s6944_s6 + $0x598] sm:$0xff] %v1466_v13  ;;  %v1468_v14 = vld [vmem:[%s6939_s25 + $0xb40] sm:$0xff]  ;;  %v1470_v15 = vld [vmem:[%s6939_s25 + $0xb50] sm:$0xff] }
  0x99   : > { %v1472_v16 = vld [vmem:[%s6939_s25 + $0xb60] sm:$0xff]  ;;  %1469 = vst [vmem:[%s6944_s6 + $0x5a0] sm:$0xff] %v1468_v14  ;;  %1471 = vst [vmem:[%s6944_s6 + $0x5a8] sm:$0xff] %v1470_v15  ;;  %v1474_v17 = vld [vmem:[%s6939_s25 + $0xb70] sm:$0xff] }
  0x9a   : > { %1473 = vst [vmem:[%s6944_s6 + $0x5b0] sm:$0xff] %v1472_v16  ;;  %v1476_v18 = vld [vmem:[%s6939_s25 + $0xb80] sm:$0xff]  ;;  %v1478_v19 = vld [vmem:[%s6939_s25 + $0xb90] sm:$0xff]  ;;  %1475 = vst [vmem:[%s6944_s6 + $0x5b8] sm:$0xff] %v1474_v17 }
  0x9b   : > { %1477 = vst [vmem:[%s6944_s6 + $0x5c0] sm:$0xff] %v1476_v18  ;;  %1479 = vst [vmem:[%s6944_s6 + $0x5c8] sm:$0xff] %v1478_v19  ;;  %v1480_v20 = vld [vmem:[%s6939_s25 + $0xba0] sm:$0xff]  ;;  %v1482_v21 = vld [vmem:[%s6939_s25 + $0xbb0] sm:$0xff] }
  0x9c   : > { %v1484_v22 = vld [vmem:[%s6939_s25 + $0xbc0] sm:$0xff]  ;;  %1481 = vst [vmem:[%s6944_s6 + $0x5d0] sm:$0xff] %v1480_v20  ;;  %1483 = vst [vmem:[%s6944_s6 + $0x5d8] sm:$0xff] %v1482_v21  ;;  %v1486_v23 = vld [vmem:[%s6939_s25 + $0xbd0] sm:$0xff] }
  0x9d   : > { %1485 = vst [vmem:[%s6944_s6 + $0x5e0] sm:$0xff] %v1484_v22  ;;  %v1488_v24 = vld [vmem:[%s6939_s25 + $0xbe0] sm:$0xff]  ;;  %v1490_v25 = vld [vmem:[%s6939_s25 + $0xbf0] sm:$0xff]  ;;  %1487 = vst [vmem:[%s6944_s6 + $0x5e8] sm:$0xff] %v1486_v23 }
  0x9e   : > { %1489 = vst [vmem:[%s6944_s6 + $0x5f0] sm:$0xff] %v1488_v24  ;;  %1491 = vst [vmem:[%s6944_s6 + $0x5f8] sm:$0xff] %v1490_v25  ;;  %v1492_v26 = vld [vmem:[%s6939_s25 + $0xc00] sm:$0xff]  ;;  %v1494_v27 = vld [vmem:[%s6939_s25 + $0xc10] sm:$0xff] }
  0x9f   : > { %v1496_v28 = vld [vmem:[%s6939_s25 + $0xc20] sm:$0xff]  ;;  %1493 = vst [vmem:[%s6944_s6 + $0x600] sm:$0xff] %v1492_v26  ;;  %1495 = vst [vmem:[%s6944_s6 + $0x608] sm:$0xff] %v1494_v27  ;;  %v1498_v29 = vld [vmem:[%s6939_s25 + $0xc30] sm:$0xff] }
  0xa0   : > { %1497 = vst [vmem:[%s6944_s6 + $0x610] sm:$0xff] %v1496_v28  ;;  %v1500_v30 = vld [vmem:[%s6939_s25 + $0xc40] sm:$0xff]  ;;  %v1502_v31 = vld [vmem:[%s6939_s25 + $0xc50] sm:$0xff]  ;;  %1499 = vst [vmem:[%s6944_s6 + $0x618] sm:$0xff] %v1498_v29 }
  0xa1   : > { %1501 = vst [vmem:[%s6944_s6 + $0x620] sm:$0xff] %v1500_v30  ;;  %1503 = vst [vmem:[%s6944_s6 + $0x628] sm:$0xff] %v1502_v31  ;;  %v1504_v32 = vld [vmem:[%s6939_s25 + $0xc60] sm:$0xff]  ;;  %v1506_v33 = vld [vmem:[%s6939_s25 + $0xc70] sm:$0xff] }
  0xa2   : > { %v1508_v34 = vld [vmem:[%s6939_s25 + $0xc80] sm:$0xff]  ;;  %1505 = vst [vmem:[%s6944_s6 + $0x630] sm:$0xff] %v1504_v32  ;;  %1507 = vst [vmem:[%s6944_s6 + $0x638] sm:$0xff] %v1506_v33  ;;  %v1510_v35 = vld [vmem:[%s6939_s25 + $0xc90] sm:$0xff] }
  0xa3   : > { %1509 = vst [vmem:[%s6944_s6 + $0x640] sm:$0xff] %v1508_v34  ;;  %v1512_v36 = vld [vmem:[%s6939_s25 + $0xca0] sm:$0xff]  ;;  %v1514_v37 = vld [vmem:[%s6939_s25 + $0xcb0] sm:$0xff]  ;;  %1511 = vst [vmem:[%s6944_s6 + $0x648] sm:$0xff] %v1510_v35 }
  0xa4   : > { %1513 = vst [vmem:[%s6944_s6 + $0x650] sm:$0xff] %v1512_v36  ;;  %1515 = vst [vmem:[%s6944_s6 + $0x658] sm:$0xff] %v1514_v37  ;;  %v1516_v38 = vld [vmem:[%s6939_s25 + $0xcc0] sm:$0xff]  ;;  %v1518_v39 = vld [vmem:[%s6939_s25 + $0xcd0] sm:$0xff] }
  0xa5   : > { %v1520_v40 = vld [vmem:[%s6939_s25 + $0xce0] sm:$0xff]  ;;  %1517 = vst [vmem:[%s6944_s6 + $0x660] sm:$0xff] %v1516_v38  ;;  %1519 = vst [vmem:[%s6944_s6 + $0x668] sm:$0xff] %v1518_v39  ;;  %v1522_v41 = vld [vmem:[%s6939_s25 + $0xcf0] sm:$0xff] }
  0xa6   : > { %1521 = vst [vmem:[%s6944_s6 + $0x670] sm:$0xff] %v1520_v40  ;;  %v1524_v42 = vld [vmem:[%s6939_s25 + $0xd00] sm:$0xff]  ;;  %v1526_v43 = vld [vmem:[%s6939_s25 + $0xd10] sm:$0xff]  ;;  %1523 = vst [vmem:[%s6944_s6 + $0x678] sm:$0xff] %v1522_v41 }
  0xa7   : > { %1525 = vst [vmem:[%s6944_s6 + $0x680] sm:$0xff] %v1524_v42  ;;  %1527 = vst [vmem:[%s6944_s6 + $0x688] sm:$0xff] %v1526_v43  ;;  %v1528_v44 = vld [vmem:[%s6939_s25 + $0xd20] sm:$0xff]  ;;  %v1530_v45 = vld [vmem:[%s6939_s25 + $0xd30] sm:$0xff] }
  0xa8   : > { %v1532_v46 = vld [vmem:[%s6939_s25 + $0xd40] sm:$0xff]  ;;  %1529 = vst [vmem:[%s6944_s6 + $0x690] sm:$0xff] %v1528_v44  ;;  %1531 = vst [vmem:[%s6944_s6 + $0x698] sm:$0xff] %v1530_v45  ;;  %v1534_v47 = vld [vmem:[%s6939_s25 + $0xd50] sm:$0xff] }
  0xa9   : > { %1533 = vst [vmem:[%s6944_s6 + $0x6a0] sm:$0xff] %v1532_v46  ;;  %v1536_v48 = vld [vmem:[%s6939_s25 + $0xd60] sm:$0xff]  ;;  %v1538_v49 = vld [vmem:[%s6939_s25 + $0xd70] sm:$0xff]  ;;  %1535 = vst [vmem:[%s6944_s6 + $0x6a8] sm:$0xff] %v1534_v47 }
  0xaa   : > { %1537 = vst [vmem:[%s6944_s6 + $0x6b0] sm:$0xff] %v1536_v48  ;;  %1539 = vst [vmem:[%s6944_s6 + $0x6b8] sm:$0xff] %v1538_v49  ;;  %v1540_v50 = vld [vmem:[%s6939_s25 + $0xd80] sm:$0xff]  ;;  %v1542_v51 = vld [vmem:[%s6939_s25 + $0xd90] sm:$0xff] }
  0xab   : > { %v1544_v52 = vld [vmem:[%s6939_s25 + $0xda0] sm:$0xff]  ;;  %1541 = vst [vmem:[%s6944_s6 + $0x6c0] sm:$0xff] %v1540_v50  ;;  %1543 = vst [vmem:[%s6944_s6 + $0x6c8] sm:$0xff] %v1542_v51  ;;  %v1546_v53 = vld [vmem:[%s6939_s25 + $0xdb0] sm:$0xff] }
  0xac   : > { %1545 = vst [vmem:[%s6944_s6 + $0x6d0] sm:$0xff] %v1544_v52  ;;  %v1548_v54 = vld [vmem:[%s6939_s25 + $0xdc0] sm:$0xff]  ;;  %v1550_v55 = vld [vmem:[%s6939_s25 + $0xdd0] sm:$0xff]  ;;  %1547 = vst [vmem:[%s6944_s6 + $0x6d8] sm:$0xff] %v1546_v53 }
  0xad   : > { %1549 = vst [vmem:[%s6944_s6 + $0x6e0] sm:$0xff] %v1548_v54  ;;  %1551 = vst [vmem:[%s6944_s6 + $0x6e8] sm:$0xff] %v1550_v55  ;;  %v1552_v56 = vld [vmem:[%s6939_s25 + $0xde0] sm:$0xff]  ;;  %v1554_v57 = vld [vmem:[%s6939_s25 + $0xdf0] sm:$0xff] }
  0xae   : > { %v1556_v58 = vld [vmem:[%s6939_s25 + $0xe00] sm:$0xff]  ;;  %1553 = vst [vmem:[%s6944_s6 + $0x6f0] sm:$0xff] %v1552_v56  ;;  %1555 = vst [vmem:[%s6944_s6 + $0x6f8] sm:$0xff] %v1554_v57  ;;  %v1558_v59 = vld [vmem:[%s6939_s25 + $0xe10] sm:$0xff] }
  0xaf   : > { %1557 = vst [vmem:[%s6944_s6 + $0x700] sm:$0xff] %v1556_v58  ;;  %v1560_v60 = vld [vmem:[%s6939_s25 + $0xe20] sm:$0xff]  ;;  %v1562_v61 = vld [vmem:[%s6939_s25 + $0xe30] sm:$0xff]  ;;  %1559 = vst [vmem:[%s6944_s6 + $0x708] sm:$0xff] %v1558_v59 }
  0xb0   : > { %1561 = vst [vmem:[%s6944_s6 + $0x710] sm:$0xff] %v1560_v60  ;;  %1563 = vst [vmem:[%s6944_s6 + $0x718] sm:$0xff] %v1562_v61  ;;  %v1564_v62 = vld [vmem:[%s6939_s25 + $0xe40] sm:$0xff]  ;;  %v1566_v63 = vld [vmem:[%s6939_s25 + $0xe50] sm:$0xff] }
  0xb1   : > { %v1568_v0 = vld [vmem:[%s6939_s25 + $0xe60] sm:$0xff]  ;;  %1565 = vst [vmem:[%s6944_s6 + $0x720] sm:$0xff] %v1564_v62  ;;  %1567 = vst [vmem:[%s6944_s6 + $0x728] sm:$0xff] %v1566_v63  ;;  %v1570_v1 = vld [vmem:[%s6939_s25 + $0xe70] sm:$0xff] }
  0xb2   : > { %1569 = vst [vmem:[%s6944_s6 + $0x730] sm:$0xff] %v1568_v0  ;;  %v1572_v2 = vld [vmem:[%s6939_s25 + $0xe80] sm:$0xff]  ;;  %v1574_v3 = vld [vmem:[%s6939_s25 + $0xe90] sm:$0xff]  ;;  %1571 = vst [vmem:[%s6944_s6 + $0x738] sm:$0xff] %v1570_v1 }
  0xb3   : > { %1573 = vst [vmem:[%s6944_s6 + $0x740] sm:$0xff] %v1572_v2  ;;  %1575 = vst [vmem:[%s6944_s6 + $0x748] sm:$0xff] %v1574_v3  ;;  %v1576_v4 = vld [vmem:[%s6939_s25 + $0xea0] sm:$0xff]  ;;  %v1578_v5 = vld [vmem:[%s6939_s25 + $0xeb0] sm:$0xff] }
  0xb4   : > { %v1580_v6 = vld [vmem:[%s6939_s25 + $0xec0] sm:$0xff]  ;;  %1577 = vst [vmem:[%s6944_s6 + $0x750] sm:$0xff] %v1576_v4  ;;  %1579 = vst [vmem:[%s6944_s6 + $0x758] sm:$0xff] %v1578_v5  ;;  %v1582_v7 = vld [vmem:[%s6939_s25 + $0xed0] sm:$0xff] }
  0xb5   : > { %1581 = vst [vmem:[%s6944_s6 + $0x760] sm:$0xff] %v1580_v6  ;;  %v1584_v8 = vld [vmem:[%s6939_s25 + $0xee0] sm:$0xff]  ;;  %v1586_v9 = vld [vmem:[%s6939_s25 + $0xef0] sm:$0xff]  ;;  %1583 = vst [vmem:[%s6944_s6 + $0x768] sm:$0xff] %v1582_v7 }
  0xb6   : > { %1585 = vst [vmem:[%s6944_s6 + $0x770] sm:$0xff] %v1584_v8  ;;  %1587 = vst [vmem:[%s6944_s6 + $0x778] sm:$0xff] %v1586_v9  ;;  %v1588_v10 = vld [vmem:[%s6939_s25 + $0xf00] sm:$0xff]  ;;  %v1590_v11 = vld [vmem:[%s6939_s25 + $0xf10] sm:$0xff] }
  0xb7   : > { %v1592_v12 = vld [vmem:[%s6939_s25 + $0xf20] sm:$0xff]  ;;  %1589 = vst [vmem:[%s6944_s6 + $0x780] sm:$0xff] %v1588_v10  ;;  %1591 = vst [vmem:[%s6944_s6 + $0x788] sm:$0xff] %v1590_v11  ;;  %v1594_v13 = vld [vmem:[%s6939_s25 + $0xf30] sm:$0xff] }
  0xb8   : > { %1593 = vst [vmem:[%s6944_s6 + $0x790] sm:$0xff] %v1592_v12  ;;  %v1596_v14 = vld [vmem:[%s6939_s25 + $0xf40] sm:$0xff]  ;;  %v1598_v15 = vld [vmem:[%s6939_s25 + $0xf50] sm:$0xff]  ;;  %1595 = vst [vmem:[%s6944_s6 + $0x798] sm:$0xff] %v1594_v13 }
  0xb9   : > { %1597 = vst [vmem:[%s6944_s6 + $0x7a0] sm:$0xff] %v1596_v14  ;;  %1599 = vst [vmem:[%s6944_s6 + $0x7a8] sm:$0xff] %v1598_v15  ;;  %v1600_v16 = vld [vmem:[%s6939_s25 + $0xf60] sm:$0xff]  ;;  %v1602_v17 = vld [vmem:[%s6939_s25 + $0xf70] sm:$0xff] }
  0xba   : > { %v1604_v18 = vld [vmem:[%s6939_s25 + $0xf80] sm:$0xff]  ;;  %1601 = vst [vmem:[%s6944_s6 + $0x7b0] sm:$0xff] %v1600_v16  ;;  %1603 = vst [vmem:[%s6944_s6 + $0x7b8] sm:$0xff] %v1602_v17  ;;  %v1606_v19 = vld [vmem:[%s6939_s25 + $0xf90] sm:$0xff] }
  0xbb   : > { %1605 = vst [vmem:[%s6944_s6 + $0x7c0] sm:$0xff] %v1604_v18  ;;  %v1608_v20 = vld [vmem:[%s6939_s25 + $0xfa0] sm:$0xff]  ;;  %v1610_v21 = vld [vmem:[%s6939_s25 + $0xfb0] sm:$0xff]  ;;  %1607 = vst [vmem:[%s6944_s6 + $0x7c8] sm:$0xff] %v1606_v19 }
  0xbc   : > { %1609 = vst [vmem:[%s6944_s6 + $0x7d0] sm:$0xff] %v1608_v20  ;;  %1611 = vst [vmem:[%s6944_s6 + $0x7d8] sm:$0xff] %v1610_v21  ;;  %v1612_v22 = vld [vmem:[%s6939_s25 + $0xfc0] sm:$0xff]  ;;  %v1614_v23 = vld [vmem:[%s6939_s25 + $0xfd0] sm:$0xff] }
  0xbd   : > { %v1616_v24 = vld [vmem:[%s6939_s25 + $0xfe0] sm:$0xff]  ;;  %1613 = vst [vmem:[%s6944_s6 + $0x7e0] sm:$0xff] %v1612_v22  ;;  %1615 = vst [vmem:[%s6944_s6 + $0x7e8] sm:$0xff] %v1614_v23  ;;  %v1618_v25 = vld [vmem:[%s6939_s25 + $0xff0] sm:$0xff] }
  0xbe   : > { %1617 = vst [vmem:[%s6944_s6 + $0x7f0] sm:$0xff] %v1616_v24  ;;  %v1620_v26 = vld [vmem:[%s6939_s25 + $0x1000] sm:$0xff]  ;;  %v1622_v27 = vld [vmem:[%s6939_s25 + $0x1010] sm:$0xff]  ;;  %1619 = vst [vmem:[%s6944_s6 + $0x7f8] sm:$0xff] %v1618_v25 }
  0xbf   : > { %1621 = vst [vmem:[%s6944_s6 + $0x800] sm:$0xff] %v1620_v26  ;;  %1623 = vst [vmem:[%s6944_s6 + $0x808] sm:$0xff] %v1622_v27  ;;  %v1624_v28 = vld [vmem:[%s6939_s25 + $0x1020] sm:$0xff]  ;;  %v1626_v29 = vld [vmem:[%s6939_s25 + $0x1030] sm:$0xff] }
  0xc0   : > { %v1628_v30 = vld [vmem:[%s6939_s25 + $0x1040] sm:$0xff]  ;;  %1625 = vst [vmem:[%s6944_s6 + $0x810] sm:$0xff] %v1624_v28  ;;  %1627 = vst [vmem:[%s6944_s6 + $0x818] sm:$0xff] %v1626_v29  ;;  %v1630_v31 = vld [vmem:[%s6939_s25 + $0x1050] sm:$0xff] }
  0xc1   : > { %1629 = vst [vmem:[%s6944_s6 + $0x820] sm:$0xff] %v1628_v30  ;;  %v1632_v32 = vld [vmem:[%s6939_s25 + $0x1060] sm:$0xff]  ;;  %v1634_v33 = vld [vmem:[%s6939_s25 + $0x1070] sm:$0xff]  ;;  %1631 = vst [vmem:[%s6944_s6 + $0x828] sm:$0xff] %v1630_v31 }
  0xc2   : > { %1633 = vst [vmem:[%s6944_s6 + $0x830] sm:$0xff] %v1632_v32  ;;  %1635 = vst [vmem:[%s6944_s6 + $0x838] sm:$0xff] %v1634_v33  ;;  %v1636_v34 = vld [vmem:[%s6939_s25 + $0x1080] sm:$0xff]  ;;  %v1638_v35 = vld [vmem:[%s6939_s25 + $0x1090] sm:$0xff] }
  0xc3   : > { %v1640_v36 = vld [vmem:[%s6939_s25 + $0x10a0] sm:$0xff]  ;;  %1637 = vst [vmem:[%s6944_s6 + $0x840] sm:$0xff] %v1636_v34  ;;  %1639 = vst [vmem:[%s6944_s6 + $0x848] sm:$0xff] %v1638_v35  ;;  %v1642_v37 = vld [vmem:[%s6939_s25 + $0x10b0] sm:$0xff] }
  0xc4   : > { %1641 = vst [vmem:[%s6944_s6 + $0x850] sm:$0xff] %v1640_v36  ;;  %v1644_v38 = vld [vmem:[%s6939_s25 + $0x10c0] sm:$0xff]  ;;  %v1646_v39 = vld [vmem:[%s6939_s25 + $0x10d0] sm:$0xff]  ;;  %1643 = vst [vmem:[%s6944_s6 + $0x858] sm:$0xff] %v1642_v37 }
  0xc5   : > { %1645 = vst [vmem:[%s6944_s6 + $0x860] sm:$0xff] %v1644_v38  ;;  %1647 = vst [vmem:[%s6944_s6 + $0x868] sm:$0xff] %v1646_v39  ;;  %v1648_v40 = vld [vmem:[%s6939_s25 + $0x10e0] sm:$0xff]  ;;  %v1650_v41 = vld [vmem:[%s6939_s25 + $0x10f0] sm:$0xff] }
  0xc6   : > { %v1652_v42 = vld [vmem:[%s6939_s25 + $0x1100] sm:$0xff]  ;;  %1649 = vst [vmem:[%s6944_s6 + $0x870] sm:$0xff] %v1648_v40  ;;  %1651 = vst [vmem:[%s6944_s6 + $0x878] sm:$0xff] %v1650_v41  ;;  %v1654_v43 = vld [vmem:[%s6939_s25 + $0x1110] sm:$0xff] }
  0xc7   : > { %1653 = vst [vmem:[%s6944_s6 + $0x880] sm:$0xff] %v1652_v42  ;;  %v1656_v44 = vld [vmem:[%s6939_s25 + $0x1120] sm:$0xff]  ;;  %v1658_v45 = vld [vmem:[%s6939_s25 + $0x1130] sm:$0xff]  ;;  %1655 = vst [vmem:[%s6944_s6 + $0x888] sm:$0xff] %v1654_v43 }
  0xc8   : > { %1657 = vst [vmem:[%s6944_s6 + $0x890] sm:$0xff] %v1656_v44  ;;  %1659 = vst [vmem:[%s6944_s6 + $0x898] sm:$0xff] %v1658_v45  ;;  %v1660_v46 = vld [vmem:[%s6939_s25 + $0x1140] sm:$0xff]  ;;  %v1662_v47 = vld [vmem:[%s6939_s25 + $0x1150] sm:$0xff] }
  0xc9   : > { %v1664_v48 = vld [vmem:[%s6939_s25 + $0x1160] sm:$0xff]  ;;  %1661 = vst [vmem:[%s6944_s6 + $0x8a0] sm:$0xff] %v1660_v46  ;;  %1663 = vst [vmem:[%s6944_s6 + $0x8a8] sm:$0xff] %v1662_v47  ;;  %v1666_v49 = vld [vmem:[%s6939_s25 + $0x1170] sm:$0xff] }
  0xca   : > { %1665 = vst [vmem:[%s6944_s6 + $0x8b0] sm:$0xff] %v1664_v48  ;;  %v1668_v50 = vld [vmem:[%s6939_s25 + $0x1180] sm:$0xff]  ;;  %v1670_v51 = vld [vmem:[%s6939_s25 + $0x1190] sm:$0xff]  ;;  %1667 = vst [vmem:[%s6944_s6 + $0x8b8] sm:$0xff] %v1666_v49 }
  0xcb   : > { %1669 = vst [vmem:[%s6944_s6 + $0x8c0] sm:$0xff] %v1668_v50  ;;  %1671 = vst [vmem:[%s6944_s6 + $0x8c8] sm:$0xff] %v1670_v51  ;;  %v1672_v52 = vld [vmem:[%s6939_s25 + $0x11a0] sm:$0xff]  ;;  %v1674_v53 = vld [vmem:[%s6939_s25 + $0x11b0] sm:$0xff] }
  0xcc   : > { %v1676_v54 = vld [vmem:[%s6939_s25 + $0x11c0] sm:$0xff]  ;;  %1673 = vst [vmem:[%s6944_s6 + $0x8d0] sm:$0xff] %v1672_v52  ;;  %1675 = vst [vmem:[%s6944_s6 + $0x8d8] sm:$0xff] %v1674_v53  ;;  %v1678_v55 = vld [vmem:[%s6939_s25 + $0x11d0] sm:$0xff] }
  0xcd   : > { %1677 = vst [vmem:[%s6944_s6 + $0x8e0] sm:$0xff] %v1676_v54  ;;  %v1680_v56 = vld [vmem:[%s6939_s25 + $0x11e0] sm:$0xff]  ;;  %v1682_v57 = vld [vmem:[%s6939_s25 + $0x11f0] sm:$0xff]  ;;  %1679 = vst [vmem:[%s6944_s6 + $0x8e8] sm:$0xff] %v1678_v55 }
  0xce   : > { %1681 = vst [vmem:[%s6944_s6 + $0x8f0] sm:$0xff] %v1680_v56  ;;  %1683 = vst [vmem:[%s6944_s6 + $0x8f8] sm:$0xff] %v1682_v57  ;;  %v1684_v58 = vld [vmem:[%s6939_s25 + $0x1200] sm:$0xff]  ;;  %v1686_v59 = vld [vmem:[%s6939_s25 + $0x1210] sm:$0xff] }
  0xcf   : > { %v1688_v60 = vld [vmem:[%s6939_s25 + $0x1220] sm:$0xff]  ;;  %1685 = vst [vmem:[%s6944_s6 + $0x900] sm:$0xff] %v1684_v58  ;;  %1687 = vst [vmem:[%s6944_s6 + $0x908] sm:$0xff] %v1686_v59  ;;  %v1690_v61 = vld [vmem:[%s6939_s25 + $0x1230] sm:$0xff] }
  0xd0   : > { %1689 = vst [vmem:[%s6944_s6 + $0x910] sm:$0xff] %v1688_v60  ;;  %v1692_v62 = vld [vmem:[%s6939_s25 + $0x1240] sm:$0xff]  ;;  %v1694_v63 = vld [vmem:[%s6939_s25 + $0x1250] sm:$0xff]  ;;  %1691 = vst [vmem:[%s6944_s6 + $0x918] sm:$0xff] %v1690_v61 }
  0xd1   : > { %1693 = vst [vmem:[%s6944_s6 + $0x920] sm:$0xff] %v1692_v62  ;;  %1695 = vst [vmem:[%s6944_s6 + $0x928] sm:$0xff] %v1694_v63  ;;  %v1696_v0 = vld [vmem:[%s6939_s25 + $0x1260] sm:$0xff]  ;;  %v1698_v1 = vld [vmem:[%s6939_s25 + $0x1270] sm:$0xff] }
  0xd2   : > { %v1700_v2 = vld [vmem:[%s6939_s25 + $0x1280] sm:$0xff]  ;;  %1697 = vst [vmem:[%s6944_s6 + $0x930] sm:$0xff] %v1696_v0  ;;  %1699 = vst [vmem:[%s6944_s6 + $0x938] sm:$0xff] %v1698_v1  ;;  %v1702_v3 = vld [vmem:[%s6939_s25 + $0x1290] sm:$0xff] }
  0xd3   : > { %1701 = vst [vmem:[%s6944_s6 + $0x940] sm:$0xff] %v1700_v2  ;;  %v1704_v4 = vld [vmem:[%s6939_s25 + $0x12a0] sm:$0xff]  ;;  %v1706_v5 = vld [vmem:[%s6939_s25 + $0x12b0] sm:$0xff]  ;;  %1703 = vst [vmem:[%s6944_s6 + $0x948] sm:$0xff] %v1702_v3 }
  0xd4   : > { %1705 = vst [vmem:[%s6944_s6 + $0x950] sm:$0xff] %v1704_v4  ;;  %1707 = vst [vmem:[%s6944_s6 + $0x958] sm:$0xff] %v1706_v5  ;;  %v1708_v6 = vld [vmem:[%s6939_s25 + $0x12c0] sm:$0xff]  ;;  %v1710_v7 = vld [vmem:[%s6939_s25 + $0x12d0] sm:$0xff] }
  0xd5   : > { %v1712_v8 = vld [vmem:[%s6939_s25 + $0x12e0] sm:$0xff]  ;;  %1709 = vst [vmem:[%s6944_s6 + $0x960] sm:$0xff] %v1708_v6  ;;  %1711 = vst [vmem:[%s6944_s6 + $0x968] sm:$0xff] %v1710_v7  ;;  %v1714_v9 = vld [vmem:[%s6939_s25 + $0x12f0] sm:$0xff] }
  0xd6   : > { %1713 = vst [vmem:[%s6944_s6 + $0x970] sm:$0xff] %v1712_v8  ;;  %v1716_v10 = vld [vmem:[%s6939_s25 + $0x1300] sm:$0xff]  ;;  %v1718_v11 = vld [vmem:[%s6939_s25 + $0x1310] sm:$0xff]  ;;  %1715 = vst [vmem:[%s6944_s6 + $0x978] sm:$0xff] %v1714_v9 }
  0xd7   : > { %1717 = vst [vmem:[%s6944_s6 + $0x980] sm:$0xff] %v1716_v10  ;;  %1719 = vst [vmem:[%s6944_s6 + $0x988] sm:$0xff] %v1718_v11  ;;  %v1720_v12 = vld [vmem:[%s6939_s25 + $0x1320] sm:$0xff]  ;;  %v1722_v13 = vld [vmem:[%s6939_s25 + $0x1330] sm:$0xff] }
  0xd8   : > { %v1724_v14 = vld [vmem:[%s6939_s25 + $0x1340] sm:$0xff]  ;;  %1721 = vst [vmem:[%s6944_s6 + $0x990] sm:$0xff] %v1720_v12  ;;  %1723 = vst [vmem:[%s6944_s6 + $0x998] sm:$0xff] %v1722_v13  ;;  %v1726_v15 = vld [vmem:[%s6939_s25 + $0x1350] sm:$0xff] }
  0xd9   : > { %1725 = vst [vmem:[%s6944_s6 + $0x9a0] sm:$0xff] %v1724_v14  ;;  %v1728_v16 = vld [vmem:[%s6939_s25 + $0x1360] sm:$0xff]  ;;  %v1730_v17 = vld [vmem:[%s6939_s25 + $0x1370] sm:$0xff]  ;;  %1727 = vst [vmem:[%s6944_s6 + $0x9a8] sm:$0xff] %v1726_v15 }
  0xda   : > { %1729 = vst [vmem:[%s6944_s6 + $0x9b0] sm:$0xff] %v1728_v16  ;;  %1731 = vst [vmem:[%s6944_s6 + $0x9b8] sm:$0xff] %v1730_v17  ;;  %v1732_v18 = vld [vmem:[%s6939_s25 + $0x1380] sm:$0xff]  ;;  %v1734_v19 = vld [vmem:[%s6939_s25 + $0x1390] sm:$0xff] }
  0xdb   : > { %v1736_v20 = vld [vmem:[%s6939_s25 + $0x13a0] sm:$0xff]  ;;  %1733 = vst [vmem:[%s6944_s6 + $0x9c0] sm:$0xff] %v1732_v18  ;;  %1735 = vst [vmem:[%s6944_s6 + $0x9c8] sm:$0xff] %v1734_v19  ;;  %v1738_v21 = vld [vmem:[%s6939_s25 + $0x13b0] sm:$0xff] }
  0xdc   : > { %1737 = vst [vmem:[%s6944_s6 + $0x9d0] sm:$0xff] %v1736_v20  ;;  %v1740_v22 = vld [vmem:[%s6939_s25 + $0x13c0] sm:$0xff]  ;;  %v1742_v23 = vld [vmem:[%s6939_s25 + $0x13d0] sm:$0xff]  ;;  %1739 = vst [vmem:[%s6944_s6 + $0x9d8] sm:$0xff] %v1738_v21 }
  0xdd   : > { %1741 = vst [vmem:[%s6944_s6 + $0x9e0] sm:$0xff] %v1740_v22  ;;  %1743 = vst [vmem:[%s6944_s6 + $0x9e8] sm:$0xff] %v1742_v23  ;;  %v1744_v24 = vld [vmem:[%s6939_s25 + $0x13e0] sm:$0xff]  ;;  %v1746_v25 = vld [vmem:[%s6939_s25 + $0x13f0] sm:$0xff] }
  0xde   : > { %v1748_v26 = vld [vmem:[%s6939_s25 + $0x1400] sm:$0xff]  ;;  %1745 = vst [vmem:[%s6944_s6 + $0x9f0] sm:$0xff] %v1744_v24  ;;  %1747 = vst [vmem:[%s6944_s6 + $0x9f8] sm:$0xff] %v1746_v25  ;;  %v1750_v27 = vld [vmem:[%s6939_s25 + $0x1410] sm:$0xff] }
  0xdf   : > { %1749 = vst [vmem:[%s6944_s6 + $0xa00] sm:$0xff] %v1748_v26  ;;  %v1752_v28 = vld [vmem:[%s6939_s25 + $0x1420] sm:$0xff]  ;;  %v1754_v29 = vld [vmem:[%s6939_s25 + $0x1430] sm:$0xff]  ;;  %1751 = vst [vmem:[%s6944_s6 + $0xa08] sm:$0xff] %v1750_v27 }
  0xe0   : > { %1753 = vst [vmem:[%s6944_s6 + $0xa10] sm:$0xff] %v1752_v28  ;;  %1755 = vst [vmem:[%s6944_s6 + $0xa18] sm:$0xff] %v1754_v29  ;;  %v1756_v30 = vld [vmem:[%s6939_s25 + $0x1440] sm:$0xff]  ;;  %v1758_v31 = vld [vmem:[%s6939_s25 + $0x1450] sm:$0xff] }
  0xe1   : > { %v1760_v32 = vld [vmem:[%s6939_s25 + $0x1460] sm:$0xff]  ;;  %1757 = vst [vmem:[%s6944_s6 + $0xa20] sm:$0xff] %v1756_v30  ;;  %1759 = vst [vmem:[%s6944_s6 + $0xa28] sm:$0xff] %v1758_v31  ;;  %v1762_v33 = vld [vmem:[%s6939_s25 + $0x1470] sm:$0xff] }
  0xe2   : > { %1761 = vst [vmem:[%s6944_s6 + $0xa30] sm:$0xff] %v1760_v32  ;;  %v1764_v34 = vld [vmem:[%s6939_s25 + $0x1480] sm:$0xff]  ;;  %v1766_v35 = vld [vmem:[%s6939_s25 + $0x1490] sm:$0xff]  ;;  %1763 = vst [vmem:[%s6944_s6 + $0xa38] sm:$0xff] %v1762_v33 }
  0xe3   : > { %1765 = vst [vmem:[%s6944_s6 + $0xa40] sm:$0xff] %v1764_v34  ;;  %1767 = vst [vmem:[%s6944_s6 + $0xa48] sm:$0xff] %v1766_v35  ;;  %v1768_v36 = vld [vmem:[%s6939_s25 + $0x14a0] sm:$0xff]  ;;  %v1770_v37 = vld [vmem:[%s6939_s25 + $0x14b0] sm:$0xff] }
  0xe4   : > { %v1772_v38 = vld [vmem:[%s6939_s25 + $0x14c0] sm:$0xff]  ;;  %1769 = vst [vmem:[%s6944_s6 + $0xa50] sm:$0xff] %v1768_v36  ;;  %1771 = vst [vmem:[%s6944_s6 + $0xa58] sm:$0xff] %v1770_v37  ;;  %v1774_v39 = vld [vmem:[%s6939_s25 + $0x14d0] sm:$0xff] }
  0xe5   : > { %1773 = vst [vmem:[%s6944_s6 + $0xa60] sm:$0xff] %v1772_v38  ;;  %v1776_v40 = vld [vmem:[%s6939_s25 + $0x14e0] sm:$0xff]  ;;  %v1778_v41 = vld [vmem:[%s6939_s25 + $0x14f0] sm:$0xff]  ;;  %1775 = vst [vmem:[%s6944_s6 + $0xa68] sm:$0xff] %v1774_v39 }
  0xe6   : > { %1777 = vst [vmem:[%s6944_s6 + $0xa70] sm:$0xff] %v1776_v40  ;;  %1779 = vst [vmem:[%s6944_s6 + $0xa78] sm:$0xff] %v1778_v41  ;;  %v1780_v42 = vld [vmem:[%s6939_s25 + $0x1500] sm:$0xff]  ;;  %v1782_v43 = vld [vmem:[%s6939_s25 + $0x1510] sm:$0xff] }
  0xe7   : > { %v1784_v44 = vld [vmem:[%s6939_s25 + $0x1520] sm:$0xff]  ;;  %1781 = vst [vmem:[%s6944_s6 + $0xa80] sm:$0xff] %v1780_v42  ;;  %1783 = vst [vmem:[%s6944_s6 + $0xa88] sm:$0xff] %v1782_v43  ;;  %v1786_v45 = vld [vmem:[%s6939_s25 + $0x1530] sm:$0xff] }
  0xe8   : > { %1785 = vst [vmem:[%s6944_s6 + $0xa90] sm:$0xff] %v1784_v44  ;;  %v1788_v46 = vld [vmem:[%s6939_s25 + $0x1540] sm:$0xff]  ;;  %v1790_v47 = vld [vmem:[%s6939_s25 + $0x1550] sm:$0xff]  ;;  %1787 = vst [vmem:[%s6944_s6 + $0xa98] sm:$0xff] %v1786_v45 }
  0xe9   : > { %1789 = vst [vmem:[%s6944_s6 + $0xaa0] sm:$0xff] %v1788_v46  ;;  %1791 = vst [vmem:[%s6944_s6 + $0xaa8] sm:$0xff] %v1790_v47  ;;  %v1792_v48 = vld [vmem:[%s6939_s25 + $0x1560] sm:$0xff]  ;;  %v1794_v49 = vld [vmem:[%s6939_s25 + $0x1570] sm:$0xff] }
  0xea   : > { %v1796_v50 = vld [vmem:[%s6939_s25 + $0x1580] sm:$0xff]  ;;  %1793 = vst [vmem:[%s6944_s6 + $0xab0] sm:$0xff] %v1792_v48  ;;  %1795 = vst [vmem:[%s6944_s6 + $0xab8] sm:$0xff] %v1794_v49  ;;  %v1798_v51 = vld [vmem:[%s6939_s25 + $0x1590] sm:$0xff] }
  0xeb   : > { %1797 = vst [vmem:[%s6944_s6 + $0xac0] sm:$0xff] %v1796_v50  ;;  %v1800_v52 = vld [vmem:[%s6939_s25 + $0x15a0] sm:$0xff]  ;;  %v1802_v53 = vld [vmem:[%s6939_s25 + $0x15b0] sm:$0xff]  ;;  %1799 = vst [vmem:[%s6944_s6 + $0xac8] sm:$0xff] %v1798_v51 }
  0xec   : > { %1801 = vst [vmem:[%s6944_s6 + $0xad0] sm:$0xff] %v1800_v52  ;;  %1803 = vst [vmem:[%s6944_s6 + $0xad8] sm:$0xff] %v1802_v53  ;;  %v1804_v54 = vld [vmem:[%s6939_s25 + $0x15c0] sm:$0xff]  ;;  %v1806_v55 = vld [vmem:[%s6939_s25 + $0x15d0] sm:$0xff] }
  0xed   : > { %v1808_v56 = vld [vmem:[%s6939_s25 + $0x15e0] sm:$0xff]  ;;  %1805 = vst [vmem:[%s6944_s6 + $0xae0] sm:$0xff] %v1804_v54  ;;  %1807 = vst [vmem:[%s6944_s6 + $0xae8] sm:$0xff] %v1806_v55  ;;  %v1810_v57 = vld [vmem:[%s6939_s25 + $0x15f0] sm:$0xff] }
  0xee   : > { %1809 = vst [vmem:[%s6944_s6 + $0xaf0] sm:$0xff] %v1808_v56  ;;  %v1812_v58 = vld [vmem:[%s6939_s25 + $0x1600] sm:$0xff]  ;;  %v1814_v59 = vld [vmem:[%s6939_s25 + $0x1610] sm:$0xff]  ;;  %1811 = vst [vmem:[%s6944_s6 + $0xaf8] sm:$0xff] %v1810_v57 }
  0xef   : > { %1813 = vst [vmem:[%s6944_s6 + $0xb00] sm:$0xff] %v1812_v58  ;;  %1815 = vst [vmem:[%s6944_s6 + $0xb08] sm:$0xff] %v1814_v59  ;;  %v1816_v60 = vld [vmem:[%s6939_s25 + $0x1620] sm:$0xff]  ;;  %v1818_v61 = vld [vmem:[%s6939_s25 + $0x1630] sm:$0xff] }
  0xf0   : > { %v1820_v62 = vld [vmem:[%s6939_s25 + $0x1640] sm:$0xff]  ;;  %1817 = vst [vmem:[%s6944_s6 + $0xb10] sm:$0xff] %v1816_v60  ;;  %1819 = vst [vmem:[%s6944_s6 + $0xb18] sm:$0xff] %v1818_v61  ;;  %v1822_v63 = vld [vmem:[%s6939_s25 + $0x1650] sm:$0xff] }
  0xf1   : > { %1821 = vst [vmem:[%s6944_s6 + $0xb20] sm:$0xff] %v1820_v62  ;;  %v1824_v0 = vld [vmem:[%s6939_s25 + $0x1660] sm:$0xff]  ;;  %v1826_v1 = vld [vmem:[%s6939_s25 + $0x1670] sm:$0xff]  ;;  %1823 = vst [vmem:[%s6944_s6 + $0xb28] sm:$0xff] %v1822_v63 }
  0xf2   : > { %1825 = vst [vmem:[%s6944_s6 + $0xb30] sm:$0xff] %v1824_v0  ;;  %1827 = vst [vmem:[%s6944_s6 + $0xb38] sm:$0xff] %v1826_v1  ;;  %v1828_v2 = vld [vmem:[%s6939_s25 + $0x1680] sm:$0xff]  ;;  %v1830_v3 = vld [vmem:[%s6939_s25 + $0x1690] sm:$0xff] }
  0xf3   : > { %v1832_v4 = vld [vmem:[%s6939_s25 + $0x16a0] sm:$0xff]  ;;  %1829 = vst [vmem:[%s6944_s6 + $0xb40] sm:$0xff] %v1828_v2  ;;  %1831 = vst [vmem:[%s6944_s6 + $0xb48] sm:$0xff] %v1830_v3  ;;  %v1834_v5 = vld [vmem:[%s6939_s25 + $0x16b0] sm:$0xff] }
  0xf4   : > { %1833 = vst [vmem:[%s6944_s6 + $0xb50] sm:$0xff] %v1832_v4  ;;  %v1836_v6 = vld [vmem:[%s6939_s25 + $0x16c0] sm:$0xff]  ;;  %v1838_v7 = vld [vmem:[%s6939_s25 + $0x16d0] sm:$0xff]  ;;  %1835 = vst [vmem:[%s6944_s6 + $0xb58] sm:$0xff] %v1834_v5 }
  0xf5   : > { %1837 = vst [vmem:[%s6944_s6 + $0xb60] sm:$0xff] %v1836_v6  ;;  %1839 = vst [vmem:[%s6944_s6 + $0xb68] sm:$0xff] %v1838_v7  ;;  %v1840_v8 = vld [vmem:[%s6939_s25 + $0x16e0] sm:$0xff]  ;;  %v1842_v9 = vld [vmem:[%s6939_s25 + $0x16f0] sm:$0xff] }
  0xf6   : > { %v1844_v10 = vld [vmem:[%s6939_s25 + $0x1700] sm:$0xff]  ;;  %1841 = vst [vmem:[%s6944_s6 + $0xb70] sm:$0xff] %v1840_v8  ;;  %1843 = vst [vmem:[%s6944_s6 + $0xb78] sm:$0xff] %v1842_v9  ;;  %v1846_v11 = vld [vmem:[%s6939_s25 + $0x1710] sm:$0xff] }
  0xf7   : > { %1845 = vst [vmem:[%s6944_s6 + $0xb80] sm:$0xff] %v1844_v10  ;;  %v1848_v12 = vld [vmem:[%s6939_s25 + $0x1720] sm:$0xff]  ;;  %v1850_v13 = vld [vmem:[%s6939_s25 + $0x1730] sm:$0xff]  ;;  %1847 = vst [vmem:[%s6944_s6 + $0xb88] sm:$0xff] %v1846_v11 }
  0xf8   : > { %1849 = vst [vmem:[%s6944_s6 + $0xb90] sm:$0xff] %v1848_v12  ;;  %1851 = vst [vmem:[%s6944_s6 + $0xb98] sm:$0xff] %v1850_v13  ;;  %v1852_v14 = vld [vmem:[%s6939_s25 + $0x1740] sm:$0xff]  ;;  %v1854_v15 = vld [vmem:[%s6939_s25 + $0x1750] sm:$0xff] }
  0xf9   : > { %v1856_v16 = vld [vmem:[%s6939_s25 + $0x1760] sm:$0xff]  ;;  %1853 = vst [vmem:[%s6944_s6 + $0xba0] sm:$0xff] %v1852_v14  ;;  %1855 = vst [vmem:[%s6944_s6 + $0xba8] sm:$0xff] %v1854_v15  ;;  %v1858_v17 = vld [vmem:[%s6939_s25 + $0x1770] sm:$0xff] }
  0xfa   : > { %1857 = vst [vmem:[%s6944_s6 + $0xbb0] sm:$0xff] %v1856_v16  ;;  %v1860_v18 = vld [vmem:[%s6939_s25 + $0x1780] sm:$0xff]  ;;  %v1862_v19 = vld [vmem:[%s6939_s25 + $0x1790] sm:$0xff]  ;;  %1859 = vst [vmem:[%s6944_s6 + $0xbb8] sm:$0xff] %v1858_v17 }
  0xfb   : > { %1861 = vst [vmem:[%s6944_s6 + $0xbc0] sm:$0xff] %v1860_v18  ;;  %1863 = vst [vmem:[%s6944_s6 + $0xbc8] sm:$0xff] %v1862_v19  ;;  %v1864_v20 = vld [vmem:[%s6939_s25 + $0x17a0] sm:$0xff]  ;;  %v1866_v21 = vld [vmem:[%s6939_s25 + $0x17b0] sm:$0xff] }
  0xfc   : > { %v1868_v22 = vld [vmem:[%s6939_s25 + $0x17c0] sm:$0xff]  ;;  %1865 = vst [vmem:[%s6944_s6 + $0xbd0] sm:$0xff] %v1864_v20  ;;  %1867 = vst [vmem:[%s6944_s6 + $0xbd8] sm:$0xff] %v1866_v21  ;;  %v1870_v23 = vld [vmem:[%s6939_s25 + $0x17d0] sm:$0xff] }
  0xfd   : > { %1869 = vst [vmem:[%s6944_s6 + $0xbe0] sm:$0xff] %v1868_v22  ;;  %v1872_v24 = vld [vmem:[%s6939_s25 + $0x17e0] sm:$0xff]  ;;  %v1874_v25 = vld [vmem:[%s6939_s25 + $0x17f0] sm:$0xff]  ;;  %1871 = vst [vmem:[%s6944_s6 + $0xbe8] sm:$0xff] %v1870_v23 }
  0xfe   : > { %1873 = vst [vmem:[%s6944_s6 + $0xbf0] sm:$0xff] %v1872_v24  ;;  %1875 = vst [vmem:[%s6944_s6 + $0xbf8] sm:$0xff] %v1874_v25  ;;  %v1876_v26 = vld [vmem:[%s6939_s25 + $0x1800] sm:$0xff]  ;;  %v1878_v27 = vld [vmem:[%s6939_s25 + $0x1810] sm:$0xff] }
  0xff   : > { %v1880_v28 = vld [vmem:[%s6939_s25 + $0x1820] sm:$0xff]  ;;  %1877 = vst [vmem:[%s6944_s6 + $0xc00] sm:$0xff] %v1876_v26  ;;  %1879 = vst [vmem:[%s6944_s6 + $0xc08] sm:$0xff] %v1878_v27  ;;  %v1882_v29 = vld [vmem:[%s6939_s25 + $0x1830] sm:$0xff] }
 0x100   : > { %1881 = vst [vmem:[%s6944_s6 + $0xc10] sm:$0xff] %v1880_v28  ;;  %v1884_v30 = vld [vmem:[%s6939_s25 + $0x1840] sm:$0xff]  ;;  %v1886_v31 = vld [vmem:[%s6939_s25 + $0x1850] sm:$0xff]  ;;  %1883 = vst [vmem:[%s6944_s6 + $0xc18] sm:$0xff] %v1882_v29 }
 0x101   : > { %1885 = vst [vmem:[%s6944_s6 + $0xc20] sm:$0xff] %v1884_v30  ;;  %1887 = vst [vmem:[%s6944_s6 + $0xc28] sm:$0xff] %v1886_v31  ;;  %v1888_v32 = vld [vmem:[%s6939_s25 + $0x1860] sm:$0xff]  ;;  %v1890_v33 = vld [vmem:[%s6939_s25 + $0x1870] sm:$0xff] }
 0x102   : > { %v1892_v34 = vld [vmem:[%s6939_s25 + $0x1880] sm:$0xff]  ;;  %1889 = vst [vmem:[%s6944_s6 + $0xc30] sm:$0xff] %v1888_v32  ;;  %1891 = vst [vmem:[%s6944_s6 + $0xc38] sm:$0xff] %v1890_v33  ;;  %v1894_v35 = vld [vmem:[%s6939_s25 + $0x1890] sm:$0xff] }
 0x103   : > { %1893 = vst [vmem:[%s6944_s6 + $0xc40] sm:$0xff] %v1892_v34  ;;  %v1896_v36 = vld [vmem:[%s6939_s25 + $0x18a0] sm:$0xff]  ;;  %v1898_v37 = vld [vmem:[%s6939_s25 + $0x18b0] sm:$0xff]  ;;  %1895 = vst [vmem:[%s6944_s6 + $0xc48] sm:$0xff] %v1894_v35 }
 0x104   : > { %1897 = vst [vmem:[%s6944_s6 + $0xc50] sm:$0xff] %v1896_v36  ;;  %1899 = vst [vmem:[%s6944_s6 + $0xc58] sm:$0xff] %v1898_v37  ;;  %v1900_v38 = vld [vmem:[%s6939_s25 + $0x18c0] sm:$0xff]  ;;  %v1902_v39 = vld [vmem:[%s6939_s25 + $0x18d0] sm:$0xff] }
 0x105   : > { %v1904_v40 = vld [vmem:[%s6939_s25 + $0x18e0] sm:$0xff]  ;;  %1901 = vst [vmem:[%s6944_s6 + $0xc60] sm:$0xff] %v1900_v38  ;;  %1903 = vst [vmem:[%s6944_s6 + $0xc68] sm:$0xff] %v1902_v39  ;;  %v1906_v41 = vld [vmem:[%s6939_s25 + $0x18f0] sm:$0xff] }
 0x106   : > { %1905 = vst [vmem:[%s6944_s6 + $0xc70] sm:$0xff] %v1904_v40  ;;  %v1908_v42 = vld [vmem:[%s6939_s25 + $0x1900] sm:$0xff]  ;;  %v1910_v43 = vld [vmem:[%s6939_s25 + $0x1910] sm:$0xff]  ;;  %1907 = vst [vmem:[%s6944_s6 + $0xc78] sm:$0xff] %v1906_v41 }
 0x107   : > { %1909 = vst [vmem:[%s6944_s6 + $0xc80] sm:$0xff] %v1908_v42  ;;  %1911 = vst [vmem:[%s6944_s6 + $0xc88] sm:$0xff] %v1910_v43  ;;  %v1912_v44 = vld [vmem:[%s6939_s25 + $0x1920] sm:$0xff]  ;;  %v1914_v45 = vld [vmem:[%s6939_s25 + $0x1930] sm:$0xff] }
 0x108   : > { %v1916_v46 = vld [vmem:[%s6939_s25 + $0x1940] sm:$0xff]  ;;  %1913 = vst [vmem:[%s6944_s6 + $0xc90] sm:$0xff] %v1912_v44  ;;  %1915 = vst [vmem:[%s6944_s6 + $0xc98] sm:$0xff] %v1914_v45  ;;  %v1918_v47 = vld [vmem:[%s6939_s25 + $0x1950] sm:$0xff] }
 0x109   : > { %1917 = vst [vmem:[%s6944_s6 + $0xca0] sm:$0xff] %v1916_v46  ;;  %v1920_v48 = vld [vmem:[%s6939_s25 + $0x1960] sm:$0xff]  ;;  %v1922_v49 = vld [vmem:[%s6939_s25 + $0x1970] sm:$0xff]  ;;  %1919 = vst [vmem:[%s6944_s6 + $0xca8] sm:$0xff] %v1918_v47 }
 0x10a   : > { %1921 = vst [vmem:[%s6944_s6 + $0xcb0] sm:$0xff] %v1920_v48  ;;  %1923 = vst [vmem:[%s6944_s6 + $0xcb8] sm:$0xff] %v1922_v49  ;;  %v1924_v50 = vld [vmem:[%s6939_s25 + $0x1980] sm:$0xff]  ;;  %v1926_v51 = vld [vmem:[%s6939_s25 + $0x1990] sm:$0xff] }
 0x10b   : > { %v1928_v52 = vld [vmem:[%s6939_s25 + $0x19a0] sm:$0xff]  ;;  %1925 = vst [vmem:[%s6944_s6 + $0xcc0] sm:$0xff] %v1924_v50  ;;  %1927 = vst [vmem:[%s6944_s6 + $0xcc8] sm:$0xff] %v1926_v51  ;;  %v1930_v53 = vld [vmem:[%s6939_s25 + $0x19b0] sm:$0xff] }
 0x10c   : > { %1929 = vst [vmem:[%s6944_s6 + $0xcd0] sm:$0xff] %v1928_v52  ;;  %v1932_v54 = vld [vmem:[%s6939_s25 + $0x19c0] sm:$0xff]  ;;  %v1934_v55 = vld [vmem:[%s6939_s25 + $0x19d0] sm:$0xff]  ;;  %1931 = vst [vmem:[%s6944_s6 + $0xcd8] sm:$0xff] %v1930_v53 }
 0x10d   : > { %1933 = vst [vmem:[%s6944_s6 + $0xce0] sm:$0xff] %v1932_v54  ;;  %1935 = vst [vmem:[%s6944_s6 + $0xce8] sm:$0xff] %v1934_v55  ;;  %v1936_v56 = vld [vmem:[%s6939_s25 + $0x19e0] sm:$0xff]  ;;  %v1938_v57 = vld [vmem:[%s6939_s25 + $0x19f0] sm:$0xff] }
 0x10e   : > { %1937 = vst [vmem:[%s6944_s6 + $0xcf0] sm:$0xff] %v1936_v56  ;;  %1939 = vst [vmem:[%s6944_s6 + $0xcf8] sm:$0xff] %v1938_v57 }
 0x10f PF: > { %p5445_p0 = scmp.ge.s32.totalorder %s6746_s22, 1  ;;  %p1952_p1 = scmp.lt.s32.totalorder %s6746_s22, 53 }
 0x111   : > { %p1953_p2 = pnand %p5445_p0, %p1952_p1 }
 0x112   : > { %s1959_s0 = sand.u32 (!%p1953_p2), 1, %s6722_s16   ;;  %s1966_s5 = sand.u32 (!%p1953_p2), 1, %s6714_s14  }
 0x113   : > { %1956 = sbr.rel (%p1953_p2) target bundleno = 966 (0x3c6), region = 85  ;;  %s1993_s28 = sand.u32 (!%p1953_p2), 1, %s6706_s12  }
 0x114   : > { %s5906_s23 = smul.u32 (!%p1953_p2), 208, %s1959_s0  ;;  %s5446_s25 = sshll.u32 (!%p1953_p2), %s1993_s28, 4 }
 0x115   : > { %s5907_s7 = smul.u32 (!%p1953_p2), 3328, %s1966_s5  ;;  %s5447_s11 = sshll.u32 (!%p1953_p2), %s6734_s19, 1 }
 0x116   : > { %p2001_p3 = scmp.lt.s32.totalorder (!%p1953_p2), %s5447_s11, 3  ;;  %s7787_s4 = scalar_lea.vmem (!%p1953_p2), [#allocation3], %s5906_s23 }
 0x117   : > { %s7789_s6 = scalar_lea.vmem (!%p1953_p2), [#allocation4], %s5907_s7  ;;  %s7791_s1 = scalar_lea.vmem (!%p1953_p2), [#allocation5], %s5446_s25 }
 0x118   : > { %s8316_s11 = smov (!%p2001_p3, %s5447_s11), 3  ;;  %p5448_p4 = scmp.ne.s32.totalorder %s6730_s18, 0 }
 0x119   : > { %s2003_s29 = scalar_lea.vmem %s8287_s2, %s8316_s11 }
 0x11a   : > { %2010 = sbr.rel (%p5448_p4) target bundleno = 290 (0x122), region = 97 }
 0x11f   : > { %v6748_v58 = vmov 0.0  }
 0x120   : > { %2011 = vst [vmem:[#allocation2 + $0x10] sm:$0xff] %v6748_v58  ;;  %2012 = vst [vmem:[#allocation2] sm:$0xff] %v6748_v58 }
 0x121   : > { %2013 = vst [vmem:[#allocation2 + $0x18] sm:$0xff] %v6748_v58  ;;  %2014 = vst [vmem:[#allocation2 + $0x8] sm:$0xff] %v6748_v58 }
 0x122 PF: > { %v5997_v59 = vld [vmem:[%s7789_s6 + $0x74] ss:$8 sps:$4 sm:$0xff]   ;;  %v6001_v61 = vld [vmem:[%s7789_s6 + $0x70] ss:$8 sps:$4 sm:$0xff]   ;;  %v6003_v63 = vld [vmem:[%s7789_s6 + $0x64] ss:$8 sps:$4 sm:$0xff]  }
 0x123   : > { %v5999_v60 = vld [vmem:[%s7789_s6 + $0x174] ss:$8 sps:$4 sm:$0xff]   ;;  %4671 = vmatprep.subr.bf16.mxu0 %v5997_v59  ;;  %v6002_v62 = vld [vmem:[%s7789_s6 + $0x170] ss:$8 sps:$4 sm:$0xff]   ;;  %v6005_v0 = vld [vmem:[%s7789_s6 + $0x164] ss:$8 sps:$4 sm:$0xff]  }
 0x124   : > { %4714 = vmatprep.subr.bf16.mxu1 %v5999_v60  ;;  %4672 = vmatpush1.bf16.msra.mxu0 %v6001_v61  ;;  %v6007_v1 = vld [vmem:[%s7789_s6 + $0x60] ss:$8 sps:$4 sm:$0xff]   ;;  %v6009_v3 = vld [vmem:[%s7789_s6 + $0x54] ss:$8 sps:$4 sm:$0xff]   ;;  %v6013_v5 = vld [vmem:[%s7789_s6 + $0x50] ss:$8 sps:$4 sm:$0xff]  }
 0x125   : > { %4715 = vmatpush1.bf16.msra.mxu1 %v6002_v62  ;;  %4673 = vmatprep.subr.bf16.mxu0 %v6003_v63  ;;  %v6008_v2 = vld [vmem:[%s7789_s6 + $0x160] ss:$8 sps:$4 sm:$0xff]   ;;  %v6011_v4 = vld [vmem:[%s7789_s6 + $0x154] ss:$8 sps:$4 sm:$0xff]   ;;  %v6014_v6 = vld [vmem:[%s7789_s6 + $0x150] ss:$8 sps:$4 sm:$0xff]  }
 0x126   : > { %4716 = vmatprep.subr.bf16.mxu1 %v6005_v0  ;;  %v6015_v7 = vld [vmem:[%s7789_s6 + $0x44] ss:$8 sps:$4 sm:$0xff]   ;;  %v6019_v9 = vld [vmem:[%s7789_s6 + $0x40] ss:$8 sps:$4 sm:$0xff]   ;;  %v6021_v11 = vld [vmem:[%s7789_s6 + $0x34] ss:$8 sps:$4 sm:$0xff]  }
 0x127   : > { %v6017_v8 = vld [vmem:[%s7789_s6 + $0x144] ss:$8 sps:$4 sm:$0xff]   ;;  %v6020_v10 = vld [vmem:[%s7789_s6 + $0x140] ss:$8 sps:$4 sm:$0xff]   ;;  %v6023_v12 = vld [vmem:[%s7789_s6 + $0x134] ss:$8 sps:$4 sm:$0xff]  }
 0x128   : > { %4674 = vmatpush1.bf16.msra.mxu0 %v6007_v1  ;;  %v6025_v13 = vld [vmem:[%s7789_s6 + $0x30] ss:$8 sps:$4 sm:$0xff]   ;;  %v6027_v15 = vld [vmem:[%s7789_s6 + $0x24] ss:$8 sps:$4 sm:$0xff]   ;;  %v6031_v17 = vld [vmem:[%s7789_s6 + $0x20] ss:$8 sps:$4 sm:$0xff]  }
 0x129   : > { %4717 = vmatpush1.bf16.msra.mxu1 %v6008_v2  ;;  %4675 = vmatprep.subr.bf16.mxu0 %v6009_v3  ;;  %v6026_v14 = vld [vmem:[%s7789_s6 + $0x130] ss:$8 sps:$4 sm:$0xff]   ;;  %v6029_v16 = vld [vmem:[%s7789_s6 + $0x124] ss:$8 sps:$4 sm:$0xff]   ;;  %v6032_v18 = vld [vmem:[%s7789_s6 + $0x120] ss:$8 sps:$4 sm:$0xff]  }
 0x12a   : > { %4718 = vmatprep.subr.bf16.mxu1 %v6011_v4  ;;  %v6033_v19 = vld [vmem:[%s7789_s6 + $0x14] ss:$8 sps:$4 sm:$0xff]   ;;  %v6037_v21 = vld [vmem:[%s7789_s6 + $0x10] ss:$8 sps:$4 sm:$0xff]   ;;  %v6039_v23 = vld [vmem:[%s7789_s6 + $0x4] ss:$8 sps:$4 sm:$0xff]  }
 0x12b   : > { %v6035_v20 = vld [vmem:[%s7789_s6 + $0x114] ss:$8 sps:$4 sm:$0xff]   ;;  %v6038_v22 = vld [vmem:[%s7789_s6 + $0x110] ss:$8 sps:$4 sm:$0xff]   ;;  %v6041_v24 = vld [vmem:[%s7789_s6 + $0x104] ss:$8 sps:$4 sm:$0xff]  }
 0x12c   : > { %4676 = vmatpush1.bf16.msra.mxu0 %v6013_v5  ;;  %v6043_v25 = vld [vmem:[%s7789_s6] ss:$8 sps:$4 sm:$0xff]   ;;  %v6045_v27 = vld [vmem:[%s7789_s6 + $0xf4] ss:$8 sps:$4 sm:$0xff]   ;;  %v6049_v29 = vld [vmem:[%s7789_s6 + $0xf0] ss:$8 sps:$4 sm:$0xff]  }
 0x12d   : > { %4719 = vmatpush1.bf16.msra.mxu1 %v6014_v6  ;;  %4677 = vmatprep.subr.bf16.mxu0 %v6015_v7  ;;  %v6044_v26 = vld [vmem:[%s7789_s6 + $0x100] ss:$8 sps:$4 sm:$0xff]   ;;  %v6047_v28 = vld [vmem:[%s7789_s6 + $0x1f4] ss:$8 sps:$4 sm:$0xff]   ;;  %v6050_v30 = vld [vmem:[%s7789_s6 + $0x1f0] ss:$8 sps:$4 sm:$0xff]  }
 0x12e   : > { %4720 = vmatprep.subr.bf16.mxu1 %v6017_v8  ;;  %v6051_v31 = vld [vmem:[%s7789_s6 + $0xe4] ss:$8 sps:$4 sm:$0xff]   ;;  %v6055_v33 = vld [vmem:[%s7789_s6 + $0xe0] ss:$8 sps:$4 sm:$0xff]   ;;  %v6057_v35 = vld [vmem:[%s7789_s6 + $0xd4] ss:$8 sps:$4 sm:$0xff]  }
 0x12f   : > { %v6053_v32 = vld [vmem:[%s7789_s6 + $0x1e4] ss:$8 sps:$4 sm:$0xff]   ;;  %v6056_v34 = vld [vmem:[%s7789_s6 + $0x1e0] ss:$8 sps:$4 sm:$0xff]   ;;  %v6059_v36 = vld [vmem:[%s7789_s6 + $0x1d4] ss:$8 sps:$4 sm:$0xff]  }
 0x130   : > { %4678 = vmatpush1.bf16.msra.mxu0 %v6019_v9  ;;  %v6061_v37 = vld [vmem:[%s7789_s6 + $0xd0] ss:$8 sps:$4 sm:$0xff]   ;;  %v6063_v39 = vld [vmem:[%s7789_s6 + $0xc4] ss:$8 sps:$4 sm:$0xff]   ;;  %v6067_v41 = vld [vmem:[%s7789_s6 + $0xc0] ss:$8 sps:$4 sm:$0xff]  }
 0x131   : > { %4721 = vmatpush1.bf16.msra.mxu1 %v6020_v10  ;;  %4679 = vmatprep.subr.bf16.mxu0 %v6021_v11  ;;  %v6062_v38 = vld [vmem:[%s7789_s6 + $0x1d0] ss:$8 sps:$4 sm:$0xff]   ;;  %v6065_v40 = vld [vmem:[%s7789_s6 + $0x1c4] ss:$8 sps:$4 sm:$0xff]   ;;  %v6068_v42 = vld [vmem:[%s7789_s6 + $0x1c0] ss:$8 sps:$4 sm:$0xff]  }
 0x132   : > { %4722 = vmatprep.subr.bf16.mxu1 %v6023_v12  ;;  %v6069_v43 = vld [vmem:[%s7789_s6 + $0xb4] ss:$8 sps:$4 sm:$0xff]   ;;  %v6073_v47 = vld [vmem:[%s7789_s6 + $0xb0] ss:$8 sps:$4 sm:$0xff]   ;;  %v6075_v49 = vld [vmem:[%s7789_s6 + $0xa4] ss:$8 sps:$4 sm:$0xff]  }
 0x133   : > { %v6095_v44 = vld [vmem:[%s7787_s4 + $0x4] ss:$104 sps:$4 sm:$0xff]   ;;  %v6074_v48 = vld [vmem:[%s7789_s6 + $0x1b0] ss:$8 sps:$4 sm:$0xff]   ;;  %v6079_v51 = vld [vmem:[%s7789_s6 + $0xa0] ss:$8 sps:$4 sm:$0xff]  }
 0x134   : > { %4680 = vmatpush1.bf16.msra.mxu0 %v6025_v13  ;;  %v6071_v45 = vld [vmem:[%s7789_s6 + $0x1b4] ss:$8 sps:$4 sm:$0xff]   ;;  %4703 = vmatprep.mubr.bf16.mxu0 %v6095_v44  ;;  %v6077_v50 = vld [vmem:[%s7789_s6 + $0x1a4] ss:$8 sps:$4 sm:$0xff]   ;;  %v6080_v52 = vld [vmem:[%s7789_s6 + $0x1a0] ss:$8 sps:$4 sm:$0xff]  }
 0x135   : > { %4723 = vmatpush1.bf16.msra.mxu1 %v6026_v14  ;;  %4681 = vmatprep.subr.bf16.mxu0 %v6027_v15  ;;  %v6098_v46 = vld [vmem:[%s7787_s4 + $0xc] ss:$104 sps:$4 sm:$0xff]   ;;  %v6085_v55 = vld [vmem:[%s7789_s6 + $0x90] ss:$8 sps:$4 sm:$0xff]   ;;  %v6091_v59 = vld [vmem:[%s7789_s6 + $0x80] ss:$8 sps:$4 sm:$0xff]  }
 0x136   : > { %4724 = vmatprep.subr.bf16.mxu1 %v6029_v16  ;;  %4746 = vmatprep.mubr.bf16.mxu1 %v6098_v46  ;;  %v6081_v53 = vld [vmem:[%s7789_s6 + $0x94] ss:$8 sps:$4 sm:$0xff]   ;;  %v6086_v56 = vld [vmem:[%s7789_s6 + $0x190] ss:$8 sps:$4 sm:$0xff]   ;;  %v6087_v57 = vld [vmem:[%s7789_s6 + $0x84] ss:$8 sps:$4 sm:$0xff]  }
 0x137   : > { %v6083_v54 = vld [vmem:[%s7789_s6 + $0x194] ss:$8 sps:$4 sm:$0xff]   ;;  %v6089_v58 = vld [vmem:[%s7789_s6 + $0x184] ss:$8 sps:$4 sm:$0xff]   ;;  %v6092_v60 = vld [vmem:[%s7789_s6 + $0x180] ss:$8 sps:$4 sm:$0xff]  }
 0x138   : > { %4682 = vmatpush1.bf16.msra.mxu0 %v6031_v17  ;;  %v6101_v61 = vld [vmem:[%s7789_s6 + $0x274] ss:$8 sps:$4 sm:$0xff]   ;;  %v6093_v63 = vld [vmem:[%s7787_s4] ss:$104 sps:$4 sm:$0xff]   ;;  %v6107_v3 = vld [vmem:[%s7789_s6 + $0x264] ss:$8 sps:$4 sm:$0xff]  }
 0x139   : > { %4725 = vmatpush1.bf16.msra.mxu1 %v6032_v18  ;;  %4683 = vmatprep.subr.bf16.mxu0 %v6033_v19  ;;  %v6104_v62 = vld [vmem:[%s7789_s6 + $0x374] ss:$8 sps:$4 sm:$0xff]   ;;  %v6096_v0 = vld [vmem:[%s7787_s4 + $0x8] ss:$104 sps:$4 sm:$0xff]   ;;  %v6110_v4 = vld [vmem:[%s7789_s6 + $0x364] ss:$8 sps:$4 sm:$0xff]  }
 0x13a   : > { %4726 = vmatprep.subr.bf16.mxu1 %v6035_v20  ;;  %v6099_v1 = vld [vmem:[%s7789_s6 + $0x270] ss:$8 sps:$4 sm:$0xff]   ;;  %v6105_v5 = vld [vmem:[%s7789_s6 + $0x260] ss:$8 sps:$4 sm:$0xff]   ;;  %v6113_v7 = vld [vmem:[%s7789_s6 + $0x254] ss:$8 sps:$4 sm:$0xff]  }
 0x13b   : > { %v6102_v2 = vld [vmem:[%s7789_s6 + $0x370] ss:$8 sps:$4 sm:$0xff]   ;;  %v6108_v6 = vld [vmem:[%s7789_s6 + $0x360] ss:$8 sps:$4 sm:$0xff]   ;;  %v6116_v8 = vld [vmem:[%s7789_s6 + $0x354] ss:$8 sps:$4 sm:$0xff]  }
 0x13c   : > { %4684 = vmatpush1.bf16.msra.mxu0 %v6037_v21  ;;  %v6111_v9 = vld [vmem:[%s7789_s6 + $0x250] ss:$8 sps:$4 sm:$0xff]   ;;  %v6119_v11 = vld [vmem:[%s7789_s6 + $0x244] ss:$8 sps:$4 sm:$0xff]   ;;  %v6117_v13 = vld [vmem:[%s7789_s6 + $0x240] ss:$8 sps:$4 sm:$0xff]  }
 0x13d   : > { %4727 = vmatpush1.bf16.msra.mxu1 %v6038_v22  ;;  %4685 = vmatprep.subr.bf16.mxu0 %v6039_v23  ;;  %v6114_v10 = vld [vmem:[%s7789_s6 + $0x350] ss:$8 sps:$4 sm:$0xff]   ;;  %v6122_v12 = vld [vmem:[%s7789_s6 + $0x344] ss:$8 sps:$4 sm:$0xff]   ;;  %v6120_v14 = vld [vmem:[%s7789_s6 + $0x340] ss:$8 sps:$4 sm:$0xff]  }
 0x13e   : > { %4728 = vmatprep.subr.bf16.mxu1 %v6041_v24  ;;  %v6125_v15 = vld [vmem:[%s7789_s6 + $0x234] ss:$8 sps:$4 sm:$0xff]   ;;  %v6123_v17 = vld [vmem:[%s7789_s6 + $0x230] ss:$8 sps:$4 sm:$0xff]   ;;  %v6131_v19 = vld [vmem:[%s7789_s6 + $0x224] ss:$8 sps:$4 sm:$0xff]  }
 0x13f   : > { %v6128_v16 = vld [vmem:[%s7789_s6 + $0x334] ss:$8 sps:$4 sm:$0xff]   ;;  %v6126_v18 = vld [vmem:[%s7789_s6 + $0x330] ss:$8 sps:$4 sm:$0xff]   ;;  %v6134_v20 = vld [vmem:[%s7789_s6 + $0x324] ss:$8 sps:$4 sm:$0xff]  }
 0x140   : > { %4686 = vmatpush1.bf16.msra.mxu0 %v6043_v25  ;;  %v6129_v21 = vld [vmem:[%s7789_s6 + $0x220] ss:$8 sps:$4 sm:$0xff]   ;;  %v6137_v23 = vld [vmem:[%s7789_s6 + $0x214] ss:$8 sps:$4 sm:$0xff]   ;;  %v6135_v25 = vld [vmem:[%s7789_s6 + $0x210] ss:$8 sps:$4 sm:$0xff]  }
 0x141   : > { %4729 = vmatpush1.bf16.msra.mxu1 %v6044_v26  ;;  %4687 = vmatprep.subr.bf16.mxu0 %v6045_v27  ;;  %v6132_v22 = vld [vmem:[%s7789_s6 + $0x320] ss:$8 sps:$4 sm:$0xff]   ;;  %v6140_v24 = vld [vmem:[%s7789_s6 + $0x314] ss:$8 sps:$4 sm:$0xff]   ;;  %v6138_v26 = vld [vmem:[%s7789_s6 + $0x310] ss:$8 sps:$4 sm:$0xff]  }
 0x142   : > { %4730 = vmatprep.subr.bf16.mxu1 %v6047_v28  ;;  %v6143_v27 = vld [vmem:[%s7789_s6 + $0x204] ss:$8 sps:$4 sm:$0xff]   ;;  %v6162_v44 = vld [vmem:[%s7789_s6 + $0x3d0] ss:$8 sps:$4 sm:$0xff]   ;;  %p5891_p5 = scmp.ne.s32.totalorder %s6730_s18, 25 }
 0x143   : > { %v6146_v28 = vld [vmem:[%s7789_s6 + $0x304] ss:$8 sps:$4 sm:$0xff]  }
 0x144   : > { %4688 = vmatpush2.bf16.msra.mxu0 %v6049_v29  ;;  %v6197_v29 = vld [vmem:[%s7787_s4 + $0x14] ss:$104 sps:$4 sm:$0xff]  }
 0x145   : > { %4731 = vmatpush2.bf16.msra.mxu1 %v6050_v30  ;;  %4689 = vmatprep.subr.bf16.mxu0 %v6051_v31  ;;  %v6141_v30 = vld [vmem:[%s7789_s6 + $0x200] ss:$8 sps:$4 sm:$0xff]   ;;  %v6170_v46 = vld [vmem:[%s7789_s6 + $0x3c4] ss:$8 sps:$4 sm:$0xff]  }
 0x146   : > { %4732 = vmatprep.subr.bf16.mxu1 %v6053_v32  ;;  %v6144_v31 = vld [vmem:[%s7789_s6 + $0x300] ss:$8 sps:$4 sm:$0xff]   ;;  %v6203_v32 = vld [vmem:[%s7787_s4 + $0x1c] ss:$104 sps:$4 sm:$0xff]  }
 0x148   : > { %4690 = vmatpush2.bf16.msra.mxu0 %v6055_v33  ;;  %v6149_v33 = vld [vmem:[%s7789_s6 + $0x2f4] ss:$8 sps:$4 sm:$0xff]  }
 0x149   : > { %4733 = vmatpush2.bf16.msra.mxu1 %v6056_v34  ;;  %4691 = vmatprep.subr.bf16.mxu0 %v6057_v35  ;;  %v6152_v34 = vld [vmem:[%s7789_s6 + $0x3f4] ss:$8 sps:$4 sm:$0xff]   ;;  %v6147_v35 = vld [vmem:[%s7789_s6 + $0x2f0] ss:$8 sps:$4 sm:$0xff]  }
 0x14a   : > { %4734 = vmatprep.subr.bf16.mxu1 %v6059_v36  ;;  %v6150_v36 = vld [vmem:[%s7789_s6 + $0x3f0] ss:$8 sps:$4 sm:$0xff]  }
 0x14c   : > { %4692 = vmatpush2.bf16.msra.mxu0 %v6061_v37  ;;  %v6155_v37 = vld [vmem:[%s7789_s6 + $0x2e4] ss:$8 sps:$4 sm:$0xff]  }
 0x14d   : > { %4735 = vmatpush2.bf16.msra.mxu1 %v6062_v38  ;;  %4693 = vmatprep.subr.bf16.mxu0 %v6063_v39  ;;  %v6158_v38 = vld [vmem:[%s7789_s6 + $0x3e4] ss:$8 sps:$4 sm:$0xff]   ;;  %v6153_v39 = vld [vmem:[%s7789_s6 + $0x2e0] ss:$8 sps:$4 sm:$0xff]  }
 0x14e   : > { %4736 = vmatprep.subr.bf16.mxu1 %v6065_v40  ;;  %v6156_v40 = vld [vmem:[%s7789_s6 + $0x3e0] ss:$8 sps:$4 sm:$0xff]  }
 0x150   : > { %4694 = vmatpush2.bf16.msra.mxu0 %v6067_v41  ;;  %v6161_v41 = vld [vmem:[%s7789_s6 + $0x2d4] ss:$8 sps:$4 sm:$0xff]  }
 0x151   : > { %4737 = vmatpush2.bf16.msra.mxu1 %v6068_v42  ;;  %4695 = vmatprep.subr.bf16.mxu0 %v6069_v43  ;;  %v6164_v42 = vld [vmem:[%s7789_s6 + $0x3d4] ss:$8 sps:$4 sm:$0xff]   ;;  %v6159_v43 = vld [vmem:[%s7789_s6 + $0x2d0] ss:$8 sps:$4 sm:$0xff]  }
 0x152   : > { %4738 = vmatprep.subr.bf16.mxu1 %v6071_v45  ;;  %v6167_v45 = vld [vmem:[%s7789_s6 + $0x2c4] ss:$8 sps:$4 sm:$0xff]  }
 0x154   : > { %4696 = vmatpush2.bf16.msra.mxu0 %v6073_v47  ;;  %v6165_v47 = vld [vmem:[%s7789_s6 + $0x2c0] ss:$8 sps:$4 sm:$0xff]  }
 0x155   : > { %4739 = vmatpush2.bf16.msra.mxu1 %v6074_v48  ;;  %4697 = vmatprep.subr.bf16.mxu0 %v6075_v49  ;;  %v6168_v48 = vld [vmem:[%s7789_s6 + $0x3c0] ss:$8 sps:$4 sm:$0xff]   ;;  %v6173_v49 = vld [vmem:[%s7789_s6 + $0x2b4] ss:$8 sps:$4 sm:$0xff]  }
 0x156   : > { %4740 = vmatprep.subr.bf16.mxu1 %v6077_v50  ;;  %v6176_v50 = vld [vmem:[%s7789_s6 + $0x3b4] ss:$8 sps:$4 sm:$0xff]  }
 0x158   : > { %4698 = vmatpush2.bf16.msra.mxu0 %v6079_v51  ;;  %v6171_v51 = vld [vmem:[%s7789_s6 + $0x2b0] ss:$8 sps:$4 sm:$0xff]  }
 0x159   : > { %4741 = vmatpush2.bf16.msra.mxu1 %v6080_v52  ;;  %4699 = vmatprep.subr.bf16.mxu0 %v6081_v53  ;;  %v6174_v52 = vld [vmem:[%s7789_s6 + $0x3b0] ss:$8 sps:$4 sm:$0xff]   ;;  %v6179_v53 = vld [vmem:[%s7789_s6 + $0x2a4] ss:$8 sps:$4 sm:$0xff]  }
 0x15a   : > { %4742 = vmatprep.subr.bf16.mxu1 %v6083_v54  ;;  %v6182_v54 = vld [vmem:[%s7789_s6 + $0x3a4] ss:$8 sps:$4 sm:$0xff]  }
 0x15c   : > { %4700 = vmatpush2.bf16.msra.mxu0 %v6085_v55  ;;  %v6177_v55 = vld [vmem:[%s7789_s6 + $0x2a0] ss:$8 sps:$4 sm:$0xff]  }
 0x15d   : > { %4743 = vmatpush2.bf16.msra.mxu1 %v6086_v56  ;;  %4701 = vmatprep.subr.bf16.mxu0 %v6087_v57  ;;  %v6180_v56 = vld [vmem:[%s7789_s6 + $0x3a0] ss:$8 sps:$4 sm:$0xff]   ;;  %v6185_v57 = vld [vmem:[%s7789_s6 + $0x294] ss:$8 sps:$4 sm:$0xff]  }
 0x15e   : > { %4744 = vmatprep.subr.bf16.mxu1 %v6089_v58  ;;  %v6188_v58 = vld [vmem:[%s7789_s6 + $0x394] ss:$8 sps:$4 sm:$0xff]  }
 0x160   : > { %4702 = vmatpush2.bf16.msra.mxu0 %v6091_v59  ;;  %v6183_v59 = vld [vmem:[%s7789_s6 + $0x290] ss:$8 sps:$4 sm:$0xff]  }
 0x161   : > { %4745 = vmatpush2.bf16.msra.mxu1 %v6092_v60  ;;  %4757 = vmatprep.subr.bf16.mxu0 %v6101_v61  ;;  %v6186_v60 = vld [vmem:[%s7789_s6 + $0x390] ss:$8 sps:$4 sm:$0xff]   ;;  %v6191_v61 = vld [vmem:[%s7789_s6 + $0x284] ss:$8 sps:$4 sm:$0xff]  }
 0x162   : > { %4800 = vmatprep.subr.bf16.mxu1 %v6104_v62  ;;  %v6194_v62 = vld [vmem:[%s7789_s6 + $0x384] ss:$8 sps:$4 sm:$0xff]  }
 0x163   : > { %4704 = vmatmul.mubr.bf16.vlgmr.msra.gmra.mxu0 %v6093_v63  ;;  %v6189_v63 = vld [vmem:[%s7789_s6 + $0x280] ss:$8 sps:$4 sm:$0xff]  }
 0x164   : > { %4747 = vmatmul.mubr.bf16.vlgmr.msra.gmra.mxu1 %v6096_v0  ;;  %4758 = vmatpush1.bf16.msra.mxu0 %v6099_v1  ;;  %v6192_v0 = vld [vmem:[%s7789_s6 + $0x380] ss:$8 sps:$4 sm:$0xff]   ;;  %v6200_v1 = vld [vmem:[%s7789_s6 + $0x474] ss:$8 sps:$4 sm:$0xff]  }
 0x165   : > { %4801 = vmatpush1.bf16.msra.mxu1 %v6102_v2  ;;  %4759 = vmatprep.subr.bf16.mxu0 %v6107_v3  ;;  %v6206_v2 = vld [vmem:[%s7789_s6 + $0x574] ss:$8 sps:$4 sm:$0xff]   ;;  %v6195_v3 = vld [vmem:[%s7787_s4 + $0x10] ss:$104 sps:$4 sm:$0xff]  }
 0x166   : > { %4802 = vmatprep.subr.bf16.mxu1 %v6110_v4  ;;  %4789 = vmatprep.mubr.bf16.mxu0 %v6197_v29  ;;  %v6198_v4 = vld [vmem:[%s7789_s6 + $0x470] ss:$8 sps:$4 sm:$0xff]   ;;  %v6239_v29 = vld [vmem:[%s7789_s6 + $0x414] ss:$8 sps:$4 sm:$0xff]  }
 0x167   : > { %4832 = vmatprep.mubr.bf16.mxu1 %v6203_v32  ;;  %v6240_v32 = vld [vmem:[%s7789_s6 + $0x510] ss:$8 sps:$4 sm:$0xff]  }
 0x168   : > { %4760 = vmatpush1.bf16.msra.mxu0 %v6105_v5  ;;  %v6201_v5 = vld [vmem:[%s7787_s4 + $0x18] ss:$104 sps:$4 sm:$0xff]  }
 0x169   : > { %4803 = vmatpush1.bf16.msra.mxu1 %v6108_v6  ;;  %4761 = vmatprep.subr.bf16.mxu0 %v6113_v7  ;;  %v6204_v6 = vld [vmem:[%s7789_s6 + $0x570] ss:$8 sps:$4 sm:$0xff]   ;;  %v6209_v7 = vld [vmem:[%s7789_s6 + $0x464] ss:$8 sps:$4 sm:$0xff]  }
 0x16a   : > { %4804 = vmatprep.subr.bf16.mxu1 %v6116_v8  ;;  %v6212_v8 = vld [vmem:[%s7789_s6 + $0x564] ss:$8 sps:$4 sm:$0xff]  }
 0x16c   : > { %4762 = vmatpush1.bf16.msra.mxu0 %v6111_v9  ;;  %v6207_v9 = vld [vmem:[%s7789_s6 + $0x460] ss:$8 sps:$4 sm:$0xff]  }
 0x16d   : > { %4805 = vmatpush1.bf16.msra.mxu1 %v6114_v10  ;;  %4763 = vmatprep.subr.bf16.mxu0 %v6119_v11  ;;  %v6210_v10 = vld [vmem:[%s7789_s6 + $0x560] ss:$8 sps:$4 sm:$0xff]   ;;  %v6215_v11 = vld [vmem:[%s7789_s6 + $0x454] ss:$8 sps:$4 sm:$0xff]  }
 0x16e   : > { %4806 = vmatprep.subr.bf16.mxu1 %v6122_v12  ;;  %v6218_v12 = vld [vmem:[%s7789_s6 + $0x554] ss:$8 sps:$4 sm:$0xff]  }
 0x170   : > { %4764 = vmatpush1.bf16.msra.mxu0 %v6117_v13  ;;  %v6213_v13 = vld [vmem:[%s7789_s6 + $0x450] ss:$8 sps:$4 sm:$0xff]  }
 0x171   : > { %4807 = vmatpush1.bf16.msra.mxu1 %v6120_v14  ;;  %4765 = vmatprep.subr.bf16.mxu0 %v6125_v15  ;;  %v6299_v14 = vld [vmem:[%s7787_s4 + $0x24] ss:$104 sps:$4 sm:$0xff]   ;;  %v6216_v15 = vld [vmem:[%s7789_s6 + $0x550] ss:$8 sps:$4 sm:$0xff]  }
 0x172   : > { %4808 = vmatprep.subr.bf16.mxu1 %v6128_v16  ;;  %v6221_v16 = vld [vmem:[%s7789_s6 + $0x444] ss:$8 sps:$4 sm:$0xff]  }
 0x174   : > { %4766 = vmatpush1.bf16.msra.mxu0 %v6123_v17  ;;  %v6224_v17 = vld [vmem:[%s7789_s6 + $0x544] ss:$8 sps:$4 sm:$0xff]  }
 0x175   : > { %4809 = vmatpush1.bf16.msra.mxu1 %v6126_v18  ;;  %4767 = vmatprep.subr.bf16.mxu0 %v6131_v19  ;;  %v6305_v18 = vld [vmem:[%s7787_s4 + $0x2c] ss:$104 sps:$4 sm:$0xff]   ;;  %v6219_v19 = vld [vmem:[%s7789_s6 + $0x440] ss:$8 sps:$4 sm:$0xff]  }
 0x176   : > { %4810 = vmatprep.subr.bf16.mxu1 %v6134_v20  ;;  %v6222_v20 = vld [vmem:[%s7789_s6 + $0x540] ss:$8 sps:$4 sm:$0xff]  }
 0x178   : > { %4768 = vmatpush1.bf16.msra.mxu0 %v6129_v21  ;;  %v6227_v21 = vld [vmem:[%s7789_s6 + $0x434] ss:$8 sps:$4 sm:$0xff]  }
 0x179   : > { %4811 = vmatpush1.bf16.msra.mxu1 %v6132_v22  ;;  %4769 = vmatprep.subr.bf16.mxu0 %v6137_v23  ;;  %v6230_v22 = vld [vmem:[%s7789_s6 + $0x534] ss:$8 sps:$4 sm:$0xff]   ;;  %v6225_v23 = vld [vmem:[%s7789_s6 + $0x430] ss:$8 sps:$4 sm:$0xff]  }
 0x17a   : > { %4812 = vmatprep.subr.bf16.mxu1 %v6140_v24  ;;  %v6228_v24 = vld [vmem:[%s7789_s6 + $0x530] ss:$8 sps:$4 sm:$0xff]  }
 0x17c   : > { %4770 = vmatpush1.bf16.msra.mxu0 %v6135_v25  ;;  %v6233_v25 = vld [vmem:[%s7789_s6 + $0x424] ss:$8 sps:$4 sm:$0xff]  }
 0x17d   : > { %4813 = vmatpush1.bf16.msra.mxu1 %v6138_v26  ;;  %4771 = vmatprep.subr.bf16.mxu0 %v6143_v27  ;;  %v6236_v26 = vld [vmem:[%s7789_s6 + $0x524] ss:$8 sps:$4 sm:$0xff]   ;;  %v6231_v27 = vld [vmem:[%s7789_s6 + $0x420] ss:$8 sps:$4 sm:$0xff]  }
 0x17e   : > { %4814 = vmatprep.subr.bf16.mxu1 %v6146_v28  ;;  %v6234_v28 = vld [vmem:[%s7789_s6 + $0x520] ss:$8 sps:$4 sm:$0xff]  }
 0x180   : > { %4772 = vmatpush1.bf16.msra.mxu0 %v6141_v30  ;;  %v6242_v30 = vld [vmem:[%s7789_s6 + $0x514] ss:$8 sps:$4 sm:$0xff]  }
 0x181   : > { %4815 = vmatpush1.bf16.msra.mxu1 %v6144_v31  ;;  %4773 = vmatprep.subr.bf16.mxu0 %v6149_v33  ;;  %v6237_v31 = vld [vmem:[%s7789_s6 + $0x410] ss:$8 sps:$4 sm:$0xff]   ;;  %v6245_v33 = vld [vmem:[%s7789_s6 + $0x404] ss:$8 sps:$4 sm:$0xff]  }
 0x182   : > { %4816 = vmatprep.subr.bf16.mxu1 %v6152_v34  ;;  %v6248_v34 = vld [vmem:[%s7789_s6 + $0x504] ss:$8 sps:$4 sm:$0xff]  }
 0x184   : > { %4774 = vmatpush2.bf16.msra.mxu0 %v6147_v35  ;;  %v6243_v35 = vld [vmem:[%s7789_s6 + $0x400] ss:$8 sps:$4 sm:$0xff]  }
 0x185   : > { %4817 = vmatpush2.bf16.msra.mxu1 %v6150_v36  ;;  %4775 = vmatprep.subr.bf16.mxu0 %v6155_v37  ;;  %v6246_v36 = vld [vmem:[%s7789_s6 + $0x500] ss:$8 sps:$4 sm:$0xff]   ;;  %v6251_v37 = vld [vmem:[%s7789_s6 + $0x4f4] ss:$8 sps:$4 sm:$0xff]  }
 0x186   : > { %4818 = vmatprep.subr.bf16.mxu1 %v6158_v38  ;;  %v6254_v38 = vld [vmem:[%s7789_s6 + $0x5f4] ss:$8 sps:$4 sm:$0xff]  }
 0x188   : > { %4776 = vmatpush2.bf16.msra.mxu0 %v6153_v39  ;;  %v6249_v39 = vld [vmem:[%s7789_s6 + $0x4f0] ss:$8 sps:$4 sm:$0xff]  }
 0x189   : > { %4819 = vmatpush2.bf16.msra.mxu1 %v6156_v40  ;;  %4777 = vmatprep.subr.bf16.mxu0 %v6161_v41  ;;  %v6252_v40 = vld [vmem:[%s7789_s6 + $0x5f0] ss:$8 sps:$4 sm:$0xff]   ;;  %v6257_v41 = vld [vmem:[%s7789_s6 + $0x4e4] ss:$8 sps:$4 sm:$0xff]  }
 0x18a   : > { %4820 = vmatprep.subr.bf16.mxu1 %v6164_v42  ;;  %v6260_v42 = vld [vmem:[%s7789_s6 + $0x5e4] ss:$8 sps:$4 sm:$0xff]  }
 0x18c   : > { %4778 = vmatpush2.bf16.msra.mxu0 %v6159_v43  ;;  %v6255_v43 = vld [vmem:[%s7789_s6 + $0x4e0] ss:$8 sps:$4 sm:$0xff]  }
 0x18d   : > { %4821 = vmatpush2.bf16.msra.mxu1 %v6162_v44  ;;  %4779 = vmatprep.subr.bf16.mxu0 %v6167_v45  ;;  %v6258_v44 = vld [vmem:[%s7789_s6 + $0x5e0] ss:$8 sps:$4 sm:$0xff]   ;;  %v6263_v45 = vld [vmem:[%s7789_s6 + $0x4d4] ss:$8 sps:$4 sm:$0xff]  }
 0x18e   : > { %4822 = vmatprep.subr.bf16.mxu1 %v6170_v46  ;;  %v6266_v46 = vld [vmem:[%s7789_s6 + $0x5d4] ss:$8 sps:$4 sm:$0xff]  }
 0x190   : > { %4780 = vmatpush2.bf16.msra.mxu0 %v6165_v47  ;;  %v6261_v47 = vld [vmem:[%s7789_s6 + $0x4d0] ss:$8 sps:$4 sm:$0xff]  }
 0x191   : > { %4823 = vmatpush2.bf16.msra.mxu1 %v6168_v48  ;;  %4781 = vmatprep.subr.bf16.mxu0 %v6173_v49  ;;  %v6264_v48 = vld [vmem:[%s7789_s6 + $0x5d0] ss:$8 sps:$4 sm:$0xff]   ;;  %v6269_v49 = vld [vmem:[%s7789_s6 + $0x4c4] ss:$8 sps:$4 sm:$0xff]  }
 0x192   : > { %4824 = vmatprep.subr.bf16.mxu1 %v6176_v50  ;;  %v6272_v50 = vld [vmem:[%s7789_s6 + $0x5c4] ss:$8 sps:$4 sm:$0xff]  }
 0x194   : > { %4782 = vmatpush2.bf16.msra.mxu0 %v6171_v51  ;;  %v6267_v51 = vld [vmem:[%s7789_s6 + $0x4c0] ss:$8 sps:$4 sm:$0xff]  }
 0x195   : > { %4825 = vmatpush2.bf16.msra.mxu1 %v6174_v52  ;;  %4783 = vmatprep.subr.bf16.mxu0 %v6179_v53  ;;  %v6270_v52 = vld [vmem:[%s7789_s6 + $0x5c0] ss:$8 sps:$4 sm:$0xff]   ;;  %v6275_v53 = vld [vmem:[%s7789_s6 + $0x4b4] ss:$8 sps:$4 sm:$0xff]  }
 0x196   : > { %4826 = vmatprep.subr.bf16.mxu1 %v6182_v54  ;;  %v6278_v54 = vld [vmem:[%s7789_s6 + $0x5b4] ss:$8 sps:$4 sm:$0xff]  }
 0x198   : > { %4784 = vmatpush2.bf16.msra.mxu0 %v6177_v55  ;;  %v6273_v55 = vld [vmem:[%s7789_s6 + $0x4b0] ss:$8 sps:$4 sm:$0xff]  }
 0x199   : > { %4827 = vmatpush2.bf16.msra.mxu1 %v6180_v56  ;;  %4785 = vmatprep.subr.bf16.mxu0 %v6185_v57  ;;  %v6276_v56 = vld [vmem:[%s7789_s6 + $0x5b0] ss:$8 sps:$4 sm:$0xff]   ;;  %v6281_v57 = vld [vmem:[%s7789_s6 + $0x4a4] ss:$8 sps:$4 sm:$0xff]  }
 0x19a   : > { %4828 = vmatprep.subr.bf16.mxu1 %v6188_v58  ;;  %v6284_v58 = vld [vmem:[%s7789_s6 + $0x5a4] ss:$8 sps:$4 sm:$0xff]  }
 0x19c   : > { %4786 = vmatpush2.bf16.msra.mxu0 %v6183_v59  ;;  %v6279_v59 = vld [vmem:[%s7789_s6 + $0x4a0] ss:$8 sps:$4 sm:$0xff]  }
 0x19d   : > { %4829 = vmatpush2.bf16.msra.mxu1 %v6186_v60  ;;  %4787 = vmatprep.subr.bf16.mxu0 %v6191_v61  ;;  %v6282_v60 = vld [vmem:[%s7789_s6 + $0x5a0] ss:$8 sps:$4 sm:$0xff]   ;;  %v6287_v61 = vld [vmem:[%s7789_s6 + $0x494] ss:$8 sps:$4 sm:$0xff]  }
 0x19e   : > { %4830 = vmatprep.subr.bf16.mxu1 %v6194_v62  ;;  %v6290_v62 = vld [vmem:[%s7789_s6 + $0x594] ss:$8 sps:$4 sm:$0xff]  }
 0x1a0   : > { %4788 = vmatpush2.bf16.msra.mxu0 %v6189_v63  ;;  %v6285_v63 = vld [vmem:[%s7789_s6 + $0x490] ss:$8 sps:$4 sm:$0xff]  }
 0x1a1   : > { %4831 = vmatpush2.bf16.msra.mxu1 %v6192_v0  ;;  %4843 = vmatprep.subr.bf16.mxu0 %v6200_v1  ;;  %v6288_v0 = vld [vmem:[%s7789_s6 + $0x590] ss:$8 sps:$4 sm:$0xff]   ;;  %v6293_v1 = vld [vmem:[%s7789_s6 + $0x484] ss:$8 sps:$4 sm:$0xff]  }
 0x1a2   : > { %4886 = vmatprep.subr.bf16.mxu1 %v6206_v2  ;;  %v6296_v2 = vld [vmem:[%s7789_s6 + $0x584] ss:$8 sps:$4 sm:$0xff]  }
 0x1a3   : > { %4790 = vmatmul.mubr.bf16.vlgmr.msra.gmra.mxu0 %v6195_v3  ;;  %v6291_v3 = vld [vmem:[%s7789_s6 + $0x480] ss:$8 sps:$4 sm:$0xff]  }
 0x1a4   : > { %4833 = vmatmul.mubr.bf16.vlgmr.msra.gmra.mxu1 %v6201_v5  ;;  %4844 = vmatpush1.bf16.msra.mxu0 %v6198_v4  ;;  %v6294_v4 = vld [vmem:[%s7789_s6 + $0x580] ss:$8 sps:$4 sm:$0xff]   ;;  %v6302_v5 = vld [vmem:[%s7789_s6 + $0x674] ss:$8 sps:$4 sm:$0xff]  }
 0x1a5   : > { %4887 = vmatpush1.bf16.msra.mxu1 %v6204_v6  ;;  %4845 = vmatprep.subr.bf16.mxu0 %v6209_v7  ;;  %v6308_v6 = vld [vmem:[%s7789_s6 + $0x774] ss:$8 sps:$4 sm:$0xff]   ;;  %v6297_v7 = vld [vmem:[%s7787_s4 + $0x20] ss:$104 sps:$4 sm:$0xff]  }
 0x1a6   : > { %4888 = vmatprep.subr.bf16.mxu1 %v6212_v8  ;;  %4875 = vmatprep.mubr.bf16.mxu0 %v6299_v14  ;;  %v6300_v8 = vld [vmem:[%s7789_s6 + $0x670] ss:$8 sps:$4 sm:$0xff]   ;;  %v6407_v14 = vld [vmem:[%s7787_s4 + $0x3c] ss:$104 sps:$4 sm:$0xff]  }
 0x1a7   : > { %4918 = vmatprep.mubr.bf16.mxu1 %v6305_v18  ;;  %v6320_v18 = vld [vmem:[%s7789_s6 + $0x754] ss:$8 sps:$4 sm:$0xff]  }
 0x1a8   : > { %4846 = vmatpush1.bf16.msra.mxu0 %v6207_v9  ;;  %v6303_v9 = vld [vmem:[%s7787_s4 + $0x28] ss:$104 sps:$4 sm:$0xff]  }
 0x1a9   : > { %4889 = vmatpush1.bf16.msra.mxu1 %v6210_v10  ;;  %4847 = vmatprep.subr.bf16.mxu0 %v6215_v11  ;;  %v6306_v10 = vld [vmem:[%s7789_s6 + $0x770] ss:$8 sps:$4 sm:$0xff]   ;;  %v6311_v11 = vld [vmem:[%s7789_s6 + $0x664] ss:$8 sps:$4 sm:$0xff]  }
 0x1aa   : > { %4890 = vmatprep.subr.bf16.mxu1 %v6218_v12  ;;  %v6314_v12 = vld [vmem:[%s7789_s6 + $0x764] ss:$8 sps:$4 sm:$0xff]  }
 0x1ac   : > { %4848 = vmatpush1.bf16.msra.mxu0 %v6213_v13  ;;  %v6401_v13 = vld [vmem:[%s7787_s4 + $0x34] ss:$104 sps:$4 sm:$0xff]  }
 0x1ad   : > { %4891 = vmatpush1.bf16.msra.mxu1 %v6216_v15  ;;  %4849 = vmatprep.subr.bf16.mxu0 %v6221_v16  ;;  %v6309_v15 = vld [vmem:[%s7789_s6 + $0x660] ss:$8 sps:$4 sm:$0xff]  }
 0x1ae   : > { %4892 = vmatprep.subr.bf16.mxu1 %v6224_v17  ;;  %v6312_v16 = vld [vmem:[%s7789_s6 + $0x760] ss:$8 sps:$4 sm:$0xff]   ;;  %v6317_v17 = vld [vmem:[%s7789_s6 + $0x654] ss:$8 sps:$4 sm:$0xff]  }
 0x1b0   : > { %4850 = vmatpush1.bf16.msra.mxu0 %v6219_v19  ;;  %v6315_v19 = vld [vmem:[%s7789_s6 + $0x650] ss:$8 sps:$4 sm:$0xff]  }
 0x1b1   : > { %4893 = vmatpush1.bf16.msra.mxu1 %v6222_v20  ;;  %4851 = vmatprep.subr.bf16.mxu0 %v6227_v21  ;;  %v6318_v20 = vld [vmem:[%s7789_s6 + $0x750] ss:$8 sps:$4 sm:$0xff]   ;;  %v6323_v21 = vld [vmem:[%s7789_s6 + $0x644] ss:$8 sps:$4 sm:$0xff]  }
 0x1b2   : > { %4894 = vmatprep.subr.bf16.mxu1 %v6230_v22  ;;  %v6326_v22 = vld [vmem:[%s7789_s6 + $0x744] ss:$8 sps:$4 sm:$0xff]  }
 0x1b4   : > { %4852 = vmatpush1.bf16.msra.mxu0 %v6225_v23  ;;  %v6321_v23 = vld [vmem:[%s7789_s6 + $0x640] ss:$8 sps:$4 sm:$0xff]  }
 0x1b5   : > { %4895 = vmatpush1.bf16.msra.mxu1 %v6228_v24  ;;  %4853 = vmatprep.subr.bf16.mxu0 %v6233_v25  ;;  %v6324_v24 = vld [vmem:[%s7789_s6 + $0x740] ss:$8 sps:$4 sm:$0xff]   ;;  %v6329_v25 = vld [vmem:[%s7789_s6 + $0x634] ss:$8 sps:$4 sm:$0xff]  }
 0x1b6   : > { %4896 = vmatprep.subr.bf16.mxu1 %v6236_v26  ;;  %v6332_v26 = vld [vmem:[%s7789_s6 + $0x734] ss:$8 sps:$4 sm:$0xff]  }
 0x1b8   : > { %4854 = vmatpush1.bf16.msra.mxu0 %v6231_v27  ;;  %v6327_v27 = vld [vmem:[%s7789_s6 + $0x630] ss:$8 sps:$4 sm:$0xff]  }
 0x1b9   : > { %4897 = vmatpush1.bf16.msra.mxu1 %v6234_v28  ;;  %4855 = vmatprep.subr.bf16.mxu0 %v6239_v29  ;;  %v6330_v28 = vld [vmem:[%s7789_s6 + $0x730] ss:$8 sps:$4 sm:$0xff]   ;;  %v6335_v29 = vld [vmem:[%s7789_s6 + $0x624] ss:$8 sps:$4 sm:$0xff]  }
 0x1ba   : > { %4898 = vmatprep.subr.bf16.mxu1 %v6242_v30  ;;  %v6338_v30 = vld [vmem:[%s7789_s6 + $0x724] ss:$8 sps:$4 sm:$0xff]  }
 0x1bc   : > { %4856 = vmatpush1.bf16.msra.mxu0 %v6237_v31  ;;  %v6333_v31 = vld [vmem:[%s7789_s6 + $0x620] ss:$8 sps:$4 sm:$0xff]  }
 0x1bd   : > { %4899 = vmatpush1.bf16.msra.mxu1 %v6240_v32  ;;  %4857 = vmatprep.subr.bf16.mxu0 %v6245_v33  ;;  %v6336_v32 = vld [vmem:[%s7789_s6 + $0x720] ss:$8 sps:$4 sm:$0xff]   ;;  %v6341_v33 = vld [vmem:[%s7789_s6 + $0x614] ss:$8 sps:$4 sm:$0xff]  }
 0x1be   : > { %4900 = vmatprep.subr.bf16.mxu1 %v6248_v34  ;;  %v6344_v34 = vld [vmem:[%s7789_s6 + $0x714] ss:$8 sps:$4 sm:$0xff]  }
 0x1c0   : > { %4858 = vmatpush1.bf16.msra.mxu0 %v6243_v35  ;;  %v6339_v35 = vld [vmem:[%s7789_s6 + $0x610] ss:$8 sps:$4 sm:$0xff]  }
 0x1c1   : > { %4901 = vmatpush1.bf16.msra.mxu1 %v6246_v36  ;;  %4859 = vmatprep.subr.bf16.mxu0 %v6251_v37  ;;  %v6342_v36 = vld [vmem:[%s7789_s6 + $0x710] ss:$8 sps:$4 sm:$0xff]   ;;  %v6347_v37 = vld [vmem:[%s7789_s6 + $0x604] ss:$8 sps:$4 sm:$0xff]  }
 0x1c2   : > { %4902 = vmatprep.subr.bf16.mxu1 %v6254_v38  ;;  %v6350_v38 = vld [vmem:[%s7789_s6 + $0x704] ss:$8 sps:$4 sm:$0xff]  }
 0x1c4   : > { %4860 = vmatpush2.bf16.msra.mxu0 %v6249_v39  ;;  %v6345_v39 = vld [vmem:[%s7789_s6 + $0x600] ss:$8 sps:$4 sm:$0xff]  }
 0x1c5   : > { %4903 = vmatpush2.bf16.msra.mxu1 %v6252_v40  ;;  %4861 = vmatprep.subr.bf16.mxu0 %v6257_v41  ;;  %v6348_v40 = vld [vmem:[%s7789_s6 + $0x700] ss:$8 sps:$4 sm:$0xff]   ;;  %v6353_v41 = vld [vmem:[%s7789_s6 + $0x6f4] ss:$8 sps:$4 sm:$0xff]  }
 0x1c6   : > { %4904 = vmatprep.subr.bf16.mxu1 %v6260_v42  ;;  %v6356_v42 = vld [vmem:[%s7789_s6 + $0x7f4] ss:$8 sps:$4 sm:$0xff]  }
 0x1c8   : > { %4862 = vmatpush2.bf16.msra.mxu0 %v6255_v43  ;;  %v6351_v43 = vld [vmem:[%s7789_s6 + $0x6f0] ss:$8 sps:$4 sm:$0xff]  }
 0x1c9   : > { %4905 = vmatpush2.bf16.msra.mxu1 %v6258_v44  ;;  %4863 = vmatprep.subr.bf16.mxu0 %v6263_v45  ;;  %v6354_v44 = vld [vmem:[%s7789_s6 + $0x7f0] ss:$8 sps:$4 sm:$0xff]   ;;  %v6359_v45 = vld [vmem:[%s7789_s6 + $0x6e4] ss:$8 sps:$4 sm:$0xff]  }
 0x1ca   : > { %4906 = vmatprep.subr.bf16.mxu1 %v6266_v46  ;;  %v6362_v46 = vld [vmem:[%s7789_s6 + $0x7e4] ss:$8 sps:$4 sm:$0xff]  }
 0x1cc   : > { %4864 = vmatpush2.bf16.msra.mxu0 %v6261_v47  ;;  %v6357_v47 = vld [vmem:[%s7789_s6 + $0x6e0] ss:$8 sps:$4 sm:$0xff]  }
 0x1cd   : > { %4907 = vmatpush2.bf16.msra.mxu1 %v6264_v48  ;;  %4865 = vmatprep.subr.bf16.mxu0 %v6269_v49  ;;  %v6360_v48 = vld [vmem:[%s7789_s6 + $0x7e0] ss:$8 sps:$4 sm:$0xff]   ;;  %v6365_v49 = vld [vmem:[%s7789_s6 + $0x6d4] ss:$8 sps:$4 sm:$0xff]  }
 0x1ce   : > { %4908 = vmatprep.subr.bf16.mxu1 %v6272_v50  ;;  %v6368_v50 = vld [vmem:[%s7789_s6 + $0x7d4] ss:$8 sps:$4 sm:$0xff]  }
 0x1d0   : > { %4866 = vmatpush2.bf16.msra.mxu0 %v6267_v51  ;;  %v6363_v51 = vld [vmem:[%s7789_s6 + $0x6d0] ss:$8 sps:$4 sm:$0xff]  }
 0x1d1   : > { %4909 = vmatpush2.bf16.msra.mxu1 %v6270_v52  ;;  %4867 = vmatprep.subr.bf16.mxu0 %v6275_v53  ;;  %v6366_v52 = vld [vmem:[%s7789_s6 + $0x7d0] ss:$8 sps:$4 sm:$0xff]   ;;  %v6371_v53 = vld [vmem:[%s7789_s6 + $0x6c4] ss:$8 sps:$4 sm:$0xff]  }
 0x1d2   : > { %4910 = vmatprep.subr.bf16.mxu1 %v6278_v54  ;;  %v6374_v54 = vld [vmem:[%s7789_s6 + $0x7c4] ss:$8 sps:$4 sm:$0xff]  }
 0x1d4   : > { %4868 = vmatpush2.bf16.msra.mxu0 %v6273_v55  ;;  %v6369_v55 = vld [vmem:[%s7789_s6 + $0x6c0] ss:$8 sps:$4 sm:$0xff]  }
 0x1d5   : > { %4911 = vmatpush2.bf16.msra.mxu1 %v6276_v56  ;;  %4869 = vmatprep.subr.bf16.mxu0 %v6281_v57  ;;  %v6372_v56 = vld [vmem:[%s7789_s6 + $0x7c0] ss:$8 sps:$4 sm:$0xff]   ;;  %v6377_v57 = vld [vmem:[%s7789_s6 + $0x6b4] ss:$8 sps:$4 sm:$0xff]  }
 0x1d6   : > { %4912 = vmatprep.subr.bf16.mxu1 %v6284_v58  ;;  %v6380_v58 = vld [vmem:[%s7789_s6 + $0x7b4] ss:$8 sps:$4 sm:$0xff]  }
 0x1d8   : > { %4870 = vmatpush2.bf16.msra.mxu0 %v6279_v59  ;;  %v6375_v59 = vld [vmem:[%s7789_s6 + $0x6b0] ss:$8 sps:$4 sm:$0xff]  }
 0x1d9   : > { %4913 = vmatpush2.bf16.msra.mxu1 %v6282_v60  ;;  %4871 = vmatprep.subr.bf16.mxu0 %v6287_v61  ;;  %v6378_v60 = vld [vmem:[%s7789_s6 + $0x7b0] ss:$8 sps:$4 sm:$0xff]   ;;  %v6383_v61 = vld [vmem:[%s7789_s6 + $0x6a4] ss:$8 sps:$4 sm:$0xff]  }
 0x1da   : > { %4914 = vmatprep.subr.bf16.mxu1 %v6290_v62  ;;  %v6386_v62 = vld [vmem:[%s7789_s6 + $0x7a4] ss:$8 sps:$4 sm:$0xff]  }
 0x1dc   : > { %4872 = vmatpush2.bf16.msra.mxu0 %v6285_v63  ;;  %v6381_v63 = vld [vmem:[%s7789_s6 + $0x6a0] ss:$8 sps:$4 sm:$0xff]  }
 0x1dd   : > { %4915 = vmatpush2.bf16.msra.mxu1 %v6288_v0  ;;  %4873 = vmatprep.subr.bf16.mxu0 %v6293_v1  ;;  %v6384_v0 = vld [vmem:[%s7789_s6 + $0x7a0] ss:$8 sps:$4 sm:$0xff]   ;;  %v6389_v1 = vld [vmem:[%s7789_s6 + $0x694] ss:$8 sps:$4 sm:$0xff]  }
 0x1de   : > { %4916 = vmatprep.subr.bf16.mxu1 %v6296_v2  ;;  %v6392_v2 = vld [vmem:[%s7789_s6 + $0x794] ss:$8 sps:$4 sm:$0xff]  }
 0x1e0   : > { %4874 = vmatpush2.bf16.msra.mxu0 %v6291_v3  ;;  %v6387_v3 = vld [vmem:[%s7789_s6 + $0x690] ss:$8 sps:$4 sm:$0xff]  }
 0x1e1   : > { %4917 = vmatpush2.bf16.msra.mxu1 %v6294_v4  ;;  %4929 = vmatprep.subr.bf16.mxu0 %v6302_v5  ;;  %v6390_v4 = vld [vmem:[%s7789_s6 + $0x790] ss:$8 sps:$4 sm:$0xff]   ;;  %v6395_v5 = vld [vmem:[%s7789_s6 + $0x684] ss:$8 sps:$4 sm:$0xff]  }
 0x1e2   : > { %4972 = vmatprep.subr.bf16.mxu1 %v6308_v6  ;;  %v6398_v6 = vld [vmem:[%s7789_s6 + $0x784] ss:$8 sps:$4 sm:$0xff]  }
 0x1e3   : > { %4876 = vmatmul.mubr.bf16.vlgmr.msra.gmra.mxu0 %v6297_v7  ;;  %v6393_v7 = vld [vmem:[%s7789_s6 + $0x680] ss:$8 sps:$4 sm:$0xff]  }
 0x1e4   : > { %4919 = vmatmul.mubr.bf16.vlgmr.msra.gmra.mxu1 %v6303_v9  ;;  %4930 = vmatpush1.bf16.msra.mxu0 %v6300_v8  ;;  %v6396_v8 = vld [vmem:[%s7789_s6 + $0x780] ss:$8 sps:$4 sm:$0xff]   ;;  %v6404_v9 = vld [vmem:[%s7789_s6 + $0x874] ss:$8 sps:$4 sm:$0xff]  }
 0x1e5   : > { %4973 = vmatpush1.bf16.msra.mxu1 %v6306_v10  ;;  %4931 = vmatprep.subr.bf16.mxu0 %v6311_v11  ;;  %v6410_v10 = vld [vmem:[%s7789_s6 + $0x974] ss:$8 sps:$4 sm:$0xff]   ;;  %v6399_v11 = vld [vmem:[%s7787_s4 + $0x30] ss:$104 sps:$4 sm:$0xff]  }
 0x1e6   : > { %4974 = vmatprep.subr.bf16.mxu1 %v6314_v12  ;;  %4961 = vmatprep.mubr.bf16.mxu0 %v6401_v13  ;;  %v6402_v12 = vld [vmem:[%s7789_s6 + $0x870] ss:$8 sps:$4 sm:$0xff]  }
 0x1e7   : > { %5004 = vmatprep.mubr.bf16.mxu1 %v6407_v14  ;;  %v6405_v13 = vld [vmem:[%s7787_s4 + $0x38] ss:$104 sps:$4 sm:$0xff]  }
 0x1e8   : > { %4932 = vmatpush1.bf16.msra.mxu0 %v6309_v15  ;;  %v6408_v14 = vld [vmem:[%s7789_s6 + $0x970] ss:$8 sps:$4 sm:$0xff]   ;;  %v6413_v15 = vld [vmem:[%s7789_s6 + $0x864] ss:$8 sps:$4 sm:$0xff]  }
 0x1e9   : > { %4975 = vmatpush1.bf16.msra.mxu1 %v6312_v16  ;;  %4933 = vmatprep.subr.bf16.mxu0 %v6317_v17  ;;  %v6416_v16 = vld [vmem:[%s7789_s6 + $0x964] ss:$8 sps:$4 sm:$0xff]  }
 0x1ea   : > { %4976 = vmatprep.subr.bf16.mxu1 %v6320_v18  ;;  %v6503_v17 = vld [vmem:[%s7787_s4 + $0x44] ss:$104 sps:$4 sm:$0xff]  }
 0x1eb   : > { %v6509_v18 = vld [vmem:[%s7787_s4 + $0x4c] ss:$104 sps:$4 sm:$0xff]  }
 0x1ec   : > { %4934 = vmatpush1.bf16.msra.mxu0 %v6315_v19  ;;  %v6411_v19 = vld [vmem:[%s7789_s6 + $0x860] ss:$8 sps:$4 sm:$0xff]  }
 0x1ed   : > { %4977 = vmatpush1.bf16.msra.mxu1 %v6318_v20  ;;  %4935 = vmatprep.subr.bf16.mxu0 %v6323_v21  ;;  %v6414_v20 = vld [vmem:[%s7789_s6 + $0x960] ss:$8 sps:$4 sm:$0xff]   ;;  %v6419_v21 = vld [vmem:[%s7789_s6 + $0x854] ss:$8 sps:$4 sm:$0xff]  }
 0x1ee   : > { %4978 = vmatprep.subr.bf16.mxu1 %v6326_v22  ;;  %v6422_v22 = vld [vmem:[%s7789_s6 + $0x954] ss:$8 sps:$4 sm:$0xff]  }
 0x1f0   : > { %4936 = vmatpush1.bf16.msra.mxu0 %v6321_v23  ;;  %v6417_v23 = vld [vmem:[%s7789_s6 + $0x850] ss:$8 sps:$4 sm:$0xff]  }
 0x1f1   : > { %4979 = vmatpush1.bf16.msra.mxu1 %v6324_v24  ;;  %4937 = vmatprep.subr.bf16.mxu0 %v6329_v25  ;;  %v6420_v24 = vld [vmem:[%s7789_s6 + $0x950] ss:$8 sps:$4 sm:$0xff]   ;;  %v6425_v25 = vld [vmem:[%s7789_s6 + $0x844] ss:$8 sps:$4 sm:$0xff]  }
 0x1f2   : > { %4980 = vmatprep.subr.bf16.mxu1 %v6332_v26  ;;  %v6428_v26 = vld [vmem:[%s7789_s6 + $0x944] ss:$8 sps:$4 sm:$0xff]  }
 0x1f4   : > { %4938 = vmatpush1.bf16.msra.mxu0 %v6327_v27  ;;  %v6423_v27 = vld [vmem:[%s7789_s6 + $0x840] ss:$8 sps:$4 sm:$0xff]  }
 0x1f5   : > { %4981 = vmatpush1.bf16.msra.mxu1 %v6330_v28  ;;  %4939 = vmatprep.subr.bf16.mxu0 %v6335_v29  ;;  %v6426_v28 = vld [vmem:[%s7789_s6 + $0x940] ss:$8 sps:$4 sm:$0xff]   ;;  %v6431_v29 = vld [vmem:[%s7789_s6 + $0x834] ss:$8 sps:$4 sm:$0xff]  }
 0x1f6   : > { %4982 = vmatprep.subr.bf16.mxu1 %v6338_v30  ;;  %v6434_v30 = vld [vmem:[%s7789_s6 + $0x934] ss:$8 sps:$4 sm:$0xff]  }
 0x1f8   : > { %4940 = vmatpush1.bf16.msra.mxu0 %v6333_v31  ;;  %v6429_v31 = vld [vmem:[%s7789_s6 + $0x830] ss:$8 sps:$4 sm:$0xff]  }
 0x1f9   : > { %4983 = vmatpush1.bf16.msra.mxu1 %v6336_v32  ;;  %4941 = vmatprep.subr.bf16.mxu0 %v6341_v33  ;;  %v6432_v32 = vld [vmem:[%s7789_s6 + $0x930] ss:$8 sps:$4 sm:$0xff]   ;;  %v6437_v33 = vld [vmem:[%s7789_s6 + $0x824] ss:$8 sps:$4 sm:$0xff]  }
 0x1fa   : > { %4984 = vmatprep.subr.bf16.mxu1 %v6344_v34  ;;  %v6440_v34 = vld [vmem:[%s7789_s6 + $0x924] ss:$8 sps:$4 sm:$0xff]  }
 0x1fc   : > { %4942 = vmatpush1.bf16.msra.mxu0 %v6339_v35  ;;  %v6435_v35 = vld [vmem:[%s7789_s6 + $0x820] ss:$8 sps:$4 sm:$0xff]  }
 0x1fd   : > { %4985 = vmatpush1.bf16.msra.mxu1 %v6342_v36  ;;  %4943 = vmatprep.subr.bf16.mxu0 %v6347_v37  ;;  %v6438_v36 = vld [vmem:[%s7789_s6 + $0x920] ss:$8 sps:$4 sm:$0xff]   ;;  %v6443_v37 = vld [vmem:[%s7789_s6 + $0x814] ss:$8 sps:$4 sm:$0xff]  }
 0x1fe   : > { %4986 = vmatprep.subr.bf16.mxu1 %v6350_v38  ;;  %v6446_v38 = vld [vmem:[%s7789_s6 + $0x914] ss:$8 sps:$4 sm:$0xff]  }
 0x200   : > { %4944 = vmatpush1.bf16.msra.mxu0 %v6345_v39  ;;  %v6441_v39 = vld [vmem:[%s7789_s6 + $0x810] ss:$8 sps:$4 sm:$0xff]  }
 0x201   : > { %4987 = vmatpush1.bf16.msra.mxu1 %v6348_v40  ;;  %4945 = vmatprep.subr.bf16.mxu0 %v6353_v41  ;;  %v6444_v40 = vld [vmem:[%s7789_s6 + $0x910] ss:$8 sps:$4 sm:$0xff]   ;;  %v6449_v41 = vld [vmem:[%s7789_s6 + $0x804] ss:$8 sps:$4 sm:$0xff]  }
 0x202   : > { %4988 = vmatprep.subr.bf16.mxu1 %v6356_v42  ;;  %v6452_v42 = vld [vmem:[%s7789_s6 + $0x904] ss:$8 sps:$4 sm:$0xff]  }
 0x204   : > { %4946 = vmatpush2.bf16.msra.mxu0 %v6351_v43  ;;  %v6447_v43 = vld [vmem:[%s7789_s6 + $0x800] ss:$8 sps:$4 sm:$0xff]  }
 0x205   : > { %4989 = vmatpush2.bf16.msra.mxu1 %v6354_v44  ;;  %4947 = vmatprep.subr.bf16.mxu0 %v6359_v45  ;;  %v6450_v44 = vld [vmem:[%s7789_s6 + $0x900] ss:$8 sps:$4 sm:$0xff]   ;;  %v6455_v45 = vld [vmem:[%s7789_s6 + $0x8f4] ss:$8 sps:$4 sm:$0xff]  }
 0x206   : > { %4990 = vmatprep.subr.bf16.mxu1 %v6362_v46  ;;  %v6458_v46 = vld [vmem:[%s7789_s6 + $0x9f4] ss:$8 sps:$4 sm:$0xff]  }
 0x208   : > { %4948 = vmatpush2.bf16.msra.mxu0 %v6357_v47  ;;  %v6453_v47 = vld [vmem:[%s7789_s6 + $0x8f0] ss:$8 sps:$4 sm:$0xff]  }
 0x209   : > { %4991 = vmatpush2.bf16.msra.mxu1 %v6360_v48  ;;  %4949 = vmatprep.subr.bf16.mxu0 %v6365_v49  ;;  %v6456_v48 = vld [vmem:[%s7789_s6 + $0x9f0] ss:$8 sps:$4 sm:$0xff]   ;;  %v6461_v49 = vld [vmem:[%s7789_s6 + $0x8e4] ss:$8 sps:$4 sm:$0xff]  }
 0x20a   : > { %4992 = vmatprep.subr.bf16.mxu1 %v6368_v50  ;;  %v6464_v50 = vld [vmem:[%s7789_s6 + $0x9e4] ss:$8 sps:$4 sm:$0xff]  }
 0x20c   : > { %4950 = vmatpush2.bf16.msra.mxu0 %v6363_v51  ;;  %v6459_v51 = vld [vmem:[%s7789_s6 + $0x8e0] ss:$8 sps:$4 sm:$0xff]  }
 0x20d   : > { %4993 = vmatpush2.bf16.msra.mxu1 %v6366_v52  ;;  %4951 = vmatprep.subr.bf16.mxu0 %v6371_v53  ;;  %v6462_v52 = vld [vmem:[%s7789_s6 + $0x9e0] ss:$8 sps:$4 sm:$0xff]   ;;  %v6467_v53 = vld [vmem:[%s7789_s6 + $0x8d4] ss:$8 sps:$4 sm:$0xff]  }
 0x20e   : > { %4994 = vmatprep.subr.bf16.mxu1 %v6374_v54  ;;  %v6470_v54 = vld [vmem:[%s7789_s6 + $0x9d4] ss:$8 sps:$4 sm:$0xff]  }
 0x210   : > { %4952 = vmatpush2.bf16.msra.mxu0 %v6369_v55  ;;  %v6465_v55 = vld [vmem:[%s7789_s6 + $0x8d0] ss:$8 sps:$4 sm:$0xff]  }
 0x211   : > { %4995 = vmatpush2.bf16.msra.mxu1 %v6372_v56  ;;  %4953 = vmatprep.subr.bf16.mxu0 %v6377_v57  ;;  %v6468_v56 = vld [vmem:[%s7789_s6 + $0x9d0] ss:$8 sps:$4 sm:$0xff]   ;;  %v6473_v57 = vld [vmem:[%s7789_s6 + $0x8c4] ss:$8 sps:$4 sm:$0xff]  }
 0x212   : > { %4996 = vmatprep.subr.bf16.mxu1 %v6380_v58  ;;  %v6476_v58 = vld [vmem:[%s7789_s6 + $0x9c4] ss:$8 sps:$4 sm:$0xff]  }
 0x214   : > { %4954 = vmatpush2.bf16.msra.mxu0 %v6375_v59  ;;  %v6471_v59 = vld [vmem:[%s7789_s6 + $0x8c0] ss:$8 sps:$4 sm:$0xff]  }
 0x215   : > { %4997 = vmatpush2.bf16.msra.mxu1 %v6378_v60  ;;  %4955 = vmatprep.subr.bf16.mxu0 %v6383_v61  ;;  %v6474_v60 = vld [vmem:[%s7789_s6 + $0x9c0] ss:$8 sps:$4 sm:$0xff]   ;;  %v6479_v61 = vld [vmem:[%s7789_s6 + $0x8b4] ss:$8 sps:$4 sm:$0xff]  }
 0x216   : > { %4998 = vmatprep.subr.bf16.mxu1 %v6386_v62  ;;  %v6482_v62 = vld [vmem:[%s7789_s6 + $0x9b4] ss:$8 sps:$4 sm:$0xff]  }
 0x218   : > { %4956 = vmatpush2.bf16.msra.mxu0 %v6381_v63  ;;  %v6477_v63 = vld [vmem:[%s7789_s6 + $0x8b0] ss:$8 sps:$4 sm:$0xff]  }
 0x219   : > { %4999 = vmatpush2.bf16.msra.mxu1 %v6384_v0  ;;  %4957 = vmatprep.subr.bf16.mxu0 %v6389_v1  ;;  %v6480_v0 = vld [vmem:[%s7789_s6 + $0x9b0] ss:$8 sps:$4 sm:$0xff]   ;;  %v6485_v1 = vld [vmem:[%s7789_s6 + $0x8a4] ss:$8 sps:$4 sm:$0xff]  }
 0x21a   : > { %5000 = vmatprep.subr.bf16.mxu1 %v6392_v2  ;;  %v6488_v2 = vld [vmem:[%s7789_s6 + $0x9a4] ss:$8 sps:$4 sm:$0xff]  }
 0x21c   : > { %4958 = vmatpush2.bf16.msra.mxu0 %v6387_v3  ;;  %v6483_v3 = vld [vmem:[%s7789_s6 + $0x8a0] ss:$8 sps:$4 sm:$0xff]  }
 0x21d   : > { %5001 = vmatpush2.bf16.msra.mxu1 %v6390_v4  ;;  %4959 = vmatprep.subr.bf16.mxu0 %v6395_v5  ;;  %v6486_v4 = vld [vmem:[%s7789_s6 + $0x9a0] ss:$8 sps:$4 sm:$0xff]   ;;  %v6491_v5 = vld [vmem:[%s7789_s6 + $0x894] ss:$8 sps:$4 sm:$0xff]  }
 0x21e   : > { %5002 = vmatprep.subr.bf16.mxu1 %v6398_v6  ;;  %v6494_v6 = vld [vmem:[%s7789_s6 + $0x994] ss:$8 sps:$4 sm:$0xff]  }
 0x220   : > { %4960 = vmatpush2.bf16.msra.mxu0 %v6393_v7  ;;  %v6489_v7 = vld [vmem:[%s7789_s6 + $0x890] ss:$8 sps:$4 sm:$0xff]  }
 0x221   : > { %5003 = vmatpush2.bf16.msra.mxu1 %v6396_v8  ;;  %5015 = vmatprep.subr.bf16.mxu0 %v6404_v9  ;;  %v6492_v8 = vld [vmem:[%s7789_s6 + $0x990] ss:$8 sps:$4 sm:$0xff]   ;;  %v6497_v9 = vld [vmem:[%s7789_s6 + $0x884] ss:$8 sps:$4 sm:$0xff]  }
 0x222   : > { %5058 = vmatprep.subr.bf16.mxu1 %v6410_v10  ;;  %v6500_v10 = vld [vmem:[%s7789_s6 + $0x984] ss:$8 sps:$4 sm:$0xff]  }
 0x223   : > { %4962 = vmatmul.mubr.bf16.vlgmr.msra.gmra.mxu0 %v6399_v11  ;;  %v6495_v11 = vld [vmem:[%s7789_s6 + $0x880] ss:$8 sps:$4 sm:$0xff]  }
 0x224   : > { %5005 = vmatmul.mubr.bf16.vlgmr.msra.gmra.mxu1 %v6405_v13  ;;  %5016 = vmatpush1.bf16.msra.mxu0 %v6402_v12  ;;  %v6498_v12 = vld [vmem:[%s7789_s6 + $0x980] ss:$8 sps:$4 sm:$0xff]   ;;  %v6506_v13 = vld [vmem:[%s7789_s6 + $0xa74] ss:$8 sps:$4 sm:$0xff]  }
 0x225   : > { %5059 = vmatpush1.bf16.msra.mxu1 %v6408_v14  ;;  %5017 = vmatprep.subr.bf16.mxu0 %v6413_v15  ;;  %v6512_v14 = vld [vmem:[%s7789_s6 + $0xb74] ss:$8 sps:$4 sm:$0xff]   ;;  %v6501_v15 = vld [vmem:[%s7787_s4 + $0x40] ss:$104 sps:$4 sm:$0xff]  }
 0x226   : > { %5060 = vmatprep.subr.bf16.mxu1 %v6416_v16  ;;  %5047 = vmatprep.mubr.bf16.mxu0 %v6503_v17  ;;  %v6507_v16 = vld [vmem:[%s7787_s4 + $0x48] ss:$104 sps:$4 sm:$0xff]  }
 0x227   : > { %5090 = vmatprep.mubr.bf16.mxu1 %v6509_v18  ;;  %v6504_v17 = vld [vmem:[%s7789_s6 + $0xa70] ss:$8 sps:$4 sm:$0xff]  }
 0x228   : > { %5018 = vmatpush1.bf16.msra.mxu0 %v6411_v19  ;;  %v6510_v18 = vld [vmem:[%s7789_s6 + $0xb70] ss:$8 sps:$4 sm:$0xff]   ;;  %v6515_v19 = vld [vmem:[%s7789_s6 + $0xa64] ss:$8 sps:$4 sm:$0xff]  }
 0x229   : > { %5061 = vmatpush1.bf16.msra.mxu1 %v6414_v20  ;;  %5019 = vmatprep.subr.bf16.mxu0 %v6419_v21  ;;  %v6518_v20 = vld [vmem:[%s7789_s6 + $0xb64] ss:$8 sps:$4 sm:$0xff]  }
 0x22a   : > { %5062 = vmatprep.subr.bf16.mxu1 %v6422_v22  ;;  %v6605_v21 = vld [vmem:[%s7787_s4 + $0x54] ss:$104 sps:$4 sm:$0xff]  }
 0x22b   : > { %v6611_v22 = vld [vmem:[%s7787_s4 + $0x5c] ss:$104 sps:$4 sm:$0xff]  }
 0x22c   : > { %5020 = vmatpush1.bf16.msra.mxu0 %v6417_v23  ;;  %v6513_v23 = vld [vmem:[%s7789_s6 + $0xa60] ss:$8 sps:$4 sm:$0xff]  }
 0x22d   : > { %5063 = vmatpush1.bf16.msra.mxu1 %v6420_v24  ;;  %5021 = vmatprep.subr.bf16.mxu0 %v6425_v25  ;;  %v6516_v24 = vld [vmem:[%s7789_s6 + $0xb60] ss:$8 sps:$4 sm:$0xff]   ;;  %v6521_v25 = vld [vmem:[%s7789_s6 + $0xa54] ss:$8 sps:$4 sm:$0xff]  }
 0x22e   : > { %5064 = vmatprep.subr.bf16.mxu1 %v6428_v26  ;;  %v6524_v26 = vld [vmem:[%s7789_s6 + $0xb54] ss:$8 sps:$4 sm:$0xff]  }
 0x230   : > { %5022 = vmatpush1.bf16.msra.mxu0 %v6423_v27  ;;  %v6519_v27 = vld [vmem:[%s7789_s6 + $0xa50] ss:$8 sps:$4 sm:$0xff]  }
 0x231   : > { %5065 = vmatpush1.bf16.msra.mxu1 %v6426_v28  ;;  %5023 = vmatprep.subr.bf16.mxu0 %v6431_v29  ;;  %v6522_v28 = vld [vmem:[%s7789_s6 + $0xb50] ss:$8 sps:$4 sm:$0xff]   ;;  %v6527_v29 = vld [vmem:[%s7789_s6 + $0xa44] ss:$8 sps:$4 sm:$0xff]  }
 0x232   : > { %5066 = vmatprep.subr.bf16.mxu1 %v6434_v30  ;;  %v6530_v30 = vld [vmem:[%s7789_s6 + $0xb44] ss:$8 sps:$4 sm:$0xff]  }
 0x234   : > { %5024 = vmatpush1.bf16.msra.mxu0 %v6429_v31  ;;  %v6525_v31 = vld [vmem:[%s7789_s6 + $0xa40] ss:$8 sps:$4 sm:$0xff]  }
 0x235   : > { %5067 = vmatpush1.bf16.msra.mxu1 %v6432_v32  ;;  %5025 = vmatprep.subr.bf16.mxu0 %v6437_v33  ;;  %v6528_v32 = vld [vmem:[%s7789_s6 + $0xb40] ss:$8 sps:$4 sm:$0xff]   ;;  %v6533_v33 = vld [vmem:[%s7789_s6 + $0xa34] ss:$8 sps:$4 sm:$0xff]  }
 0x236   : > { %5068 = vmatprep.subr.bf16.mxu1 %v6440_v34  ;;  %v6536_v34 = vld [vmem:[%s7789_s6 + $0xb34] ss:$8 sps:$4 sm:$0xff]  }
 0x238   : > { %5026 = vmatpush1.bf16.msra.mxu0 %v6435_v35  ;;  %v6531_v35 = vld [vmem:[%s7789_s6 + $0xa30] ss:$8 sps:$4 sm:$0xff]  }
 0x239   : > { %5069 = vmatpush1.bf16.msra.mxu1 %v6438_v36  ;;  %5027 = vmatprep.subr.bf16.mxu0 %v6443_v37  ;;  %v6534_v36 = vld [vmem:[%s7789_s6 + $0xb30] ss:$8 sps:$4 sm:$0xff]   ;;  %v6539_v37 = vld [vmem:[%s7789_s6 + $0xa24] ss:$8 sps:$4 sm:$0xff]  }
 0x23a   : > { %5070 = vmatprep.subr.bf16.mxu1 %v6446_v38  ;;  %v6542_v38 = vld [vmem:[%s7789_s6 + $0xb24] ss:$8 sps:$4 sm:$0xff]  }
 0x23c   : > { %5028 = vmatpush1.bf16.msra.mxu0 %v6441_v39  ;;  %v6537_v39 = vld [vmem:[%s7789_s6 + $0xa20] ss:$8 sps:$4 sm:$0xff]  }
 0x23d   : > { %5071 = vmatpush1.bf16.msra.mxu1 %v6444_v40  ;;  %5029 = vmatprep.subr.bf16.mxu0 %v6449_v41  ;;  %v6540_v40 = vld [vmem:[%s7789_s6 + $0xb20] ss:$8 sps:$4 sm:$0xff]   ;;  %v6545_v41 = vld [vmem:[%s7789_s6 + $0xa14] ss:$8 sps:$4 sm:$0xff]  }
 0x23e   : > { %5072 = vmatprep.subr.bf16.mxu1 %v6452_v42  ;;  %v6548_v42 = vld [vmem:[%s7789_s6 + $0xb14] ss:$8 sps:$4 sm:$0xff]  }
 0x240   : > { %5030 = vmatpush1.bf16.msra.mxu0 %v6447_v43  ;;  %v6543_v43 = vld [vmem:[%s7789_s6 + $0xa10] ss:$8 sps:$4 sm:$0xff]  }
 0x241   : > { %5073 = vmatpush1.bf16.msra.mxu1 %v6450_v44  ;;  %5031 = vmatprep.subr.bf16.mxu0 %v6455_v45  ;;  %v6546_v44 = vld [vmem:[%s7789_s6 + $0xb10] ss:$8 sps:$4 sm:$0xff]   ;;  %v6551_v45 = vld [vmem:[%s7789_s6 + $0xa04] ss:$8 sps:$4 sm:$0xff]  }
 0x242   : > { %5074 = vmatprep.subr.bf16.mxu1 %v6458_v46  ;;  %v6554_v46 = vld [vmem:[%s7789_s6 + $0xb04] ss:$8 sps:$4 sm:$0xff]  }
 0x244   : > { %5032 = vmatpush2.bf16.msra.mxu0 %v6453_v47  ;;  %v6549_v47 = vld [vmem:[%s7789_s6 + $0xa00] ss:$8 sps:$4 sm:$0xff]  }
 0x245   : > { %5075 = vmatpush2.bf16.msra.mxu1 %v6456_v48  ;;  %5033 = vmatprep.subr.bf16.mxu0 %v6461_v49  ;;  %v6552_v48 = vld [vmem:[%s7789_s6 + $0xb00] ss:$8 sps:$4 sm:$0xff]   ;;  %v6557_v49 = vld [vmem:[%s7789_s6 + $0xaf4] ss:$8 sps:$4 sm:$0xff]  }
 0x246   : > { %5076 = vmatprep.subr.bf16.mxu1 %v6464_v50  ;;  %v6560_v50 = vld [vmem:[%s7789_s6 + $0xbf4] ss:$8 sps:$4 sm:$0xff]  }
 0x248   : > { %5034 = vmatpush2.bf16.msra.mxu0 %v6459_v51  ;;  %v6555_v51 = vld [vmem:[%s7789_s6 + $0xaf0] ss:$8 sps:$4 sm:$0xff]  }
 0x249   : > { %5077 = vmatpush2.bf16.msra.mxu1 %v6462_v52  ;;  %5035 = vmatprep.subr.bf16.mxu0 %v6467_v53  ;;  %v6558_v52 = vld [vmem:[%s7789_s6 + $0xbf0] ss:$8 sps:$4 sm:$0xff]   ;;  %v6563_v53 = vld [vmem:[%s7789_s6 + $0xae4] ss:$8 sps:$4 sm:$0xff]  }
 0x24a   : > { %5078 = vmatprep.subr.bf16.mxu1 %v6470_v54  ;;  %v6566_v54 = vld [vmem:[%s7789_s6 + $0xbe4] ss:$8 sps:$4 sm:$0xff]  }
 0x24c   : > { %5036 = vmatpush2.bf16.msra.mxu0 %v6465_v55  ;;  %v6561_v55 = vld [vmem:[%s7789_s6 + $0xae0] ss:$8 sps:$4 sm:$0xff]  }
 0x24d   : > { %5079 = vmatpush2.bf16.msra.mxu1 %v6468_v56  ;;  %5037 = vmatprep.subr.bf16.mxu0 %v6473_v57  ;;  %v6564_v56 = vld [vmem:[%s7789_s6 + $0xbe0] ss:$8 sps:$4 sm:$0xff]   ;;  %v6569_v57 = vld [vmem:[%s7789_s6 + $0xad4] ss:$8 sps:$4 sm:$0xff]  }
 0x24e   : > { %5080 = vmatprep.subr.bf16.mxu1 %v6476_v58  ;;  %v6572_v58 = vld [vmem:[%s7789_s6 + $0xbd4] ss:$8 sps:$4 sm:$0xff]  }
 0x250   : > { %5038 = vmatpush2.bf16.msra.mxu0 %v6471_v59  ;;  %v6567_v59 = vld [vmem:[%s7789_s6 + $0xad0] ss:$8 sps:$4 sm:$0xff]  }
 0x251   : > { %5081 = vmatpush2.bf16.msra.mxu1 %v6474_v60  ;;  %5039 = vmatprep.subr.bf16.mxu0 %v6479_v61  ;;  %v6570_v60 = vld [vmem:[%s7789_s6 + $0xbd0] ss:$8 sps:$4 sm:$0xff]   ;;  %v6575_v61 = vld [vmem:[%s7789_s6 + $0xac4] ss:$8 sps:$4 sm:$0xff]  }
 0x252   : > { %5082 = vmatprep.subr.bf16.mxu1 %v6482_v62  ;;  %v6578_v62 = vld [vmem:[%s7789_s6 + $0xbc4] ss:$8 sps:$4 sm:$0xff]  }
 0x254   : > { %5040 = vmatpush2.bf16.msra.mxu0 %v6477_v63  ;;  %v6573_v63 = vld [vmem:[%s7789_s6 + $0xac0] ss:$8 sps:$4 sm:$0xff]  }
 0x255   : > { %5083 = vmatpush2.bf16.msra.mxu1 %v6480_v0  ;;  %5041 = vmatprep.subr.bf16.mxu0 %v6485_v1  ;;  %v6576_v0 = vld [vmem:[%s7789_s6 + $0xbc0] ss:$8 sps:$4 sm:$0xff]   ;;  %v6581_v1 = vld [vmem:[%s7789_s6 + $0xab4] ss:$8 sps:$4 sm:$0xff]  }
 0x256   : > { %5084 = vmatprep.subr.bf16.mxu1 %v6488_v2  ;;  %v6584_v2 = vld [vmem:[%s7789_s6 + $0xbb4] ss:$8 sps:$4 sm:$0xff]  }
 0x258   : > { %5042 = vmatpush2.bf16.msra.mxu0 %v6483_v3  ;;  %v6579_v3 = vld [vmem:[%s7789_s6 + $0xab0] ss:$8 sps:$4 sm:$0xff]  }
 0x259   : > { %5085 = vmatpush2.bf16.msra.mxu1 %v6486_v4  ;;  %5043 = vmatprep.subr.bf16.mxu0 %v6491_v5  ;;  %v6582_v4 = vld [vmem:[%s7789_s6 + $0xbb0] ss:$8 sps:$4 sm:$0xff]   ;;  %v6587_v5 = vld [vmem:[%s7789_s6 + $0xaa4] ss:$8 sps:$4 sm:$0xff]  }
 0x25a   : > { %5086 = vmatprep.subr.bf16.mxu1 %v6494_v6  ;;  %v6590_v6 = vld [vmem:[%s7789_s6 + $0xba4] ss:$8 sps:$4 sm:$0xff]  }
 0x25c   : > { %5044 = vmatpush2.bf16.msra.mxu0 %v6489_v7  ;;  %v6585_v7 = vld [vmem:[%s7789_s6 + $0xaa0] ss:$8 sps:$4 sm:$0xff]  }
 0x25d   : > { %5087 = vmatpush2.bf16.msra.mxu1 %v6492_v8  ;;  %5045 = vmatprep.subr.bf16.mxu0 %v6497_v9  ;;  %v6588_v8 = vld [vmem:[%s7789_s6 + $0xba0] ss:$8 sps:$4 sm:$0xff]   ;;  %v6593_v9 = vld [vmem:[%s7789_s6 + $0xa94] ss:$8 sps:$4 sm:$0xff]  }
 0x25e   : > { %5088 = vmatprep.subr.bf16.mxu1 %v6500_v10  ;;  %v6596_v10 = vld [vmem:[%s7789_s6 + $0xb94] ss:$8 sps:$4 sm:$0xff]  }
 0x260   : > { %5046 = vmatpush2.bf16.msra.mxu0 %v6495_v11  ;;  %v6591_v11 = vld [vmem:[%s7789_s6 + $0xa90] ss:$8 sps:$4 sm:$0xff]  }
 0x261   : > { %5089 = vmatpush2.bf16.msra.mxu1 %v6498_v12  ;;  %5101 = vmatprep.subr.bf16.mxu0 %v6506_v13  ;;  %v6594_v12 = vld [vmem:[%s7789_s6 + $0xb90] ss:$8 sps:$4 sm:$0xff]   ;;  %v6599_v13 = vld [vmem:[%s7789_s6 + $0xa84] ss:$8 sps:$4 sm:$0xff]  }
 0x262   : > { %5144 = vmatprep.subr.bf16.mxu1 %v6512_v14  ;;  %v6602_v14 = vld [vmem:[%s7789_s6 + $0xb84] ss:$8 sps:$4 sm:$0xff]  }
 0x263   : > { %5048 = vmatmul.mubr.bf16.vlgmr.msra.gmra.mxu0 %v6501_v15  ;;  %v6597_v15 = vld [vmem:[%s7789_s6 + $0xa80] ss:$8 sps:$4 sm:$0xff]  }
 0x264   : > { %5091 = vmatmul.mubr.bf16.vlgmr.msra.gmra.mxu1 %v6507_v16  ;;  %5102 = vmatpush1.bf16.msra.mxu0 %v6504_v17  ;;  %v6600_v16 = vld [vmem:[%s7789_s6 + $0xb80] ss:$8 sps:$4 sm:$0xff]   ;;  %v6608_v17 = vld [vmem:[%s7789_s6 + $0xc74] ss:$8 sps:$4 sm:$0xff]  }
 0x265   : > { %5145 = vmatpush1.bf16.msra.mxu1 %v6510_v18  ;;  %5103 = vmatprep.subr.bf16.mxu0 %v6515_v19  ;;  %v6603_v18 = vld [vmem:[%s7787_s4 + $0x50] ss:$104 sps:$4 sm:$0xff]  }
 0x266   : > { %5146 = vmatprep.subr.bf16.mxu1 %v6518_v20  ;;  %5133 = vmatprep.mubr.bf16.mxu0 %v6605_v21  ;;  %v6609_v19 = vld [vmem:[%s7787_s4 + $0x58] ss:$104 sps:$4 sm:$0xff]   ;;  %v6659_v21 = vld [vmem:[%s7787_s4 + $0x64] ss:$104 sps:$4 sm:$0xff]  }
 0x267   : > { %5176 = vmatprep.mubr.bf16.mxu1 %v6611_v22  ;;  %v6606_v20 = vld [vmem:[%s7789_s6 + $0xc70] ss:$8 sps:$4 sm:$0xff]   ;;  %v6614_v22 = vld [vmem:[%s7789_s6 + $0xc64] ss:$8 sps:$4 sm:$0xff]  }
 0x268   : > { %5104 = vmatpush1.bf16.msra.mxu0 %v6513_v23  ;;  %v6612_v23 = vld [vmem:[%s7789_s6 + $0xc60] ss:$8 sps:$4 sm:$0xff]  }
 0x269   : > { %5147 = vmatpush1.bf16.msra.mxu1 %v6516_v24  ;;  %5105 = vmatprep.subr.bf16.mxu0 %v6521_v25  ;;  %v6617_v24 = vld [vmem:[%s7789_s6 + $0xc54] ss:$8 sps:$4 sm:$0xff]   ;;  %v6615_v25 = vld [vmem:[%s7789_s6 + $0xc50] ss:$8 sps:$4 sm:$0xff]  }
 0x26a   : > { %5148 = vmatprep.subr.bf16.mxu1 %v6524_v26  ;;  %v6620_v26 = vld [vmem:[%s7789_s6 + $0xc44] ss:$8 sps:$4 sm:$0xff]  }
 0x26c   : > { %5106 = vmatpush1.bf16.msra.mxu0 %v6519_v27  ;;  %v6618_v27 = vld [vmem:[%s7789_s6 + $0xc40] ss:$8 sps:$4 sm:$0xff]  }
 0x26d   : > { %5149 = vmatpush1.bf16.msra.mxu1 %v6522_v28  ;;  %5107 = vmatprep.subr.bf16.mxu0 %v6527_v29  ;;  %v6623_v28 = vld [vmem:[%s7789_s6 + $0xc34] ss:$8 sps:$4 sm:$0xff]   ;;  %v6621_v29 = vld [vmem:[%s7789_s6 + $0xc30] ss:$8 sps:$4 sm:$0xff]  }
 0x26e   : > { %5150 = vmatprep.subr.bf16.mxu1 %v6530_v30  ;;  %v6626_v30 = vld [vmem:[%s7789_s6 + $0xc24] ss:$8 sps:$4 sm:$0xff]  }
 0x270   : > { %5108 = vmatpush1.bf16.msra.mxu0 %v6525_v31  ;;  %v6624_v31 = vld [vmem:[%s7789_s6 + $0xc20] ss:$8 sps:$4 sm:$0xff]  }
 0x271   : > { %5151 = vmatpush1.bf16.msra.mxu1 %v6528_v32  ;;  %5109 = vmatprep.subr.bf16.mxu0 %v6533_v33  ;;  %v6629_v32 = vld [vmem:[%s7789_s6 + $0xc14] ss:$8 sps:$4 sm:$0xff]   ;;  %v6627_v33 = vld [vmem:[%s7789_s6 + $0xc10] ss:$8 sps:$4 sm:$0xff]  }
 0x272   : > { %5152 = vmatprep.subr.bf16.mxu1 %v6536_v34  ;;  %v6632_v34 = vld [vmem:[%s7789_s6 + $0xc04] ss:$8 sps:$4 sm:$0xff]  }
 0x274   : > { %5110 = vmatpush1.bf16.msra.mxu0 %v6531_v35  ;;  %v6630_v35 = vld [vmem:[%s7789_s6 + $0xc00] ss:$8 sps:$4 sm:$0xff]  }
 0x275   : > { %5153 = vmatpush1.bf16.msra.mxu1 %v6534_v36  ;;  %5111 = vmatprep.subr.bf16.mxu0 %v6539_v37  ;;  %v6635_v36 = vld [vmem:[%s7789_s6 + $0xcf4] ss:$8 sps:$4 sm:$0xff]   ;;  %v6633_v37 = vld [vmem:[%s7789_s6 + $0xcf0] ss:$8 sps:$4 sm:$0xff]  }
 0x276   : > { %5154 = vmatprep.subr.bf16.mxu1 %v6542_v38  ;;  %v6638_v38 = vld [vmem:[%s7789_s6 + $0xce4] ss:$8 sps:$4 sm:$0xff]  }
 0x278   : > { %5112 = vmatpush1.bf16.msra.mxu0 %v6537_v39  ;;  %v6636_v39 = vld [vmem:[%s7789_s6 + $0xce0] ss:$8 sps:$4 sm:$0xff]  }
 0x279   : > { %5155 = vmatpush1.bf16.msra.mxu1 %v6540_v40  ;;  %5113 = vmatprep.subr.bf16.mxu0 %v6545_v41  ;;  %v6641_v40 = vld [vmem:[%s7789_s6 + $0xcd4] ss:$8 sps:$4 sm:$0xff]   ;;  %v6639_v41 = vld [vmem:[%s7789_s6 + $0xcd0] ss:$8 sps:$4 sm:$0xff]  }
 0x27a   : > { %5156 = vmatprep.subr.bf16.mxu1 %v6548_v42  ;;  %v6644_v42 = vld [vmem:[%s7789_s6 + $0xcc4] ss:$8 sps:$4 sm:$0xff]  }
 0x27c   : > { %5114 = vmatpush1.bf16.msra.mxu0 %v6543_v43  ;;  %v6642_v43 = vld [vmem:[%s7789_s6 + $0xcc0] ss:$8 sps:$4 sm:$0xff]  }
 0x27d   : > { %5157 = vmatpush1.bf16.msra.mxu1 %v6546_v44  ;;  %5115 = vmatprep.subr.bf16.mxu0 %v6551_v45  ;;  %v6647_v44 = vld [vmem:[%s7789_s6 + $0xcb4] ss:$8 sps:$4 sm:$0xff]   ;;  %v6645_v45 = vld [vmem:[%s7789_s6 + $0xcb0] ss:$8 sps:$4 sm:$0xff]  }
 0x27e   : > { %5158 = vmatprep.subr.bf16.mxu1 %v6554_v46  ;;  %v6650_v46 = vld [vmem:[%s7789_s6 + $0xca4] ss:$8 sps:$4 sm:$0xff]  }
 0x280   : > { %5116 = vmatpush1.bf16.msra.mxu0 %v6549_v47  ;;  %v6648_v47 = vld [vmem:[%s7789_s6 + $0xca0] ss:$8 sps:$4 sm:$0xff]  }
 0x281   : > { %5159 = vmatpush1.bf16.msra.mxu1 %v6552_v48  ;;  %5117 = vmatprep.subr.bf16.mxu0 %v6557_v49  ;;  %v6653_v48 = vld [vmem:[%s7789_s6 + $0xc94] ss:$8 sps:$4 sm:$0xff]   ;;  %v6651_v49 = vld [vmem:[%s7789_s6 + $0xc90] ss:$8 sps:$4 sm:$0xff]  }
 0x282   : > { %5160 = vmatprep.subr.bf16.mxu1 %v6560_v50  ;;  %v6656_v50 = vld [vmem:[%s7789_s6 + $0xc84] ss:$8 sps:$4 sm:$0xff]  }
 0x284   : > { %5118 = vmatpush2.bf16.msra.mxu0 %v6555_v51  ;;  %v6654_v51 = vld [vmem:[%s7789_s6 + $0xc80] ss:$8 sps:$4 sm:$0xff]  }
 0x285   : > { %5161 = vmatpush2.bf16.msra.mxu1 %v6558_v52  ;;  %5119 = vmatprep.subr.bf16.mxu0 %v6563_v53  ;;  %v6657_v52 = vld [vmem:[%s7787_s4 + $0x60] ss:$104 sps:$4 sm:$0xff]   ;;  %v4705_v53 = vpop.f32.mrf.mxu0 }
 0x286   : > { %5162 = vmatprep.subr.bf16.mxu1 %v6566_v54  ;;  %v4748_v54 = vpop.f32.mrf.mxu1 }
 0x288   : > { %5120 = vmatpush2.bf16.msra.mxu0 %v6561_v55  ;;  %v4707_v55 = vpop.f32.mrf.mxu0 }
 0x289   : > { %5163 = vmatpush2.bf16.msra.mxu1 %v6564_v56  ;;  %5121 = vmatprep.subr.bf16.mxu0 %v6569_v57  ;;  %v4750_v56 = vpop.f32.mrf.mxu1 }
 0x28a   : > { %5164 = vmatprep.subr.bf16.mxu1 %v6572_v58  ;;  %v4709_v57 = vpop.f32.mrf.mxu0 }
 0x28b   : > { %v4752_v58 = vpop.f32.mrf.mxu1 }
 0x28c   : > { %5122 = vmatpush2.bf16.msra.mxu0 %v6567_v59  ;;  %v4711_v59 = vpop.f32.mrf.mxu0 }
 0x28d   : > { %5165 = vmatpush2.bf16.msra.mxu1 %v6570_v60  ;;  %5123 = vmatprep.subr.bf16.mxu0 %v6575_v61  ;;  %v4754_v61 = vpop.f32.mrf.mxu1 }
 0x28e   : > { %5166 = vmatprep.subr.bf16.mxu1 %v6578_v62  ;;  %v4791_v60 = vpop.f32.mrf.mxu0 }
 0x290   : > { %5124 = vmatpush2.bf16.msra.mxu0 %v6573_v63  ;;  %v4793_v62 = vpop.f32.mrf.mxu0  ;;  %v4834_v63 = vpop.f32.mrf.mxu1 }
 0x291   : > { %5167 = vmatpush2.bf16.msra.mxu1 %v6576_v0  ;;  %5125 = vmatprep.subr.bf16.mxu0 %v6581_v1 }
 0x292   : > { %5168 = vmatprep.subr.bf16.mxu1 %v6584_v2  ;;  %v4795_v0 = vpop.f32.mrf.mxu0  ;;  %v4836_v1 = vpop.f32.mrf.mxu1 }
 0x294   : > { %5126 = vmatpush2.bf16.msra.mxu0 %v6579_v3  ;;  %v4797_v2 = vpop.f32.mrf.mxu0  ;;  %v4838_v3 = vpop.f32.mrf.mxu1 }
 0x295   : > { %5169 = vmatpush2.bf16.msra.mxu1 %v6582_v4  ;;  %5127 = vmatprep.subr.bf16.mxu0 %v6587_v5 }
 0x296   : > { %5170 = vmatprep.subr.bf16.mxu1 %v6590_v6  ;;  %v4840_v5 = vpop.f32.mrf.mxu1 }
 0x298   : > { %5128 = vmatpush2.bf16.msra.mxu0 %v6585_v7 }
 0x299   : > { %5171 = vmatpush2.bf16.msra.mxu1 %v6588_v8  ;;  %5129 = vmatprep.subr.bf16.mxu0 %v6593_v9 }
 0x29a   : > { %5172 = vmatprep.subr.bf16.mxu1 %v6596_v10 }
 0x29c   : > { %5130 = vmatpush2.bf16.msra.mxu0 %v6591_v11 }
 0x29d   : > { %5173 = vmatpush2.bf16.msra.mxu1 %v6594_v12  ;;  %5131 = vmatprep.subr.bf16.mxu0 %v6599_v13 }
 0x29e   : > { %5174 = vmatprep.subr.bf16.mxu1 %v6602_v14 }
 0x2a0   : > { %5132 = vmatpush2.bf16.msra.mxu0 %v6597_v15 }
 0x2a1   : > { %5175 = vmatpush2.bf16.msra.mxu1 %v6600_v16  ;;  %5187 = vmatprep.subr.bf16.mxu0 %v6608_v17 }
 0x2a3   : > { %5134 = vmatmul.mubr.bf16.vlgmr.msra.gmra.mxu0 %v6603_v18  ;;  %v4877_v4 = vpop.f32.mrf.mxu0  ;;  %v4749_v18 = vadd.f32 %v4748_v54, %v4705_v53 }
 0x2a4   : > { %5177 = vmatmul.mubr.bf16.vlgmr.msra.gmra.mxu1 %v6609_v19  ;;  %5188 = vmatpush1.bf16.msra.mxu0 %v6606_v20  ;;  %v4920_v7 = vpop.f32.mrf.mxu1 }
 0x2a5   : > { %5219 = vmatprep.mubr.bf16.mxu0 %v6659_v21  ;;  %5189 = vmatprep.subr.bf16.mxu0 %v6614_v22  ;;  %v4879_v6 = vpop.f32.mrf.mxu0  ;;  %v4751_v21 = vadd.f32 %v4750_v56, %v4707_v55  ;;  %v4792_v22 = vadd.f32 %v4791_v60, %v4749_v18  ;;  %v2016_v18 = vld [vmem:[#allocation2] sm:$0xff] }
 0x2a6   : > { %v4922_v9 = vpop.f32.mrf.mxu1 }
 0x2a7   : > { %v4881_v8 = vpop.f32.mrf.mxu0 }
 0x2a8   : > { %5190 = vmatpush1.bf16.msra.mxu0 %v6612_v23  ;;  %v4924_v11 = vpop.f32.mrf.mxu1 }
 0x2a9   : > { %5191 = vmatprep.subr.bf16.mxu0 %v6617_v24  ;;  %v4883_v10 = vpop.f32.mrf.mxu0  ;;  %v4753_v24 = vadd.f32 %v4752_v58, %v4709_v57 }
 0x2aa   : > { %v4926_v13 = vpop.f32.mrf.mxu1 }
 0x2ac   : > { %5192 = vmatpush1.bf16.msra.mxu0 %v6615_v25  ;;  %v4794_v25 = vadd.f32 %v4793_v62, %v4751_v21 }
 0x2ad   : > { %5193 = vmatprep.subr.bf16.mxu0 %v6620_v26 }
 0x2b0   : > { %5194 = vmatpush1.bf16.msra.mxu0 %v6618_v27  ;;  %v4755_v27 = vadd.f32 %v4754_v61, %v4711_v59 }
 0x2b1   : > { %5195 = vmatprep.subr.bf16.mxu0 %v6623_v28  ;;  %v4835_v28 = vadd.f32 %v4834_v63, %v4792_v22 }
 0x2b4   : > { %5196 = vmatpush1.bf16.msra.mxu0 %v6621_v29  ;;  %v4796_v29 = vadd.f32 %v4795_v0, %v4753_v24 }
 0x2b5   : > { %5197 = vmatprep.subr.bf16.mxu0 %v6626_v30 }
 0x2b8   : > { %5198 = vmatpush1.bf16.msra.mxu0 %v6624_v31 }
 0x2b9   : > { %5199 = vmatprep.subr.bf16.mxu0 %v6629_v32  ;;  %v4837_v32 = vadd.f32 %v4836_v1, %v4794_v25 }
 0x2bc   : > { %5200 = vmatpush1.bf16.msra.mxu0 %v6627_v33  ;;  %v4798_v33 = vadd.f32 %v4797_v2, %v4755_v27 }
 0x2bd   : > { %5201 = vmatprep.subr.bf16.mxu0 %v6632_v34  ;;  %v4878_v34 = vadd.f32 %v4877_v4, %v4835_v28  ;;  %v2018_v28 = vld [vmem:[#allocation2 + $0x8] sm:$0xff] }
 0x2c0   : > { %5202 = vmatpush1.bf16.msra.mxu0 %v6630_v35  ;;  %v4839_v35 = vadd.f32 %v4838_v3, %v4796_v29 }
 0x2c1   : > { %5203 = vmatprep.subr.bf16.mxu0 %v6635_v36  ;;  %v4880_v36 = vadd.f32 %v4879_v6, %v4837_v32 }
 0x2c4   : > { %5204 = vmatpush2.bf16.msra.mxu0 %v6633_v37 }
 0x2c5   : > { %5205 = vmatprep.subr.bf16.mxu0 %v6638_v38 }
 0x2c8   : > { %5206 = vmatpush2.bf16.msra.mxu0 %v6636_v39  ;;  %v4841_v39 = vadd.f32 %v4840_v5, %v4798_v33 }
 0x2c9   : > { %5207 = vmatprep.subr.bf16.mxu0 %v6641_v40  ;;  %v4921_v40 = vadd.f32 %v4920_v7, %v4878_v34 }
 0x2cc   : > { %5208 = vmatpush2.bf16.msra.mxu0 %v6639_v41  ;;  %v4882_v41 = vadd.f32 %v4881_v8, %v4839_v35 }
 0x2cd   : > { %5209 = vmatprep.subr.bf16.mxu0 %v6644_v42  ;;  %v4923_v42 = vadd.f32 %v4922_v9, %v4880_v36 }
 0x2d0   : > { %5210 = vmatpush2.bf16.msra.mxu0 %v6642_v43  ;;  %v4884_v43 = vadd.f32 %v4883_v10, %v4841_v39 }
 0x2d1   : > { %5211 = vmatprep.subr.bf16.mxu0 %v6647_v44 }
 0x2d4   : > { %5212 = vmatpush2.bf16.msra.mxu0 %v6645_v45 }
 0x2d5   : > { %5213 = vmatprep.subr.bf16.mxu0 %v6650_v46 }
 0x2d8   : > { %5214 = vmatpush2.bf16.msra.mxu0 %v6648_v47  ;;  %v4925_v47 = vadd.f32 %v4924_v11, %v4882_v41 }
 0x2d9   : > { %5215 = vmatprep.subr.bf16.mxu0 %v6653_v48 }
 0x2dc   : > { %5216 = vmatpush2.bf16.msra.mxu0 %v6651_v49 }
 0x2dd   : > { %5217 = vmatprep.subr.bf16.mxu0 %v6656_v50  ;;  %v4927_v50 = vadd.f32 %v4926_v13, %v4884_v43 }
 0x2e0   : > { %5218 = vmatpush2.bf16.msra.mxu0 %v6654_v51 }
 0x2e3   : > { %5220 = vmatmul.mubr.bf16.vlgmr.msra.gmra.mxu0 %v6657_v52  ;;  %v4963_v12 = vpop.f32.mrf.mxu0 }
 0x2e4   : > { %v5006_v15 = vpop.f32.mrf.mxu1  ;;  %v4964_v44 = vadd.f32 %v4963_v12, %v4921_v40  ;;  %v2015_v12 = vld [vmem:[#allocation2 + $0x10] sm:$0xff] }
 0x2e5   : > { %v4965_v14 = vpop.f32.mrf.mxu0 }
 0x2e6   : > { %v5008_v17 = vpop.f32.mrf.mxu1  ;;  %v4966_v48 = vadd.f32 %v4965_v14, %v4923_v42  ;;  %v5007_v51 = vadd.f32 %v5006_v15, %v4964_v44 }
 0x2e7   : > { %v4967_v16 = vpop.f32.mrf.mxu0 }
 0x2e8   : > { %v5010_v20 = vpop.f32.mrf.mxu1  ;;  %v4968_v52 = vadd.f32 %v4967_v16, %v4925_v47  ;;  %v5009_v54 = vadd.f32 %v5008_v17, %v4966_v48 }
 0x2e9   : > { %v4969_v19 = vpop.f32.mrf.mxu0 }
 0x2ea   : > { %v5012_v26 = vpop.f32.mrf.mxu1  ;;  %v4970_v55 = vadd.f32 %v4969_v19, %v4927_v50  ;;  %v5011_v59 = vadd.f32 %v5010_v20, %v4968_v52 }
 0x2ec   : > { %v5013_v61 = vadd.f32 %v5012_v26, %v4970_v55 }
 0x323   : > { %v5049_v23 = vpop.f32.mrf.mxu0 }
 0x324   : > { %v5092_v31 = vpop.f32.mrf.mxu1  ;;  %v5050_v56 = vadd.f32 %v5049_v23, %v5007_v51  ;;  %v2017_v23 = vld [vmem:[#allocation2 + $0x18] sm:$0xff] }
 0x325   : > { %v5051_v30 = vpop.f32.mrf.mxu0 }
 0x326   : > { %v5094_v38 = vpop.f32.mrf.mxu1  ;;  %v5052_v60 = vadd.f32 %v5051_v30, %v5009_v54  ;;  %v5093_v62 = vadd.f32 %v5092_v31, %v5050_v56 }
 0x327   : > { %v5053_v37 = vpop.f32.mrf.mxu0 }
 0x328   : > { %v5096_v46 = vpop.f32.mrf.mxu1  ;;  %v5054_v63 = vadd.f32 %v5053_v37, %v5011_v59  ;;  %v5095_v2 = vadd.f32 %v5094_v38, %v5052_v60 }
 0x329   : > { %v5055_v45 = vpop.f32.mrf.mxu0 }
 0x32a   : > { %v5098_v53 = vpop.f32.mrf.mxu1  ;;  %v5056_v3 = vadd.f32 %v5055_v45, %v5013_v61  ;;  %v5097_v5 = vadd.f32 %v5096_v46, %v5054_v63 }
 0x32c   : > { %v5099_v9 = vadd.f32 %v5098_v53, %v5056_v3 }
 0x363   : > { %v5135_v49 = vpop.f32.mrf.mxu0 }
 0x364   : > { %v5178_v58 = vpop.f32.mrf.mxu1  ;;  %v5136_v4 = vadd.f32 %v5135_v49, %v5093_v62 }
 0x365   : > { %v5137_v57 = vpop.f32.mrf.mxu0 }
 0x366   : > { %v5180_v1 = vpop.f32.mrf.mxu1  ;;  %v5138_v6 = vadd.f32 %v5137_v57, %v5095_v2  ;;  %v5179_v10 = vadd.f32 %v5178_v58, %v5136_v4 }
 0x367   : > { %v5139_v0 = vpop.f32.mrf.mxu0 }
 0x368   : > { %v5182_v8 = vpop.f32.mrf.mxu1  ;;  %v5140_v11 = vadd.f32 %v5139_v0, %v5097_v5  ;;  %v5181_v14 = vadd.f32 %v5180_v1, %v5138_v6 }
 0x369   : > { %v5141_v7 = vpop.f32.mrf.mxu0 }
 0x36a   : > { %v5142_v15 = vadd.f32 %v5141_v7, %v5099_v9  ;;  %v5184_v17 = vpop.f32.mrf.mxu1  ;;  %v5183_v20 = vadd.f32 %v5182_v8, %v5140_v11 }
 0x36c   : > { %v5185_v25 = vadd.f32 %v5184_v17, %v5142_v15 }
 0x3a3   : > { %v5221_v13 = vpop.f32.mrf.mxu0 }
 0x3a4   : > { %v5222_v16 = vadd.f32 %v5221_v13, %v5179_v10 }
 0x3a5   : > { %v5223_v19 = vpop.f32.mrf.mxu0 }
 0x3a6   : > { %v5230_v21 = vadd.f32 %v5222_v16, %v2015_v12  ;;  %v5224_v22 = vadd.f32 %v5223_v19, %v5181_v14 }
 0x3a7   : > { %v5225_v24 = vpop.f32.mrf.mxu0 }
 0x3a8   : > { %5234 = vst [vmem:[#allocation2 + $0x10] sm:$0xff] %v5230_v21  ;;  %v5231_v26 = vadd.f32 %v5224_v22, %v2016_v18  ;;  %v5226_v27 = vadd.f32 %v5225_v24, %v5183_v20 }
 0x3a9   : > { %v5227_v29 = vpop.f32.mrf.mxu0 }
 0x3aa   : > { %5235 = vst [vmem:[#allocation2] sm:$0xff] %v5231_v26  ;;  %v5232_v30 = vadd.f32 %v5226_v27, %v2017_v23  ;;  %v5228_v31 = vadd.f32 %v5227_v29, %v5185_v25  ;;  %5241 = sbr.rel (%p5891_p5) target bundleno = 958 (0x3be), region = 101 }
 0x3ac   : > { %5236 = vst [vmem:[#allocation2 + $0x18] sm:$0xff] %v5232_v30  ;;  %v5233_v32 = vadd.f32 %v5228_v31, %v2018_v28 }
 0x3ae   : > { %5237 = vst [vmem:[#allocation2 + $0x8] sm:$0xff] %v5233_v32 }
 0x3af   : > { %v5248_v33 = vlaneseq  ;;  %v5246_v35 = vld [vmem:[%s2003_s29] sm:$0x3]  ;;  %v5242_v36 = vld [vmem:[#allocation2 + $0x10] sm:$0xff] }
 0x3b1   : > { %v5249_v34 = vshrl.u32 %v5248_v33, 7  ;;  %v5243_v39 = vld [vmem:[#allocation2] sm:$0xff] }
 0x3b3   : > { %v5250_v37 = vsub.s32 0, %v5249_v34  ;;  %v5254_v38 = vsub.s32 1, %v5249_v34  ;;  %v5244_v40 = vld [vmem:[#allocation2 + $0x18] sm:$0xff] }
 0x3b5   : > { %v5245_v41 = vld [vmem:[#allocation2 + $0x8] sm:$0xff]  ;;  %v5251_v42 = vrot.slane %v5246_v35, %v5250_v37  ;;  %v5255_v43 = vrot.slane %v5246_v35, %v5254_v38 }
 0x3b7   : > { %v5258_v44 = vadd.f32 %v5251_v42, %v5242_v36  ;;  %v5259_v45 = vadd.f32 %v5255_v43, %v5243_v39  ;;  %v5260_v46 = vadd.f32 %v5251_v42, %v5244_v40  ;;  %v5261_v47 = vadd.f32 %v5255_v43, %v5245_v41 }
 0x3b9   : > { %v5262_v48 = vmax.f32 %v5258_v44, 0.0  ;;  %v5263_v49 = vmax.f32 %v5259_v45, 0.0  ;;  %v5264_v50 = vmax.f32 %v5260_v46, 0.0  ;;  %v5265_v51 = vmax.f32 %v5261_v47, 0.0 }
 0x3bb   : > { %v5901_v52 = vpack.c.bf16 %v5263_v49, %v5262_v48  ;;  %v5902_v53 = vpack.c.bf16 %v5265_v51, %v5264_v50 }
 0x3bd   : > { %5278 = vst [vmem:[%s7791_s1] sm:$0xff] %v5901_v52  ;;  %5279 = vst [vmem:[%s7791_s1 + $0x8] sm:$0xff] %v5902_v53 }
 0x3be PF: > { %5286 = sbr.rel (!%p6863_p12) target bundleno = 966 (0x3c6), region = 105  ;;  %s5903_s16 = sshll.u32 (%p6863_p12), %s6734_s19, 3 }
 0x3bf   : > { %s5292_s5 = scalar_lea.vmem (%p6863_p12), %s8288_s3, %s5903_s16 }
 0x3c4   : > { %v5323_v54 = vld [vmem:[%s7791_s1] sm:$0xff]  ;;  %v5325_v55 = vld [vmem:[%s7791_s1 + $0x8] sm:$0xff] }
 0x3c5   : > { %5324 = vst [vmem:[%s5292_s5] sm:$0xff] %v5323_v54  ;;  %5326 = vst [vmem:[%s5292_s5 + $0x10] sm:$0xff] %v5325_v55 }
 0x3c6 PF: > { %s13_s22 = sadd.s32 1, %s6746_s22   ;;  %s8298_s1 = sld [smem:[#allocation6_spill]] }
 0x3c7   : > { %p10_p6 = scmp.ge.s32.totalorder %s13_s22, 54   ;;  %s8299_s12 = smov %s6710_s13 }
 0x3c8   : > { %s8300_s13 = smov %s6861_s9  ;;  %s8301_s14 = smov %s6718_s15 }
 0x3c9   : > { %s8302_s15 = smov %s6858_s8  ;;  %s8303_s16 = smov %s6726_s17 }
 0x3ca   : > { %s8304_s17 = smov %s6844_s30  ;;  %s8305_s18 = smov %s6738_s20 }
 0x3cb   : > { %s8306_s19 = smov %s6742_s21  ;;  %s8307_s20 = smov %s8310_s24 }
 0x3cc   : > { %s8308_s21 = smov %s8298_s1  ;;  %12 = sbr.rel (!%p10_p6) target bundleno = 9 (0x9), region = 185 }

// kernel: my_model_forward.15
= control target key start
LH: loop header
LB: loop body
LE: loop exit
PB: predicated region body
PF: predicated region fallthrough
CT: control target
= control target key end

     0   :  { %s646_s1 = inlined_call_operand.vmem [shape: bf16[512,128], index: 1, kind: input, shape index: {}]   ;;  %s647_s0 = inlined_call_operand.vmem [shape: bf16[16,512], index: 0, kind: input, shape index: {}]   ;;  %s648_s2 = inlined_call_operand.vmem [shape: f32[1,128], index: 2, kind: input, shape index: {}]   ;;  %s649_s3 = inlined_call_operand.vmem [shape: f32[16,128], index: 3, kind: output, shape index: {}]  }
   0x1   :  { %v471_v0 = vld [vmem:[%s646_s1 + $0x78] sm:$0xff]   ;;  %v475_v4 = vld [vmem:[%s646_s1 + $0x70] sm:$0xff]   ;;  %v479_v8 = vld [vmem:[%s646_s1 + $0x68] sm:$0xff]  }
   0x2   :  { %v472_v1 = vld [vmem:[%s646_s1 + $0xf8] sm:$0xff]   ;;  %427 = vmatprep.subr.bf16.mxu0 %v471_v0  ;;  %v476_v5 = vld [vmem:[%s646_s1 + $0xf0] sm:$0xff]   ;;  %v480_v9 = vld [vmem:[%s646_s1 + $0xe8] sm:$0xff]  }
   0x3   :  { %v473_v2 = vld [vmem:[%s646_s1 + $0x38] sm:$0xff]   ;;  %449 = vmatprep.subr.bf16.mxu1 %v472_v1  ;;  %v477_v6 = vld [vmem:[%s646_s1 + $0x30] sm:$0xff]   ;;  %v481_v10 = vld [vmem:[%s646_s1 + $0x28] sm:$0xff]  }
   0x4   :  { %v474_v3 = vld [vmem:[%s646_s1 + $0xb8] sm:$0xff]   ;;  %428 = vmatpush3.bf16.msra.mxu0 %v473_v2  ;;  %v478_v7 = vld [vmem:[%s646_s1 + $0xb0] sm:$0xff]   ;;  %v482_v11 = vld [vmem:[%s646_s1 + $0xa8] sm:$0xff]  }
   0x5   :  { %450 = vmatpush3.bf16.msra.mxu1 %v474_v3  ;;  %429 = vmatprep.subr.bf16.mxu0 %v475_v4  ;;  %v483_v12 = vld [vmem:[%s646_s1 + $0x60] sm:$0xff]   ;;  %v487_v16 = vld [vmem:[%s646_s1 + $0x58] sm:$0xff]   ;;  %v491_v20 = vld [vmem:[%s646_s1 + $0x50] sm:$0xff]  }
   0x6   :  { %451 = vmatprep.subr.bf16.mxu1 %v476_v5  ;;  %v484_v13 = vld [vmem:[%s646_s1 + $0xe0] sm:$0xff]   ;;  %v488_v17 = vld [vmem:[%s646_s1 + $0xd8] sm:$0xff]   ;;  %v492_v21 = vld [vmem:[%s646_s1 + $0xd0] sm:$0xff]  }
   0x7   :  { %v485_v14 = vld [vmem:[%s646_s1 + $0x20] sm:$0xff]   ;;  %v489_v18 = vld [vmem:[%s646_s1 + $0x18] sm:$0xff]   ;;  %v493_v22 = vld [vmem:[%s646_s1 + $0x10] sm:$0xff]  }
   0x8   :  { %430 = vmatpush3.bf16.msra.mxu0 %v477_v6  ;;  %v486_v15 = vld [vmem:[%s646_s1 + $0xa0] sm:$0xff]   ;;  %v490_v19 = vld [vmem:[%s646_s1 + $0x98] sm:$0xff]   ;;  %v494_v23 = vld [vmem:[%s646_s1 + $0x90] sm:$0xff]  }
   0x9   :  { %452 = vmatpush3.bf16.msra.mxu1 %v478_v7  ;;  %431 = vmatprep.subr.bf16.mxu0 %v479_v8  ;;  %v495_v24 = vld [vmem:[%s646_s1 + $0x48] sm:$0xff]   ;;  %v499_v28 = vld [vmem:[%s646_s1 + $0x40] sm:$0xff]  }
   0xa   :  { %453 = vmatprep.subr.bf16.mxu1 %v480_v9  ;;  %v496_v25 = vld [vmem:[%s646_s1 + $0xc8] sm:$0xff]   ;;  %v500_v29 = vld [vmem:[%s646_s1 + $0xc0] sm:$0xff]  }
   0xb   :  { %v497_v26 = vld [vmem:[%s646_s1 + $0x8] sm:$0xff]   ;;  %v501_v30 = vld [vmem:[%s646_s1] sm:$0xff]  }
   0xc   :  { %432 = vmatpush3.bf16.msra.mxu0 %v481_v10  ;;  %v498_v27 = vld [vmem:[%s646_s1 + $0x88] sm:$0xff]   ;;  %v502_v31 = vld [vmem:[%s646_s1 + $0x80] sm:$0xff]  }
   0xd   :  { %454 = vmatpush3.bf16.msra.mxu1 %v482_v11  ;;  %433 = vmatprep.subr.bf16.mxu0 %v483_v12  ;;  %v503_v32 = vld [vmem:[%s647_s0] ss:$16 sps:$4 sm:$0xff]   ;;  %v505_v33 = vld [vmem:[%s647_s0 + $0x4] ss:$16 sps:$4 sm:$0xff]   ;;  %v506_v34 = vld [vmem:[%s647_s0 + $0x8] ss:$16 sps:$4 sm:$0xff]  }
   0xe   :  { %455 = vmatprep.subr.bf16.mxu1 %v484_v13  ;;  %v508_v35 = vld [vmem:[%s647_s0 + $0xc] ss:$16 sps:$4 sm:$0xff]   ;;  %334 = vmatprep.mubr.bf16.mxu0 %v505_v33  ;;  %v390_v38 = vld [vmem:[%s648_s2] ss:$0 sm:$0xff] }
   0xf   :  { %375 = vmatprep.mubr.bf16.mxu1 %v508_v35 }
  0x10   :  { %434 = vmatpush3.bf16.msra.mxu0 %v485_v14 }
  0x11   :  { %456 = vmatpush3.bf16.msra.mxu1 %v486_v15  ;;  %435 = vmatprep.subr.bf16.mxu0 %v487_v16 }
  0x12   :  { %457 = vmatprep.subr.bf16.mxu1 %v488_v17 }
  0x14   :  { %436 = vmatpush3.bf16.msra.mxu0 %v489_v18 }
  0x15   :  { %458 = vmatpush3.bf16.msra.mxu1 %v490_v19  ;;  %437 = vmatprep.subr.bf16.mxu0 %v491_v20 }
  0x16   :  { %459 = vmatprep.subr.bf16.mxu1 %v492_v21 }
  0x18   :  { %438 = vmatpush3.bf16.msra.mxu0 %v493_v22 }
  0x19   :  { %460 = vmatpush3.bf16.msra.mxu1 %v494_v23  ;;  %439 = vmatprep.subr.bf16.mxu0 %v495_v24 }
  0x1a   :  { %461 = vmatprep.subr.bf16.mxu1 %v496_v25 }
  0x1c   :  { %440 = vmatpush3.bf16.msra.mxu0 %v497_v26 }
  0x1d   :  { %462 = vmatpush3.bf16.msra.mxu1 %v498_v27  ;;  %441 = vmatprep.subr.bf16.mxu0 %v499_v28 }
  0x1e   :  { %463 = vmatprep.subr.bf16.mxu1 %v500_v29 }
  0x20   :  { %442 = vmatpush3.bf16.msra.mxu0 %v501_v30 }
  0x21   :  { %464 = vmatpush3.bf16.msra.mxu1 %v502_v31 }
  0x23   :  { %335 = vmatmul.mubr.bf16.vlgmr.msra.gmra.mxu0 %v503_v32 }
  0x24   :  { %376 = vmatmul.mubr.bf16.vlgmr.msra.gmra.mxu1 %v506_v34 }
  0xe3   :  { %v443_v36 = vpop.f32.mrf.mxu0 }
  0xe4   :  { %v465_v37 = vpop.f32.mrf.mxu1 }
  0xe5   :  { %v444_v39 = vpop.f32.mrf.mxu0 }
  0xe6   :  { %v445_v40 = vadd.f32 %v444_v39, %v443_v36  ;;  %v466_v41 = vpop.f32.mrf.mxu1 }
  0xe7   :  { %v446_v42 = vpop.f32.mrf.mxu0  ;;  %v467_v44 = vadd.f32 %v466_v41, %v465_v37 }
  0xe8   :  { %v337_v43 = vadd.f32 %v445_v40, %v390_v38  ;;  %v468_v45 = vpop.f32.mrf.mxu1 }
  0xe9   :  { %v447_v46 = vpop.f32.mrf.mxu0 }
  0xea   :  { %v378_v47 = vadd.f32 %v467_v44, %v337_v43  ;;  %v448_v48 = vadd.f32 %v447_v46, %v446_v42  ;;  %v469_v49 = vpop.f32.mrf.mxu1 }
  0xeb   :  { %v470_v51 = vadd.f32 %v469_v49, %v468_v45 }
  0xec   :  { %384 = vst [vmem:[%s649_s3] sm:$0xff] %v378_v47  ;;  %v340_v50 = vadd.f32 %v448_v48, %v390_v38 }
  0xee   :  { %v381_v52 = vadd.f32 %v470_v51, %v340_v50 }
  0xf0   :  { %385 = vst [vmem:[%s649_s3 + $0x8] sm:$0xff] %v381_v52 }

</bundles_post_ra>
